<compile_context>
chip_gen: v6e
topology: v6e:2x2x1
jax: 0.10.0
libtpu: 0.0.40
codegen_flags: <defaults>
</compile_context>

<pallas_src>
import functools

import jax
import jax.numpy as jnp
from jax.experimental import pallas as pl
from jax.experimental.pallas import tpu as pltpu

VMEM_LIMIT = 32 * 1024 * 1024


def _round_up(x, m):
    return (x + m - 1) // m * m


def _pick_tile(dim, candidates):
    for c in candidates:
        if c <= dim and dim % c == 0:
            return c
    return dim


# ---------------------------------------------------------------------------
# Fused 3x3 conv (padding=1) + bias + ReLU + 2x2/stride-2 max-pool.
#
# The input block is a row-flattened slab of shape (Lb, Cin):
#  * n_taps == 1 (conv1): taps were pre-gathered into Cin = 27, Lb = hb*W,
#    so the conv is a single matmul.
#  * n_taps == 9 (conv2): Lb = (hb+3)*Wp (2 halo rows + 1 slack row, width
#    padded to Wp = round_up(W+2, 8)); each tap is a shifted slice of length
#    hb*Wp and a (., Cin) @ (Cin, Cout) matmul, accumulated in f32.
# Bias + ReLU + 2x2 max-pool are fused in the epilogue; the Wp-W garbage
# columns are cropped before the store.  Output is bf16.
# ---------------------------------------------------------------------------
def _conv_relu_pool_kernel(x_ref, w_ref, b_ref, o_ref, *, hb, Wp, W, n_taps):
    L = hb * Wp
    acc = None
    for t in range(n_taps):
        dh, dw = t // 3, t % 3
        off = dh * Wp + dw
        xs = x_ref[0, 0, pl.ds(off, L), :]                   # (L, Cin) bf16
        d = jnp.dot(xs, w_ref[t], preferred_element_type=jnp.float32)
        acc = d if acc is None else acc + d
    y = jnp.maximum(acc + b_ref[...], 0.0)                    # (L, Cout) f32
    C = y.shape[-1]
    # vertical 2x (pairs of conv rows, each Wp sublanes -> tile-aligned split)
    t2 = y.reshape(hb // 2, 2 * Wp, C)
    v = jnp.maximum(t2[:, :Wp, :], t2[:, Wp:, :])             # (hb//2, Wp, C)
    # horizontal 2x (adjacent columns)
    h = v.reshape(hb // 2, Wp // 2, 2, C)
    pooled = jnp.maximum(h[:, :, 0, :], h[:, :, 1, :])        # (hb//2, Wp//2, C)
    o_ref[0, 0] = pooled[:, :W // 2, :].astype(o_ref.dtype)


def conv_relu_pool(xblocks, w, b, *, hb, Wp, W, n_taps):
    """xblocks: (N, NB, Lb, Cin) bf16 -> (N, H/2, W/2, Cout) bf16."""
    N, NB, Lb, Cin = xblocks.shape
    Cout = w.shape[-1]
    out = pl.pallas_call(
        functools.partial(_conv_relu_pool_kernel, hb=hb, Wp=Wp, W=W,
                          n_taps=n_taps),
        out_shape=jax.ShapeDtypeStruct((N, NB, hb // 2, W // 2, Cout),
                                       jnp.bfloat16),
        grid=(N, NB),
        in_specs=[
            pl.BlockSpec((1, 1, Lb, Cin), lambda n, i: (n, i, 0, 0)),
            pl.BlockSpec((n_taps, Cin, Cout), lambda n, i: (0, 0, 0)),
            pl.BlockSpec((1, Cout), lambda n, i: (0, 0)),
        ],
        out_specs=pl.BlockSpec((1, 1, hb // 2, W // 2, Cout),
                               lambda n, i: (n, i, 0, 0, 0)),
        compiler_params=pltpu.CompilerParams(
            dimension_semantics=("parallel", "parallel"),
            vmem_limit_bytes=VMEM_LIMIT),
    )(xblocks, w, b)
    return out.reshape(N, NB * (hb // 2), W // 2, Cout)


def conv1_tap_expand(x, hb):
    """x: (N,H,W,3) bf16 -> (N, NB, hb*W, 27): 9 taps gathered into channels."""
    N, H, W, C = x.shape
    xp = jnp.pad(x, ((0, 0), (1, 1), (1, 1), (0, 0)))
    taps = [xp[:, dh:dh + H, dw:dw + W, :]
            for dh in range(3) for dw in range(3)]
    x27 = jnp.concatenate(taps, axis=-1)                      # (N, H, W, 27)
    NB = H // hb
    return x27.reshape(N, NB, hb * W, 9 * C)


def conv2_halo_blocks(x, hb, Wp):
    """x: (N,H,W,C) bf16 -> overlapping row blocks (N, NB, (hb+3)*Wp, C)."""
    N, H, W, C = x.shape
    # 1 row top / 2 rows bottom (slack row keeps every tap slice in-bounds),
    # 1 col left, right-pad up to Wp (sublane-aligned tap offsets).
    xp = jnp.pad(x, ((0, 0), (1, 2), (1, Wp - W - 1), (0, 0)))  # (N,H+3,Wp,C)
    NB = H // hb
    blocks = jnp.stack([xp[:, i * hb:i * hb + hb + 3] for i in range(NB)],
                       axis=1)                                  # (N,NB,hb+3,Wp,C)
    return blocks.reshape(N, NB, (hb + 3) * Wp, C)


# ---------------------------------------------------------------------------
# Linear: y = relu?(x @ w + b).  bf16 operands, f32 accumulation directly in
# the f32 output block, bias + ReLU fused on the last K step.
# Grid = (M tiles, N tiles, K tiles); N axis "parallel" (v7x megacore split).
# ---------------------------------------------------------------------------
def _matmul_bias_kernel(x_ref, w_ref, b_ref, o_ref, *, relu):
    k = pl.program_id(2)

    @pl.when(k == 0)
    def _():
        o_ref[...] = jnp.zeros_like(o_ref)

    o_ref[...] += jnp.dot(x_ref[...], w_ref[...],
                          preferred_element_type=jnp.float32)

    @pl.when(k == pl.num_programs(2) - 1)
    def _():
        r = o_ref[...] + b_ref[...]
        if relu:
            r = jnp.maximum(r, 0.0)
        o_ref[...] = r


def matmul_bias(x, w, b, *, relu):
    """x: (M, K) bf16, w: (K, N) bf16, b: (1, N) f32 -> (M, N) f32."""
    M, K = x.shape
    Kw, N = w.shape
    assert K == Kw
    tm = _pick_tile(M, (256, 128, 64, 32, 16, 8))
    tn = _pick_tile(N, (256, 128))               # 256: both v7x TCs stay busy
    tk = _pick_tile(K, (8192, 4096, 2048, 1024, 512, 256, 128))
    grid = (M // tm, N // tn, K // tk)
    return pl.pallas_call(
        functools.partial(_matmul_bias_kernel, relu=relu),
        out_shape=jax.ShapeDtypeStruct((M, N), jnp.float32),
        grid=grid,
        in_specs=[
            pl.BlockSpec((tm, tk), lambda i, j, k: (i, k)),
            pl.BlockSpec((tk, tn), lambda i, j, k: (k, j)),
            pl.BlockSpec((1, tn), lambda i, j, k: (0, j)),
        ],
        out_specs=pl.BlockSpec((tm, tn), lambda i, j, k: (i, j)),
        compiler_params=pltpu.CompilerParams(
            dimension_semantics=("parallel", "parallel", "arbitrary"),
            vmem_limit_bytes=VMEM_LIMIT),
    )(x, w, b)


# ---------------------------------------------------------------------------
# Parameters: PyTorch-layout init + ONE-TIME repack into kernel layouts.
# ---------------------------------------------------------------------------
def init_params(key, num_classes=5, img_size=32):
    ks = jax.random.split(key, 8)
    feat = 128 * (img_size // 4) * (img_size // 4)
    s = 0.05
    return dict(
        conv1_w=s * jax.random.normal(ks[0], (64, 3, 3, 3), jnp.float32),
        conv1_b=s * jax.random.normal(ks[1], (64,), jnp.float32),
        conv2_w=s * jax.random.normal(ks[2], (128, 64, 3, 3), jnp.float32),
        conv2_b=s * jax.random.normal(ks[3], (128,), jnp.float32),
        fc1_w=s * jax.random.normal(ks[4], (512, feat), jnp.float32),
        fc1_b=s * jax.random.normal(ks[5], (512,), jnp.float32),
        fc2_w=s * jax.random.normal(ks[6], (num_classes, 512), jnp.float32),
        fc2_b=s * jax.random.normal(ks[7], (num_classes,), jnp.float32),
    )


def prepare_params(params, img_size, num_classes=5):
    """One-time weight repack (outside the jitted forward).

    - conv1 (64,3,3,3)  -> (1, 27, 64): tap-major rows matching the 27-wide
      tap-expanded input.
    - conv2 (128,64,3,3)-> (9, 64, 128): one (Cin,Cout) slice per tap.
    - fc1 rows permuted from NCHW-flatten to NHWC-flatten order, stored (K,512).
    - fc2 stored (512, 128): transposed and zero-padded to 128 output lanes.
    """
    h4 = w4 = img_size // 4

    c1 = jnp.transpose(params["conv1_w"], (2, 3, 1, 0)).reshape(1, 27, 64)
    c2 = jnp.transpose(params["conv2_w"], (2, 3, 1, 0)).reshape(9, 64, 128)

    fc1 = params["fc1_w"].reshape(512, 128, h4, w4)
    fc1 = jnp.transpose(fc1, (2, 3, 1, 0)).reshape(h4 * w4 * 128, 512)

    n_out = _round_up(num_classes, 128)
    fc2 = jnp.pad(params["fc2_w"].T, ((0, 0), (0, n_out - num_classes)))
    fc2_b = jnp.pad(params["fc2_b"], (0, n_out - num_classes))

    # TODO(synk): per-generation fc1 weight quantization (int8 on v5e/v6e,
    # fp8 on v7x) would halve the dominant weight stream; kept bf16 here.
    return dict(
        conv1_w=c1.astype(jnp.bfloat16),
        conv1_b=params["conv1_b"].reshape(1, -1).astype(jnp.float32),
        conv2_w=c2.astype(jnp.bfloat16),
        conv2_b=params["conv2_b"].reshape(1, -1).astype(jnp.float32),
        fc1_w=fc1.astype(jnp.bfloat16),
        fc1_b=params["fc1_b"].reshape(1, -1).astype(jnp.float32),
        fc2_w=fc2.astype(jnp.bfloat16),
        fc2_b=fc2_b.reshape(1, -1).astype(jnp.float32),
    )


# ---------------------------------------------------------------------------
# Forward pass (eval mode).
# ---------------------------------------------------------------------------
@functools.partial(jax.jit, static_argnames=("num_classes",))
def skin_disease_forward(x_nchw, p, num_classes=5):
    x = jnp.transpose(x_nchw, (0, 2, 3, 1)).astype(jnp.bfloat16)  # NCHW->NHWC
    N, H, W, _ = x.shape

    # Conv(3->64) + ReLU + MaxPool2, fused; conv1 taps pre-gathered (K=27).
    hb1 = _pick_tile(H, (16, 8, 4, 2))
    x1 = conv1_tap_expand(x, hb1)                              # (N,NB1,hb1*W,27)
    y = conv_relu_pool(x1, p["conv1_w"], p["conv1_b"],
                       hb=hb1, Wp=W, W=W, n_taps=1)            # (N,H/2,W/2,64)

    # Conv(64->128) + ReLU + MaxPool2, fused; row blocks with 2-row halo.
    H2, W2 = H // 2, W // 2
    hb2 = _pick_tile(H2, (16, 8, 4, 2))
    Wp2 = _round_up(W2 + 2, 8)
    x2 = conv2_halo_blocks(y, hb2, Wp2)                        # (N,NB2,(hb2+3)*Wp2,64)
    y = conv_relu_pool(x2, p["conv2_w"], p["conv2_b"],
                       hb=hb2, Wp=Wp2, W=W2, n_taps=9)         # (N,H/4,W/4,128)

    # flatten: fc1 rows were pre-permuted to NHWC order, so a plain reshape
    # reproduces torch.flatten(x, 1) semantics with no runtime transpose.
    feats = y.reshape(N, -1)                                   # bf16

    # classifier: Linear -> ReLU -> Dropout -> Linear
    h = matmul_bias(feats, p["fc1_w"], p["fc1_b"], relu=True)
    # TODO(synk): nn.Dropout is identity at inference (eval); training-time
    # random masking is not implemented.
    logits = matmul_bias(h.astype(jnp.bfloat16), p["fc2_w"], p["fc2_b"],
                         relu=False)
    return logits[:, :num_classes]


if __name__ == "__main__":
    IMG = 32
    NUM_CLASSES = 5
    key = jax.random.PRNGKey(0)
    kx, kp = jax.random.split(key)
    x = jax.random.normal(kx, (2, 3, IMG, IMG), jnp.float32)

    params = init_params(kp, num_classes=NUM_CLASSES, img_size=IMG)
    prepared = prepare_params(params, img_size=IMG, num_classes=NUM_CLASSES)

    out = skin_disease_forward(x, prepared, num_classes=NUM_CLASSES)
    out = jax.block_until_ready(out)

    assert out.shape == (2, NUM_CLASSES), out.shape
    assert bool(jnp.all(jnp.isfinite(out)))
    print("KERNEL_OK")
</pallas_src>

<mosaic_0001>
module attributes {stable_mosaic.version = 11 : i64} {
  func.func @_conv_relu_pool_kernel(%arg0: i32, %arg1: i32, %arg2: memref<1x1x512x27xbf16, #tpu.memory_space<vmem>>, %arg3: memref<1x27x64xbf16, #tpu.memory_space<vmem>>, %arg4: memref<1x64xf32, #tpu.memory_space<vmem>>, %arg5: memref<1x1x8x16x64xbf16, #tpu.memory_space<vmem>>) attributes {dimension_semantics = [#tpu.dimension_semantics<parallel>, #tpu.dimension_semantics<parallel>], iteration_bounds = array<i64: 2, 2>, scalar_prefetch = 0 : i64, scratch_operands = 0 : i64, tpu.core_type = #tpu.core_type<tc>, window_params = [{transform_indices = @transform_0, window_bounds = array<i64: 1, 1, 512, 27>}, {pipeline_mode = #tpu.pipeline_mode<synchronous>, transform_indices = @transform_1, window_bounds = array<i64: 1, 27, 64>}, {pipeline_mode = #tpu.pipeline_mode<synchronous>, transform_indices = @transform_2, window_bounds = array<i64: 1, 64>}, {transform_indices = @transform_3, window_bounds = array<i64: 1, 1, 8, 16, 64>}]} {
    %c0 = arith.constant 0 : index
    %c0_0 = arith.constant 0 : index
    %c0_1 = arith.constant 0 : index
    %c0_2 = arith.constant 0 : index
    %0 = vector.load %arg2[%c0, %c0_0, %c0_1, %c0_2] : memref<1x1x512x27xbf16, #tpu.memory_space<vmem>>, vector<1x1x512x27xbf16>
    %1 = vector.shape_cast %0 : vector<1x1x512x27xbf16> to vector<512x27xbf16>
    %c0_3 = arith.constant 0 : index
    %c0_4 = arith.constant 0 : index
    %c0_5 = arith.constant 0 : index
    %2 = vector.load %arg3[%c0_3, %c0_4, %c0_5] : memref<1x27x64xbf16, #tpu.memory_space<vmem>>, vector<1x27x64xbf16>
    %3 = vector.shape_cast %2 : vector<1x27x64xbf16> to vector<27x64xbf16>
    %cst = arith.constant dense<0.000000e+00> : vector<512x64xf32>
    %4 = tpu.matmul %1, %3, %cst {dimension_numbers = #tpu.dot_dimension_numbers<[1], [0], [0], [1], [0, 0, 1, 1], [], []>} : vector<512x27xbf16>, vector<27x64xbf16>, vector<512x64xf32> -> vector<512x64xf32>
    %c0_6 = arith.constant 0 : index
    %c0_7 = arith.constant 0 : index
    %5 = vector.load %arg4[%c0_6, %c0_7] : memref<1x64xf32, #tpu.memory_space<vmem>>, vector<1x64xf32>
    %6 = vector.broadcast %5 : vector<1x64xf32> to vector<512x64xf32>
    %7 = arith.addf %4, %6 : vector<512x64xf32>
    %cst_8 = arith.constant 0.000000e+00 : f32
    %8 = vector.broadcast %cst_8 : f32 to vector<512x64xf32>
    %9 = arith.maximumf %7, %8 : vector<512x64xf32>
    %10 = vector.shape_cast %9 : vector<512x64xf32> to vector<8x64x64xf32>
    %11 = vector.extract_strided_slice %10 {offsets = [0, 0, 0], sizes = [8, 32, 64], strides = [1, 1, 1]} : vector<8x64x64xf32> to vector<8x32x64xf32>
    %12 = vector.extract_strided_slice %10 {offsets = [0, 32, 0], sizes = [8, 32, 64], strides = [1, 1, 1]} : vector<8x64x64xf32> to vector<8x32x64xf32>
    %13 = arith.maximumf %11, %12 : vector<8x32x64xf32>
    %14 = vector.shape_cast %13 : vector<8x32x64xf32> to vector<8x16x2x64xf32>
    %15 = vector.extract_strided_slice %14 {offsets = [0, 0, 0, 0], sizes = [8, 16, 1, 64], strides = [1, 1, 1, 1]} : vector<8x16x2x64xf32> to vector<8x16x1x64xf32>
    %16 = vector.shape_cast %15 : vector<8x16x1x64xf32> to vector<8x16x64xf32>
    %17 = vector.extract_strided_slice %14 {offsets = [0, 0, 1, 0], sizes = [8, 16, 1, 64], strides = [1, 1, 1, 1]} : vector<8x16x2x64xf32> to vector<8x16x1x64xf32>
    %18 = vector.shape_cast %17 : vector<8x16x1x64xf32> to vector<8x16x64xf32>
    %19 = arith.maximumf %16, %18 : vector<8x16x64xf32>
    %20 = arith.truncf %19 : vector<8x16x64xf32> to vector<8x16x64xbf16>
    %c0_9 = arith.constant 0 : index
    %c0_10 = arith.constant 0 : index
    %c0_11 = arith.constant 0 : index
    %c0_12 = arith.constant 0 : index
    %c0_13 = arith.constant 0 : index
    %21 = vector.load %arg5[%c0_9, %c0_10, %c0_11, %c0_12, %c0_13] : memref<1x1x8x16x64xbf16, #tpu.memory_space<vmem>>, vector<1x1x8x16x64xbf16>
    %22 = vector.shape_cast %21 : vector<1x1x8x16x64xbf16> to vector<8x16x64xbf16>
    %23 = vector.shape_cast %20 : vector<8x16x64xbf16> to vector<1x1x8x16x64xbf16>
    tpu.vector_store %arg5[%c0_9, %c0_10, %c0_11, %c0_12, %c0_13], %23 {strides = array<i32>} : memref<1x1x8x16x64xbf16, #tpu.memory_space<vmem>>, vector<1x1x8x16x64xbf16>,
    return
  }
  func.func @transform_0(%arg0: i32, %arg1: i32) -> (i32, i32, i32, i32) {
    %c0_i32 = arith.constant 0 : i32
    %c0_i32_0 = arith.constant 0 : i32
    %c0_i32_1 = arith.constant 0 : i32
    return %arg0, %arg1, %c0_i32, %c0_i32_0 : i32, i32, i32, i32
  }
  func.func @transform_1(%arg0: i32, %arg1: i32) -> (i32, i32, i32) {
    %c0_i32 = arith.constant 0 : i32
    %c0_i32_0 = arith.constant 0 : i32
    %c0_i32_1 = arith.constant 0 : i32
    %c0_i32_2 = arith.constant 0 : i32
    return %c0_i32, %c0_i32_0, %c0_i32_1 : i32, i32, i32
  }
  func.func @transform_2(%arg0: i32, %arg1: i32) -> (i32, i32) {
    %c0_i32 = arith.constant 0 : i32
    %c0_i32_0 = arith.constant 0 : i32
    %c0_i32_1 = arith.constant 0 : i32
    return %c0_i32, %c0_i32_0 : i32, i32
  }
  func.func @transform_3(%arg0: i32, %arg1: i32) -> (i32, i32, i32, i32, i32) {
    %c0_i32 = arith.constant 0 : i32
    %c0_i32_0 = arith.constant 0 : i32
    %c0_i32_1 = arith.constant 0 : i32
    %c0_i32_2 = arith.constant 0 : i32
    return %arg0, %arg1, %c0_i32, %c0_i32_0, %c0_i32_1 : i32, i32, i32, i32, i32
  }
}

module attributes {stable_mosaic.version = 11 : i64} {
  func.func @_conv_relu_pool_kernel(%arg0: i32, %arg1: i32, %arg2: memref<1x1x456x64xbf16, #tpu.memory_space<vmem>>, %arg3: memref<9x64x128xbf16, #tpu.memory_space<vmem>>, %arg4: memref<1x128xf32, #tpu.memory_space<vmem>>, %arg5: memref<1x1x8x8x128xbf16, #tpu.memory_space<vmem>>) attributes {dimension_semantics = [#tpu.dimension_semantics<parallel>, #tpu.dimension_semantics<parallel>], iteration_bounds = array<i64: 2, 1>, scalar_prefetch = 0 : i64, scratch_operands = 0 : i64, tpu.core_type = #tpu.core_type<tc>, window_params = [{transform_indices = @transform_0, window_bounds = array<i64: 1, 1, 456, 64>}, {pipeline_mode = #tpu.pipeline_mode<synchronous>, transform_indices = @transform_1, window_bounds = array<i64: 9, 64, 128>}, {pipeline_mode = #tpu.pipeline_mode<synchronous>, transform_indices = @transform_2, window_bounds = array<i64: 1, 128>}, {transform_indices = @transform_3, window_bounds = array<i64: 1, 1, 8, 8, 128>}]} {
    %c0 = arith.constant 0 : index
    %c0_0 = arith.constant 0 : index
    %c0_1 = arith.constant 0 : index
    %c0_2 = arith.constant 0 : index
    %0 = vector.load %arg2[%c0, %c0_0, %c0_1, %c0_2] : memref<1x1x456x64xbf16, #tpu.memory_space<vmem>>, vector<1x1x384x64xbf16>
    %1 = vector.shape_cast %0 : vector<1x1x384x64xbf16> to vector<384x64xbf16>
    %c0_3 = arith.constant 0 : index
    %c0_4 = arith.constant 0 : index
    %c0_5 = arith.constant 0 : index
    %2 = vector.load %arg3[%c0_3, %c0_4, %c0_5] : memref<9x64x128xbf16, #tpu.memory_space<vmem>>, vector<1x64x128xbf16>
    %3 = vector.shape_cast %2 : vector<1x64x128xbf16> to vector<64x128xbf16>
    %cst = arith.constant dense<0.000000e+00> : vector<384x128xf32>
    %4 = tpu.matmul %1, %3, %cst {dimension_numbers = #tpu.dot_dimension_numbers<[1], [0], [0], [1], [0, 0, 1, 1], [], []>} : vector<384x64xbf16>, vector<64x128xbf16>, vector<384x128xf32> -> vector<384x128xf32>
    %c0_6 = arith.constant 0 : index
    %c0_7 = arith.constant 0 : index
    %c1 = arith.constant 1 : index
    %c0_8 = arith.constant 0 : index
    %5 = vector.load %arg2[%c0_6, %c0_7, %c1, %c0_8] : memref<1x1x456x64xbf16, #tpu.memory_space<vmem>>, vector<1x1x384x64xbf16>
    %6 = vector.shape_cast %5 : vector<1x1x384x64xbf16> to vector<384x64xbf16>
    %c1_9 = arith.constant 1 : index
    %c0_10 = arith.constant 0 : index
    %c0_11 = arith.constant 0 : index
    %7 = vector.load %arg3[%c1_9, %c0_10, %c0_11] : memref<9x64x128xbf16, #tpu.memory_space<vmem>>, vector<1x64x128xbf16>
    %8 = vector.shape_cast %7 : vector<1x64x128xbf16> to vector<64x128xbf16>
    %cst_12 = arith.constant dense<0.000000e+00> : vector<384x128xf32>
    %9 = tpu.matmul %6, %8, %cst_12 {dimension_numbers = #tpu.dot_dimension_numbers<[1], [0], [0], [1], [0, 0, 1, 1], [], []>} : vector<384x64xbf16>, vector<64x128xbf16>, vector<384x128xf32> -> vector<384x128xf32>
    %10 = arith.addf %4, %9 : vector<384x128xf32>
    %c0_13 = arith.constant 0 : index
    %c0_14 = arith.constant 0 : index
    %c2 = arith.constant 2 : index
    %c0_15 = arith.constant 0 : index
    %11 = vector.load %arg2[%c0_13, %c0_14, %c2, %c0_15] : memref<1x1x456x64xbf16, #tpu.memory_space<vmem>>, vector<1x1x384x64xbf16>
    %12 = vector.shape_cast %11 : vector<1x1x384x64xbf16> to vector<384x64xbf16>
    %c2_16 = arith.constant 2 : index
    %c0_17 = arith.constant 0 : index
    %c0_18 = arith.constant 0 : index
    %13 = vector.load %arg3[%c2_16, %c0_17, %c0_18] : memref<9x64x128xbf16, #tpu.memory_space<vmem>>, vector<1x64x128xbf16>
    %14 = vector.shape_cast %13 : vector<1x64x128xbf16> to vector<64x128xbf16>
    %cst_19 = arith.constant dense<0.000000e+00> : vector<384x128xf32>
    %15 = tpu.matmul %12, %14, %cst_19 {dimension_numbers = #tpu.dot_dimension_numbers<[1], [0], [0], [1], [0, 0, 1, 1], [], []>} : vector<384x64xbf16>, vector<64x128xbf16>, vector<384x128xf32> -> vector<384x128xf32>
    %16 = arith.addf %10, %15 : vector<384x128xf32>
    %c0_20 = arith.constant 0 : index
    %c0_21 = arith.constant 0 : index
    %c24 = arith.constant 24 : index
    %c0_22 = arith.constant 0 : index
    %17 = vector.load %arg2[%c0_20, %c0_21, %c24, %c0_22] : memref<1x1x456x64xbf16, #tpu.memory_space<vmem>>, vector<1x1x384x64xbf16>
    %18 = vector.shape_cast %17 : vector<1x1x384x64xbf16> to vector<384x64xbf16>
    %c3 = arith.constant 3 : index
    %c0_23 = arith.constant 0 : index
    %c0_24 = arith.constant 0 : index
    %19 = vector.load %arg3[%c3, %c0_23, %c0_24] : memref<9x64x128xbf16, #tpu.memory_space<vmem>>, vector<1x64x128xbf16>
    %20 = vector.shape_cast %19 : vector<1x64x128xbf16> to vector<64x128xbf16>
    %cst_25 = arith.constant dense<0.000000e+00> : vector<384x128xf32>
    %21 = tpu.matmul %18, %20, %cst_25 {dimension_numbers = #tpu.dot_dimension_numbers<[1], [0], [0], [1], [0, 0, 1, 1], [], []>} : vector<384x64xbf16>, vector<64x128xbf16>, vector<384x128xf32> -> vector<384x128xf32>
    %22 = arith.addf %16, %21 : vector<384x128xf32>
    %c0_26 = arith.constant 0 : index
    %c0_27 = arith.constant 0 : index
    %c25 = arith.constant 25 : index
    %c0_28 = arith.constant 0 : index
    %23 = vector.load %arg2[%c0_26, %c0_27, %c25, %c0_28] : memref<1x1x456x64xbf16, #tpu.memory_space<vmem>>, vector<1x1x384x64xbf16>
    %24 = vector.shape_cast %23 : vector<1x1x384x64xbf16> to vector<384x64xbf16>
    %c4 = arith.constant 4 : index
    %c0_29 = arith.constant 0 : index
    %c0_30 = arith.constant 0 : index
    %25 = vector.load %arg3[%c4, %c0_29, %c0_30] : memref<9x64x128xbf16, #tpu.memory_space<vmem>>, vector<1x64x128xbf16>
    %26 = vector.shape_cast %25 : vector<1x64x128xbf16> to vector<64x128xbf16>
    %cst_31 = arith.constant dense<0.000000e+00> : vector<384x128xf32>
    %27 = tpu.matmul %24, %26, %cst_31 {dimension_numbers = #tpu.dot_dimension_numbers<[1], [0], [0], [1], [0, 0, 1, 1], [], []>} : vector<384x64xbf16>, vector<64x128xbf16>, vector<384x128xf32> -> vector<384x128xf32>
    %28 = arith.addf %22, %27 : vector<384x128xf32>
    %c0_32 = arith.constant 0 : index
    %c0_33 = arith.constant 0 : index
    %c26 = arith.constant 26 : index
    %c0_34 = arith.constant 0 : index
    %29 = vector.load %arg2[%c0_32, %c0_33, %c26, %c0_34] : memref<1x1x456x64xbf16, #tpu.memory_space<vmem>>, vector<1x1x384x64xbf16>
    %30 = vector.shape_cast %29 : vector<1x1x384x64xbf16> to vector<384x64xbf16>
    %c5 = arith.constant 5 : index
    %c0_35 = arith.constant 0 : index
    %c0_36 = arith.constant 0 : index
    %31 = vector.load %arg3[%c5, %c0_35, %c0_36] : memref<9x64x128xbf16, #tpu.memory_space<vmem>>, vector<1x64x128xbf16>
    %32 = vector.shape_cast %31 : vector<1x64x128xbf16> to vector<64x128xbf16>
    %cst_37 = arith.constant dense<0.000000e+00> : vector<384x128xf32>
    %33 = tpu.matmul %30, %32, %cst_37 {dimension_numbers = #tpu.dot_dimension_numbers<[1], [0], [0], [1], [0, 0, 1, 1], [], []>} : vector<384x64xbf16>, vector<64x128xbf16>, vector<384x128xf32> -> vector<384x128xf32>
    %34 = arith.addf %28, %33 : vector<384x128xf32>
    %c0_38 = arith.constant 0 : index
    %c0_39 = arith.constant 0 : index
    %c48 = arith.constant 48 : index
    %c0_40 = arith.constant 0 : index
    %35 = vector.load %arg2[%c0_38, %c0_39, %c48, %c0_40] : memref<1x1x456x64xbf16, #tpu.memory_space<vmem>>, vector<1x1x384x64xbf16>
    %36 = vector.shape_cast %35 : vector<1x1x384x64xbf16> to vector<384x64xbf16>
    %c6 = arith.constant 6 : index
    %c0_41 = arith.constant 0 : index
    %c0_42 = arith.constant 0 : index
    %37 = vector.load %arg3[%c6, %c0_41, %c0_42] : memref<9x64x128xbf16, #tpu.memory_space<vmem>>, vector<1x64x128xbf16>
    %38 = vector.shape_cast %37 : vector<1x64x128xbf16> to vector<64x128xbf16>
    %cst_43 = arith.constant dense<0.000000e+00> : vector<384x128xf32>
    %39 = tpu.matmul %36, %38, %cst_43 {dimension_numbers = #tpu.dot_dimension_numbers<[1], [0], [0], [1], [0, 0, 1, 1], [], []>} : vector<384x64xbf16>, vector<64x128xbf16>, vector<384x128xf32> -> vector<384x128xf32>
    %40 = arith.addf %34, %39 : vector<384x128xf32>
    %c0_44 = arith.constant 0 : index
    %c0_45 = arith.constant 0 : index
    %c49 = arith.constant 49 : index
    %c0_46 = arith.constant 0 : index
    %41 = vector.load %arg2[%c0_44, %c0_45, %c49, %c0_46] : memref<1x1x456x64xbf16, #tpu.memory_space<vmem>>, vector<1x1x384x64xbf16>
    %42 = vector.shape_cast %41 : vector<1x1x384x64xbf16> to vector<384x64xbf16>
    %c7 = arith.constant 7 : index
    %c0_47 = arith.constant 0 : index
    %c0_48 = arith.constant 0 : index
    %43 = vector.load %arg3[%c7, %c0_47, %c0_48] : memref<9x64x128xbf16, #tpu.memory_space<vmem>>, vector<1x64x128xbf16>
    %44 = vector.shape_cast %43 : vector<1x64x128xbf16> to vector<64x128xbf16>
    %cst_49 = arith.constant dense<0.000000e+00> : vector<384x128xf32>
    %45 = tpu.matmul %42, %44, %cst_49 {dimension_numbers = #tpu.dot_dimension_numbers<[1], [0], [0], [1], [0, 0, 1, 1], [], []>} : vector<384x64xbf16>, vector<64x128xbf16>, vector<384x128xf32> -> vector<384x128xf32>
    %46 = arith.addf %40, %45 : vector<384x128xf32>
    %c0_50 = arith.constant 0 : index
    %c0_51 = arith.constant 0 : index
    %c50 = arith.constant 50 : index
    %c0_52 = arith.constant 0 : index
    %47 = vector.load %arg2[%c0_50, %c0_51, %c50, %c0_52] : memref<1x1x456x64xbf16, #tpu.memory_space<vmem>>, vector<1x1x384x64xbf16>
    %48 = vector.shape_cast %47 : vector<1x1x384x64xbf16> to vector<384x64xbf16>
    %c8 = arith.constant 8 : index
    %c0_53 = arith.constant 0 : index
    %c0_54 = arith.constant 0 : index
    %49 = vector.load %arg3[%c8, %c0_53, %c0_54] : memref<9x64x128xbf16, #tpu.memory_space<vmem>>, vector<1x64x128xbf16>
    %50 = vector.shape_cast %49 : vector<1x64x128xbf16> to vector<64x128xbf16>
    %cst_55 = arith.constant dense<0.000000e+00> : vector<384x128xf32>
    %51 = tpu.matmul %48, %50, %cst_55 {dimension_numbers = #tpu.dot_dimension_numbers<[1], [0], [0], [1], [0, 0, 1, 1], [], []>} : vector<384x64xbf16>, vector<64x128xbf16>, vector<384x128xf32> -> vector<384x128xf32>
    %52 = arith.addf %46, %51 : vector<384x128xf32>
    %c0_56 = arith.constant 0 : index
    %c0_57 = arith.constant 0 : index
    %53 = vector.load %arg4[%c0_56, %c0_57] : memref<1x128xf32, #tpu.memory_space<vmem>>, vector<1x128xf32>
    %54 = vector.broadcast %53 : vector<1x128xf32> to vector<384x128xf32>
    %55 = arith.addf %52, %54 : vector<384x128xf32>
    %cst_58 = arith.constant 0.000000e+00 : f32
    %56 = vector.broadcast %cst_58 : f32 to vector<384x128xf32>
    %57 = arith.maximumf %55, %56 : vector<384x128xf32>
    %58 = vector.shape_cast %57 : vector<384x128xf32> to vector<8x48x128xf32>
    %59 = vector.extract_strided_slice %58 {offsets = [0, 0, 0], sizes = [8, 24, 128], strides = [1, 1, 1]} : vector<8x48x128xf32> to vector<8x24x128xf32>
    %60 = vector.extract_strided_slice %58 {offsets = [0, 24, 0], sizes = [8, 24, 128], strides = [1, 1, 1]} : vector<8x48x128xf32> to vector<8x24x128xf32>
    %61 = arith.maximumf %59, %60 : vector<8x24x128xf32>
    %62 = vector.shape_cast %61 : vector<8x24x128xf32> to vector<8x12x2x128xf32>
    %63 = vector.extract_strided_slice %62 {offsets = [0, 0, 0, 0], sizes = [8, 12, 1, 128], strides = [1, 1, 1, 1]} : vector<8x12x2x128xf32> to vector<8x12x1x128xf32>
    %64 = vector.shape_cast %63 : vector<8x12x1x128xf32> to vector<8x12x128xf32>
    %65 = vector.extract_strided_slice %62 {offsets = [0, 0, 1, 0], sizes = [8, 12, 1, 128], strides = [1, 1, 1, 1]} : vector<8x12x2x128xf32> to vector<8x12x1x128xf32>
    %66 = vector.shape_cast %65 : vector<8x12x1x128xf32> to vector<8x12x128xf32>
    %67 = arith.maximumf %64, %66 : vector<8x12x128xf32>
    %68 = vector.extract_strided_slice %67 {offsets = [0, 0, 0], sizes = [8, 8, 128], strides = [1, 1, 1]} : vector<8x12x128xf32> to vector<8x8x128xf32>
    %69 = arith.truncf %68 : vector<8x8x128xf32> to vector<8x8x128xbf16>
    %c0_59 = arith.constant 0 : index
    %c0_60 = arith.constant 0 : index
    %c0_61 = arith.constant 0 : index
    %c0_62 = arith.constant 0 : index
    %c0_63 = arith.constant 0 : index
    %70 = vector.load %arg5[%c0_59, %c0_60, %c0_61, %c0_62, %c0_63] : memref<1x1x8x8x128xbf16, #tpu.memory_space<vmem>>, vector<1x1x8x8x128xbf16>
    %71 = vector.shape_cast %70 : vector<1x1x8x8x128xbf16> to vector<8x8x128xbf16>
    %72 = vector.shape_cast %69 : vector<8x8x128xbf16> to vector<1x1x8x8x128xbf16>
    tpu.vector_store %arg5[%c0_59, %c0_60, %c0_61, %c0_62, %c0_63], %72 {strides = array<i32>} : memref<1x1x8x8x128xbf16, #tpu.memory_space<vmem>>, vector<1x1x8x8x128xbf16>,
    return
  }
  func.func @transform_0(%arg0: i32, %arg1: i32) -> (i32, i32, i32, i32) {
    %c0_i32 = arith.constant 0 : i32
    %c0_i32_0 = arith.constant 0 : i32
    %c0_i32_1 = arith.constant 0 : i32
    return %arg0, %arg1, %c0_i32, %c0_i32_0 : i32, i32, i32, i32
  }
  func.func @transform_1(%arg0: i32, %arg1: i32) -> (i32, i32, i32) {
    %c0_i32 = arith.constant 0 : i32
    %c0_i32_0 = arith.constant 0 : i32
    %c0_i32_1 = arith.constant 0 : i32
    %c0_i32_2 = arith.constant 0 : i32
    return %c0_i32, %c0_i32_0, %c0_i32_1 : i32, i32, i32
  }
  func.func @transform_2(%arg0: i32, %arg1: i32) -> (i32, i32) {
    %c0_i32 = arith.constant 0 : i32
    %c0_i32_0 = arith.constant 0 : i32
    %c0_i32_1 = arith.constant 0 : i32
    return %c0_i32, %c0_i32_0 : i32, i32
  }
  func.func @transform_3(%arg0: i32, %arg1: i32) -> (i32, i32, i32, i32, i32) {
    %c0_i32 = arith.constant 0 : i32
    %c0_i32_0 = arith.constant 0 : i32
    %c0_i32_1 = arith.constant 0 : i32
    %c0_i32_2 = arith.constant 0 : i32
    return %arg0, %arg1, %c0_i32, %c0_i32_0, %c0_i32_1 : i32, i32, i32, i32, i32
  }
}

module attributes {stable_mosaic.version = 11 : i64} {
  func.func @_matmul_bias_kernel(%arg0: i32, %arg1: i32, %arg2: i32, %arg3: memref<2x8192xbf16, #tpu.memory_space<vmem>>, %arg4: memref<8192x256xbf16, #tpu.memory_space<vmem>>, %arg5: memref<1x256xf32, #tpu.memory_space<vmem>>, %arg6: memref<2x256xf32, #tpu.memory_space<vmem>>) attributes {dimension_semantics = [#tpu.dimension_semantics<parallel>, #tpu.dimension_semantics<parallel>, #tpu.dimension_semantics<arbitrary>], iteration_bounds = array<i64: 1, 2, 1>, scalar_prefetch = 0 : i64, scratch_operands = 0 : i64, tpu.core_type = #tpu.core_type<tc>, window_params = [{transform_indices = @transform_0, window_bounds = array<i64: 2, 8192>}, {transform_indices = @transform_1, window_bounds = array<i64: 8192, 256>}, {transform_indices = @transform_2, window_bounds = array<i64: 1, 256>}, {transform_indices = @transform_3, window_bounds = array<i64: 2, 256>}]} {
    %c0_i32 = arith.constant 0 : i32
    %0 = arith.cmpi eq, %arg2, %c0_i32 : i32
    %1 = arith.extui %0 : i1 to i32
    %c0_i32_0 = arith.constant 0 : i32
    %2 = arith.cmpi ne, %1, %c0_i32_0 : i32
    scf.if %2 {
      %cst_10 = arith.constant 0.000000e+00 : f32
      %12 = vector.broadcast %cst_10 : f32 to vector<2x256xf32>
      %c0_11 = arith.constant 0 : index
      %c0_12 = arith.constant 0 : index
      %13 = vector.load %arg6[%c0_11, %c0_12] : memref<2x256xf32, #tpu.memory_space<vmem>>, vector<2x256xf32>
      tpu.vector_store %arg6[%c0_11, %c0_12], %12 {strides = array<i32>} : memref<2x256xf32, #tpu.memory_space<vmem>>, vector<2x256xf32>,
    } else {
    }
    %c0 = arith.constant 0 : index
    %c0_1 = arith.constant 0 : index
    %3 = vector.load %arg6[%c0, %c0_1] : memref<2x256xf32, #tpu.memory_space<vmem>>, vector<2x256xf32>
    %c0_2 = arith.constant 0 : index
    %c0_3 = arith.constant 0 : index
    %4 = vector.load %arg3[%c0_2, %c0_3] : memref<2x8192xbf16, #tpu.memory_space<vmem>>, vector<2x8192xbf16>
    %c0_4 = arith.constant 0 : index
    %c0_5 = arith.constant 0 : index
    %5 = vector.load %arg4[%c0_4, %c0_5] : memref<8192x256xbf16, #tpu.memory_space<vmem>>, vector<8192x256xbf16>
    %cst = arith.constant dense<0.000000e+00> : vector<2x256xf32>
    %6 = tpu.matmul %4, %5, %cst {dimension_numbers = #tpu.dot_dimension_numbers<[1], [0], [0], [1], [0, 0, 1, 1], [], []>} : vector<2x8192xbf16>, vector<8192x256xbf16>, vector<2x256xf32> -> vector<2x256xf32>
    %7 = arith.addf %3, %6 : vector<2x256xf32>
    %c0_6 = arith.constant 0 : index
    %c0_7 = arith.constant 0 : index
    %8 = vector.load %arg6[%c0_6, %c0_7] : memref<2x256xf32, #tpu.memory_space<vmem>>, vector<2x256xf32>
    tpu.vector_store %arg6[%c0_6, %c0_7], %7 {strides = array<i32>} : memref<2x256xf32, #tpu.memory_space<vmem>>, vector<2x256xf32>,
    %c0_i32_8 = arith.constant 0 : i32
    %9 = arith.cmpi eq, %arg2, %c0_i32_8 : i32
    %10 = arith.extui %9 : i1 to i32
    %c0_i32_9 = arith.constant 0 : i32
    %11 = arith.cmpi ne, %10, %c0_i32_9 : i32
    scf.if %11 {
      %c0_10 = arith.constant 0 : index
      %c0_11 = arith.constant 0 : index
      %12 = vector.load %arg6[%c0_10, %c0_11] : memref<2x256xf32, #tpu.memory_space<vmem>>, vector<2x256xf32>
      %c0_12 = arith.constant 0 : index
      %c0_13 = arith.constant 0 : index
      %13 = vector.load %arg5[%c0_12, %c0_13] : memref<1x256xf32, #tpu.memory_space<vmem>>, vector<1x256xf32>
      %14 = vector.broadcast %13 : vector<1x256xf32> to vector<2x256xf32>
      %15 = arith.addf %12, %14 : vector<2x256xf32>
      %cst_14 = arith.constant 0.000000e+00 : f32
      %16 = vector.broadcast %cst_14 : f32 to vector<2x256xf32>
      %17 = arith.maximumf %15, %16 : vector<2x256xf32>
      %c0_15 = arith.constant 0 : index
      %c0_16 = arith.constant 0 : index
      %18 = vector.load %arg6[%c0_15, %c0_16] : memref<2x256xf32, #tpu.memory_space<vmem>>, vector<2x256xf32>
      tpu.vector_store %arg6[%c0_15, %c0_16], %17 {strides = array<i32>} : memref<2x256xf32, #tpu.memory_space<vmem>>, vector<2x256xf32>,
    } else {
    }
    return
  }
  func.func @transform_0(%arg0: i32, %arg1: i32, %arg2: i32) -> (i32, i32) {
    %c0_i32 = arith.constant 0 : i32
    return %arg0, %arg2 : i32, i32
  }
  func.func @transform_1(%arg0: i32, %arg1: i32, %arg2: i32) -> (i32, i32) {
    %c0_i32 = arith.constant 0 : i32
    return %arg2, %arg1 : i32, i32
  }
  func.func @transform_2(%arg0: i32, %arg1: i32, %arg2: i32) -> (i32, i32) {
    %c0_i32 = arith.constant 0 : i32
    %c0_i32_0 = arith.constant 0 : i32
    return %c0_i32, %arg1 : i32, i32
  }
  func.func @transform_3(%arg0: i32, %arg1: i32, %arg2: i32) -> (i32, i32) {
    %c0_i32 = arith.constant 0 : i32
    return %arg0, %arg1 : i32, i32
  }
}

module attributes {stable_mosaic.version = 11 : i64} {
  func.func @_matmul_bias_kernel(%arg0: i32, %arg1: i32, %arg2: i32, %arg3: memref<2x512xbf16, #tpu.memory_space<vmem>>, %arg4: memref<512x128xbf16, #tpu.memory_space<vmem>>, %arg5: memref<1x128xf32, #tpu.memory_space<vmem>>, %arg6: memref<2x128xf32, #tpu.memory_space<vmem>>) attributes {dimension_semantics = [#tpu.dimension_semantics<parallel>, #tpu.dimension_semantics<parallel>, #tpu.dimension_semantics<arbitrary>], iteration_bounds = array<i64: 1, 1, 1>, scalar_prefetch = 0 : i64, scratch_operands = 0 : i64, tpu.core_type = #tpu.core_type<tc>, window_params = [{transform_indices = @transform_0, window_bounds = array<i64: 2, 512>}, {transform_indices = @transform_1, window_bounds = array<i64: 512, 128>}, {transform_indices = @transform_2, window_bounds = array<i64: 1, 128>}, {transform_indices = @transform_3, window_bounds = array<i64: 2, 128>}]} {
    %c0_i32 = arith.constant 0 : i32
    %0 = arith.cmpi eq, %arg2, %c0_i32 : i32
    %1 = arith.extui %0 : i1 to i32
    %c0_i32_0 = arith.constant 0 : i32
    %2 = arith.cmpi ne, %1, %c0_i32_0 : i32
    scf.if %2 {
      %cst_10 = arith.constant 0.000000e+00 : f32
      %12 = vector.broadcast %cst_10 : f32 to vector<2x128xf32>
      %c0_11 = arith.constant 0 : index
      %c0_12 = arith.constant 0 : index
      %13 = vector.load %arg6[%c0_11, %c0_12] : memref<2x128xf32, #tpu.memory_space<vmem>>, vector<2x128xf32>
      tpu.vector_store %arg6[%c0_11, %c0_12], %12 {strides = array<i32>} : memref<2x128xf32, #tpu.memory_space<vmem>>, vector<2x128xf32>,
    } else {
    }
    %c0 = arith.constant 0 : index
    %c0_1 = arith.constant 0 : index
    %3 = vector.load %arg6[%c0, %c0_1] : memref<2x128xf32, #tpu.memory_space<vmem>>, vector<2x128xf32>
    %c0_2 = arith.constant 0 : index
    %c0_3 = arith.constant 0 : index
    %4 = vector.load %arg3[%c0_2, %c0_3] : memref<2x512xbf16, #tpu.memory_space<vmem>>, vector<2x512xbf16>
    %c0_4 = arith.constant 0 : index
    %c0_5 = arith.constant 0 : index
    %5 = vector.load %arg4[%c0_4, %c0_5] : memref<512x128xbf16, #tpu.memory_space<vmem>>, vector<512x128xbf16>
    %cst = arith.constant dense<0.000000e+00> : vector<2x128xf32>
    %6 = tpu.matmul %4, %5, %cst {dimension_numbers = #tpu.dot_dimension_numbers<[1], [0], [0], [1], [0, 0, 1, 1], [], []>} : vector<2x512xbf16>, vector<512x128xbf16>, vector<2x128xf32> -> vector<2x128xf32>
    %7 = arith.addf %3, %6 : vector<2x128xf32>
    %c0_6 = arith.constant 0 : index
    %c0_7 = arith.constant 0 : index
    %8 = vector.load %arg6[%c0_6, %c0_7] : memref<2x128xf32, #tpu.memory_space<vmem>>, vector<2x128xf32>
    tpu.vector_store %arg6[%c0_6, %c0_7], %7 {strides = array<i32>} : memref<2x128xf32, #tpu.memory_space<vmem>>, vector<2x128xf32>,
    %c0_i32_8 = arith.constant 0 : i32
    %9 = arith.cmpi eq, %arg2, %c0_i32_8 : i32
    %10 = arith.extui %9 : i1 to i32
    %c0_i32_9 = arith.constant 0 : i32
    %11 = arith.cmpi ne, %10, %c0_i32_9 : i32
    scf.if %11 {
      %c0_10 = arith.constant 0 : index
      %c0_11 = arith.constant 0 : index
      %12 = vector.load %arg6[%c0_10, %c0_11] : memref<2x128xf32, #tpu.memory_space<vmem>>, vector<2x128xf32>
      %c0_12 = arith.constant 0 : index
      %c0_13 = arith.constant 0 : index
      %13 = vector.load %arg5[%c0_12, %c0_13] : memref<1x128xf32, #tpu.memory_space<vmem>>, vector<1x128xf32>
      %14 = vector.broadcast %13 : vector<1x128xf32> to vector<2x128xf32>
      %15 = arith.addf %12, %14 : vector<2x128xf32>
      %c0_14 = arith.constant 0 : index
      %c0_15 = arith.constant 0 : index
      %16 = vector.load %arg6[%c0_14, %c0_15] : memref<2x128xf32, #tpu.memory_space<vmem>>, vector<2x128xf32>
      tpu.vector_store %arg6[%c0_14, %c0_15], %15 {strides = array<i32>} : memref<2x128xf32, #tpu.memory_space<vmem>>, vector<2x128xf32>,
    } else {
    }
    return
  }
  func.func @transform_0(%arg0: i32, %arg1: i32, %arg2: i32) -> (i32, i32) {
    %c0_i32 = arith.constant 0 : i32
    return %arg0, %arg2 : i32, i32
  }
  func.func @transform_1(%arg0: i32, %arg1: i32, %arg2: i32) -> (i32, i32) {
    %c0_i32 = arith.constant 0 : i32
    return %arg2, %arg1 : i32, i32
  }
  func.func @transform_2(%arg0: i32, %arg1: i32, %arg2: i32) -> (i32, i32) {
    %c0_i32 = arith.constant 0 : i32
    %c0_i32_0 = arith.constant 0 : i32
    return %c0_i32, %arg1 : i32, i32
  }
  func.func @transform_3(%arg0: i32, %arg1: i32, %arg2: i32) -> (i32, i32) {
    %c0_i32 = arith.constant 0 : i32
    return %arg0, %arg1 : i32, i32
  }
}

</mosaic_0001>

<bundles_post_ra>
// kernel: skin_disease_forward.4
= control target key start
LH: loop header
LB: loop body
LE: loop exit
PB: predicated region body
PF: predicated region fallthrough
CT: control target
= control target key end

     0   :  { %8 = vsyncpa [#allocation3], 0  ;;  %s4779_s0 = inlined_call_operand.vmem [shape: bf16[2,2,512,27], index: 0, kind: input, shape index: {}]   ;;  %s4780_s1 = inlined_call_operand.hbm [shape: bf16[1,27,64], index: 1, kind: input, shape index: {}]   ;;  %s4781_s2 = inlined_call_operand.hbm [shape: f32[1,64], index: 2, kind: input, shape index: {}]   ;;  %s4782_s3 = inlined_call_operand.vmem [shape: bf16[2,2,8,16,64], index: 3, kind: output, shape index: {}]  }
   0x1   :  { %9 = vsyncpa [#allocation5], 0  ;;  %s4025_s12 = smov 0   ;;  %s4027_s13 = smov 0  }
   0x2   :  { %s4029_s14 = smov 0   ;;  %s4031_s15 = smov 0  }
   0x3   :  { %s4033_s16 = smov 0  }
   0x4 LB: > { %s3225_s17 = sadd.s32 4294967295, %s3997_s16   ;;  %s24_s18 = sadd.s32 1, %s3989_s14  ;;  %s3997_s16 = sphi %s4033_s16, %s15_s16   ;;  %s3993_s15 = sphi %s4031_s15, %s4789_s15   ;;  %s3989_s14 = sphi %s4029_s14, %s4788_s14   ;;  %s3985_s13 = sphi %s4027_s13, %s4787_s13   ;;  %s3981_s12 = sphi %s4025_s12, %s4786_s12  }
   0x5   : > { %p25_p0 = scmp.ge.s32.totalorder %s24_s18, 2  ;;  %s27_s19 = sadd.s32 1, %s3993_s15 }
   0x6   : > { %p3227_p1 = scmp.ge.s32.totalorder %s3997_s16, 1  ;;  %p130_p2 = scmp.lt.s32.totalorder %s3997_s16, 5 }
   0x7   : > { %s4791_s18 = smov (%p25_p0, %s24_s18), 0  ;;  %s4793_s19 = smov (!%p25_p0, %s27_s19), %s3993_s15 }
   0x8   : > { %p4058_p3 = pnand %p3227_p1, %p130_p2  ;;  %p29_p4 = scmp.ge.s32.totalorder %s4793_s19, 2 }
   0x9   : > { %p4062_p5 = scmp.eq.s32.totalorder %s3225_s17, 0  ;;  %s3999_s22 = smov [#allocation2]  }
   0xa   : > { %p3807_p6 = pneg %p4058_p3  ;;  %s4795_s19 = smov (%p29_p4, %s4793_s19), 0 }
   0xb   : > { %s142_s23 = sshll.u32 %s3999_s22, 4  ;;  %s143_s23 = int_to_ptr.vmem [resolvable:$true] %s142_s23 }
   0xc   : > { %p4072_p7 = pnand %p4062_p5, %p3807_p6  ;;  %s3910_s25 = scalar_lea.vmem %s143_s23, 256 }
   0xd   : > { %p3911_p9 = scmp.ne.s32.totalorder %s143_s23, %s3910_s25  ;;  %p3918_p12 = scmp.lt.s32.totalorder %s143_s23, %s143_s23 }
   0xe   : > { %p3901_p8 = pneg %p4072_p7  ;;  %p3919_p13 = scmp.lt.s32.totalorder %s3910_s25, %s3910_s25 }
  0x10   : > { %p3913_p10 = pnand %p3911_p9, %p3901_p8  ;;  %p3920_p0 = por %p3919_p13, %p3918_p12 }
  0x12   : > { %p3914_p11 = pneg %p3913_p10 }
  0x14   : > { %p3921_p1 = pnand %p3920_p0, %p3914_p11 }
  0x16   : > { %3924 = shalt.err (!%p3921_p1)
}
  0x17   : > { %s4000_s26 = smov 64   ;;  %s4001_s27 = smov 4  }
  0x18   : > { %3810 = dma.hbm_to_vmem [thread:$0]  (!%p4072_p7), %s4780_s1, 256, %s143_s23, [#allocation3], %s4000_s26, %s4000_s26, %s4001_s27  }
  0x19   : > { %s4002_s30 = smov [#allocation4]  }
  0x1a   : > { %s156_s4 = sshll.u32 %s4002_s30, 4  ;;  %s157_s4 = int_to_ptr.vmem [resolvable:$true] %s156_s4 }
  0x1b   : > { %s3936_s5 = scalar_lea.vmem %s157_s4, 16  ;;  %s3943_s6 = scalar_lea.vmem %s157_s4, 32 }
  0x1c   : > { %p3937_p2 = scmp.ne.s32.totalorder %s157_s4, %s3936_s5  ;;  %p3944_p9 = scmp.lt.s32.totalorder %s157_s4, %s157_s4 }
  0x1d   : > { %p3945_p10 = scmp.lt.s32.totalorder %s3943_s6, %s3936_s5 }
  0x1e   : > { %p3939_p4 = pnand %p3937_p2, %p3901_p8 }
  0x1f   : > { %p3946_p11 = por %p3945_p10, %p3944_p9 }
  0x20   : > { %p3940_p6 = pneg %p3939_p4 }
  0x22   : > { %p3947_p12 = pnand %p3946_p11, %p3940_p6 }
  0x24   : > { %3950 = shalt.err (!%p3947_p12)
}
  0x25   : > { %3813 = dma.hbm_to_vmem [thread:$0]  (!%p4072_p7), %s4781_s2, 16, %s157_s4, [#allocation5]  }
  0x26   : > { %181 = sbr.rel (%p4058_p3) target bundleno = 537 (0x219), region = 32 }
  0x2b   : > { %3972 = dma.done.wait (%p4062_p5), [#allocation3], 256  }
  0x2c   : > { %3974 = vsyncadd (%p4062_p5), [#allocation3], 4294967040 }
  0x2d   : > { %3976 = dma.done.wait (%p4062_p5), [#allocation5], 16  }
  0x2e   : > { %3978 = vsyncadd (%p4062_p5), [#allocation5], 4294967280  ;;  %vm579_vm0 = vcmask 1044480   ;;  %p217_p7 = scmp.lt.s32.totalorder %s3985_s13, 1  ;;  %p219_p8 = scmp.lt.s32.totalorder %s3981_s12, 1  ;;  %vm580_vm1 = vcmask 1045504   ;;  %v1007_v42 = vlaneseq }
  0x2f   : > { %v4003_v0 = vmov 65535   ;;  %v3864_v3 = vld [vmem:[#allocation2 + $0x8] sm:$0x3f]   ;;  %v3865_v5 = vld [vmem:[#allocation2] sm:$0xff]   ;;  %vm482_vm2 = vcmask 220160   ;;  %vm2828_vm3 = vcmask 1041409  }
  0x30   : > { %s4797_s13 = smov (!%p217_p7, %s3985_s13), 1  ;;  %v581_v1 = vsel %vm579_vm0, 4294967295, %v4003_v0  ;;  %s4799_s12 = smov (!%p219_p8, %s3981_s12), 1  ;;  %v4004_v40 = vmov 1983009808   ;;  %v1008_v49 = vshrl.u32 %v1007_v42, 7 }
  0x31   : > { %s3235_s9 = sshll.u32 %s4797_s13, 7  ;;  %s3234_s10 = sshll.u32 %s4799_s12, 6  ;;  %v582_v2 = vsel %vm580_vm1, %v581_v1, 0  ;;  %v1005_v41 = vunpack.c.l.s4 %v4004_v40  ;;  %v4183_v45 = vld [vmem:[#allocation4] ss:$0 sm:$0xff]  ;;  %vm2831_vm4 = vcmask 1042434  }
  0x32   : > { %s223_s11 = sadd.s32 %s3235_s9, %s3234_s10  ;;  %v584_v4 = vand.u32 %v3864_v3, %v582_v2  ;;  %vm2834_vm5 = vcmask 1043459   ;;  %vm2837_vm6 = vcmask 1044484   ;;  %vm2840_vm7 = vcmask 1045509   ;;  %s3237_s23 = sshll.u32 %s4799_s12, 4 }
  0x33   : > { %s3236_s17 = sshll.u32 %s223_s11, 2  ;;  %v1006_v48 = vunpack.c.0.s8 %v1005_v41  ;;  %vm2843_vm8 = vcmask 1046534   ;;  %vm2846_vm9 = vcmask 1047559   ;;  %s3238_s24 = sshll.u32 %s4797_s13, 5  ;;  %vm3090_vm10 = vcmask 519168  }
  0x34   : > { %s4117_s22 = scalar_lea.vmem %s4779_s0, %s3236_s17  ;;  %3727 = vmatprep.subr.bf16.mxu0 %v584_v4  ;;  %3795 = vmatprep.subr.bf16.mxu1 %v584_v4  ;;  %s4266_s12 = sadd.s32 %s3238_s24, %s3237_s23 }
  0x35   : > { %v3866_v6 = vld [vmem:[%s4117_s22] sm:$0xff]   ;;  %3728 = vmatpush3.bf16.msra.mxu0 %v584_v4  ;;  %3797 = vmatpush3.bf16.msra.mxu1 %v584_v4  ;;  %v3868_v8 = vld [vmem:[%s4117_s22 + $0x8] sm:$0xff]   ;;  %v3870_v10 = vld [vmem:[%s4117_s22 + $0x10] sm:$0xff]   ;;  %v4193_v60 = vsub.s32 %v1006_v48, %v1008_v49  ;;  %s3239_s13 = sshll.u32 %s4266_s12, 2 }
  0x36   : > { %v3867_v7 = vld [vmem:[%s4117_s22 + $0x80] sm:$0xff]   ;;  %3729 = vmatprep.subr.bf16.mxu0 %v3865_v5  ;;  %3796 = vmatprep.subr.bf16.mxu1 %v3865_v5  ;;  %v3869_v9 = vld [vmem:[%s4117_s22 + $0x88] sm:$0xff]   ;;  %v3871_v11 = vld [vmem:[%s4117_s22 + $0x90] sm:$0xff]   ;;  %s4285_s27 = scalar_lea.vmem %s4782_s3, %s3239_s13 }
  0x37   : > { %3731 = vmatprep.mubr.msk.bf16.mxu0 %vm482_vm2, %v3866_v6  ;;  %3763 = vmatprep.mubr.msk.bf16.mxu1 %vm482_vm2, %v3867_v7  ;;  %v3872_v12 = vld [vmem:[%s4117_s22 + $0x18] sm:$0xff]   ;;  %v3874_v14 = vld [vmem:[%s4117_s22 + $0x20] sm:$0xff]   ;;  %v3876_v16 = vld [vmem:[%s4117_s22 + $0x28] sm:$0xff]  }
  0x38   : > { %v3873_v13 = vld [vmem:[%s4117_s22 + $0x98] sm:$0xff]   ;;  %v3875_v15 = vld [vmem:[%s4117_s22 + $0xa0] sm:$0xff]   ;;  %v3877_v17 = vld [vmem:[%s4117_s22 + $0xa8] sm:$0xff]  }
  0x39   : > { %3730 = vmatpush3.bf16.msra.mxu0 %v3865_v5  ;;  %3798 = vmatpush3.bf16.msra.mxu1 %v3865_v5  ;;  %v3878_v18 = vld [vmem:[%s4117_s22 + $0x30] sm:$0xff]   ;;  %v3880_v20 = vld [vmem:[%s4117_s22 + $0x38] sm:$0xff]   ;;  %v3882_v22 = vld [vmem:[%s4117_s22 + $0x40] sm:$0xff]  }
  0x3a   : > { %v3879_v19 = vld [vmem:[%s4117_s22 + $0xb0] sm:$0xff]   ;;  %v3881_v21 = vld [vmem:[%s4117_s22 + $0xb8] sm:$0xff]   ;;  %v3883_v23 = vld [vmem:[%s4117_s22 + $0xc0] sm:$0xff]  }
  0x3b   : > { %v3884_v24 = vld [vmem:[%s4117_s22 + $0x48] sm:$0xff]   ;;  %v3886_v26 = vld [vmem:[%s4117_s22 + $0x50] sm:$0xff]   ;;  %v3888_v28 = vld [vmem:[%s4117_s22 + $0x58] sm:$0xff]  }
  0x3c   : > { %3732 = vmatmul.mubr.msk.bf16.vlgmr.msra.gmra.mxu0 %vm482_vm2, %v3868_v8  ;;  %3764 = vmatmul.mubr.msk.bf16.vlgmr.msra.gmra.mxu1 %vm482_vm2, %v3869_v9  ;;  %v3885_v25 = vld [vmem:[%s4117_s22 + $0xc8] sm:$0xff]   ;;  %v3887_v27 = vld [vmem:[%s4117_s22 + $0xd0] sm:$0xff]   ;;  %v3889_v29 = vld [vmem:[%s4117_s22 + $0xd8] sm:$0xff]  }
  0x3d   : > { %3735 = vmatprep.mubr.msk.bf16.mxu0 %vm482_vm2, %v3870_v10  ;;  %3767 = vmatprep.mubr.msk.bf16.mxu1 %vm482_vm2, %v3871_v11  ;;  %v3890_v30 = vld [vmem:[%s4117_s22 + $0x60] sm:$0xff]   ;;  %v3892_v32 = vld [vmem:[%s4117_s22 + $0x68] sm:$0xff]   ;;  %v3894_v34 = vld [vmem:[%s4117_s22 + $0x70] sm:$0xff]  }
  0x3e   : > { %v3891_v31 = vld [vmem:[%s4117_s22 + $0xe0] sm:$0xff]   ;;  %v3893_v33 = vld [vmem:[%s4117_s22 + $0xe8] sm:$0xff]   ;;  %v3895_v35 = vld [vmem:[%s4117_s22 + $0xf0] sm:$0xff]  }
  0x3f   : > { %v3896_v36 = vld [vmem:[%s4117_s22 + $0x78] sm:$0xff]  }
  0x40   : > { %v3897_v37 = vld [vmem:[%s4117_s22 + $0xf8] sm:$0xff]  }
  0x44   : > { %3736 = vmatmul.mubr.msk.bf16.gmra.mxu0 %vm482_vm2, %v3872_v12  ;;  %3768 = vmatmul.mubr.msk.bf16.gmra.mxu1 %vm482_vm2, %v3873_v13 }
  0x45   : > { %3739 = vmatprep.mubr.msk.bf16.mxu0 %vm482_vm2, %v3874_v14  ;;  %3771 = vmatprep.mubr.msk.bf16.mxu1 %vm482_vm2, %v3875_v15 }
  0x4c   : > { %3740 = vmatmul.mubr.msk.bf16.gmra.mxu0 %vm482_vm2, %v3876_v16  ;;  %3772 = vmatmul.mubr.msk.bf16.gmra.mxu1 %vm482_vm2, %v3877_v17 }
  0x4d   : > { %3743 = vmatprep.mubr.msk.bf16.mxu0 %vm482_vm2, %v3878_v18  ;;  %3775 = vmatprep.mubr.msk.bf16.mxu1 %vm482_vm2, %v3879_v19 }
  0x54   : > { %3744 = vmatmul.mubr.msk.bf16.gmra.mxu0 %vm482_vm2, %v3880_v20  ;;  %3776 = vmatmul.mubr.msk.bf16.gmra.mxu1 %vm482_vm2, %v3881_v21 }
  0x55   : > { %3747 = vmatprep.mubr.msk.bf16.mxu0 %vm482_vm2, %v3882_v22  ;;  %3779 = vmatprep.mubr.msk.bf16.mxu1 %vm482_vm2, %v3883_v23 }
  0x5c   : > { %3748 = vmatmul.mubr.msk.bf16.gmra.mxu0 %vm482_vm2, %v3884_v24  ;;  %3780 = vmatmul.mubr.msk.bf16.gmra.mxu1 %vm482_vm2, %v3885_v25 }
  0x5d   : > { %3751 = vmatprep.mubr.msk.bf16.mxu0 %vm482_vm2, %v3886_v26  ;;  %3783 = vmatprep.mubr.msk.bf16.mxu1 %vm482_vm2, %v3887_v27 }
  0x64   : > { %3752 = vmatmul.mubr.msk.bf16.gmra.mxu0 %vm482_vm2, %v3888_v28  ;;  %3784 = vmatmul.mubr.msk.bf16.gmra.mxu1 %vm482_vm2, %v3889_v29 }
  0x65   : > { %3755 = vmatprep.mubr.msk.bf16.mxu0 %vm482_vm2, %v3890_v30  ;;  %3787 = vmatprep.mubr.msk.bf16.mxu1 %vm482_vm2, %v3891_v31 }
  0x6c   : > { %3756 = vmatmul.mubr.msk.bf16.gmra.mxu0 %vm482_vm2, %v3892_v32  ;;  %3788 = vmatmul.mubr.msk.bf16.gmra.mxu1 %vm482_vm2, %v3893_v33 }
  0x6d   : > { %3759 = vmatprep.mubr.msk.bf16.mxu0 %vm482_vm2, %v3894_v34  ;;  %3791 = vmatprep.mubr.msk.bf16.mxu1 %vm482_vm2, %v3895_v35 }
  0x74   : > { %3760 = vmatmul.mubr.msk.bf16.gmra.mxu0 %vm482_vm2, %v3896_v36  ;;  %3792 = vmatmul.mubr.msk.bf16.gmra.mxu1 %vm482_vm2, %v3897_v37 }
  0xfc   : > { %v3733_v38 = vpop.f32.mrf.mxu0  ;;  %v3765_v39 = vpop.f32.mrf.mxu1 }
  0xfd   : > { %v629_v50 = vadd.f32 %v3733_v38, %v4183_v45  ;;  %v757_v51 = vadd.f32 %v3765_v39, %v4183_v45 }
  0xfe   : > { %v620_v43 = vpop.f32.mrf.mxu0  ;;  %v748_v44 = vpop.f32.mrf.mxu1 }
  0xff   : > { %v621_v54 = vadd.f32 %v4183_v45, %v620_v43  ;;  %v749_v55 = vadd.f32 %v4183_v45, %v748_v44  ;;  %v877_v62 = vmax.f32 %v629_v50, 0.0  ;;  %v909_v63 = vmax.f32 %v757_v51, 0.0 }
 0x100   : > { %v3734_v46 = vpop.f32.mrf.mxu0  ;;  %v3766_v47 = vpop.f32.mrf.mxu1 }
 0x101   : > { %v4190_v56 = vadd.f32 %v3734_v46, %v4183_v45  ;;  %v4197_v0 = vadd.f32 %v3766_v47, %v4183_v45  ;;  %v875_v8 = vmax.f32 %v621_v54, 0.0  ;;  %v907_v9 = vmax.f32 %v749_v55, 0.0 }
 0x102   : > { %v623_v52 = vpop.f32.mrf.mxu0  ;;  %v751_v53 = vpop.f32.mrf.mxu1 }
 0x103   : > { %v4200_v1 = vadd.f32 %v4183_v45, %v623_v52  ;;  %v878_v10 = vmax.f32 %v4190_v56, 0.0  ;;  %v4206_v11 = vadd.f32 %v4183_v45, %v751_v53  ;;  %v910_v18 = vmax.f32 %v4197_v0, 0.0 }
 0x104   : > { %v3737_v57 = vpop.f32.mrf.mxu0  ;;  %v3769_v58 = vpop.f32.mrf.mxu1 }
 0x105   : > { %v645_v59 = vadd.f32 %v3737_v57, %v4183_v45  ;;  %v773_v61 = vadd.f32 %v3769_v58, %v4183_v45  ;;  %v876_v19 = vmax.f32 %v4200_v1, 0.0  ;;  %v908_v26 = vmax.f32 %v4206_v11, 0.0 }
 0x106   : > { %v636_v2 = vpop.f32.mrf.mxu0  ;;  %v764_v3 = vpop.f32.mrf.mxu1 }
 0x107   : > { %v881_v4 = vmax.f32 %v645_v59, 0.0  ;;  %v913_v5 = vmax.f32 %v773_v61, 0.0  ;;  %v637_v6 = vadd.f32 %v4183_v45, %v636_v2  ;;  %v765_v7 = vadd.f32 %v4183_v45, %v764_v3 }
 0x108   : > { %v3738_v12 = vpop.f32.mrf.mxu0  ;;  %v3770_v13 = vpop.f32.mrf.mxu1 }
 0x109   : > { %v941_v14 = vmax.f32 %v877_v62, %v881_v4  ;;  %v957_v15 = vmax.f32 %v909_v63, %v913_v5  ;;  %v879_v16 = vmax.f32 %v637_v6, 0.0  ;;  %v911_v17 = vmax.f32 %v765_v7, 0.0 }
 0x10a   : > { %v4211_v20 = vadd.f32 %v3738_v12, %v4183_v45  ;;  %v4214_v21 = vadd.f32 %v3770_v13, %v4183_v45 }
 0x10b   : > { %v1037_v22 = vcombine.high %v941_v14, %v941_v14  ;;  %v1044_v23 = vrot.slane %v941_v14, %v4193_v60  ;;  %v1309_v24 = vcombine.high %v957_v15, %v957_v15  ;;  %v1316_v25 = vrot.slane %v957_v15, %v4193_v60 }
 0x10c   : > { %v939_v27 = vmax.f32 %v875_v8, %v879_v16  ;;  %v4219_v28 = vmax.f32 %v907_v9, %v911_v17  ;;  %v882_v29 = vmax.f32 %v4211_v20, 0.0  ;;  %v914_v37 = vmax.f32 %v4214_v21, 0.0 }
 0x10d   : > { %v1051_v30 = vrot.slane %v1037_v22, %v4193_v60  ;;  %v1052_v31 = vcombine.high %v1044_v23, %v1044_v23  ;;  %v3315_v32 = vrot.slane %v1044_v23, 9  ;;  %v1323_v33 = vrot.slane %v1309_v24, %v4193_v60 }
 0x10e   : > { %v1324_v34 = vcombine.high %v1316_v25, %v1316_v25  ;;  %v3379_v35 = vrot.slane %v1316_v25, 9  ;;  %v1003_v36 = vcombine.high %v939_v27, %v939_v27  ;;  %v1010_v54 = vrot.slane %v939_v27, %v4193_v60 }
 0x10f   : > { %v1053_v38 = vcombine.high %v1051_v30, %v1051_v30  ;;  %v3316_v39 = vrot.slane %v1052_v31, 9  ;;  %v3317_v40 = vrot.slane %v1051_v30, 9  ;;  %v2067_v41 = vmax.f32 %v1044_v23, %v3315_v32 }
 0x110   : > { %v1325_v42 = vcombine.high %v1323_v33, %v1323_v33  ;;  %v3380_v43 = vrot.slane %v1324_v34, 9  ;;  %v3381_v44 = vrot.slane %v1323_v33, 9  ;;  %v2131_v46 = vmax.f32 %v1316_v25, %v3379_v35 }
 0x111   : > { %v3318_v47 = vrot.slane %v1053_v38, 9  ;;  %v2068_v48 = vmax.f32 %v1052_v31, %v3316_v39  ;;  %v2069_v49 = vmax.f32 %v1051_v30, %v3317_v40  ;;  %v3573_v50 = vpack.c.bf16 %v2067_v41, %v2067_v41 }
 0x112   : > { %v3382_v51 = vrot.slane %v1325_v42, 9  ;;  %v2132_v52 = vmax.f32 %v1324_v34, %v3380_v43  ;;  %v2133_v53 = vmax.f32 %v1323_v33, %v3381_v44  ;;  %v3637_v59 = vpack.c.bf16 %v2131_v46, %v2131_v46 }
 0x113   : > { %v2070_v55 = vmax.f32 %v1053_v38, %v3318_v47  ;;  %v3574_v57 = vpack.c.bf16 %v2068_v48, %v2068_v48  ;;  %v3575_v58 = vpack.c.bf16 %v2069_v49, %v2069_v49  ;;  %v2707_v61 = vunpack.c.l.b16 %v3573_v50 }
 0x114   : > { %v2134_v62 = vmax.f32 %v1325_v42, %v3382_v51  ;;  %v3638_v63 = vpack.c.bf16 %v2132_v52, %v2132_v52  ;;  %v3639_v2 = vpack.c.bf16 %v2133_v53, %v2133_v53  ;;  %v1017_v6 = vrot.slane %v1003_v36, %v4193_v60 }
 0x115   : > { %v3576_v3 = vpack.c.bf16 %v2070_v55, %v2070_v55  ;;  %v2708_v4 = vunpack.c.l.b16 %v3574_v57  ;;  %v2709_v5 = vunpack.c.l.b16 %v3575_v58  ;;  %v1018_v12 = vcombine.high %v1010_v54, %v1010_v54 }
 0x116   : > { %v3640_v7 = vpack.c.bf16 %v2134_v62, %v2134_v62  ;;  %v2772_v8 = vunpack.c.l.b16 %v3638_v63  ;;  %v2773_v9 = vunpack.c.l.b16 %v3639_v2  ;;  %v1019_v16 = vcombine.high %v1017_v6, %v1017_v6 }
 0x117   : > { %v2710_v13 = vunpack.c.l.b16 %v3576_v3  ;;  %v2848_v14 = vrot.slane %v2708_v4, 7  ;;  %v2850_v15 = vrot.slane %v2709_v5, 6  ;;  %v2771_v17 = vunpack.c.l.b16 %v3637_v59 }
 0x118   : > { %v4227_v22 = vunpack.c.l.b16 %v3640_v7  ;;  %v2960_v23 = vrot.slane %v2772_v8, 7  ;;  %v3307_v24 = vrot.slane %v1010_v54, 9  ;;  %v2962_v27 = vrot.slane %v2773_v9, 6 }
 0x119   : > { %v2849_v25 = vsel %vm2828_vm3, %v2848_v14, %v2707_v61  ;;  %v3308_v30 = vrot.slane %v1018_v12, 9  ;;  %v3309_v31 = vrot.slane %v1017_v6, 9  ;;  %v2852_v33 = vrot.slane %v2710_v13, 5 }
 0x11a   : > { %v2851_v32 = vsel %vm2831_vm4, %v2850_v15, %v2849_v25  ;;  %v2961_v34 = vsel %vm2828_vm3, %v2960_v23, %v2771_v17  ;;  %v3310_v35 = vrot.slane %v1019_v16, 9  ;;  %v2964_v36 = vrot.slane %v4227_v22, 5 }
 0x11b   : > { %v2059_v38 = vmax.f32 %v1010_v54, %v3307_v24  ;;  %v2060_v39 = vmax.f32 %v1018_v12, %v3308_v30  ;;  %v2061_v40 = vmax.f32 %v1017_v6, %v3309_v31  ;;  %v1275_v42 = vcombine.high %v4219_v28, %v4219_v28 }
 0x11c   : > { %v2062_v41 = vmax.f32 %v1019_v16, %v3310_v35  ;;  %v1282_v43 = vrot.slane %v4219_v28, %v4193_v60  ;;  %v942_v44 = vmax.f32 %v878_v10, %v882_v29  ;;  %v4242_v46 = vsel %vm2831_vm4, %v2962_v27, %v2961_v34 }
 0x11d   : > { %v3565_v47 = vpack.c.bf16 %v2059_v38, %v2059_v38  ;;  %v3566_v48 = vpack.c.bf16 %v2060_v39, %v2060_v39  ;;  %v3567_v49 = vpack.c.bf16 %v2061_v40, %v2061_v40  ;;  %v1289_v51 = vrot.slane %v1275_v42, %v4193_v60 }
 0x11e   : > { %v3568_v50 = vpack.c.bf16 %v2062_v41, %v2062_v41  ;;  %v1290_v52 = vcombine.high %v1282_v43, %v1282_v43  ;;  %v3371_v53 = vrot.slane %v1282_v43, 9  ;;  %v1054_v57 = vcombine.high %v942_v44, %v942_v44 }
 0x11f   : > { %v2700_v54 = vunpack.c.l.b16 %v3566_v48  ;;  %v2701_v55 = vunpack.c.l.b16 %v3567_v49  ;;  %v4246_v28 = vsel %vm2834_vm5, %v2852_v33, %v2851_v32  ;;  %v1291_v56 = vcombine.high %v1289_v51, %v1289_v51 }
 0x120   : > { %v4248_v20 = vunpack.c.l.b16 %v3568_v50  ;;  %v3372_v10 = vrot.slane %v1290_v52, 9  ;;  %v3373_v29 = vrot.slane %v1289_v51, 9  ;;  %v2699_v58 = vunpack.c.l.b16 %v3565_v47 }
 0x121   : > { %v2827_v59 = vrot.slane %v2700_v54, 7  ;;  %v2123_v61 = vmax.f32 %v1282_v43, %v3371_v53  ;;  %v1061_v62 = vrot.slane %v942_v44, %v4193_v60  ;;  %v2830_v63 = vrot.slane %v2701_v55, 6 }
 0x122   : > { %v3374_v2 = vrot.slane %v1291_v56, 9  ;;  %v2124_v3 = vmax.f32 %v1290_v52, %v3372_v10  ;;  %v2125_v4 = vmax.f32 %v1289_v51, %v3373_v29  ;;  %v2833_v5 = vrot.slane %v4248_v20, 5  ;;  %v767_v52 = vpop.f32.mrf.mxu1 }
 0x123   : > { %v3629_v6 = vpack.c.bf16 %v2123_v61, %v2123_v61  ;;  %v1068_v7 = vrot.slane %v1054_v57, %v4193_v60  ;;  %v1069_v8 = vcombine.high %v1061_v62, %v1061_v62  ;;  %v2829_v9 = vsel %vm2828_vm3, %v2827_v59, %v2699_v58 }
 0x124   : > { %v2126_v12 = vmax.f32 %v1291_v56, %v3374_v2  ;;  %v3630_v13 = vpack.c.bf16 %v2124_v3, %v2124_v3  ;;  %v3631_v14 = vpack.c.bf16 %v2125_v4, %v2125_v4  ;;  %v3319_v17 = vrot.slane %v1061_v62, 9 }
 0x125   : > { %v2763_v15 = vunpack.c.l.b16 %v3629_v6  ;;  %v1070_v16 = vcombine.high %v1068_v7, %v1068_v7  ;;  %v3320_v23 = vrot.slane %v1069_v8, 9  ;;  %v3321_v30 = vrot.slane %v1068_v7, 9 }
 0x126   : > { %v3632_v24 = vpack.c.bf16 %v2126_v12, %v2126_v12  ;;  %v2764_v25 = vunpack.c.l.b16 %v3630_v13  ;;  %v2765_v27 = vunpack.c.l.b16 %v3631_v14  ;;  %v2071_v32 = vmax.f32 %v1061_v62, %v3319_v17 }
 0x127   : > { %v3322_v31 = vrot.slane %v1070_v16, 9  ;;  %v2072_v33 = vmax.f32 %v1069_v8, %v3320_v23  ;;  %v958_v34 = vmax.f32 %v910_v18, %v914_v37  ;;  %v2073_v40 = vmax.f32 %v1068_v7, %v3321_v30  ;;  %v639_v18 = vpop.f32.mrf.mxu0  ;;  %v4274_v8 = vpop.f32.mrf.mxu1 }
 0x128   : > { %v4258_v35 = vunpack.c.l.b16 %v3632_v24  ;;  %v2946_v38 = vrot.slane %v2764_v25, 7  ;;  %v2948_v39 = vrot.slane %v2765_v27, 6  ;;  %v3577_v42 = vpack.c.bf16 %v2071_v32, %v2071_v32 }
 0x129   : > { %v2074_v41 = vmax.f32 %v1070_v16, %v3322_v31  ;;  %v3578_v43 = vpack.c.bf16 %v2072_v33, %v2072_v33  ;;  %v1326_v44 = vcombine.high %v958_v34, %v958_v34  ;;  %v2832_v47 = vsel %vm2831_vm4, %v2830_v63, %v2829_v9  ;;  %v3741_v2 = vpop.f32.mrf.mxu0 }
 0x12a   : > { %v2947_v48 = vsel %vm2828_vm3, %v2946_v38, %v2763_v15  ;;  %v3579_v49 = vpack.c.bf16 %v2073_v40, %v2073_v40  ;;  %v1333_v0 = vrot.slane %v958_v34, %v4193_v60  ;;  %v2950_v21 = vrot.slane %v4258_v35, 5 }
 0x12b   : > { %v3580_v37 = vpack.c.bf16 %v2074_v41, %v2074_v41  ;;  %v2711_v50 = vunpack.c.l.b16 %v3577_v42  ;;  %v2712_v51 = vunpack.c.l.b16 %v3578_v43  ;;  %v1340_v54 = vrot.slane %v1326_v44, %v4193_v60  ;;  %v4288_v30 = vpop.f32.mrf.mxu0 }
 0x12c   : > { %v2713_v53 = vunpack.c.l.b16 %v3579_v49  ;;  %v1341_v55 = vcombine.high %v1333_v0, %v1333_v0  ;;  %v3383_v57 = vrot.slane %v1333_v0, 9  ;;  %v2949_v56 = vsel %vm2831_vm4, %v2948_v39, %v2947_v48 }
 0x12d   : > { %v2714_v10 = vunpack.c.l.b16 %v3580_v37  ;;  %v2854_v29 = vrot.slane %v2711_v50, 4  ;;  %v2856_v58 = vrot.slane %v2712_v51, 3  ;;  %v1342_v61 = vcombine.high %v1340_v54, %v1340_v54  ;;  %v4304_v48 = vpop.f32.mrf.mxu0 }
 0x12e   : > { %v2858_v59 = vrot.slane %v2713_v53, 2  ;;  %v3384_v62 = vrot.slane %v1341_v55, 9  ;;  %v3385_v63 = vrot.slane %v1340_v54, 9  ;;  %v2135_v6 = vmax.f32 %v1333_v0, %v3383_v57 }
 0x12f   : > { %v2855_v3 = vsel %vm2837_vm6, %v2854_v29, %v4246_v28  ;;  %v2860_v4 = vrot.slane %v2714_v10, 1  ;;  %v640_v7 = vadd.f32 %v4183_v45, %v639_v18  ;;  %v3386_v12 = vrot.slane %v1342_v61, 9  ;;  %v4319_v29 = vpop.f32.mrf.mxu0 }
 0x130   : > { %v2857_v9 = vsel %vm2840_vm7, %v2856_v58, %v2855_v3  ;;  %v2136_v13 = vmax.f32 %v1341_v55, %v3384_v62  ;;  %v2137_v14 = vmax.f32 %v1340_v54, %v3385_v63  ;;  %v3641_v16 = vpack.c.bf16 %v2135_v6, %v2135_v6 }
 0x131   : > { %v2859_v15 = vsel %vm2843_vm8, %v2858_v59, %v2857_v9  ;;  %v2965_v17 = vsel %vm2834_vm5, %v2964_v36, %v4242_v46  ;;  %v880_v28 = vmax.f32 %v640_v7, 0.0  ;;  %v2138_v24 = vmax.f32 %v1342_v61, %v3386_v12  ;;  %v4293_v46 = vpop.f32.mrf.mxu1 }
 0x132   : > { %v2861_v23 = vsel %vm2846_vm9, %v2860_v4, %v2859_v15  ;;  %v3642_v25 = vpack.c.bf16 %v2136_v13, %v2136_v13  ;;  %v3643_v27 = vpack.c.bf16 %v2137_v14, %v2137_v14  ;;  %v2775_v32 = vunpack.c.l.b16 %v3641_v16  ;;  %v3745_v16 = vpop.f32.mrf.mxu0 }
 0x133   : > { %v3059_v31 = vpack.c.b16 %v2861_v23, %v2861_v23  ;;  %v940_v22 = vmax.f32 %v876_v19, %v880_v28  ;;  %v768_v36 = vadd.f32 %v4183_v45, %v767_v52  ;;  %v3644_v33 = vpack.c.bf16 %v2138_v24, %v2138_v24  ;;  %v4308_v0 = vpop.f32.mrf.mxu1 }
 0x134   : > { %v2776_v34 = vunpack.c.l.b16 %v3642_v25  ;;  %v2777_v35 = vunpack.c.l.b16 %v3643_v27  ;;  %v2835_v38 = vsel %vm2834_vm5, %v2833_v5, %v2832_v47  ;;  %v2966_v39 = vrot.slane %v2775_v32, 4 }
 0x135   : > { %3092 = vst.msk [vmem:[%s4285_s27 + $0x4] sm:$0xf] %vm3090_vm10, %v3059_v31  ;;  %v1020_v40 = vcombine.high %v940_v22, %v940_v22  ;;  %v1027_v41 = vrot.slane %v940_v22, %v4193_v60  ;;  %v912_v42 = vmax.f32 %v768_v36, 0.0  ;;  %v2778_v1 = vunpack.c.l.b16 %v3644_v33  ;;  %v4321_v61 = vpop.f32.mrf.mxu1 }
 0x136   : > { %v2968_v19 = vrot.slane %v2776_v34, 3  ;;  %v2970_v43 = vrot.slane %v2777_v35, 2  ;;  %v4302_v44 = vsel %vm2834_vm5, %v2950_v21, %v2949_v56  ;;  %v2967_v49 = vsel %vm2837_vm6, %v2966_v39, %v2965_v17 }
 0x137   : > { %v1034_v20 = vrot.slane %v1020_v40, %v4193_v60  ;;  %v1035_v5 = vcombine.high %v1027_v41, %v1027_v41  ;;  %v3311_v47 = vrot.slane %v1027_v41, 9  ;;  %v2972_v37 = vrot.slane %v2778_v1, 1  ;;  %v3777_v25 = vpop.f32.mrf.mxu1  ;;  %v668_v1 = vpop.f32.mrf.mxu0 }
 0x138   : > { %v2969_v18 = vsel %vm2840_vm7, %v2968_v19, %v2967_v49  ;;  %v956_v50 = vmax.f32 %v908_v26, %v912_v42  ;;  %v4314_v51 = vadd.f32 %v3741_v2, %v4183_v45 }
 0x139   : > { %v2971_v21 = vsel %vm2843_vm8, %v2970_v43, %v2969_v18  ;;  %v1036_v52 = vcombine.high %v1034_v20, %v1034_v20  ;;  %v3312_v53 = vrot.slane %v1035_v5, 9  ;;  %v3313_v54 = vrot.slane %v1034_v20, 9 }
 0x13a   : > { %v2973_v55 = vsel %vm2846_vm9, %v2972_v37, %v2971_v21  ;;  %v2063_v57 = vmax.f32 %v1027_v41, %v3311_v47  ;;  %v1292_v56 = vcombine.high %v956_v50, %v956_v50  ;;  %v1299_v10 = vrot.slane %v956_v50, %v4193_v60 }
 0x13b   : > { %v3067_v58 = vpack.c.b16 %v2973_v55, %v2973_v55  ;;  %v3314_v11 = vrot.slane %v1036_v52, 9  ;;  %v2064_v26 = vmax.f32 %v1035_v5, %v3312_v53  ;;  %v2065_v59 = vmax.f32 %v1034_v20, %v3313_v54  ;;  %v796_v5 = vpop.f32.mrf.mxu1 }
 0x13c   : > { %v3569_v62 = vpack.c.bf16 %v2063_v57, %v2063_v57  ;;  %v1306_v63 = vrot.slane %v1292_v56, %v4193_v60  ;;  %v1307_v2 = vcombine.high %v1299_v10, %v1299_v10  ;;  %v3375_v3 = vrot.slane %v1299_v10, 9  ;;  %v3746_v56 = vpop.f32.mrf.mxu0 }
 0x13d   : > { %3100 = vst.msk [vmem:[%s4285_s27 + $0x24] sm:$0xf] %vm3090_vm10, %v3067_v58  ;;  %v2066_v4 = vmax.f32 %v1036_v52, %v3314_v11  ;;  %v3570_v6 = vpack.c.bf16 %v2064_v26, %v2064_v26  ;;  %v3571_v7 = vpack.c.bf16 %v2065_v59, %v2065_v59  ;;  %v885_v9 = vmax.f32 %v4314_v51, 0.0  ;;  %v3778_v59 = vpop.f32.mrf.mxu1 }
 0x13e   : > { %v2703_v12 = vunpack.c.l.b16 %v3569_v62  ;;  %v1308_v13 = vcombine.high %v1306_v63, %v1306_v63  ;;  %v3376_v14 = vrot.slane %v1307_v2, 9  ;;  %v3377_v15 = vrot.slane %v1306_v63, 9 }
 0x13f   : > { %v3572_v17 = vpack.c.bf16 %v2066_v4, %v2066_v4  ;;  %v2704_v28 = vunpack.c.l.b16 %v3570_v6  ;;  %v2705_v23 = vunpack.c.l.b16 %v3571_v7  ;;  %v2127_v24 = vmax.f32 %v1299_v10, %v3375_v3 }
 0x140   : > { %v2836_v27 = vrot.slane %v2703_v12, 4  ;;  %v3378_v31 = vrot.slane %v1308_v13, 9  ;;  %v2128_v32 = vmax.f32 %v1307_v2, %v3376_v14  ;;  %v2129_v22 = vmax.f32 %v1306_v63, %v3377_v15  ;;  %v671_v12 = vpop.f32.mrf.mxu0 }
 0x141   : > { %v2706_v36 = vunpack.c.l.b16 %v3572_v17  ;;  %v2839_v33 = vrot.slane %v2704_v28, 3  ;;  %v2842_v34 = vrot.slane %v2705_v23, 2  ;;  %v3633_v35 = vpack.c.bf16 %v2127_v24, %v2127_v24  ;;  %v799_v17 = vpop.f32.mrf.mxu1 }
 0x142   : > { %v2838_v39 = vsel %vm2837_vm6, %v2836_v27, %v2835_v38  ;;  %v2130_v40 = vmax.f32 %v1308_v13, %v3378_v31  ;;  %v3634_v41 = vpack.c.bf16 %v2128_v32, %v2128_v32  ;;  %v3635_v42 = vpack.c.bf16 %v2129_v22, %v2129_v22 }
 0x143   : > { %v2841_v19 = vsel %vm2840_vm7, %v2839_v33, %v2838_v39  ;;  %v2845_v43 = vrot.slane %v2706_v36, 1  ;;  %v2767_v49 = vunpack.c.l.b16 %v3633_v35  ;;  %v789_v20 = vadd.f32 %v4274_v8, %v4183_v45 }
 0x144   : > { %v2844_v47 = vsel %vm2843_vm8, %v2842_v34, %v2841_v19  ;;  %v3636_v18 = vpack.c.bf16 %v2130_v40, %v2130_v40  ;;  %v2768_v37 = vunpack.c.l.b16 %v3634_v41  ;;  %v2769_v50 = vunpack.c.l.b16 %v3635_v42 }
 0x145   : > { %v2847_v38 = vsel %vm2846_vm9, %v2845_v43, %v2844_v47  ;;  %v2952_v21 = vrot.slane %v2767_v49, 4  ;;  %v653_v52 = vadd.f32 %v4183_v45, %v4288_v30  ;;  %v781_v53 = vadd.f32 %v4183_v45, %v4293_v46 }
 0x146   : > { %v3058_v54 = vpack.c.b16 %v2847_v38, %v2847_v38  ;;  %v2770_v55 = vunpack.c.l.b16 %v3636_v18  ;;  %v2954_v57 = vrot.slane %v2768_v37, 3  ;;  %v2956_v8 = vrot.slane %v2769_v50, 2 }
 0x147   : > { %v2953_v10 = vsel %vm2837_vm6, %v2952_v21, %v4302_v44  ;;  %v917_v58 = vmax.f32 %v789_v20, 0.0  ;;  %v883_v11 = vmax.f32 %v653_v52, 0.0  ;;  %v664_v26 = vadd.f32 %v4304_v48, %v4183_v45 }
 0x148   : > { %3091 = vst.msk [vmem:[%s4285_s27] sm:$0xf] %vm3090_vm10, %v3058_v54  ;;  %v2955_v30 = vsel %vm2840_vm7, %v2954_v57, %v2953_v10  ;;  %v2958_v62 = vrot.slane %v2770_v55, 1  ;;  %v4346_v46 = vadd.f32 %v4308_v0, %v4183_v45  ;;  %v4350_v63 = vadd.f32 %v4183_v45, %v4319_v29 }
 0x149   : > { %v2957_v44 = vsel %vm2843_vm8, %v2956_v8, %v2955_v30  ;;  %v915_v2 = vmax.f32 %v781_v53, 0.0  ;;  %v4355_v48 = vadd.f32 %v4183_v45, %v4321_v61  ;;  %v677_v3 = vadd.f32 %v3745_v16, %v4183_v45 }
 0x14a   : > { %v2959_v4 = vsel %vm2846_vm9, %v2958_v62, %v2957_v44  ;;  %v886_v6 = vmax.f32 %v664_v26, 0.0  ;;  %v918_v0 = vmax.f32 %v4346_v46, 0.0  ;;  %v805_v7 = vadd.f32 %v3777_v25, %v4183_v45 }
 0x14b   : > { %v3066_v29 = vpack.c.b16 %v2959_v4, %v2959_v4  ;;  %v884_v13 = vmax.f32 %v4350_v63, 0.0  ;;  %v889_v14 = vmax.f32 %v677_v3, 0.0  ;;  %v669_v15 = vadd.f32 %v4183_v45, %v668_v1 }
 0x14c   : > { %v921_v61 = vmax.f32 %v805_v7, 0.0  ;;  %v797_v28 = vadd.f32 %v4183_v45, %v796_v5  ;;  %v680_v16 = vadd.f32 %v3746_v56, %v4183_v45  ;;  %v4366_v23 = vadd.f32 %v3778_v59, %v4183_v45 }
 0x14d   : > { %3099 = vst.msk [vmem:[%s4285_s27 + $0x20] sm:$0xf] %vm3090_vm10, %v3066_v29  ;;  %v916_v24 = vmax.f32 %v4355_v48, 0.0  ;;  %v945_v25 = vmax.f32 %v885_v9, %v889_v14  ;;  %v887_v27 = vmax.f32 %v669_v15, 0.0  ;;  %v4374_v31 = vadd.f32 %v4183_v45, %v671_v12 }
 0x14e   : > { %v961_v32 = vmax.f32 %v917_v58, %v921_v61  ;;  %v919_v22 = vmax.f32 %v797_v28, 0.0  ;;  %v890_v36 = vmax.f32 %v680_v16, 0.0  ;;  %v4377_v33 = vadd.f32 %v4183_v45, %v799_v17 }
 0x14f   : > { %v1105_v34 = vcombine.high %v945_v25, %v945_v25  ;;  %v1112_v35 = vrot.slane %v945_v25, %v4193_v60  ;;  %v943_v39 = vmax.f32 %v883_v11, %v887_v27  ;;  %v922_v40 = vmax.f32 %v4366_v23, 0.0 }
 0x150   : > { %v1377_v41 = vcombine.high %v961_v32, %v961_v32  ;;  %v1384_v51 = vrot.slane %v961_v32, %v4193_v60  ;;  %v4382_v9 = vmax.f32 %v915_v2, %v919_v22  ;;  %v888_v42 = vmax.f32 %v4374_v31, 0.0 }
 0x151   : > { %v1119_v1 = vrot.slane %v1105_v34, %v4193_v60  ;;  %v1120_v19 = vcombine.high %v1112_v35, %v1112_v35  ;;  %v3331_v43 = vrot.slane %v1112_v35, 9  ;;  %v4386_v49 = vmax.f32 %v886_v6, %v890_v36 }
 0x152   : > { %v1391_v45 = vrot.slane %v1377_v41, %v4193_v60  ;;  %v1392_v20 = vcombine.high %v1384_v51, %v1384_v51  ;;  %v3395_v5 = vrot.slane %v1384_v51, 9  ;;  %v1071_v47 = vcombine.high %v943_v39, %v943_v39 }
 0x153   : > { %v1121_v18 = vcombine.high %v1119_v1, %v1119_v1  ;;  %v3332_v37 = vrot.slane %v1120_v19, 9  ;;  %v3333_v50 = vrot.slane %v1119_v1, 9  ;;  %v2083_v38 = vmax.f32 %v1112_v35, %v3331_v43 }
 0x154   : > { %v1393_v21 = vcombine.high %v1391_v45, %v1391_v45  ;;  %v3396_v52 = vrot.slane %v1392_v20, 9  ;;  %v3397_v53 = vrot.slane %v1391_v45, 9  ;;  %v2147_v54 = vmax.f32 %v1384_v51, %v3395_v5 }
 0x155   : > { %v3334_v55 = vrot.slane %v1121_v18, 9  ;;  %v2084_v57 = vmax.f32 %v1120_v19, %v3332_v37  ;;  %v2085_v8 = vmax.f32 %v1119_v1, %v3333_v50  ;;  %v3589_v56 = vpack.c.bf16 %v2083_v38, %v2083_v38 }
 0x156   : > { %v3398_v10 = vrot.slane %v1393_v21, 9  ;;  %v2148_v58 = vmax.f32 %v1392_v20, %v3396_v52  ;;  %v2149_v11 = vmax.f32 %v1391_v45, %v3397_v53  ;;  %v1078_v26 = vrot.slane %v943_v39, %v4193_v60 }
 0x157   : > { %v2086_v59 = vmax.f32 %v1121_v18, %v3334_v55  ;;  %v3590_v30 = vpack.c.bf16 %v2084_v57, %v2084_v57  ;;  %v3591_v62 = vpack.c.bf16 %v2085_v8, %v2085_v8  ;;  %v3653_v44 = vpack.c.bf16 %v2147_v54, %v2147_v54 }
 0x158   : > { %v2723_v2 = vunpack.c.l.b16 %v3589_v56  ;;  %v2150_v3 = vmax.f32 %v1393_v21, %v3398_v10  ;;  %v3654_v4 = vpack.c.bf16 %v2148_v58, %v2148_v58  ;;  %v3655_v6 = vpack.c.bf16 %v2149_v11, %v2149_v11 }
 0x159   : > { %v3592_v7 = vpack.c.bf16 %v2086_v59, %v2086_v59  ;;  %v2724_v12 = vunpack.c.l.b16 %v3590_v30  ;;  %v2725_v29 = vunpack.c.l.b16 %v3591_v62  ;;  %v1085_v14 = vrot.slane %v1071_v47, %v4193_v60 }
 0x15a   : > { %v3656_v15 = vpack.c.bf16 %v2150_v3, %v2150_v3  ;;  %v2788_v17 = vunpack.c.l.b16 %v3654_v4  ;;  %v2789_v61 = vunpack.c.l.b16 %v3655_v6  ;;  %v1086_v28 = vcombine.high %v1078_v26, %v1078_v26 }
 0x15b   : > { %v4391_v16 = vunpack.c.l.b16 %v3592_v7  ;;  %v2876_v25 = vrot.slane %v2724_v12, 7  ;;  %v2878_v27 = vrot.slane %v2725_v29, 6  ;;  %v1087_v32 = vcombine.high %v1085_v14, %v1085_v14 }
 0x15c   : > { %v2787_v22 = vunpack.c.l.b16 %v3653_v44  ;;  %v4393_v36 = vunpack.c.l.b16 %v3656_v15  ;;  %v2988_v34 = vrot.slane %v2788_v17, 7  ;;  %v3323_v35 = vrot.slane %v1078_v26, 9 }
 0x15d   : > { %v2877_v39 = vsel %vm2828_vm3, %v2876_v25, %v2723_v2  ;;  %v2990_v41 = vrot.slane %v2789_v61, 6  ;;  %v3324_v51 = vrot.slane %v1086_v28, 9  ;;  %v3325_v1 = vrot.slane %v1085_v14, 9 }
 0x15e   : > { %v2879_v19 = vsel %vm2831_vm4, %v2878_v27, %v2877_v39  ;;  %v2880_v43 = vrot.slane %v4391_v16, 5  ;;  %v2989_v45 = vsel %vm2828_vm3, %v2988_v34, %v2787_v22  ;;  %v3326_v20 = vrot.slane %v1087_v32, 9 }
 0x15f   : > { %v2992_v5 = vrot.slane %v4393_v36, 5  ;;  %v2075_v47 = vmax.f32 %v1078_v26, %v3323_v35  ;;  %v2076_v18 = vmax.f32 %v1086_v28, %v3324_v51  ;;  %v2077_v37 = vmax.f32 %v1085_v14, %v3325_v1 }
 0x160   : > { %v2078_v50 = vmax.f32 %v1087_v32, %v3326_v20  ;;  %v1343_v38 = vcombine.high %v4382_v9, %v4382_v9  ;;  %v1350_v21 = vrot.slane %v4382_v9, %v4193_v60  ;;  %v1122_v52 = vcombine.high %v4386_v49, %v4386_v49 }
 0x161   : > { %v3581_v53 = vpack.c.bf16 %v2075_v47, %v2075_v47  ;;  %v3582_v54 = vpack.c.bf16 %v2076_v18, %v2076_v18  ;;  %v3583_v55 = vpack.c.bf16 %v2077_v37, %v2077_v37  ;;  %v1129_v57 = vrot.slane %v4386_v49, %v4193_v60 }
 0x162   : > { %v3584_v8 = vpack.c.bf16 %v2078_v50, %v2078_v50  ;;  %v1357_v56 = vrot.slane %v1343_v38, %v4193_v60  ;;  %v1358_v10 = vcombine.high %v1350_v21, %v1350_v21  ;;  %v3387_v58 = vrot.slane %v1350_v21, 9 }
 0x163   : > { %v2715_v11 = vunpack.c.l.b16 %v3581_v53  ;;  %v2716_v26 = vunpack.c.l.b16 %v3582_v54  ;;  %v2717_v59 = vunpack.c.l.b16 %v3583_v55  ;;  %v1136_v30 = vrot.slane %v1122_v52, %v4193_v60 }
 0x164   : > { %v2718_v9 = vunpack.c.l.b16 %v3584_v8  ;;  %v1359_v62 = vcombine.high %v1357_v56, %v1357_v56  ;;  %v3388_v44 = vrot.slane %v1358_v10, 9  ;;  %v3389_v2 = vrot.slane %v1357_v56, 9 }
 0x165   : > { %v2862_v3 = vrot.slane %v2716_v26, 7  ;;  %v2864_v4 = vrot.slane %v2717_v59, 6  ;;  %v2139_v6 = vmax.f32 %v1350_v21, %v3387_v58  ;;  %v1137_v7 = vcombine.high %v1129_v57, %v1129_v57 }
 0x166   : > { %v2991_v49 = vsel %vm2831_vm4, %v2990_v41, %v2989_v45  ;;  %v3390_v12 = vrot.slane %v1359_v62, 9  ;;  %v2140_v29 = vmax.f32 %v1358_v10, %v3388_v44  ;;  %v2141_v14 = vmax.f32 %v1357_v56, %v3389_v2 }
 0x167   : > { %v2863_v15 = vsel %vm2828_vm3, %v2862_v3, %v2715_v11  ;;  %v3645_v17 = vpack.c.bf16 %v2139_v6, %v2139_v6  ;;  %v1138_v61 = vcombine.high %v1136_v30, %v1136_v30  ;;  %v3335_v28 = vrot.slane %v1129_v57, 9 }
 0x168   : > { %v2866_v16 = vrot.slane %v2718_v9, 5  ;;  %v2142_v25 = vmax.f32 %v1359_v62, %v3390_v12  ;;  %v3646_v27 = vpack.c.bf16 %v2140_v29, %v2140_v29  ;;  %v3647_v32 = vpack.c.bf16 %v2141_v14, %v2141_v14 }
 0x169   : > { %v2865_v22 = vsel %vm2831_vm4, %v2864_v4, %v2863_v15  ;;  %v3336_v34 = vrot.slane %v1137_v7, 9  ;;  %v3337_v35 = vrot.slane %v1136_v30, 9  ;;  %v3338_v39 = vrot.slane %v1138_v61, 9  ;;  %v4446_v15 = vpop.f32.mrf.mxu0 }
 0x16a   : > { %v3648_v51 = vpack.c.bf16 %v2142_v25, %v2142_v25  ;;  %v2780_v1 = vunpack.c.l.b16 %v3646_v27  ;;  %v4413_v41 = vunpack.c.l.b16 %v3647_v32  ;;  %v2087_v45 = vmax.f32 %v1129_v57, %v3335_v28 }
 0x16b   : > { %v2779_v20 = vunpack.c.l.b16 %v3645_v17  ;;  %v2088_v47 = vmax.f32 %v1137_v7, %v3336_v34  ;;  %v2089_v18 = vmax.f32 %v1136_v30, %v3337_v35  ;;  %v2090_v37 = vmax.f32 %v1138_v61, %v3338_v39 }
 0x16c   : > { %v4415_v50 = vunpack.c.l.b16 %v3648_v51  ;;  %v2974_v38 = vrot.slane %v2780_v1, 7  ;;  %v3593_v21 = vpack.c.bf16 %v2087_v45, %v2087_v45  ;;  %v2881_v52 = vsel %vm2834_vm5, %v2880_v43, %v2879_v19 }
 0x16d   : > { %v3594_v53 = vpack.c.bf16 %v2088_v47, %v2088_v47  ;;  %v3595_v54 = vpack.c.bf16 %v2089_v18, %v2089_v18  ;;  %v3596_v55 = vpack.c.bf16 %v2090_v37, %v2090_v37  ;;  %v962_v8 = vmax.f32 %v918_v0, %v922_v40  ;;  %v684_v18 = vpop.f32.mrf.mxu0 }
 0x16e   : > { %v4423_v57 = vsel %vm2828_vm3, %v2974_v38, %v2779_v20  ;;  %v2976_v56 = vrot.slane %v4413_v41, 6  ;;  %v2978_v10 = vrot.slane %v4415_v50, 5  ;;  %v2727_v58 = vunpack.c.l.b16 %v3593_v21 }
 0x16f   : > { %v2728_v11 = vunpack.c.l.b16 %v3594_v53  ;;  %v2729_v26 = vunpack.c.l.b16 %v3595_v54  ;;  %v2730_v59 = vunpack.c.l.b16 %v3596_v55  ;;  %v2993_v19 = vsel %vm2834_vm5, %v2992_v5, %v2991_v49 }
 0x170   : > { %v2882_v43 = vrot.slane %v2727_v58, 4  ;;  %v1394_v23 = vcombine.high %v962_v8, %v962_v8  ;;  %v1401_v46 = vrot.slane %v962_v8, %v4193_v60  ;;  %v944_v0 = vmax.f32 %v884_v13, %v888_v42 }
 0x171   : > { %v2884_v40 = vrot.slane %v2728_v11, 3  ;;  %v2886_v30 = vrot.slane %v2729_v26, 2  ;;  %v2888_v9 = vrot.slane %v2730_v59, 1  ;;  %v4436_v62 = vsel %vm2834_vm5, %v2866_v16, %v2865_v22  ;;  %v3781_v22 = vpop.f32.mrf.mxu1 }
 0x172   : > { %v2883_v44 = vsel %vm2837_vm6, %v2882_v43, %v2881_v52  ;;  %v1408_v36 = vrot.slane %v1394_v23, %v4193_v60  ;;  %v1409_v5 = vcombine.high %v1401_v46, %v1401_v46  ;;  %v3399_v2 = vrot.slane %v1401_v46, 9 }
 0x173   : > { %v2885_v3 = vsel %vm2840_vm7, %v2884_v40, %v2883_v44  ;;  %v1088_v4 = vcombine.high %v944_v0, %v944_v0  ;;  %v1095_v31 = vrot.slane %v944_v0, %v4193_v60  ;;  %v920_v63 = vmax.f32 %v4377_v33, 0.0  ;;  %v812_v58 = vpop.f32.mrf.mxu1 }
 0x174   : > { %v2887_v13 = vsel %vm2843_vm8, %v2886_v30, %v2885_v3  ;;  %v1410_v42 = vcombine.high %v1408_v36, %v1408_v36  ;;  %v3400_v6 = vrot.slane %v1409_v5, 9  ;;  %v3401_v7 = vrot.slane %v1408_v36, 9  ;;  %v3750_v30 = vpop.f32.mrf.mxu0 }
 0x175   : > { %v2889_v49 = vsel %vm2846_vm9, %v2888_v9, %v2887_v13  ;;  %v2151_v12 = vmax.f32 %v1401_v46, %v3399_v2  ;;  %v1102_v29 = vrot.slane %v1088_v4, %v4193_v60  ;;  %v1103_v14 = vcombine.high %v1095_v31, %v1095_v31  ;;  %v3782_v13 = vpop.f32.mrf.mxu1 }
 0x176   : > { %v3061_v17 = vpack.c.b16 %v2889_v49, %v2889_v49  ;;  %v3402_v61 = vrot.slane %v1410_v42, 9  ;;  %v2152_v28 = vmax.f32 %v1409_v5, %v3400_v6  ;;  %v2153_v16 = vmax.f32 %v1408_v36, %v3401_v7 }
 0x177   : > { %v3657_v25 = vpack.c.bf16 %v2151_v12, %v2151_v12  ;;  %v1104_v33 = vcombine.high %v1102_v29, %v1102_v29  ;;  %v3327_v27 = vrot.slane %v1095_v31, 9  ;;  %v3328_v32 = vrot.slane %v1103_v14, 9  ;;  %v687_v12 = vpop.f32.mrf.mxu0 }
 0x178   : > { %3094 = vst.msk [vmem:[%s4285_s27 + $0xc] sm:$0xf] %vm3090_vm10, %v3061_v17  ;;  %v2154_v34 = vmax.f32 %v1410_v42, %v3402_v61  ;;  %v3658_v35 = vpack.c.bf16 %v2152_v28, %v2152_v28  ;;  %v3659_v39 = vpack.c.bf16 %v2153_v16, %v2153_v16  ;;  %v3329_v51 = vrot.slane %v1102_v29, 9  ;;  %v4468_v16 = vld [vmem:[#allocation4] ss:$0 sm:$0xff] }
 0x179   : > { %v2791_v1 = vunpack.c.l.b16 %v3657_v25  ;;  %v3330_v45 = vrot.slane %v1104_v33, 9  ;;  %v2079_v20 = vmax.f32 %v1095_v31, %v3327_v27  ;;  %v2080_v47 = vmax.f32 %v1103_v14, %v3328_v32 }
 0x17a   : > { %v3660_v37 = vpack.c.bf16 %v2154_v34, %v2154_v34  ;;  %v2792_v38 = vunpack.c.l.b16 %v3658_v35  ;;  %v2793_v21 = vunpack.c.l.b16 %v3659_v39  ;;  %v2081_v52 = vmax.f32 %v1102_v29, %v3329_v51  ;;  %v3753_v51 = vpop.f32.mrf.mxu0 }
 0x17b   : > { %v2994_v53 = vrot.slane %v2791_v1, 4  ;;  %v2082_v54 = vmax.f32 %v1104_v33, %v3330_v45  ;;  %v3585_v55 = vpack.c.bf16 %v2079_v20, %v2079_v20  ;;  %v3586_v8 = vpack.c.bf16 %v2080_v47, %v2080_v47 }
 0x17c   : > { %v2794_v11 = vunpack.c.l.b16 %v3660_v37  ;;  %v2996_v26 = vrot.slane %v2792_v38, 3  ;;  %v2998_v59 = vrot.slane %v2793_v21, 2  ;;  %v3587_v43 = vpack.c.bf16 %v2081_v52, %v2081_v52 }
 0x17d   : > { %v2995_v23 = vsel %vm2837_vm6, %v2994_v53, %v2993_v19  ;;  %v3588_v46 = vpack.c.bf16 %v2082_v54, %v2082_v54  ;;  %v2719_v0 = vunpack.c.l.b16 %v3585_v55  ;;  %v2720_v40 = vunpack.c.l.b16 %v3586_v8 }
 0x17e   : > { %v2997_v9 = vsel %vm2840_vm7, %v2996_v26, %v2995_v23  ;;  %v3000_v44 = vrot.slane %v2794_v11, 1  ;;  %v2721_v36 = vunpack.c.l.b16 %v3587_v43  ;;  %v960_v5 = vmax.f32 %v916_v24, %v920_v63  ;;  %v700_v11 = vpop.f32.mrf.mxu0 }
 0x17f   : > { %v2999_v2 = vsel %vm2843_vm8, %v2998_v59, %v2997_v9  ;;  %v2722_v3 = vunpack.c.l.b16 %v3588_v46  ;;  %v2868_v4 = vrot.slane %v2719_v0, 4  ;;  %v2870_v31 = vrot.slane %v2720_v40, 3 }
 0x180   : > { %v3001_v19 = vsel %vm2846_vm9, %v3000_v44, %v2999_v2  ;;  %v2872_v42 = vrot.slane %v2721_v36, 2  ;;  %v1360_v6 = vcombine.high %v960_v5, %v960_v5  ;;  %v1367_v7 = vrot.slane %v960_v5, %v4193_v60 }
 0x181   : > { %v2977_v49 = vsel %vm2831_vm4, %v2976_v56, %v4423_v57  ;;  %v3069_v48 = vpack.c.b16 %v3001_v19, %v3001_v19  ;;  %v2869_v24 = vsel %vm2837_vm6, %v2868_v4, %v4436_v62  ;;  %v2874_v63 = vrot.slane %v2722_v3, 1  ;;  %v815_v62 = vpop.f32.mrf.mxu1 }
 0x182   : > { %v2871_v29 = vsel %vm2840_vm7, %v2870_v31, %v2869_v24  ;;  %v1374_v14 = vrot.slane %v1360_v6, %v4193_v60  ;;  %v1375_v17 = vcombine.high %v1367_v7, %v1367_v7  ;;  %v3391_v61 = vrot.slane %v1367_v7, 9 }
 0x183   : > { %3102 = vst.msk [vmem:[%s4285_s27 + $0x2c] sm:$0xf] %vm3090_vm10, %v3069_v48  ;;  %v2873_v28 = vsel %vm2843_vm8, %v2872_v42, %v2871_v29  ;;  %v693_v41 = vadd.f32 %v4468_v16, %v4446_v15  ;;  %v821_v57 = vadd.f32 %v4468_v16, %v3781_v22  ;;  %v685_v56 = vadd.f32 %v4468_v16, %v684_v18  ;;  %v3785_v38 = vpop.f32.mrf.mxu1 }
 0x184   : > { %v2875_v25 = vsel %vm2846_vm9, %v2874_v63, %v2873_v28  ;;  %v1376_v33 = vcombine.high %v1374_v14, %v1374_v14  ;;  %v3392_v27 = vrot.slane %v1375_v17, 9  ;;  %v3393_v32 = vrot.slane %v1374_v14, 9  ;;  %v3754_v63 = vpop.f32.mrf.mxu0 }
 0x185   : > { %v3060_v34 = vpack.c.b16 %v2875_v25, %v2875_v25  ;;  %v2143_v35 = vmax.f32 %v1367_v7, %v3391_v61  ;;  %v2979_v39 = vsel %vm2834_vm5, %v2978_v10, %v2977_v49  ;;  %v893_v20 = vmax.f32 %v693_v41, 0.0 }
 0x186   : > { %v3394_v1 = vrot.slane %v1376_v33, 9  ;;  %v2144_v15 = vmax.f32 %v1375_v17, %v3392_v27  ;;  %v2145_v45 = vmax.f32 %v1374_v14, %v3393_v32  ;;  %v925_v47 = vmax.f32 %v821_v57, 0.0 }
 0x187   : > { %3093 = vst.msk [vmem:[%s4285_s27 + $0x8] sm:$0xf] %vm3090_vm10, %v3060_v34  ;;  %v3649_v22 = vpack.c.bf16 %v2143_v35, %v2143_v35  ;;  %v813_v18 = vadd.f32 %v4468_v16, %v812_v58  ;;  %v4482_v37 = vadd.f32 %v4468_v16, %v3750_v30  ;;  %v891_v53 = vmax.f32 %v685_v56, 0.0  ;;  %v828_v30 = vpop.f32.mrf.mxu1 }
 0x188   : > { %v2146_v21 = vmax.f32 %v1376_v33, %v3394_v1  ;;  %v3650_v52 = vpack.c.bf16 %v2144_v15, %v2144_v15  ;;  %v3651_v50 = vpack.c.bf16 %v2145_v45, %v2145_v45  ;;  %v4485_v55 = vadd.f32 %v4468_v16, %v3782_v13 }
 0x189   : > { %v2783_v10 = vunpack.c.l.b16 %v3649_v22  ;;  %v923_v54 = vmax.f32 %v813_v18, 0.0  ;;  %v4488_v8 = vadd.f32 %v4468_v16, %v687_v12  ;;  %v894_v43 = vmax.f32 %v4482_v37, 0.0 }
 0x18a   : > { %v3652_v26 = vpack.c.bf16 %v2146_v21, %v2146_v21  ;;  %v2784_v59 = vunpack.c.l.b16 %v3650_v52  ;;  %v2785_v58 = vunpack.c.l.b16 %v3651_v50  ;;  %v4492_v46 = vadd.f32 %v4468_v16, %v815_v62 }
 0x18b   : > { %v2980_v23 = vrot.slane %v2783_v10, 4  ;;  %v709_v0 = vadd.f32 %v4468_v16, %v3753_v51  ;;  %v837_v40 = vadd.f32 %v4468_v16, %v3785_v38  ;;  %v701_v5 = vadd.f32 %v4468_v16, %v700_v11 }
 0x18c   : > { %v2786_v9 = vunpack.c.l.b16 %v3652_v26  ;;  %v2982_v44 = vrot.slane %v2784_v59, 3  ;;  %v2984_v36 = vrot.slane %v2785_v58, 2  ;;  %v926_v3 = vmax.f32 %v4485_v55, 0.0 }
 0x18d   : > { %v2981_v2 = vsel %vm2837_vm6, %v2980_v23, %v2979_v39  ;;  %v897_v4 = vmax.f32 %v709_v0, 0.0  ;;  %v929_v31 = vmax.f32 %v837_v40, 0.0  ;;  %v895_v42 = vmax.f32 %v701_v5, 0.0 }
 0x18e   : > { %v2983_v13 = vsel %vm2840_vm7, %v2982_v44, %v2981_v2  ;;  %v2986_v19 = vrot.slane %v2786_v9, 1  ;;  %v829_v6 = vadd.f32 %v4468_v16, %v828_v30  ;;  %v892_v49 = vmax.f32 %v4488_v8, 0.0 }
 0x18f   : > { %v2985_v7 = vsel %vm2843_vm8, %v2984_v36, %v2983_v13  ;;  %v949_v48 = vmax.f32 %v893_v20, %v897_v4  ;;  %v965_v24 = vmax.f32 %v925_v47, %v929_v31  ;;  %v924_v29 = vmax.f32 %v4492_v46, 0.0 }
 0x190   : > { %v2987_v12 = vsel %vm2846_vm9, %v2986_v19, %v2985_v7  ;;  %v947_v14 = vmax.f32 %v891_v53, %v895_v42  ;;  %v927_v17 = vmax.f32 %v829_v6, 0.0  ;;  %v4509_v33 = vadd.f32 %v4468_v16, %v3754_v63 }
 0x191   : > { %v3068_v61 = vpack.c.b16 %v2987_v12, %v2987_v12  ;;  %v1173_v28 = vcombine.high %v949_v48, %v949_v48  ;;  %v1180_v41 = vrot.slane %v949_v48, %v4193_v60  ;;  %v1445_v57 = vcombine.high %v965_v24, %v965_v24 }
 0x192   : > { %v1452_v56 = vrot.slane %v965_v24, %v4193_v60  ;;  %v1139_v62 = vcombine.high %v947_v14, %v947_v14  ;;  %v1146_v25 = vrot.slane %v947_v14, %v4193_v60  ;;  %v4516_v15 = vmax.f32 %v923_v54, %v927_v17  ;;  %v3786_v14 = vpop.f32.mrf.mxu1 }
 0x193   : > { %3101 = vst.msk [vmem:[%s4285_s27 + $0x28] sm:$0xf] %vm3090_vm10, %v3068_v61  ;;  %v1187_v27 = vrot.slane %v1173_v28, %v4193_v60  ;;  %v1188_v32 = vcombine.high %v1180_v41, %v1180_v41  ;;  %v3347_v34 = vrot.slane %v1180_v41, 9  ;;  %v1459_v35 = vrot.slane %v1445_v57, %v4193_v60 }
 0x194   : > { %v1460_v39 = vcombine.high %v1452_v56, %v1452_v56  ;;  %v3411_v51 = vrot.slane %v1452_v56, 9  ;;  %v1153_v1 = vrot.slane %v1139_v62, %v4193_v60  ;;  %v1154_v23 = vcombine.high %v1146_v25, %v1146_v25 }
 0x195   : > { %v1189_v45 = vcombine.high %v1187_v27, %v1187_v27  ;;  %v3348_v20 = vrot.slane %v1188_v32, 9  ;;  %v3349_v22 = vrot.slane %v1187_v27, 9  ;;  %v2099_v47 = vmax.f32 %v1180_v41, %v3347_v34 }
 0x196   : > { %v1461_v18 = vcombine.high %v1459_v35, %v1459_v35  ;;  %v3412_v38 = vrot.slane %v1460_v39, 9  ;;  %v3413_v21 = vrot.slane %v1459_v35, 9  ;;  %v2163_v52 = vmax.f32 %v1452_v56, %v3411_v51 }
 0x197   : > { %v3350_v50 = vrot.slane %v1189_v45, 9  ;;  %v2100_v53 = vmax.f32 %v1188_v32, %v3348_v20  ;;  %v2101_v10 = vmax.f32 %v1187_v27, %v3349_v22  ;;  %v3605_v11 = vpack.c.bf16 %v2099_v47, %v2099_v47 }
 0x198   : > { %v3414_v26 = vrot.slane %v1461_v18, 9  ;;  %v2164_v59 = vmax.f32 %v1460_v39, %v3412_v38  ;;  %v2165_v58 = vmax.f32 %v1459_v35, %v3413_v21  ;;  %v3669_v30 = vpack.c.bf16 %v2163_v52, %v2163_v52 }
 0x199   : > { %v2102_v0 = vmax.f32 %v1189_v45, %v3350_v50  ;;  %v3606_v40 = vpack.c.bf16 %v2100_v53, %v2100_v53  ;;  %v3607_v54 = vpack.c.bf16 %v2101_v10, %v2101_v10  ;;  %v2739_v9 = vunpack.c.l.b16 %v3605_v11 }
 0x19a   : > { %v2166_v44 = vmax.f32 %v1461_v18, %v3414_v26  ;;  %v3670_v36 = vpack.c.bf16 %v2164_v59, %v2164_v59  ;;  %v3671_v5 = vpack.c.bf16 %v2165_v58, %v2165_v58  ;;  %v1155_v13 = vcombine.high %v1153_v1, %v1153_v1 }
 0x19b   : > { %v3608_v2 = vpack.c.bf16 %v2102_v0, %v2102_v0  ;;  %v2740_v4 = vunpack.c.l.b16 %v3606_v40  ;;  %v2741_v31 = vunpack.c.l.b16 %v3607_v54  ;;  %v3339_v7 = vrot.slane %v1146_v25, 9 }
 0x19c   : > { %v3672_v19 = vpack.c.bf16 %v2166_v44, %v2166_v44  ;;  %v2804_v42 = vunpack.c.l.b16 %v3670_v36  ;;  %v2805_v6 = vunpack.c.l.b16 %v3671_v5  ;;  %v3340_v12 = vrot.slane %v1154_v23, 9 }
 0x19d   : > { %v2742_v48 = vunpack.c.l.b16 %v3608_v2  ;;  %v2904_v24 = vrot.slane %v2740_v4, 7  ;;  %v2906_v63 = vrot.slane %v2741_v31, 6  ;;  %v2803_v17 = vunpack.c.l.b16 %v3669_v30 }
 0x19e   : > { %v4518_v61 = vunpack.c.l.b16 %v3672_v19  ;;  %v3016_v28 = vrot.slane %v2804_v42, 7  ;;  %v3341_v41 = vrot.slane %v1153_v1, 9  ;;  %v3018_v56 = vrot.slane %v2805_v6, 6 }
 0x19f   : > { %v2905_v57 = vsel %vm2828_vm3, %v2904_v24, %v2739_v9  ;;  %v3342_v62 = vrot.slane %v1155_v13, 9  ;;  %v2091_v27 = vmax.f32 %v1146_v25, %v3339_v7  ;;  %v2908_v32 = vrot.slane %v2742_v48, 5 }
 0x1a0   : > { %v3017_v34 = vsel %vm2828_vm3, %v3016_v28, %v2803_v17  ;;  %v2092_v35 = vmax.f32 %v1154_v23, %v3340_v12  ;;  %v840_v39 = vadd.f32 %v4468_v16, %v3786_v14  ;;  %v2907_v51 = vsel %vm2831_vm4, %v2906_v63, %v2905_v57 }
 0x1a1   : > { %v2093_v45 = vmax.f32 %v1153_v1, %v3341_v41  ;;  %v2094_v20 = vmax.f32 %v1155_v13, %v3342_v62  ;;  %v3597_v22 = vpack.c.bf16 %v2091_v27, %v2091_v27  ;;  %v1411_v18 = vcombine.high %v4516_v15, %v4516_v15 }
 0x1a2   : > { %v3598_v47 = vpack.c.bf16 %v2092_v35, %v2092_v35  ;;  %v1418_v38 = vrot.slane %v4516_v15, %v4193_v60  ;;  %v898_v25 = vmax.f32 %v4509_v33, 0.0  ;;  %v4530_v21 = vsel %vm2831_vm4, %v3018_v56, %v3017_v34 }
 0x1a3   : > { %v3020_v52 = vrot.slane %v4518_v61, 5  ;;  %v3599_v50 = vpack.c.bf16 %v2093_v45, %v2093_v45  ;;  %v3600_v53 = vpack.c.bf16 %v2094_v20, %v2094_v20  ;;  %v1425_v1 = vrot.slane %v1411_v18, %v4193_v60 }
 0x1a4   : > { %v2732_v10 = vunpack.c.l.b16 %v3598_v47  ;;  %v1426_v11 = vcombine.high %v1418_v38, %v1418_v38  ;;  %v3403_v26 = vrot.slane %v1418_v38, 9  ;;  %v2731_v59 = vunpack.c.l.b16 %v3597_v22 }
 0x1a5   : > { %v2733_v58 = vunpack.c.l.b16 %v3599_v50  ;;  %v4534_v23 = vunpack.c.l.b16 %v3600_v53  ;;  %v950_v15 = vmax.f32 %v894_v43, %v898_v25  ;;  %v1427_v33 = vcombine.high %v1425_v1, %v1425_v1  ;;  %v703_v25 = vpop.f32.mrf.mxu0 }
 0x1a6   : > { %v3404_v0 = vrot.slane %v1426_v11, 9  ;;  %v3405_v40 = vrot.slane %v1425_v1, 9  ;;  %v930_v54 = vmax.f32 %v840_v39, 0.0  ;;  %v2890_v30 = vrot.slane %v2732_v10, 7 }
 0x1a7   : > { %v2155_v9 = vmax.f32 %v1418_v38, %v3403_v26  ;;  %v1190_v44 = vcombine.high %v950_v15, %v950_v15  ;;  %v2909_v36 = vsel %vm2834_vm5, %v2908_v32, %v2907_v51  ;;  %v2892_v5 = vrot.slane %v2733_v58, 6 }
 0x1a8   : > { %v3406_v2 = vrot.slane %v1427_v33, 9  ;;  %v2156_v4 = vmax.f32 %v1426_v11, %v3404_v0  ;;  %v2157_v31 = vmax.f32 %v1425_v1, %v3405_v40  ;;  %v2894_v13 = vrot.slane %v4534_v23, 5 }
 0x1a9   : > { %v3661_v19 = vpack.c.bf16 %v2155_v9, %v2155_v9  ;;  %v1197_v42 = vrot.slane %v950_v15, %v4193_v60  ;;  %v1204_v37 = vrot.slane %v1190_v44, %v4193_v60  ;;  %v966_v48 = vmax.f32 %v926_v3, %v930_v54  ;;  %v831_v15 = vpop.f32.mrf.mxu1 }
 0x1aa   : > { %v2158_v43 = vmax.f32 %v1427_v33, %v3406_v2  ;;  %v3662_v6 = vpack.c.bf16 %v2156_v4, %v2156_v4  ;;  %v3663_v7 = vpack.c.bf16 %v2157_v31, %v2157_v31  ;;  %v2891_v24 = vsel %vm2828_vm3, %v2890_v30, %v2731_v59  ;;  %v3757_v2 = vpop.f32.mrf.mxu0 }
 0x1ab   : > { %v1205_v63 = vcombine.high %v1197_v42, %v1197_v42  ;;  %v1206_v12 = vcombine.high %v1204_v37, %v1204_v37  ;;  %v3351_v14 = vrot.slane %v1197_v42, 9  ;;  %v3353_v57 = vrot.slane %v1204_v37, 9 }
 0x1ac   : > { %v3664_v17 = vpack.c.bf16 %v2158_v43, %v2158_v43  ;;  %v2796_v28 = vunpack.c.l.b16 %v3662_v6  ;;  %v4545_v41 = vunpack.c.l.b16 %v3663_v7  ;;  %v1462_v32 = vcombine.high %v966_v48, %v966_v48 }
 0x1ad   : > { %v3352_v56 = vrot.slane %v1205_v63, 9  ;;  %v3354_v62 = vrot.slane %v1206_v12, 9  ;;  %v2103_v27 = vmax.f32 %v1197_v42, %v3351_v14  ;;  %v4548_v34 = vsel %vm2831_vm4, %v2892_v5, %v2891_v24 }
 0x1ae   : > { %v2795_v35 = vunpack.c.l.b16 %v3661_v19  ;;  %v3002_v55 = vrot.slane %v2796_v28, 7  ;;  %v2105_v3 = vmax.f32 %v1204_v37, %v3353_v57  ;;  %v1469_v20 = vrot.slane %v966_v48, %v4193_v60  ;;  %v3789_v48 = vpop.f32.mrf.mxu1  ;;  %v716_v57 = vpop.f32.mrf.mxu0 }
 0x1af   : > { %v2104_v39 = vmax.f32 %v1205_v63, %v3352_v56  ;;  %v2106_v51 = vmax.f32 %v1206_v12, %v3354_v62  ;;  %v3609_v45 = vpack.c.bf16 %v2103_v27, %v2103_v27  ;;  %v4551_v22 = vunpack.c.l.b16 %v3664_v17 }
 0x1b0   : > { %v3004_v47 = vrot.slane %v4545_v41, 6  ;;  %v3611_v18 = vpack.c.bf16 %v2105_v3, %v2105_v3  ;;  %v1476_v38 = vrot.slane %v1462_v32, %v4193_v60  ;;  %v3003_v50 = vsel %vm2828_vm3, %v3002_v55, %v2795_v35 }
 0x1b1   : > { %v3610_v53 = vpack.c.bf16 %v2104_v39, %v2104_v39  ;;  %v3612_v10 = vpack.c.bf16 %v2106_v51, %v2106_v51  ;;  %v2743_v1 = vunpack.c.l.b16 %v3609_v45  ;;  %v1477_v26 = vcombine.high %v1469_v20, %v1469_v20 }
 0x1b2   : > { %v2745_v11 = vunpack.c.l.b16 %v3611_v18  ;;  %v1478_v59 = vcombine.high %v1476_v38, %v1476_v38  ;;  %v3415_v58 = vrot.slane %v1469_v20, 9  ;;  %v3417_v54 = vrot.slane %v1476_v38, 9 }
 0x1b3   : > { %v2744_v33 = vunpack.c.l.b16 %v3610_v53  ;;  %v2746_v0 = vunpack.c.l.b16 %v3612_v10  ;;  %v2910_v40 = vrot.slane %v2743_v1, 4  ;;  %v3416_v9 = vrot.slane %v1477_v26, 9 }
 0x1b4   : > { %v2914_v30 = vrot.slane %v2745_v11, 2  ;;  %v3418_v44 = vrot.slane %v1478_v59, 9  ;;  %v2167_v5 = vmax.f32 %v1469_v20, %v3415_v58  ;;  %v2169_v42 = vmax.f32 %v1476_v38, %v3417_v54  ;;  %v4575_v38 = vpop.f32.mrf.mxu0 }
 0x1b5   : > { %v2911_v4 = vsel %vm2837_vm6, %v2910_v40, %v2909_v36  ;;  %v2912_v31 = vrot.slane %v2744_v33, 3  ;;  %v2916_v19 = vrot.slane %v2746_v0, 1  ;;  %v3006_v37 = vrot.slane %v4551_v22, 5 }
 0x1b6   : > { %v2168_v43 = vmax.f32 %v1477_v26, %v3416_v9  ;;  %v2170_v6 = vmax.f32 %v1478_v59, %v3418_v44  ;;  %v3673_v7 = vpack.c.bf16 %v2167_v5, %v2167_v5  ;;  %v3675_v63 = vpack.c.bf16 %v2169_v42, %v2169_v42  ;;  %v4600_v58 = vpop.f32.mrf.mxu0 }
 0x1b7   : > { %v2913_v24 = vsel %vm2840_vm7, %v2912_v31, %v2911_v4  ;;  %v3021_v12 = vsel %vm2834_vm5, %v3020_v52, %v4530_v21  ;;  %v704_v14 = vadd.f32 %v4468_v16, %v703_v25  ;;  %v832_v32 = vadd.f32 %v4468_v16, %v831_v15  ;;  %v4567_v21 = vpop.f32.mrf.mxu1 }
 0x1b8   : > { %v2915_v36 = vsel %vm2843_vm8, %v2914_v30, %v2913_v24  ;;  %v3674_v17 = vpack.c.bf16 %v2168_v43, %v2168_v43  ;;  %v3676_v28 = vpack.c.bf16 %v2170_v6, %v2170_v6  ;;  %v2807_v41 = vunpack.c.l.b16 %v3673_v7  ;;  %v3761_v7 = vpop.f32.mrf.mxu0 }
 0x1b9   : > { %v2917_v56 = vsel %vm2846_vm9, %v2916_v19, %v2915_v36  ;;  %v2809_v62 = vunpack.c.l.b16 %v3675_v63  ;;  %v896_v27 = vmax.f32 %v704_v14, 0.0  ;;  %v3005_v52 = vsel %vm2831_vm4, %v3004_v47, %v3003_v50  ;;  %v4591_v1 = vpop.f32.mrf.mxu1 }
 0x1ba   : > { %v3063_v35 = vpack.c.b16 %v2917_v56, %v2917_v56  ;;  %v2808_v55 = vunpack.c.l.b16 %v3674_v17  ;;  %v2810_v61 = vunpack.c.l.b16 %v3676_v28  ;;  %v3022_v3 = vrot.slane %v2807_v41, 4 }
 0x1bb   : > { %v3026_v39 = vrot.slane %v2809_v62, 2  ;;  %v948_v51 = vmax.f32 %v892_v49, %v896_v27  ;;  %v928_v45 = vmax.f32 %v832_v32, 0.0  ;;  %v2895_v8 = vsel %vm2834_vm5, %v2894_v13, %v4548_v34  ;;  %v4603_v5 = vpop.f32.mrf.mxu1 }
 0x1bc   : > { %3096 = vst.msk [vmem:[%s4285_s27 + $0x14] sm:$0xf] %vm3090_vm10, %v3063_v35  ;;  %v3023_v20 = vsel %vm2837_vm6, %v3022_v3, %v3021_v12  ;;  %v3024_v22 = vrot.slane %v2808_v55, 3  ;;  %v3028_v18 = vrot.slane %v2810_v61, 1  ;;  %v4586_v49 = vsel %vm2834_vm5, %v3006_v37, %v3005_v52  ;;  %v732_v3 = vpop.f32.mrf.mxu0 }
 0x1bd   : > { %v1156_v25 = vcombine.high %v948_v51, %v948_v51  ;;  %v1163_v53 = vrot.slane %v948_v51, %v4193_v60  ;;  %v964_v10 = vmax.f32 %v924_v29, %v928_v45  ;;  %v4589_v50 = vadd.f32 %v4468_v16, %v3757_v2  ;;  %v3793_v41 = vpop.f32.mrf.mxu1 }
 0x1be   : > { %v3025_v47 = vsel %vm2840_vm7, %v3024_v22, %v3023_v20  ;;  %v4598_v34 = vadd.f32 %v4468_v16, %v3789_v48  ;;  %v4608_v19 = vadd.f32 %v4468_v16, %v716_v57 }
 0x1bf   : > { %v3027_v11 = vsel %vm2843_vm8, %v3026_v39, %v3025_v47  ;;  %v1170_v46 = vrot.slane %v1156_v25, %v4193_v60  ;;  %v1171_v29 = vcombine.high %v1163_v53, %v1163_v53  ;;  %v3343_v26 = vrot.slane %v1163_v53, 9 }
 0x1c0   : > { %v3029_v59 = vsel %vm2846_vm9, %v3028_v18, %v3027_v11  ;;  %v1428_v23 = vcombine.high %v964_v10, %v964_v10  ;;  %v1435_v13 = vrot.slane %v964_v10, %v4193_v60 }
 0x1c1   : > { %v3071_v15 = vpack.c.b16 %v3029_v59, %v3029_v59  ;;  %v1172_v33 = vcombine.high %v1170_v46, %v1170_v46  ;;  %v3344_v0 = vrot.slane %v1171_v29, 9  ;;  %v3345_v40 = vrot.slane %v1170_v46, 9 }
 0x1c2   : > { %v2095_v54 = vmax.f32 %v1163_v53, %v3343_v26  ;;  %v1442_v30 = vrot.slane %v1428_v23, %v4193_v60  ;;  %v1443_v9 = vcombine.high %v1435_v13, %v1435_v13  ;;  %v3407_v44 = vrot.slane %v1435_v13, 9  ;;  %v860_v53 = vpop.f32.mrf.mxu1 }
 0x1c3   : > { %3104 = vst.msk [vmem:[%s4285_s27 + $0x34] sm:$0xf] %vm3090_vm10, %v3071_v15  ;;  %v3346_v2 = vrot.slane %v1172_v33, 9  ;;  %v2096_v4 = vmax.f32 %v1171_v29, %v3344_v0  ;;  %v2097_v31 = vmax.f32 %v1170_v46, %v3345_v40  ;;  %v845_v46 = vadd.f32 %v4468_v16, %v4567_v21 }
 0x1c4   : > { %v3601_v42 = vpack.c.bf16 %v2095_v54, %v2095_v54  ;;  %v1444_v37 = vcombine.high %v1442_v30, %v1442_v30  ;;  %v3408_v43 = vrot.slane %v1443_v9, 9  ;;  %v3409_v6 = vrot.slane %v1442_v30, 9 }
 0x1c5   : > { %v2098_v48 = vmax.f32 %v1172_v33, %v3346_v2  ;;  %v3602_v24 = vpack.c.bf16 %v2096_v4, %v2096_v4  ;;  %v3603_v63 = vpack.c.bf16 %v2097_v31, %v2097_v31  ;;  %v2159_v12 = vmax.f32 %v1435_v13, %v3407_v44  ;;  %v3762_v13 = vpop.f32.mrf.mxu0 }
 0x1c6   : > { %v2735_v14 = vunpack.c.l.b16 %v3601_v42  ;;  %v3410_v36 = vrot.slane %v1444_v37, 9  ;;  %v2160_v17 = vmax.f32 %v1443_v9, %v3408_v43  ;;  %v2161_v28 = vmax.f32 %v1442_v30, %v3409_v6  ;;  %v3794_v9 = vpop.f32.mrf.mxu1 }
 0x1c7   : > { %v3604_v56 = vpack.c.bf16 %v2098_v48, %v2098_v48  ;;  %v2736_v62 = vunpack.c.l.b16 %v3602_v24  ;;  %v2737_v27 = vunpack.c.l.b16 %v3603_v63  ;;  %v3665_v32 = vpack.c.bf16 %v2159_v12, %v2159_v12  ;;  %v735_v42 = vpop.f32.mrf.mxu0 }
 0x1c8   : > { %v2896_v57 = vrot.slane %v2735_v14, 4  ;;  %v2162_v35 = vmax.f32 %v1444_v37, %v3410_v36  ;;  %v3666_v55 = vpack.c.bf16 %v2160_v17, %v2160_v17  ;;  %v3667_v61 = vpack.c.bf16 %v2161_v28, %v2161_v28 }
 0x1c9   : > { %v2738_v52 = vunpack.c.l.b16 %v3604_v56  ;;  %v2898_v39 = vrot.slane %v2736_v62, 3  ;;  %v2900_v51 = vrot.slane %v2737_v27, 2  ;;  %v2799_v45 = vunpack.c.l.b16 %v3665_v32 }
 0x1ca   : > { %v2897_v20 = vsel %vm2837_vm6, %v2896_v57, %v2895_v8  ;;  %v3668_v22 = vpack.c.bf16 %v2162_v35, %v2162_v35  ;;  %v2800_v18 = vunpack.c.l.b16 %v3666_v55  ;;  %v2801_v25 = vunpack.c.l.b16 %v3667_v61 }
 0x1cb   : > { %v2899_v10 = vsel %vm2840_vm7, %v2898_v39, %v2897_v20  ;;  %v2902_v47 = vrot.slane %v2738_v52, 1  ;;  %v3008_v11 = vrot.slane %v2799_v45, 4  ;;  %v901_v33 = vmax.f32 %v4589_v50, 0.0 }
 0x1cc   : > { %v2901_v29 = vsel %vm2843_vm8, %v2900_v51, %v2899_v10  ;;  %v2802_v26 = vunpack.c.l.b16 %v3668_v22  ;;  %v3010_v59 = vrot.slane %v2800_v18, 3  ;;  %v3012_v23 = vrot.slane %v2801_v25, 2 }
 0x1cd   : > { %v2903_v8 = vsel %vm2846_vm9, %v2902_v47, %v2901_v29  ;;  %v3009_v15 = vsel %vm2837_vm6, %v3008_v11, %v4586_v49  ;;  %v933_v0 = vmax.f32 %v4598_v34, 0.0  ;;  %v4623_v30 = vadd.f32 %v4468_v16, %v4575_v38 }
 0x1ce   : > { %v3062_v40 = vpack.c.b16 %v2903_v8, %v2903_v8  ;;  %v3011_v54 = vsel %vm2840_vm7, %v3010_v59, %v3009_v15  ;;  %v3014_v21 = vrot.slane %v2802_v26, 1  ;;  %v899_v2 = vmax.f32 %v4608_v19, 0.0 }
 0x1cf   : > { %v3013_v44 = vsel %vm2843_vm8, %v3012_v23, %v3011_v54  ;;  %v931_v4 = vmax.f32 %v845_v46, 0.0  ;;  %v4629_v49 = vadd.f32 %v4468_v16, %v4591_v1  ;;  %v4636_v34 = vadd.f32 %v4468_v16, %v4600_v58 }
 0x1d0   : > { %3095 = vst.msk [vmem:[%s4285_s27 + $0x10] sm:$0xf] %vm3090_vm10, %v3062_v40  ;;  %v3015_v50 = vsel %vm2846_vm9, %v3014_v21, %v3013_v44  ;;  %v741_v38 = vadd.f32 %v4468_v16, %v3761_v7  ;;  %v869_v31 = vadd.f32 %v4468_v16, %v3793_v41  ;;  %v4642_v37 = vadd.f32 %v4468_v16, %v4603_v5  ;;  %v863_v7 = vpop.f32.mrf.mxu1 }
 0x1d1   : > { %v3070_v19 = vpack.c.b16 %v3015_v50, %v3015_v50  ;;  %v733_v1 = vadd.f32 %v4468_v16, %v732_v3  ;;  %v861_v43 = vadd.f32 %v4468_v16, %v860_v53  ;;  %v902_v6 = vmax.f32 %v4623_v30, 0.0 }
 0x1d2   : > { %v905_v48 = vmax.f32 %v741_v38, 0.0  ;;  %v937_v24 = vmax.f32 %v869_v31, 0.0  ;;  %v4648_v58 = vadd.f32 %v4468_v16, %v3762_v13  ;;  %v4653_v14 = vadd.f32 %v4468_v16, %v3794_v9 }
 0x1d3   : > { %3103 = vst.msk [vmem:[%s4285_s27 + $0x30] sm:$0xf] %vm3090_vm10, %v3070_v19  ;;  %v903_v63 = vmax.f32 %v733_v1, 0.0  ;;  %v935_v12 = vmax.f32 %v861_v43, 0.0  ;;  %v4656_v5 = vadd.f32 %v4468_v16, %v735_v42  ;;  %v934_v36 = vmax.f32 %v4629_v49, 0.0 }
 0x1d4   : > { %v900_v17 = vmax.f32 %v4636_v34, 0.0  ;;  %v953_v28 = vmax.f32 %v901_v33, %v905_v48  ;;  %v969_v41 = vmax.f32 %v933_v0, %v937_v24  ;;  %v932_v56 = vmax.f32 %v4642_v37, 0.0 }
 0x1d5   : > { %v951_v62 = vmax.f32 %v899_v2, %v903_v63  ;;  %v906_v27 = vmax.f32 %v4648_v58, 0.0  ;;  %v4663_v32 = vadd.f32 %v4468_v16, %v863_v7  ;;  %v4667_v52 = vmax.f32 %v931_v4, %v935_v12 }
 0x1d6   : > { %v1241_v57 = vcombine.high %v953_v28, %v953_v28  ;;  %v1248_v35 = vrot.slane %v953_v28, %v4193_v60  ;;  %v1513_v55 = vcombine.high %v969_v41, %v969_v41  ;;  %v1520_v61 = vrot.slane %v969_v41, %v4193_v60 }
 0x1d7   : > { %v1207_v3 = vcombine.high %v951_v62, %v951_v62  ;;  %v938_v39 = vmax.f32 %v4653_v14, 0.0  ;;  %v904_v51 = vmax.f32 %v4656_v5, 0.0  ;;  %v1214_v53 = vrot.slane %v951_v62, %v4193_v60 }
 0x1d8   : > { %v1255_v45 = vrot.slane %v1241_v57, %v4193_v60  ;;  %v1256_v20 = vcombine.high %v1248_v35, %v1248_v35  ;;  %v3363_v22 = vrot.slane %v1248_v35, 9  ;;  %v1527_v16 = vrot.slane %v1513_v55, %v4193_v60 }
 0x1d9   : > { %v1528_v18 = vcombine.high %v1520_v61, %v1520_v61  ;;  %v3427_v25 = vrot.slane %v1520_v61, 9  ;;  %v1221_v10 = vrot.slane %v1207_v3, %v4193_v60  ;;  %v1222_v9 = vcombine.high %v1214_v53, %v1214_v53 }
 0x1da   : > { %v1257_v47 = vcombine.high %v1255_v45, %v1255_v45  ;;  %v3364_v11 = vrot.slane %v1256_v20, 9  ;;  %v3365_v46 = vrot.slane %v1255_v45, 9  ;;  %v2115_v29 = vmax.f32 %v1248_v35, %v3363_v22 }
 0x1db   : > { %v1529_v26 = vcombine.high %v1527_v16, %v1527_v16  ;;  %v3428_v59 = vrot.slane %v1528_v18, 9  ;;  %v3429_v23 = vrot.slane %v1527_v16, 9  ;;  %v2179_v13 = vmax.f32 %v1520_v61, %v3427_v25 }
 0x1dc   : > { %v3366_v8 = vrot.slane %v1257_v47, 9  ;;  %v2116_v15 = vmax.f32 %v1256_v20, %v3364_v11  ;;  %v2117_v33 = vmax.f32 %v1255_v45, %v3365_v46  ;;  %v3621_v0 = vpack.c.bf16 %v2115_v29, %v2115_v29 }
 0x1dd   : > { %v3430_v40 = vrot.slane %v1529_v26, 9  ;;  %v2180_v54 = vmax.f32 %v1528_v18, %v3428_v59  ;;  %v2181_v21 = vmax.f32 %v1527_v16, %v3429_v23  ;;  %v3685_v50 = vpack.c.bf16 %v2179_v13, %v2179_v13 }
 0x1de   : > { %v2118_v44 = vmax.f32 %v1257_v47, %v3366_v8  ;;  %v3622_v2 = vpack.c.bf16 %v2116_v15, %v2116_v15  ;;  %v3623_v4 = vpack.c.bf16 %v2117_v33, %v2117_v33  ;;  %v2755_v38 = vunpack.c.l.b16 %v3621_v0 }
 0x1df   : > { %v2182_v31 = vmax.f32 %v1529_v26, %v3430_v40  ;;  %v3686_v42 = vpack.c.bf16 %v2180_v54, %v2180_v54  ;;  %v3687_v19 = vpack.c.bf16 %v2181_v21, %v2181_v21  ;;  %v1223_v24 = vcombine.high %v1221_v10, %v1221_v10 }
 0x1e0   : > { %v3624_v1 = vpack.c.bf16 %v2118_v44, %v2118_v44  ;;  %v2756_v43 = vunpack.c.l.b16 %v3622_v2  ;;  %v2757_v48 = vunpack.c.l.b16 %v3623_v4  ;;  %v3355_v28 = vrot.slane %v1214_v53, 9 }
 0x1e1   : > { %v3688_v7 = vpack.c.bf16 %v2182_v31, %v2182_v31  ;;  %v2820_v63 = vunpack.c.l.b16 %v3686_v42  ;;  %v2821_v12 = vunpack.c.l.b16 %v3687_v19  ;;  %v3356_v35 = vrot.slane %v1222_v9, 9 }
 0x1e2   : > { %v4675_v41 = vunpack.c.l.b16 %v3624_v1  ;;  %v2932_v62 = vrot.slane %v2756_v43, 7  ;;  %v2934_v57 = vrot.slane %v2757_v48, 6  ;;  %v3357_v55 = vrot.slane %v1221_v10, 9 }
 0x1e3   : > { %v1479_v61 = vcombine.high %v4667_v52, %v4667_v52  ;;  %v1486_v3 = vrot.slane %v4667_v52, %v4193_v60  ;;  %v936_v45 = vmax.f32 %v4663_v32, 0.0  ;;  %v2819_v22 = vunpack.c.l.b16 %v3685_v50 }
 0x1e4   : > { %v2933_v20 = vsel %vm2828_vm3, %v2932_v62, %v2755_v38  ;;  %v3358_v16 = vrot.slane %v1223_v24, 9  ;;  %v2107_v18 = vmax.f32 %v1214_v53, %v3355_v28  ;;  %v4683_v25 = vunpack.c.l.b16 %v3688_v7 }
 0x1e5   : > { %v3044_v47 = vrot.slane %v2820_v63, 7  ;;  %v3046_v11 = vrot.slane %v2821_v12, 6  ;;  %v2108_v46 = vmax.f32 %v1222_v9, %v3356_v35  ;;  %v2935_v29 = vsel %vm2831_vm4, %v2934_v57, %v2933_v20 }
 0x1e6   : > { %v2936_v26 = vrot.slane %v4675_v41, 5  ;;  %v2109_v59 = vmax.f32 %v1221_v10, %v3357_v55  ;;  %v2110_v23 = vmax.f32 %v1223_v24, %v3358_v16  ;;  %v1493_v52 = vrot.slane %v1479_v61, %v4193_v60 }
 0x1e7   : > { %v3614_v13 = vpack.c.bf16 %v2108_v46, %v2108_v46  ;;  %v1494_v8 = vcombine.high %v1486_v3, %v1486_v3  ;;  %v3419_v15 = vrot.slane %v1486_v3, 9  ;;  %v3613_v33 = vpack.c.bf16 %v2107_v18, %v2107_v18 }
 0x1e8   : > { %v3615_v0 = vpack.c.bf16 %v2109_v59, %v2109_v59  ;;  %v3616_v40 = vpack.c.bf16 %v2110_v23, %v2110_v23  ;;  %v954_v53 = vmax.f32 %v902_v6, %v906_v27  ;;  %v1495_v21 = vcombine.high %v1493_v52, %v1493_v52 }
 0x1e9   : > { %v2748_v54 = vunpack.c.l.b16 %v3614_v13  ;;  %v3420_v9 = vrot.slane %v1494_v8, 9  ;;  %v3421_v44 = vrot.slane %v1493_v52, 9  ;;  %v3045_v10 = vsel %vm2828_vm3, %v3044_v47, %v2819_v22 }
 0x1ea   : > { %v2749_v2 = vunpack.c.l.b16 %v3615_v0  ;;  %v2171_v4 = vmax.f32 %v1486_v3, %v3419_v15  ;;  %v1258_v50 = vcombine.high %v954_v53, %v954_v53  ;;  %v3422_v31 = vrot.slane %v1495_v21, 9 }
 0x1eb   : > { %v2918_v38 = vrot.slane %v2748_v54, 7  ;;  %v2172_v42 = vmax.f32 %v1494_v8, %v3420_v9  ;;  %v2173_v19 = vmax.f32 %v1493_v52, %v3421_v44  ;;  %v2747_v1 = vunpack.c.l.b16 %v3613_v33 }
 0x1ec   : > { %v2750_v43 = vunpack.c.l.b16 %v3616_v40  ;;  %v2920_v48 = vrot.slane %v2749_v2, 6  ;;  %v1265_v58 = vrot.slane %v954_v53, %v4193_v60  ;;  %v2174_v30 = vmax.f32 %v1495_v21, %v3422_v31 }
 0x1ed   : > { %v3677_v6 = vpack.c.bf16 %v2171_v4, %v2171_v4  ;;  %v3678_v27 = vpack.c.bf16 %v2172_v42, %v2172_v42  ;;  %v3679_v24 = vpack.c.bf16 %v2173_v19, %v2173_v19  ;;  %v3048_v7 = vrot.slane %v4683_v25, 5 }
 0x1ee   : > { %v2919_v63 = vsel %vm2828_vm3, %v2918_v38, %v2747_v1  ;;  %v1272_v12 = vrot.slane %v1258_v50, %v4193_v60  ;;  %v1273_v28 = vcombine.high %v1265_v58, %v1265_v58  ;;  %v3047_v41 = vsel %vm2831_vm4, %v3046_v11, %v3045_v10 }
 0x1ef   : > { %v3680_v62 = vpack.c.bf16 %v2174_v30, %v2174_v30  ;;  %v4698_v57 = vunpack.c.l.b16 %v3678_v27  ;;  %v3367_v35 = vrot.slane %v1265_v58, 9  ;;  %v2922_v55 = vrot.slane %v2750_v43, 5 }
 0x1f0   : > { %v1274_v61 = vcombine.high %v1272_v12, %v1272_v12  ;;  %v3368_v3 = vrot.slane %v1273_v28, 9  ;;  %v3369_v20 = vrot.slane %v1272_v12, 9  ;;  %v2921_v22 = vsel %vm2831_vm4, %v2920_v48, %v2919_v63 }
 0x1f1   : > { %v4701_v16 = vunpack.c.l.b16 %v3677_v6  ;;  %v4703_v18 = vunpack.c.l.b16 %v3679_v24  ;;  %v2119_v25 = vmax.f32 %v1265_v58, %v3367_v35  ;;  %v970_v11 = vmax.f32 %v934_v36, %v938_v39 }
 0x1f2   : > { %v3370_v47 = vrot.slane %v1274_v61, 9  ;;  %v2120_v46 = vmax.f32 %v1273_v28, %v3368_v3  ;;  %v2121_v59 = vmax.f32 %v1272_v12, %v3369_v20  ;;  %v4709_v23 = vunpack.c.l.b16 %v3680_v62 }
 0x1f3   : > { %v3030_v13 = vrot.slane %v4698_v57, 7  ;;  %v3625_v52 = vpack.c.bf16 %v2119_v25, %v2119_v25  ;;  %v2937_v8 = vsel %vm2834_vm5, %v2936_v26, %v2935_v29  ;;  %v3049_v40 = vsel %vm2834_vm5, %v3048_v7, %v3047_v41 }
 0x1f4   : > { %v2122_v15 = vmax.f32 %v1274_v61, %v3370_v47  ;;  %v3626_v33 = vpack.c.bf16 %v2120_v46, %v2120_v46  ;;  %v3627_v0 = vpack.c.bf16 %v2121_v59, %v2121_v59  ;;  %v1530_v54 = vcombine.high %v970_v11, %v970_v11 }
 0x1f5   : > { %v2759_v53 = vunpack.c.l.b16 %v3625_v52  ;;  %v1537_v21 = vrot.slane %v970_v11, %v4193_v60  ;;  %v952_v49 = vmax.f32 %v900_v17, %v904_v51  ;;  %v4720_v9 = vsel %vm2834_vm5, %v2922_v55, %v2921_v22 }
 0x1f6   : > { %v3628_v14 = vpack.c.bf16 %v2122_v15, %v2122_v15  ;;  %v2760_v36 = vunpack.c.l.b16 %v3626_v33  ;;  %v2761_v39 = vunpack.c.l.b16 %v3627_v0  ;;  %v1544_v26 = vrot.slane %v1530_v54, %v4193_v60 }
 0x1f7   : > { %v2938_v29 = vrot.slane %v2759_v53, 4  ;;  %v1545_v44 = vcombine.high %v1537_v21, %v1537_v21  ;;  %v3431_v10 = vrot.slane %v1537_v21, 9  ;;  %v1224_v38 = vcombine.high %v952_v49, %v952_v49 }
 0x1f8   : > { %v2762_v2 = vunpack.c.l.b16 %v3628_v14  ;;  %v2940_v4 = vrot.slane %v2760_v36, 3  ;;  %v2942_v50 = vrot.slane %v2761_v39, 2  ;;  %v1546_v31 = vcombine.high %v1544_v26, %v1544_v26 }
 0x1f9   : > { %v2939_v5 = vsel %vm2837_vm6, %v2938_v29, %v2937_v8  ;;  %v3432_v34 = vrot.slane %v1545_v44, 9  ;;  %v3433_v17 = vrot.slane %v1544_v26, 9  ;;  %v2183_v19 = vmax.f32 %v1537_v21, %v3431_v10 }
 0x1fa   : > { %v2941_v51 = vsel %vm2840_vm7, %v2940_v4, %v2939_v5  ;;  %v2944_v42 = vrot.slane %v2762_v2, 1  ;;  %v1231_v1 = vrot.slane %v952_v49, %v4193_v60  ;;  %v3434_v48 = vrot.slane %v1546_v31, 9 }
 0x1fb   : > { %v2943_v43 = vsel %vm2843_vm8, %v2942_v50, %v2941_v51  ;;  %v2184_v58 = vmax.f32 %v1545_v44, %v3432_v34  ;;  %v2185_v30 = vmax.f32 %v1544_v26, %v3433_v17  ;;  %v3689_v27 = vpack.c.bf16 %v2183_v19, %v2183_v19 }
 0x1fc   : > { %v2945_v6 = vsel %vm2846_vm9, %v2944_v42, %v2943_v43  ;;  %v1238_v24 = vrot.slane %v1224_v38, %v4193_v60  ;;  %v1239_v7 = vcombine.high %v1231_v1, %v1231_v1  ;;  %v2186_v12 = vmax.f32 %v1546_v31, %v3434_v48 }
 0x1fd   : > { %v3065_v63 = vpack.c.b16 %v2945_v6, %v2945_v6  ;;  %v3690_v28 = vpack.c.bf16 %v2184_v58, %v2184_v58  ;;  %v3691_v41 = vpack.c.bf16 %v2185_v30, %v2185_v30  ;;  %v2823_v62 = vunpack.c.l.b16 %v3689_v27 }
 0x1fe   : > { %v1240_v35 = vcombine.high %v1238_v24, %v1238_v24  ;;  %v3359_v55 = vrot.slane %v1231_v1, 9  ;;  %v3360_v61 = vrot.slane %v1239_v7, 9  ;;  %v3692_v3 = vpack.c.bf16 %v2186_v12, %v2186_v12 }
 0x1ff   : > { %3098 = vst.msk [vmem:[%s4285_s27 + $0x1c] sm:$0xf] %vm3090_vm10, %v3065_v63  ;;  %v2824_v20 = vunpack.c.l.b16 %v3690_v28  ;;  %v2825_v22 = vunpack.c.l.b16 %v3691_v41  ;;  %v3361_v25 = vrot.slane %v1238_v24, 9  ;;  %v3050_v47 = vrot.slane %v2823_v62, 4 }
 0x200   : > { %v3362_v46 = vrot.slane %v1240_v35, 9  ;;  %v2111_v59 = vmax.f32 %v1231_v1, %v3359_v55  ;;  %v2112_v11 = vmax.f32 %v1239_v7, %v3360_v61  ;;  %v2826_v52 = vunpack.c.l.b16 %v3692_v3 }
 0x201   : > { %v3052_v8 = vrot.slane %v2824_v20, 3  ;;  %v3054_v15 = vrot.slane %v2825_v22, 2  ;;  %v2113_v33 = vmax.f32 %v1238_v24, %v3361_v25  ;;  %v3051_v0 = vsel %vm2837_vm6, %v3050_v47, %v3049_v40 }
 0x202   : > { %v2114_v53 = vmax.f32 %v1240_v35, %v3362_v46  ;;  %v3617_v54 = vpack.c.bf16 %v2111_v59, %v2111_v59  ;;  %v3618_v21 = vpack.c.bf16 %v2112_v11, %v2112_v11  ;;  %v3056_v14 = vrot.slane %v2826_v52, 1 }
 0x203   : > { %v3053_v49 = vsel %vm2840_vm7, %v3052_v8, %v3051_v0  ;;  %v3619_v36 = vpack.c.bf16 %v2113_v33, %v2113_v33  ;;  %v968_v39 = vmax.f32 %v932_v56, %v936_v45  ;;  %v3031_v17 = vsel %vm2828_vm3, %v3030_v13, %v4701_v16 }
 0x204   : > { %v3055_v29 = vsel %vm2843_vm8, %v3054_v15, %v3053_v49  ;;  %v3620_v26 = vpack.c.bf16 %v2114_v53, %v2114_v53  ;;  %v2751_v44 = vunpack.c.l.b16 %v3617_v54  ;;  %v2752_v10 = vunpack.c.l.b16 %v3618_v21 }
 0x205   : > { %v3057_v40 = vsel %vm2846_vm9, %v3056_v14, %v3055_v29  ;;  %v2753_v2 = vunpack.c.l.b16 %v3619_v36  ;;  %v1496_v4 = vcombine.high %v968_v39, %v968_v39  ;;  %v1503_v50 = vrot.slane %v968_v39, %v4193_v60 }
 0x206   : > { %v3073_v38 = vpack.c.b16 %v3057_v40, %v3057_v40  ;;  %v2754_v5 = vunpack.c.l.b16 %v3620_v26  ;;  %v2924_v31 = vrot.slane %v2751_v44, 4  ;;  %v2926_v34 = vrot.slane %v2752_v10, 3 }
 0x207   : > { %v2928_v32 = vrot.slane %v2753_v2, 2  ;;  %v1510_v37 = vrot.slane %v1496_v4, %v4193_v60  ;;  %v1511_v56 = vcombine.high %v1503_v50, %v1503_v50  ;;  %v3423_v45 = vrot.slane %v1503_v50, 9 }
 0x208   : > { %v3032_v51 = vrot.slane %v4703_v18, 6  ;;  %3106 = vst.msk [vmem:[%s4285_s27 + $0x3c] sm:$0xf] %vm3090_vm10, %v3073_v38  ;;  %v2925_v42 = vsel %vm2837_vm6, %v2924_v31, %v4720_v9  ;;  %v2930_v19 = vrot.slane %v2754_v5, 1  ;;  %v3034_v58 = vrot.slane %v4709_v23, 5 }
 0x209   : > { %v2927_v1 = vsel %vm2840_vm7, %v2926_v34, %v2925_v42  ;;  %v1512_v43 = vcombine.high %v1510_v37, %v1510_v37  ;;  %v3424_v60 = vrot.slane %v1511_v56, 9  ;;  %v3425_v48 = vrot.slane %v1510_v37, 9 }
 0x20a   : > { %v2929_v57 = vsel %vm2843_vm8, %v2928_v32, %v2927_v1  ;;  %v2175_v30 = vmax.f32 %v1503_v50, %v3423_v45  ;;  %v3033_v27 = vsel %vm2831_vm4, %v3032_v51, %v3031_v17 }
 0x20b   : > { %v2931_v16 = vsel %vm2846_vm9, %v2930_v19, %v2929_v57  ;;  %v3426_v18 = vrot.slane %v1512_v43, 9  ;;  %v2176_v13 = vmax.f32 %v1511_v56, %v3424_v60  ;;  %v2177_v6 = vmax.f32 %v1510_v37, %v3425_v48 }
 0x20c   : > { %v3064_v9 = vpack.c.b16 %v2931_v16, %v2931_v16  ;;  %v3681_v24 = vpack.c.bf16 %v2175_v30, %v2175_v30  ;;  %v3035_v35 = vsel %vm2834_vm5, %v3034_v58, %v3033_v27 }
 0x20d   : > { %v2178_v7 = vmax.f32 %v1512_v43, %v3426_v18  ;;  %v3682_v63 = vpack.c.bf16 %v2176_v13, %v2176_v13  ;;  %v3683_v12 = vpack.c.bf16 %v2177_v6, %v2177_v6 }
 0x20e   : > { %3097 = vst.msk [vmem:[%s4285_s27 + $0x18] sm:$0xf] %vm3090_vm10, %v3064_v9  ;;  %v2815_v28 = vunpack.c.l.b16 %v3681_v24 }
 0x20f   : > { %v3684_v23 = vpack.c.bf16 %v2178_v7, %v2178_v7  ;;  %v2816_v41 = vunpack.c.l.b16 %v3682_v63  ;;  %v2817_v62 = vunpack.c.l.b16 %v3683_v12 }
 0x210   : > { %v3036_v55 = vrot.slane %v2815_v28, 4 }
 0x211   : > { %v2818_v61 = vunpack.c.l.b16 %v3684_v23  ;;  %v3038_v3 = vrot.slane %v2816_v41, 3  ;;  %v3040_v20 = vrot.slane %v2817_v62, 2 }
 0x212   : > { %v3037_v22 = vsel %vm2837_vm6, %v3036_v55, %v3035_v35 }
 0x213   : > { %v3039_v25 = vsel %vm2840_vm7, %v3038_v3, %v3037_v22  ;;  %v3042_v47 = vrot.slane %v2818_v61, 1 }
 0x214   : > { %v3041_v46 = vsel %vm2843_vm8, %v3040_v20, %v3039_v25 }
 0x215   : > { %v3043_v59 = vsel %vm2846_vm9, %v3042_v47, %v3041_v46 }
 0x216   : > { %v3072_v11 = vpack.c.b16 %v3043_v59, %v3043_v59 }
 0x218   : > { %3105 = vst.msk [vmem:[%s4285_s27 + $0x38] sm:$0xf] %vm3090_vm10, %v3072_v11 }
 0x219 PF: > { %s15_s16 = sadd.s32 1, %s3997_s16   ;;  %s4786_s12 = smov %s3989_s14 }
 0x21a   : > { %p12_p3 = scmp.ge.s32.totalorder %s15_s16, 6   ;;  %s4787_s13 = smov %s3993_s15 }
 0x21b   : > { %s4788_s14 = smov %s4791_s18  ;;  %s4789_s15 = smov %s4795_s19 }
 0x21c   :  { %14 = sbr.rel (!%p12_p3) target bundleno = 4 (0x4), region = 71 }
 0x221   :  { %3136 = vsyncpa [#allocation3], 1 }
 0x222   :  { %3138 = vsyncpa [#allocation3 + $0x1], 1 }
 0x223   :  { %3139 = vsyncpa [#allocation5], 1 }

// kernel: skin_disease_forward.7
= control target key start
LH: loop header
LB: loop body
LE: loop exit
PB: predicated region body
PF: predicated region fallthrough
CT: control target
= control target key end

     0   :  { %v99_v30 = vlaneseq  ;;  %v552_v34 = vmov 1966171168   ;;  %s680_s0 = inlined_call_operand.vmem [shape: bf16[2,512], index: 0, kind: input, shape index: {}]   ;;  %s681_s1 = inlined_call_operand.vmem [shape: bf16[512,128], index: 1, kind: input, shape index: {}]   ;;  %s682_s2 = inlined_call_operand.vmem [shape: f32[1,128], index: 2, kind: input, shape index: {}]   ;;  %s683_s3 = inlined_call_operand.hbm [shape: f32[2,128], index: 3, kind: output, shape index: {}]  }
   0x1   :  { %v498_v0 = vld [vmem:[%s681_s1 + $0x78] sm:$0xff]   ;;  %v502_v4 = vld [vmem:[%s681_s1 + $0x70] sm:$0xff]   ;;  %v506_v8 = vld [vmem:[%s681_s1 + $0x68] sm:$0xff]   ;;  %v97_v35 = vunpack.c.l.s4 %v552_v34 }
   0x2   :  { %v499_v1 = vld [vmem:[%s681_s1 + $0xf8] sm:$0xff]   ;;  %451 = vmatprep.subr.bf16.mxu0 %v498_v0  ;;  %v503_v5 = vld [vmem:[%s681_s1 + $0xf0] sm:$0xff]   ;;  %v507_v9 = vld [vmem:[%s681_s1 + $0xe8] sm:$0xff]   ;;  %v100_v36 = vshrl.u32 %v99_v30, 7 }
   0x3   :  { %v500_v2 = vld [vmem:[%s681_s1 + $0x38] sm:$0xff]   ;;  %473 = vmatprep.subr.bf16.mxu1 %v499_v1  ;;  %v504_v6 = vld [vmem:[%s681_s1 + $0x30] sm:$0xff]   ;;  %v508_v10 = vld [vmem:[%s681_s1 + $0x28] sm:$0xff]  }
   0x4   :  { %v501_v3 = vld [vmem:[%s681_s1 + $0xb8] sm:$0xff]   ;;  %452 = vmatpush3.bf16.msra.mxu0 %v500_v2  ;;  %v505_v7 = vld [vmem:[%s681_s1 + $0xb0] sm:$0xff]   ;;  %v509_v11 = vld [vmem:[%s681_s1 + $0xa8] sm:$0xff]  }
   0x5   :  { %474 = vmatpush3.bf16.msra.mxu1 %v501_v3  ;;  %453 = vmatprep.subr.bf16.mxu0 %v502_v4  ;;  %v510_v12 = vld [vmem:[%s681_s1 + $0x60] sm:$0xff]   ;;  %v514_v16 = vld [vmem:[%s681_s1 + $0x58] sm:$0xff]   ;;  %v518_v20 = vld [vmem:[%s681_s1 + $0x50] sm:$0xff]  }
   0x6   :  { %475 = vmatprep.subr.bf16.mxu1 %v503_v5  ;;  %v511_v13 = vld [vmem:[%s681_s1 + $0xe0] sm:$0xff]   ;;  %v515_v17 = vld [vmem:[%s681_s1 + $0xd8] sm:$0xff]   ;;  %v519_v21 = vld [vmem:[%s681_s1 + $0xd0] sm:$0xff]  }
   0x7   :  { %v512_v14 = vld [vmem:[%s681_s1 + $0x20] sm:$0xff]   ;;  %v516_v18 = vld [vmem:[%s681_s1 + $0x18] sm:$0xff]   ;;  %v520_v22 = vld [vmem:[%s681_s1 + $0x10] sm:$0xff]  }
   0x8   :  { %454 = vmatpush3.bf16.msra.mxu0 %v504_v6  ;;  %v513_v15 = vld [vmem:[%s681_s1 + $0xa0] sm:$0xff]   ;;  %v517_v19 = vld [vmem:[%s681_s1 + $0x98] sm:$0xff]   ;;  %v521_v23 = vld [vmem:[%s681_s1 + $0x90] sm:$0xff]  }
   0x9   :  { %476 = vmatpush3.bf16.msra.mxu1 %v505_v7  ;;  %455 = vmatprep.subr.bf16.mxu0 %v506_v8  ;;  %v522_v24 = vld [vmem:[%s681_s1 + $0x48] sm:$0xff]   ;;  %v526_v28 = vld [vmem:[%s681_s1 + $0x40] sm:$0xff]  }
   0xa   :  { %477 = vmatprep.subr.bf16.mxu1 %v507_v9  ;;  %v523_v25 = vld [vmem:[%s681_s1 + $0xc8] sm:$0xff]   ;;  %v527_v29 = vld [vmem:[%s681_s1 + $0xc0] sm:$0xff]  }
   0xb   :  { %v524_v26 = vld [vmem:[%s681_s1 + $0x8] sm:$0xff]   ;;  %v528_v31 = vld [vmem:[%s681_s1] sm:$0xff]  }
   0xc   :  { %456 = vmatpush3.bf16.msra.mxu0 %v508_v10  ;;  %v525_v27 = vld [vmem:[%s681_s1 + $0x88] sm:$0xff]   ;;  %v529_v32 = vld [vmem:[%s681_s1 + $0x80] sm:$0xff]  }
   0xd   :  { %478 = vmatpush3.bf16.msra.mxu1 %v509_v11  ;;  %457 = vmatprep.subr.bf16.mxu0 %v510_v12  ;;  %v417_v33 = vld.sshfl [vmem:[%s680_s0] sm:$0x33 pattern:$0x75316420] }
   0xe   :  { %479 = vmatprep.subr.bf16.mxu1 %v511_v13 }
  0x10   :  { %458 = vmatpush3.bf16.msra.mxu0 %v512_v14 }
  0x11   :  { %480 = vmatpush3.bf16.msra.mxu1 %v513_v15  ;;  %459 = vmatprep.subr.bf16.mxu0 %v514_v16 }
  0x12   :  { %481 = vmatprep.subr.bf16.mxu1 %v515_v17 }
  0x14   :  { %460 = vmatpush3.bf16.msra.mxu0 %v516_v18 }
  0x15   :  { %482 = vmatpush3.bf16.msra.mxu1 %v517_v19  ;;  %461 = vmatprep.subr.bf16.mxu0 %v518_v20 }
  0x16   :  { %483 = vmatprep.subr.bf16.mxu1 %v519_v21 }
  0x18   :  { %462 = vmatpush3.bf16.msra.mxu0 %v520_v22 }
  0x19   :  { %484 = vmatpush3.bf16.msra.mxu1 %v521_v23  ;;  %463 = vmatprep.subr.bf16.mxu0 %v522_v24 }
  0x1a   :  { %485 = vmatprep.subr.bf16.mxu1 %v523_v25 }
  0x1c   :  { %464 = vmatpush3.bf16.msra.mxu0 %v524_v26 }
  0x1d   :  { %486 = vmatpush3.bf16.msra.mxu1 %v525_v27  ;;  %465 = vmatprep.subr.bf16.mxu0 %v526_v28 }
  0x1e   :  { %487 = vmatprep.subr.bf16.mxu1 %v527_v29 }
  0x20   :  { %466 = vmatpush3.bf16.msra.mxu0 %v528_v31 }
  0x21   :  { %488 = vmatpush3.bf16.msra.mxu1 %v529_v32 }
  0x22   :  { %8 = vsyncpa [#allocation3], 0  ;;  %v95_v37 = vcombine.high %v417_v33, %v417_v33  ;;  %v98_v38 = vunpack.c.0.s8 %v97_v35  ;;  %v553_v44 = vmov 0.0   ;;  %v450_v58 = vld [vmem:[%s682_s2] ss:$0 sm:$0xff]  ;;  %s554_s24 = smov [#allocation2]  }
  0x23   :  { %20 = vst [vmem:[#allocation2] sm:$0x3] %v553_v44  ;;  %s409_s25 = sshll.u32 %s554_s24, 4  ;;  %s410_s25 = int_to_ptr.vmem [resolvable:$true] %s409_s25 }
  0x24   :  { %v101_v39 = vsub.s32 %v98_v38, %v100_v36  ;;  %s530_s26 = scalar_lea.vmem %s410_s25, 32  ;;  %p535_p1 = scmp.lt.s32.totalorder %s410_s25, %s410_s25 }
  0x25   :  { %p531_p0 = scmp.ne.s32.totalorder %s410_s25, %s530_s26  ;;  %p536_p2 = scmp.lt.s32.totalorder %s530_s26, %s530_s26 }
  0x26   :  { %v109_v40 = vrot.slane %v95_v37, %v101_v39  ;;  %v102_v41 = vrot.slane %v417_v33, %v101_v39 }
  0x27   :  { %p537_p3 = por %p536_p2, %p535_p1 }
  0x28   :  { %340 = vmatprep.mubr.bf16.mxu0 %v109_v40  ;;  %v111_v42 = vcombine.high %v109_v40, %v109_v40  ;;  %v110_v43 = vcombine.high %v102_v41, %v102_v41 }
  0x29   :  { %341 = vmatmul.mubr.bf16.vlgmr.msra.gmra.mxu0 %v102_v41  ;;  %p538_p4 = pnand %p537_p3, %p531_p0 }
  0x2a   :  { %380 = vmatprep.mubr.bf16.mxu1 %v111_v42  ;;  %v21_v52 = vld [vmem:[#allocation2] sm:$0x3] }
  0x2b   :  { %381 = vmatmul.mubr.bf16.vlgmr.msra.gmra.mxu1 %v110_v43 }
  0xe9   :  { %v467_v45 = vpop.f32.mrf.mxu0 }
  0xeb   :  { %v489_v46 = vpop.f32.mrf.mxu1  ;;  %v468_v47 = vpop.f32.mrf.mxu0 }
  0xec   :  { %v469_v48 = vadd.f32 %v468_v47, %v467_v45 }
  0xed   :  { %v490_v49 = vpop.f32.mrf.mxu1  ;;  %v470_v50 = vpop.f32.mrf.mxu0 }
  0xee   :  { %v491_v51 = vadd.f32 %v490_v49, %v489_v46 }
  0xef   :  { %v492_v53 = vpop.f32.mrf.mxu1  ;;  %v471_v54 = vpop.f32.mrf.mxu0 }
  0xf0   :  { %v383_v55 = vadd.f32 %v491_v51, %v469_v48 }
  0xf1   :  { %v493_v56 = vpop.f32.mrf.mxu1 }
  0xf2   :  { %v388_v57 = vadd.f32 %v383_v55, %v21_v52 }
  0xf4   :  { %389 = vst [vmem:[#allocation2] sm:$0x3] %v388_v57 }
  0xfb   :  { %v393_v59 = vld [vmem:[#allocation2] sm:$0x3] }
  0xfc   :  { %v401_v60 = vadd.f32 %v450_v58, %v393_v59 }
  0xfe   :  { %402 = vst [vmem:[#allocation2] sm:$0x3] %v401_v60 }
  0xff   :  { %541 = shalt.err (!%p538_p4)
}
 0x100   :  { %412 = dma.vmem_to_hbm [thread:$0]  %s410_s25, 32, %s683_s3, [#allocation3]  }
 0x101   :  { %550 = dma.done.wait [#allocation3], 32  }
 0x102   :  { %551 = vsyncadd [#allocation3], 4294967264 }
 0x103   :  { %416 = vsyncpa [#allocation3], 1 }

// kernel: skin_disease_forward.5
= control target key start
LH: loop header
LB: loop body
LE: loop exit
PB: predicated region body
PF: predicated region fallthrough
CT: control target
= control target key end

     0   :  { %8 = vsyncpa [#allocation3], 0  ;;  %s9423_s0 = inlined_call_operand.vmem [shape: bf16[2,1,456,64], index: 0, kind: input, shape index: {}]   ;;  %s9424_s1 = inlined_call_operand.hbm [shape: bf16[9,64,128], index: 1, kind: input, shape index: {}]   ;;  %s9425_s2 = inlined_call_operand.hbm [shape: f32[1,128], index: 2, kind: input, shape index: {}]   ;;  %s9426_s3 = inlined_call_operand.vmem [shape: bf16[2,1,8,8,128], index: 3, kind: output, shape index: {}]  }
   0x1   :  { %9 = vsyncpa [#allocation5], 0  ;;  %s7807_s12 = smov 0   ;;  %s7809_s13 = smov 0  }
   0x2   :  { %s7811_s14 = smov 0  }
   0x3 LB: > { %s6136_s15 = sadd.s32 4294967295, %s7780_s14   ;;  %s27_s16 = sadd.s32 1, %s7776_s13  ;;  %s7780_s14 = sphi %s7811_s14, %s15_s14   ;;  %s7776_s13 = sphi %s7809_s13, %s9465_s13   ;;  %s7772_s12 = sphi %s7807_s12, %s9464_s12  }
   0x4   : > { %p29_p0 = scmp.ge.s32.totalorder %s27_s16, 2  ;;  %p6138_p1 = scmp.ge.s32.totalorder %s7780_s14, 1 }
   0x5   : > { %p130_p2 = scmp.lt.s32.totalorder %s7780_s14, 3  ;;  %p7832_p4 = scmp.eq.s32.totalorder %s6136_s15, 0 }
   0x6   : > { %s9467_s16 = smov (%p29_p0, %s27_s16), 0  ;;  %s7782_s19 = smov [#allocation2]  }
   0x7   : > { %p7828_p3 = pnand %p6138_p1, %p130_p2  ;;  %s142_s20 = sshll.u32 %s7782_s19, 4  ;;  %s143_s20 = int_to_ptr.vmem [resolvable:$true] %s142_s20 }
   0x8   : > { %s7783_s22 = smov [#allocation4]   ;;  %s7709_s24 = scalar_lea.vmem %s143_s20, 4608 }
   0x9   : > { %p7495_p5 = pneg %p7828_p3  ;;  %s156_s23 = sshll.u32 %s7783_s22, 4  ;;  %s157_s23 = int_to_ptr.vmem [resolvable:$true] %s156_s23 }
   0xa   : > { %p7710_p8 = scmp.ne.s32.totalorder %s143_s20, %s7709_s24  ;;  %p7717_p11 = scmp.lt.s32.totalorder %s143_s20, %s143_s20 }
   0xb   : > { %p7840_p6 = pnand %p7832_p4, %p7495_p5  ;;  %p7718_p12 = scmp.lt.s32.totalorder %s7709_s24, %s7709_s24 }
   0xd   : > { %p7700_p7 = pneg %p7840_p6  ;;  %p7719_p13 = por %p7718_p12, %p7717_p11 }
   0xf   : > { %p7712_p9 = pnand %p7710_p8, %p7700_p7 }
  0x11   : > { %p7713_p10 = pneg %p7712_p9 }
  0x13   : > { %p7720_p0 = pnand %p7719_p13, %p7713_p10 }
  0x15   : > { %7723 = shalt.err (!%p7720_p0)
}
  0x16   : > { %s7784_s25 = smov 64   ;;  %s7785_s26 = smov 4  }
  0x17   : > { %7498 = dma.hbm_to_vmem [thread:$0]  (!%p7840_p6), %s9424_s1, 4608, %s143_s20, [#allocation3], %s7784_s25, %s7784_s25, %s7785_s26  }
  0x18   : > { %s7735_s29 = scalar_lea.vmem %s157_s23, 16  ;;  %s7742_s30 = scalar_lea.vmem %s157_s23, 32 }
  0x19   : > { %p7736_p1 = scmp.ne.s32.totalorder %s157_s23, %s7735_s29  ;;  %p7743_p8 = scmp.lt.s32.totalorder %s157_s23, %s157_s23 }
  0x1a   : > { %p7744_p9 = scmp.lt.s32.totalorder %s7742_s30, %s7735_s29 }
  0x1b   : > { %p7738_p2 = pnand %p7736_p1, %p7700_p7 }
  0x1c   : > { %p7745_p10 = por %p7744_p9, %p7743_p8 }
  0x1d   : > { %p7739_p5 = pneg %p7738_p2 }
  0x1f   : > { %p7746_p11 = pnand %p7745_p10, %p7739_p5 }
  0x21   : > { %7749 = shalt.err (!%p7746_p11)
}
  0x22   : > { %7501 = dma.hbm_to_vmem [thread:$0]  (!%p7840_p6), %s9425_s2, 16, %s157_s23, [#allocation5]  }
  0x23   : > { %181 = sbr.rel (%p7828_p3) target bundleno = 763 (0x2fb), region = 32 }
  0x28   : > { %7763 = dma.done.wait (%p7832_p4), [#allocation3], 4608  }
  0x29   : > { %7765 = vsyncadd (%p7832_p4), [#allocation3], 4294962688 }
  0x2a   : > { %7767 = dma.done.wait (%p7832_p4), [#allocation5], 16  }
  0x2b   : > { %7769 = vsyncadd (%p7832_p4), [#allocation5], 4294967280  ;;  %p217_p7 = scmp.lt.s32.totalorder %s7772_s12, 1  ;;  %v7535_v0 = vld [vmem:[#allocation2 + $0x38] sm:$0xff]   ;;  %v7536_v1 = vld [vmem:[#allocation2 + $0x30] sm:$0xff]   ;;  %vm646_vm1 = vcmask 523264  }
  0x2c   : > { %6974 = vmatprep.subr.bf16.mxu0 %v7535_v0  ;;  %7478 = vmatprep.subr.bf16.mxu1 %v7535_v0  ;;  %vm425_vm0 = vsmask.f32 7424  ;;  %v7537_v2 = vld [vmem:[#allocation2 + $0x28] sm:$0xff]   ;;  %v7538_v7 = vld [vmem:[#allocation2 + $0x20] sm:$0xff]   ;;  %v7545_v26 = vld [vmem:[#allocation2 + $0x18] sm:$0xff]   ;;  %vm1222_vm2 = vcmask 1046528  }
  0x2d   : > { %s9469_s12 = smov (!%p217_p7, %s7772_s12), 1  ;;  %6975 = vmatpush3.bf16.msra.mxu0 %v7535_v0  ;;  %7482 = vmatpush3.bf16.msra.mxu1 %v7535_v0  ;;  %v7546_v30 = vld [vmem:[#allocation2 + $0x58] sm:$0xff]   ;;  %v7551_v55 = vld [vmem:[#allocation2 + $0x10] sm:$0xff]   ;;  %vm5879_vm3 = vcmask 1041409   ;;  %vm5882_vm4 = vcmask 1042434   ;;  %vm5885_vm5 = vcmask 1043459  }
  0x2e   : > { %s7486_s6 = smul.u32 228, %s9469_s12  ;;  %6976 = vmatprep.subr.bf16.mxu0 %v7536_v1  ;;  %7479 = vmatprep.subr.bf16.mxu1 %v7536_v1  ;;  %v7552_v56 = vld [vmem:[#allocation2 + $0x50] sm:$0xff]   ;;  %vm5888_vm6 = vcmask 1044484   ;;  %vm5891_vm7 = vcmask 1045509   ;;  %vm5894_vm8 = vcmask 1046534   ;;  %vm5897_vm9 = vcmask 1047559  }
  0x2f   : > { %s6657_s10 = sshll.u32 %s9469_s12, 5 }
  0x30   : > { %s7880_s9 = scalar_lea.vmem %s9423_s0, %s7486_s6  ;;  %s9126_s15 = scalar_lea.vmem %s9426_s3, %s6657_s10 }
  0x31   : > { %v236_v3 = vld [vmem:[%s7880_s9] sm:$0xf]  ;;  %v7884_v4 = vld [vmem:[%s7880_s9 + $0x4] sm:$0xf]  ;;  %v7890_v6 = vld [vmem:[%s7880_s9 + $0x8] sm:$0xff]   ;;  %6977 = vmatpush3.bf16.msra.mxu0 %v7536_v1  ;;  %7483 = vmatpush3.bf16.msra.mxu1 %v7536_v1 }
  0x32   : > { %v7887_v5 = vcombine.low %v236_v3, %v7884_v4  ;;  %v434_v10 = vshll.u32 %v7890_v6, 16  ;;  %v438_v11 = vshrl.u32 %v7890_v6, 16  ;;  %v7897_v12 = vld [vmem:[%s7880_s9 + $0x60] sm:$0xff]   ;;  %v7900_v13 = vld [vmem:[%s7880_s9 + $0x68] sm:$0xff]   ;;  %6978 = vmatprep.subr.bf16.mxu0 %v7537_v2  ;;  %7480 = vmatprep.subr.bf16.mxu1 %v7537_v2  ;;  %v7903_v14 = vld [vmem:[%s7880_s9 + $0x10] sm:$0xff]  }
  0x33   : > { %v522_v17 = vshll.u32 %v7897_v12, 16  ;;  %v526_v18 = vshrl.u32 %v7897_v12, 16  ;;  %v530_v19 = vshll.u32 %v7900_v13, 16  ;;  %v534_v20 = vshrl.u32 %v7900_v13, 16  ;;  %v7911_v22 = vld [vmem:[%s7880_s9 + $0x70] sm:$0xff]   ;;  %v7920_v35 = vld [vmem:[%s7880_s9 + $0x18] sm:$0xff]  }
  0x34   : > { %v427_v8 = vshrl.u32 %v7887_v5, 16  ;;  %v429_v9 = vshll.u32 %v7887_v5, 16  ;;  %v436_v16 = vrot.slane %v434_v10, 1  ;;  %v442_v21 = vshll.u32 %v7903_v14, 16  ;;  %v7924_v37 = vld [vmem:[%s7880_s9 + $0x78] sm:$0xff]   ;;  %v7930_v41 = vld [vmem:[%s7880_s9 + $0x20] sm:$0xff]  }
  0x35   : > { %6979 = vmatpush3.bf16.msra.mxu0 %v7537_v2  ;;  %7484 = vmatpush3.bf16.msra.mxu1 %v7537_v2  ;;  %v7913_v25 = vrot.slane %v522_v17, 1  ;;  %v532_v27 = vrot.slane %v530_v19, 1  ;;  %v538_v29 = vshll.u32 %v7911_v22, 16  ;;  %v446_v36 = vshrl.u32 %v7903_v14, 16  ;;  %v7939_v49 = vld [vmem:[%s7880_s9 + $0x80] sm:$0xff]   ;;  %v7950_v62 = vld [vmem:[%s7880_s9 + $0x28] sm:$0xff]  }
  0x36   : > { %v431_v15 = vrot.slane %v429_v9, 1  ;;  %v440_v24 = vor.u32 %v438_v11, %v436_v16  ;;  %6980 = vmatprep.subr.bf16.mxu0 %v7538_v7  ;;  %7481 = vmatprep.subr.bf16.mxu1 %v7538_v7  ;;  %v444_v28 = vrot.slane %v442_v21, 1  ;;  %v542_v40 = vshrl.u32 %v7911_v22, 16  ;;  %v7954_v0 = vld [vmem:[%s7880_s9 + $0x88] sm:$0xff]   ;;  %v7959_v3 = vld [vmem:[%s7880_s9 + $0x30] sm:$0xff]  }
  0x37   : > { %v528_v32 = vor.u32 %v526_v18, %v7913_v25  ;;  %v536_v33 = vor.u32 %v534_v20, %v532_v27  ;;  %v540_v34 = vrot.slane %v538_v29, 1  ;;  %v450_v44 = vshll.u32 %v7920_v35, 16  ;;  %v7967_v17 = vld [vmem:[%s7880_s9 + $0x90] sm:$0xff]  }
  0x38   : > { %v432_v23 = vor.u32 %v431_v15, %v427_v8  ;;  %v445_v39 = vsel %vm425_vm0, %v440_v24, %v444_v28  ;;  %v448_v43 = vor.u32 %v446_v36, %v444_v28  ;;  %v546_v45 = vshll.u32 %v7924_v37, 16  ;;  %v7974_v24 = vld [vmem:[%s7880_s9 + $0x38] sm:$0xff]  }
  0x39   : > { %6981 = vmatpush3.bf16.msra.mxu0 %v7538_v7  ;;  %7485 = vmatpush3.bf16.msra.mxu1 %v7538_v7  ;;  %v533_v38 = vsel %vm425_vm0, %v528_v32, %v532_v27  ;;  %v541_v42 = vsel %vm425_vm0, %v536_v33, %v540_v34  ;;  %v544_v46 = vor.u32 %v542_v40, %v540_v34  ;;  %v454_v47 = vshrl.u32 %v7920_v35, 16 }
  0x3a   : > { %v437_v31 = vsel %vm425_vm0, %v432_v23, %v436_v16  ;;  %7006 = vmatprep.mubr.msk.bf16.mxu1 %vm646_vm1, %v533_v38  ;;  %7030 = vmatprep.subr.bf16.mxu1 %v7545_v26  ;;  %v458_v48 = vshll.u32 %v7930_v41, 16  ;;  %v550_v50 = vshrl.u32 %v7924_v37, 16  ;;  %v452_v51 = vrot.slane %v450_v44, 1  ;;  %v7987_v38 = vld [vmem:[%s7880_s9 + $0x40] sm:$0xff]  }
  0x3b   : > { %6982 = vmatprep.mubr.msk.bf16.mxu0 %vm646_vm1, %v437_v31  ;;  %7086 = vmatprep.subr.bf16.mxu0 %v7546_v30  ;;  %v548_v52 = vrot.slane %v546_v45, 1  ;;  %v554_v54 = vshll.u32 %v7939_v49, 16  ;;  %v462_v63 = vshrl.u32 %v7930_v41, 16  ;;  %v558_v2 = vshrl.u32 %v7939_v49, 16  ;;  %v7980_v31 = vld [vmem:[%s7880_s9 + $0x98] sm:$0xff]   ;;  %v7993_v45 = vld [vmem:[%s7880_s9 + $0xa0] sm:$0xff]  }
  0x3c   : > { %6983 = vmatmul.mubr.msk.bf16.vlgmr.msra.gmra.mxu0 %vm646_vm1, %v445_v39  ;;  %7007 = vmatmul.mubr.msk.bf16.vlgmr.msra.gmra.mxu1 %vm646_vm1, %v541_v42  ;;  %v460_v53 = vrot.slane %v458_v48, 1  ;;  %v453_v57 = vsel %vm425_vm0, %v448_v43, %v452_v51  ;;  %v456_v59 = vor.u32 %v454_v47, %v452_v51  ;;  %v466_v9 = vshll.u32 %v7950_v62, 16 }
  0x3d   : > { %7031 = vmatpush3.bf16.msra.mxu1 %v7545_v26  ;;  %7087 = vmatpush3.bf16.msra.mxu0 %v7546_v30  ;;  %v549_v58 = vsel %vm425_vm0, %v544_v46, %v548_v52  ;;  %v552_v60 = vor.u32 %v550_v50, %v548_v52  ;;  %v556_v61 = vrot.slane %v554_v54, 1  ;;  %v562_v10 = vshll.u32 %v7954_v0, 16  ;;  %v7561_v46 = vld [vmem:[#allocation2 + $0x8] sm:$0xff]  }
  0x3e   : > { %6986 = vmatprep.mubr.msk.bf16.mxu0 %vm646_vm1, %v453_v57  ;;  %7010 = vmatprep.mubr.msk.bf16.mxu1 %vm646_vm1, %v549_v58  ;;  %v461_v1 = vsel %vm425_vm0, %v456_v59, %v460_v53  ;;  %v464_v8 = vor.u32 %v462_v63, %v460_v53  ;;  %v470_v15 = vshrl.u32 %v7950_v62, 16  ;;  %v474_v16 = vshll.u32 %v7959_v3, 16  ;;  %v8006_v59 = vld [vmem:[%s7880_s9 + $0xa8] sm:$0xff]  }
  0x3f   : > { %7032 = vmatprep.subr.bf16.mxu1 %v7551_v55  ;;  %7088 = vmatprep.subr.bf16.mxu0 %v7552_v56  ;;  %v557_v7 = vsel %vm425_vm0, %v552_v60, %v556_v61  ;;  %v560_v11 = vor.u32 %v558_v2, %v556_v61  ;;  %v566_v18 = vshrl.u32 %v7954_v0, 16  ;;  %v468_v19 = vrot.slane %v466_v9, 1 }
  0x40   : > { %v564_v20 = vrot.slane %v562_v10, 1  ;;  %v476_v21 = vrot.slane %v474_v16, 1  ;;  %v570_v23 = vshll.u32 %v7967_v17, 16  ;;  %v478_v26 = vshrl.u32 %v7959_v3, 16  ;;  %v8016_v10 = vld [vmem:[%s7880_s9 + $0x50] sm:$0xff]  }
  0x41   : > { %7033 = vmatpush3.bf16.msra.mxu1 %v7551_v55  ;;  %7089 = vmatpush3.bf16.msra.mxu0 %v7552_v56  ;;  %v469_v27 = vsel %vm425_vm0, %v464_v8, %v468_v19  ;;  %v472_v29 = vor.u32 %v470_v15, %v468_v19  ;;  %v482_v34 = vshll.u32 %v7974_v24, 16  ;;  %v574_v36 = vshrl.u32 %v7967_v17, 16  ;;  %v7562_v55 = vld [vmem:[#allocation2 + $0x48] sm:$0xff]   ;;  %v8020_v15 = vld [vmem:[%s7880_s9 + $0xb0] sm:$0xff]  }
  0x42   : > { %v565_v28 = vsel %vm425_vm0, %v560_v11, %v564_v20  ;;  %v568_v30 = vor.u32 %v566_v18, %v564_v20  ;;  %v572_v32 = vrot.slane %v570_v23, 1  ;;  %v480_v33 = vor.u32 %v478_v26, %v476_v21  ;;  %7034 = vmatprep.subr.bf16.mxu1 %v7561_v46  ;;  %v8001_v56 = vld [vmem:[%s7880_s9 + $0x48] sm:$0xff]   ;;  %7090 = vmatprep.subr.bf16.mxu0 %v7562_v55  ;;  %v7567_v23 = vld [vmem:[#allocation2] sm:$0xff]  }
  0x43   : > { %v578_v39 = vshll.u32 %v7980_v31, 16  ;;  %v486_v40 = vshrl.u32 %v7974_v24, 16  ;;  %v484_v42 = vrot.slane %v482_v34, 1  ;;  %v490_v44 = vshll.u32 %v7987_v38, 16  ;;  %v7568_v26 = vld [vmem:[#allocation2 + $0x40] sm:$0xff]   ;;  %v8034_v34 = vld [vmem:[%s7880_s9 + $0xb8] sm:$0xff]  }
  0x44   : > { %6987 = vmatmul.mubr.msk.bf16.gmra.mxu0 %vm646_vm1, %v461_v1  ;;  %7011 = vmatmul.mubr.msk.bf16.gmra.mxu1 %vm646_vm1, %v557_v7  ;;  %v576_v43 = vor.u32 %v574_v36, %v572_v32  ;;  %v477_v47 = vsel %vm425_vm0, %v472_v29, %v476_v21  ;;  %v573_v48 = vsel %vm425_vm0, %v568_v30, %v572_v32  ;;  %v582_v51 = vshrl.u32 %v7980_v31, 16  ;;  %v8030_v32 = vld [vmem:[%s7880_s9 + $0x58] sm:$0xff]  }
  0x45   : > { %6990 = vmatprep.mubr.msk.bf16.mxu0 %vm646_vm1, %v469_v27  ;;  %7014 = vmatprep.mubr.msk.bf16.mxu1 %vm646_vm1, %v565_v28  ;;  %v580_v50 = vrot.slane %v578_v39, 1  ;;  %v485_v52 = vsel %vm425_vm0, %v480_v33, %v484_v42  ;;  %v492_v53 = vrot.slane %v490_v44, 1  ;;  %v586_v54 = vshll.u32 %v7993_v45, 16 }
  0x46   : > { %7035 = vmatpush3.bf16.msra.mxu1 %v7561_v46  ;;  %v494_v58 = vshrl.u32 %v7987_v38, 16  ;;  %v498_v61 = vshll.u32 %v8001_v56, 16  ;;  %v488_v63 = vor.u32 %v486_v40, %v484_v42  ;;  %v590_v2 = vshrl.u32 %v7993_v45, 16  ;;  %7091 = vmatpush3.bf16.msra.mxu0 %v7562_v55 }
  0x47   : > { %v581_v57 = vsel %vm425_vm0, %v576_v43, %v580_v50  ;;  %v588_v60 = vrot.slane %v586_v54, 1  ;;  %v584_v1 = vor.u32 %v582_v51, %v580_v50  ;;  %v594_v7 = vshll.u32 %v8006_v59, 16  ;;  %7036 = vmatprep.subr.bf16.mxu1 %v7567_v23  ;;  %7092 = vmatprep.subr.bf16.mxu0 %v7568_v26  ;;  %v7574_v54 = vld [vmem:[#allocation2 + $0x98] sm:$0xff]  }
  0x48   : > { %v496_v8 = vor.u32 %v494_v58, %v492_v53  ;;  %v500_v9 = vrot.slane %v498_v61, 1  ;;  %v502_v11 = vshrl.u32 %v8001_v56, 16  ;;  %v598_v19 = vshrl.u32 %v8006_v59, 16 }
  0x49   : > { %v592_v16 = vor.u32 %v590_v2, %v588_v60  ;;  %v596_v18 = vrot.slane %v594_v7, 1  ;;  %v506_v20 = vshll.u32 %v8016_v10, 16  ;;  %v602_v21 = vshll.u32 %v8020_v15, 16 }
  0x4a   : > { %v493_v27 = vsel %vm425_vm0, %v488_v63, %v492_v53  ;;  %v589_v28 = vsel %vm425_vm0, %v584_v1, %v588_v60  ;;  %v501_v29 = vsel %vm425_vm0, %v496_v8, %v500_v9  ;;  %v510_v33 = vshrl.u32 %v8016_v10, 16  ;;  %7037 = vmatpush3.bf16.msra.mxu1 %v7567_v23  ;;  %7093 = vmatpush3.bf16.msra.mxu0 %v7568_v26  ;;  %v1209_v53 = vld [vmem:[%s7880_s9] sm:$0xe] }
  0x4b   : > { %v597_v30 = vsel %vm425_vm0, %v592_v16, %v596_v18  ;;  %v606_v36 = vshrl.u32 %v8020_v15, 16  ;;  %v508_v39 = vrot.slane %v506_v20, 1  ;;  %v604_v40 = vrot.slane %v602_v21, 1  ;;  %7198 = vmatprep.subr.bf16.mxu0 %v7574_v54 }
  0x4c   : > { %6991 = vmatmul.mubr.msk.bf16.gmra.mxu0 %vm646_vm1, %v477_v47  ;;  %7015 = vmatmul.mubr.msk.bf16.gmra.mxu1 %vm646_vm1, %v573_v48  ;;  %v514_v42 = vshll.u32 %v8030_v32, 16  ;;  %v504_v43 = vor.u32 %v502_v11, %v500_v9  ;;  %v600_v44 = vor.u32 %v598_v19, %v596_v18  ;;  %v610_v46 = vshll.u32 %v8034_v34, 16  ;;  %v8044_v47 = vld [vmem:[%s7880_s9 + $0xc0] ss:$0 sps:$4 sm:$0x11]   ;;  %v7573_v48 = vld [vmem:[#allocation2 + $0x78] sm:$0xff]  }
  0x4d   : > { %6994 = vmatprep.mubr.msk.bf16.mxu0 %vm646_vm1, %v485_v52  ;;  %7018 = vmatprep.mubr.msk.bf16.mxu1 %vm646_vm1, %v581_v57  ;;  %v512_v50 = vor.u32 %v510_v33, %v508_v39  ;;  %v608_v52 = vor.u32 %v606_v36, %v604_v40  ;;  %v518_v57 = vshrl.u32 %v8030_v32, 16  ;;  %v614_v61 = vshrl.u32 %v8034_v34, 16  ;;  %v7578_v33 = vld [vmem:[#allocation2 + $0x88] sm:$0xff]  }
  0x4e   : > { %v516_v51 = vrot.slane %v514_v42, 1  ;;  %v612_v55 = vrot.slane %v610_v46, 1  ;;  %7142 = vmatprep.subr.bf16.mxu1 %v7573_v48  ;;  %v509_v58 = vsel %vm425_vm0, %v504_v43, %v508_v39  ;;  %v605_v60 = vsel %vm425_vm0, %v600_v44, %v604_v40  ;;  %v7579_v39 = vld [vmem:[#allocation2 + $0x60] sm:$0xff]   ;;  %v8091_v43 = vld [vmem:[#allocation2 + $0xb8] sm:$0xff]  }
  0x4f   : > { %v618_v63 = vshll.u32 %v8044_v47, 16  ;;  %v6229_v7 = vcombine.low %v1209_v53, %v7884_v4  ;;  %v1224_v18 = vrot.slane %v7890_v6, 1  ;;  %v1226_v21 = vrot.slane %v7903_v14, 1  ;;  %v7580_v40 = vld [vmem:[#allocation2 + $0x80] sm:$0xff]   ;;  %v8093_v44 = vld [vmem:[#allocation2 + $0xd8] sm:$0xff]  }
  0x50   : > { %v517_v1 = vsel %vm425_vm0, %v512_v50, %v516_v51  ;;  %v613_v2 = vsel %vm425_vm0, %v608_v52, %v612_v55  ;;  %v520_v8 = vor.u32 %v518_v57, %v516_v51  ;;  %v616_v9 = vor.u32 %v614_v61, %v612_v55 }
  0x51   : > { %v620_v11 = vrot.slane %v618_v63, 1  ;;  %v1223_v16 = vrot.slane %v6229_v7, 1  ;;  %v1228_v23 = vrot.slane %v7920_v35, 1  ;;  %v1227_v26 = vsel %vm1222_vm2, %v1224_v18, %v1226_v21 }
  0x52   : > { %v525_v19 = vsel %vm425_vm0, %v520_v8, %v7913_v25  ;;  %v7575_v25 = vld [vmem:[#allocation2 + $0x70] sm:$0xff]   ;;  %v1236_v42 = vrot.slane %v7974_v24, 1 }
  0x53   : > { %v621_v4 = vsel %vm425_vm0, %v616_v9, %v620_v11  ;;  %v1225_v20 = vsel %vm1222_vm2, %v1223_v16, %v1224_v18  ;;  %v8169_v8 = vld [vmem:[%s7880_s9 + $0x14] sm:$0xff]   ;;  %v1266_v16 = vrot.slane %v8020_v15, 1  ;;  %v1268_v18 = vrot.slane %v8034_v34, 1 }
  0x54   : > { %6995 = vmatmul.mubr.msk.bf16.gmra.mxu0 %vm646_vm1, %v493_v27  ;;  %7019 = vmatmul.mubr.msk.bf16.gmra.mxu1 %vm646_vm1, %v589_v28  ;;  %v1229_v27 = vsel %vm1222_vm2, %v1226_v21, %v1228_v23  ;;  %v7576_v28 = vld [vmem:[#allocation2 + $0x90] sm:$0xff]  }
  0x55   : > { %6998 = vmatprep.mubr.msk.bf16.mxu0 %vm646_vm1, %v501_v29  ;;  %7022 = vmatprep.mubr.msk.bf16.mxu1 %vm646_vm1, %v597_v30  ;;  %v1230_v29 = vrot.slane %v7930_v41, 1  ;;  %v7577_v30 = vld [vmem:[#allocation2 + $0x68] sm:$0xff]  }
  0x57   : > { %v1231_v36 = vsel %vm1222_vm2, %v1228_v23, %v1230_v29 }
  0x5c   : > { %6999 = vmatmul.mubr.msk.bf16.gmra.mxu0 %vm646_vm1, %v509_v58  ;;  %7023 = vmatmul.mubr.msk.bf16.gmra.mxu1 %vm646_vm1, %v605_v60 }
  0x5d   : > { %7002 = vmatprep.mubr.msk.bf16.mxu0 %vm646_vm1, %v517_v1  ;;  %7026 = vmatprep.mubr.msk.bf16.mxu1 %vm646_vm1, %v613_v2  ;;  %v2123_v1 = vld [vmem:[%s7880_s9 + $0xc] sm:$0xf]  ;;  %v8160_v2 = vld [vmem:[%s7880_s9 + $0x10] sm:$0xf] }
  0x5e   : > { %v6310_v9 = vcombine.low %v2123_v1, %v8160_v2  ;;  %v8250_v1 = vld [vmem:[%s7880_s9 + $0x4c] sm:$0xff]  }
  0x60   : > { %v2305_v23 = vshrl.u32 %v6310_v9, 16 }
  0x64   : > { %7003 = vmatmul.mubr.msk.bf16.gmra.mxu0 %vm646_vm1, %v525_v19  ;;  %7027 = vmatmul.mubr.msk.bf16.gmra.mxu1 %vm646_vm1, %v621_v4  ;;  %v2307_v19 = vshll.u32 %v6310_v9, 16  ;;  %v2312_v4 = vshll.u32 %v8169_v8, 16  ;;  %v8255_v9 = vld [vmem:[%s7880_s9 + $0x54] sm:$0xff]  }
  0x65   : > { %7038 = vmatprep.mubr.msk.bf16.mxu1 %vm646_vm1, %v7887_v5  ;;  %7094 = vmatprep.mubr.msk.bf16.mxu0 %vm646_vm1, %v1225_v20  ;;  %v1232_v5 = vrot.slane %v7950_v62, 1  ;;  %v1270_v20 = vrot.slane %v8044_v47, 1  ;;  %v7581_v47 = vld [vmem:[%s7880_s9 + $0xc] sm:$0xff]  }
  0x6c   : > { %7039 = vmatmul.mubr.msk.bf16.vlgmr.msra.gmra.mxu1 %vm646_vm1, %v7890_v6  ;;  %7095 = vmatmul.mubr.msk.bf16.vlgmr.msra.gmra.mxu0 %vm646_vm1, %v1227_v26  ;;  %v1233_v6 = vsel %vm1222_vm2, %v1230_v29, %v1232_v5  ;;  %v2314_v26 = vrot.slane %v2312_v4, 1  ;;  %v2316_v29 = vshrl.u32 %v8169_v8, 16  ;;  %v7596_v4 = vld [vmem:[%s7880_s9 + $0x3c] sm:$0xff]  }
  0x6d   : > { %7143 = vmatpush3.bf16.msra.mxu1 %v7573_v48  ;;  %7199 = vmatpush3.bf16.msra.mxu0 %v7574_v54  ;;  %v1240_v48 = vrot.slane %v8001_v56, 1 }
  0x6e   : > { %7042 = vmatprep.mubr.msk.bf16.mxu1 %vm646_vm1, %v7903_v14  ;;  %7098 = vmatprep.mubr.msk.bf16.mxu0 %vm646_vm1, %v1229_v27  ;;  %v1234_v14 = vrot.slane %v7959_v3, 1 }
  0x6f   : > { %7144 = vmatprep.subr.bf16.mxu1 %v7575_v25  ;;  %7200 = vmatprep.subr.bf16.mxu0 %v7576_v28 }
  0x70   : > { %v1237_v46 = vsel %vm1222_vm2, %v1234_v14, %v1236_v42 }
  0x71   : > { %7145 = vmatpush3.bf16.msra.mxu1 %v7575_v25  ;;  %7201 = vmatpush3.bf16.msra.mxu0 %v7576_v28  ;;  %v1269_v25 = vsel %vm1222_vm2, %v1266_v16, %v1268_v18  ;;  %v8194_v28 = vld [vmem:[%s7880_s9 + $0x24] sm:$0xff]  }
  0x72   : > { %7146 = vmatprep.subr.bf16.mxu1 %v7577_v30  ;;  %7202 = vmatprep.subr.bf16.mxu0 %v7578_v33 }
  0x74   : > { %7043 = vmatmul.mubr.msk.bf16.gmra.mxu1 %vm646_vm1, %v7920_v35  ;;  %7099 = vmatmul.mubr.msk.bf16.gmra.mxu0 %vm646_vm1, %v1231_v36  ;;  %v1235_v35 = vsel %vm1222_vm2, %v1232_v5, %v1234_v14  ;;  %v1271_v5 = vsel %vm1222_vm2, %v1268_v18, %v1270_v20  ;;  %v7594_v18 = vld [vmem:[%s7880_s9 + $0x34] sm:$0xff]  }
  0x75   : > { %7046 = vmatprep.mubr.msk.bf16.mxu1 %vm646_vm1, %v7930_v41  ;;  %7102 = vmatprep.mubr.msk.bf16.mxu0 %vm646_vm1, %v1233_v6  ;;  %v1238_v41 = vrot.slane %v7987_v38, 1  ;;  %v8209_v6 = vld [vmem:[%s7880_s9 + $0x2c] sm:$0xff]  }
  0x76   : > { %7147 = vmatpush3.bf16.msra.mxu1 %v7577_v30  ;;  %7203 = vmatpush3.bf16.msra.mxu0 %v7578_v33  ;;  %v2328_v33 = vshll.u32 %v8194_v28, 16 }
  0x77   : > { %7148 = vmatprep.subr.bf16.mxu1 %v7579_v39  ;;  %7204 = vmatprep.subr.bf16.mxu0 %v7580_v40  ;;  %v1239_v50 = vsel %vm1222_vm2, %v1236_v42, %v1238_v41  ;;  %v1241_v51 = vsel %vm1222_vm2, %v1238_v41, %v1240_v48  ;;  %v7584_v42 = vld [vmem:[%s7880_s9 + $0x14] sm:$0xff]   ;;  %v7588_v41 = vld [vmem:[%s7880_s9 + $0x1c] sm:$0xff]  }
  0x7a   : > { %7149 = vmatpush3.bf16.msra.mxu1 %v7579_v39  ;;  %7205 = vmatpush3.bf16.msra.mxu0 %v7580_v40  ;;  %v2330_v39 = vrot.slane %v2328_v33, 1  ;;  %v8217_v40 = vld [vmem:[%s7880_s9 + $0x34] sm:$0xff]  }
  0x7b   : > { %7254 = vmatprep.subr.bf16.mxu1 %v8091_v43  ;;  %7310 = vmatprep.subr.bf16.mxu0 %v8093_v44 }
  0x7c   : > { %7047 = vmatmul.mubr.msk.bf16.gmra.mxu1 %vm646_vm1, %v7950_v62  ;;  %7103 = vmatmul.mubr.msk.bf16.gmra.mxu0 %vm646_vm1, %v1235_v35  ;;  %v1242_v62 = vrot.slane %v8016_v10, 1  ;;  %v2336_v35 = vshll.u32 %v8209_v6, 16 }
  0x7d   : > { %7050 = vmatprep.mubr.msk.bf16.mxu1 %vm646_vm1, %v7959_v3  ;;  %7106 = vmatprep.mubr.msk.bf16.mxu0 %vm646_vm1, %v1237_v46  ;;  %v1244_v3 = vrot.slane %v8030_v32, 1 }
  0x7e   : > { %v1243_v52 = vsel %vm1222_vm2, %v1240_v48, %v1242_v62  ;;  %v2340_v48 = vshrl.u32 %v8209_v6, 16 }
  0x7f   : > { %v1245_v53 = vsel %vm1222_vm2, %v1242_v62, %v1244_v3  ;;  %v7600_v62 = vld [vmem:[#allocation2 + $0xb0] sm:$0xff]  }
  0x84   : > { %7051 = vmatmul.mubr.msk.bf16.gmra.mxu1 %vm646_vm1, %v7974_v24  ;;  %7107 = vmatmul.mubr.msk.bf16.gmra.mxu0 %vm646_vm1, %v1239_v50  ;;  %v1246_v24 = vrot.slane %v7897_v12, 1  ;;  %v2344_v50 = vshll.u32 %v8217_v40, 16 }
  0x85   : > { %7054 = vmatprep.mubr.msk.bf16.mxu1 %vm646_vm1, %v7987_v38  ;;  %7110 = vmatprep.mubr.msk.bf16.mxu0 %vm646_vm1, %v1241_v51  ;;  %v1248_v38 = vrot.slane %v7900_v13, 1 }
  0x86   : > { %v1247_v54 = vsel %vm1222_vm2, %v1244_v3, %v1246_v24  ;;  %v7601_v3 = vld [vmem:[#allocation2 + $0xd0] sm:$0xff]  }
  0x87   : > { %v1249_v55 = vsel %vm1222_vm2, %v1246_v24, %v1248_v38 }
  0x8c   : > { %7055 = vmatmul.mubr.msk.bf16.gmra.mxu1 %vm646_vm1, %v8001_v56  ;;  %7111 = vmatmul.mubr.msk.bf16.gmra.mxu0 %vm646_vm1, %v1243_v52  ;;  %v1250_v56 = vrot.slane %v7911_v22, 1  ;;  %v2338_v52 = vrot.slane %v2336_v35, 1  ;;  %v8292_v35 = vld [vmem:[%s7880_s9 + $0x6c] sm:$0xff]  }
  0x8d   : > { %7058 = vmatprep.mubr.msk.bf16.mxu1 %vm646_vm1, %v8016_v10  ;;  %7114 = vmatprep.mubr.msk.bf16.mxu0 %vm646_vm1, %v1245_v53  ;;  %v1252_v10 = vrot.slane %v7924_v37, 1  ;;  %v8230_v53 = vld [vmem:[%s7880_s9 + $0x3c] sm:$0xff]  }
  0x8e   : > { %v1251_v57 = vsel %vm1222_vm2, %v1248_v38, %v1250_v56  ;;  %v2342_v38 = vor.u32 %v2340_v48, %v2338_v52  ;;  %v8297_v48 = vld [vmem:[%s7880_s9 + $0x74] sm:$0xff]  }
  0x8f   : > { %v1253_v58 = vsel %vm1222_vm2, %v1250_v56, %v1252_v10  ;;  %v7614_v56 = vld [vmem:[#allocation2 + $0xa8] sm:$0xff]  }
  0x94   : > { %7059 = vmatmul.mubr.msk.bf16.gmra.mxu1 %vm646_vm1, %v8030_v32  ;;  %7115 = vmatmul.mubr.msk.bf16.gmra.mxu0 %vm646_vm1, %v1247_v54  ;;  %v1256_v32 = vrot.slane %v7954_v0, 1  ;;  %v2346_v54 = vrot.slane %v2344_v50, 1  ;;  %v7604_v50 = vld [vmem:[%s7880_s9 + $0x54] sm:$0xff]  }
  0x95   : > { %7062 = vmatprep.mubr.msk.bf16.mxu1 %vm646_vm1, %v7897_v12  ;;  %7118 = vmatprep.mubr.msk.bf16.mxu0 %vm646_vm1, %v1249_v55  ;;  %v1254_v12 = vrot.slane %v7939_v49, 1  ;;  %v8237_v55 = vld [vmem:[%s7880_s9 + $0x44] sm:$0xff]  }
  0x96   : > { %v2364_v20 = vshrl.u32 %v8237_v55, 16 }
  0x97   : > { %v1255_v60 = vsel %vm1222_vm2, %v1252_v10, %v1254_v12  ;;  %v1257_v61 = vsel %vm1222_vm2, %v1254_v12, %v1256_v32  ;;  %v7615_v10 = vld [vmem:[#allocation2 + $0xc8] sm:$0xff]   ;;  %v2348_v12 = vshrl.u32 %v8217_v40, 16 }
  0x9c   : > { %7063 = vmatmul.mubr.msk.bf16.gmra.mxu1 %vm646_vm1, %v7900_v13  ;;  %7119 = vmatmul.mubr.msk.bf16.gmra.mxu0 %vm646_vm1, %v1251_v57  ;;  %v1258_v13 = vrot.slane %v7967_v17, 1  ;;  %v7590_v57 = vld [vmem:[%s7880_s9 + $0x24] sm:$0xff]  }
  0x9d   : > { %7066 = vmatprep.mubr.msk.bf16.mxu1 %vm646_vm1, %v7911_v22  ;;  %7122 = vmatprep.mubr.msk.bf16.mxu0 %vm646_vm1, %v1253_v58  ;;  %v1260_v22 = vrot.slane %v7980_v31, 1  ;;  %v2352_v58 = vshll.u32 %v8230_v53, 16 }
  0x9e   : > { %v1259_v63 = vsel %vm1222_vm2, %v1256_v32, %v1258_v13  ;;  %v2347_v32 = vsel %vm425_vm0, %v2342_v38, %v2346_v54  ;;  %v2404_v38 = vshrl.u32 %v8292_v35, 16 }
  0x9f   : > { %v1261_v7 = vsel %vm1222_vm2, %v1258_v13, %v1260_v22  ;;  %v7628_v13 = vld [vmem:[#allocation2 + $0xa0] sm:$0xff]  }
  0xa4   : > { %7067 = vmatmul.mubr.msk.bf16.gmra.mxu1 %vm646_vm1, %v7924_v37  ;;  %7123 = vmatmul.mubr.msk.bf16.gmra.mxu0 %vm646_vm1, %v1255_v60  ;;  %v1262_v37 = vrot.slane %v7993_v45, 1  ;;  %v2356_v60 = vshrl.u32 %v8230_v53, 16 }
  0xa5   : > { %7070 = vmatprep.mubr.msk.bf16.mxu1 %vm646_vm1, %v7939_v49  ;;  %7126 = vmatprep.mubr.msk.bf16.mxu0 %vm646_vm1, %v1257_v61  ;;  %v1264_v49 = vrot.slane %v8006_v59, 1  ;;  %v2360_v61 = vshll.u32 %v8237_v55, 16 }
  0xa6   : > { %v1263_v11 = vsel %vm1222_vm2, %v1260_v22, %v1262_v37  ;;  %v7629_v22 = vld [vmem:[#allocation2 + $0xc0] sm:$0xff]  }
  0xa7   : > { %v1267_v21 = vsel %vm1222_vm2, %v1264_v49, %v1266_v16  ;;  %v8259_v16 = vld [vmem:[#allocation2 + $0x118] sm:$0xff]  }
  0xac   : > { %7071 = vmatmul.mubr.msk.bf16.gmra.mxu1 %vm646_vm1, %v7954_v0  ;;  %7127 = vmatmul.mubr.msk.bf16.gmra.mxu0 %vm646_vm1, %v1259_v63  ;;  %v1265_v0 = vsel %vm1222_vm2, %v1262_v37, %v1264_v49  ;;  %v2354_v63 = vrot.slane %v2352_v58, 1  ;;  %v2362_v49 = vrot.slane %v2360_v61, 1  ;;  %v7610_v61 = vld [vmem:[%s7880_s9 + $0x6c] sm:$0xff]  }
  0xad   : > { %7074 = vmatprep.mubr.msk.bf16.mxu1 %vm646_vm1, %v7967_v17  ;;  %7130 = vmatprep.mubr.msk.bf16.mxu0 %vm646_vm1, %v1261_v7  ;;  %v8184_v17 = vld [vmem:[%s7880_s9 + $0x1c] sm:$0xff]   ;;  %v2350_v7 = vor.u32 %v2348_v12, %v2346_v54  ;;  %v2408_v54 = vshll.u32 %v8297_v48, 16  ;;  %v7608_v12 = vld [vmem:[%s7880_s9 + $0x64] sm:$0xff]  }
  0xae   : > { %v2320_v27 = vshll.u32 %v8184_v17, 16  ;;  %v2324_v36 = vshrl.u32 %v8184_v17, 16  ;;  %v2358_v37 = vor.u32 %v2356_v60, %v2354_v63 }
  0xb0   : > { %v2322_v30 = vrot.slane %v2320_v27, 1  ;;  %v2366_v27 = vor.u32 %v2364_v20, %v2362_v49  ;;  %v7612_v20 = vld [vmem:[%s7880_s9 + $0x74] sm:$0xff]  }
  0xb2   : > { %v2326_v14 = vor.u32 %v2324_v36, %v2322_v30  ;;  %v2380_v36 = vshrl.u32 %v8255_v9, 16 }
  0xb4   : > { %7075 = vmatmul.mubr.msk.bf16.gmra.mxu1 %vm646_vm1, %v7980_v31  ;;  %7131 = vmatmul.mubr.msk.bf16.gmra.mxu0 %vm646_vm1, %v1263_v11  ;;  %v2309_v31 = vrot.slane %v2307_v19, 1  ;;  %v2331_v51 = vsel %vm425_vm0, %v2326_v14, %v2330_v39  ;;  %v8257_v11 = vld [vmem:[#allocation2 + $0xf8] sm:$0xff]   ;;  %v2355_v19 = vsel %vm425_vm0, %v2350_v7, %v2354_v63 }
  0xb5   : > { %7078 = vmatprep.mubr.msk.bf16.mxu1 %vm646_vm1, %v7993_v45  ;;  %7134 = vmatprep.mubr.msk.bf16.mxu0 %vm646_vm1, %v1265_v0  ;;  %v2368_v0 = vshll.u32 %v8250_v1, 16 }
  0xb6   : > { %v2310_v45 = vor.u32 %v2309_v31, %v2305_v23  ;;  %v2372_v23 = vshrl.u32 %v8250_v1, 16  ;;  %v8274_v31 = vld [vmem:[%s7880_s9 + $0x5c] sm:$0xff]  }
  0xbc   : > { %7079 = vmatmul.mubr.msk.bf16.gmra.mxu1 %vm646_vm1, %v8006_v59  ;;  %7135 = vmatmul.mubr.msk.bf16.gmra.mxu0 %vm646_vm1, %v1267_v21  ;;  %v2315_v59 = vsel %vm425_vm0, %v2310_v45, %v2314_v26  ;;  %v2363_v21 = vsel %vm425_vm0, %v2358_v37, %v2362_v49  ;;  %v8328_v49 = vld [vmem:[%s7880_s9 + $0x8c] sm:$0xff]  }
  0xbd   : > { %7082 = vmatprep.mubr.msk.bf16.mxu1 %vm646_vm1, %v8020_v15  ;;  %7138 = vmatprep.mubr.msk.bf16.mxu0 %vm646_vm1, %v1269_v25  ;;  %v2318_v15 = vor.u32 %v2316_v29, %v2314_v26  ;;  %v2376_v26 = vshll.u32 %v8255_v9, 16  ;;  %v2370_v25 = vrot.slane %v2368_v0, 1  ;;  %v8279_v29 = vld [vmem:[%s7880_s9 + $0x64] sm:$0xff]  }
  0xbe   : > { %v2392_v14 = vshll.u32 %v8279_v29, 16 }
  0xbf   : > { %v2323_v46 = vsel %vm425_vm0, %v2318_v15, %v2322_v30  ;;  %v2374_v45 = vor.u32 %v2372_v23, %v2370_v25  ;;  %v2384_v30 = vshll.u32 %v8274_v31, 16  ;;  %v2371_v33 = vsel %vm425_vm0, %v2366_v27, %v2370_v25 }
  0xc4   : > { %7083 = vmatmul.mubr.msk.bf16.gmra.mxu1 %vm646_vm1, %v8034_v34  ;;  %7139 = vmatmul.mubr.msk.bf16.gmra.mxu0 %vm646_vm1, %v1271_v5  ;;  %v2332_v34 = vshrl.u32 %v8194_v28, 16  ;;  %v7598_v5 = vld [vmem:[%s7880_s9 + $0x44] sm:$0xff]  }
  0xc5   : > { %7150 = vmatprep.mubr.msk.bf16.mxu1 %vm646_vm1, %v7581_v47  ;;  %7206 = vmatprep.mubr.msk.bf16.mxu0 %vm646_vm1, %v2315_v59  ;;  %v2378_v47 = vrot.slane %v2376_v26, 1  ;;  %v7602_v59 = vld [vmem:[%s7880_s9 + $0x4c] sm:$0xff]   ;;  %v7616_v26 = vld [vmem:[%s7880_s9 + $0x7c] sm:$0xff]  }
  0xc6   : > { %v2334_v24 = vor.u32 %v2332_v34, %v2330_v39  ;;  %v2388_v39 = vshrl.u32 %v8274_v31, 16  ;;  %v2394_v34 = vrot.slane %v2392_v14, 1 }
  0xc7   : > { %v2379_v15 = vsel %vm425_vm0, %v2374_v45, %v2378_v47  ;;  %v2436_v45 = vshrl.u32 %v8328_v49, 16 }
  0xcc   : > { %7151 = vmatmul.mubr.msk.bf16.vlgmr.msra.gmra.mxu1 %vm646_vm1, %v7584_v42  ;;  %7207 = vmatmul.mubr.msk.bf16.vlgmr.msra.gmra.mxu0 %vm646_vm1, %v2323_v46  ;;  %v2386_v42 = vrot.slane %v2384_v30, 1  ;;  %v2382_v46 = vor.u32 %v2380_v36, %v2378_v47 }
  0xcd   : > { %7255 = vmatpush3.bf16.msra.mxu1 %v8091_v43  ;;  %7311 = vmatpush3.bf16.msra.mxu0 %v8093_v44  ;;  %v2339_v43 = vsel %vm425_vm0, %v2334_v24, %v2338_v52  ;;  %v7592_v44 = vld [vmem:[%s7880_s9 + $0x2c] sm:$0xff]   ;;  %v2396_v52 = vshrl.u32 %v8279_v29, 16 }
  0xce   : > { %7154 = vmatprep.mubr.msk.bf16.mxu1 %vm646_vm1, %v7588_v41  ;;  %7210 = vmatprep.mubr.msk.bf16.mxu0 %vm646_vm1, %v2331_v51  ;;  %v2390_v41 = vor.u32 %v2388_v39, %v2386_v42  ;;  %v2400_v51 = vshll.u32 %v8292_v35, 16 }
  0xcf   : > { %7256 = vmatprep.subr.bf16.mxu1 %v7600_v62  ;;  %7312 = vmatprep.subr.bf16.mxu0 %v7601_v3 }
  0xd0   : > { %v2395_v24 = vsel %vm425_vm0, %v2390_v41, %v2394_v34 }
  0xd1   : > { %7257 = vmatpush3.bf16.msra.mxu1 %v7600_v62  ;;  %7313 = vmatpush3.bf16.msra.mxu0 %v7601_v3  ;;  %v2387_v62 = vsel %vm425_vm0, %v2382_v46, %v2386_v42  ;;  %v7606_v3 = vld [vmem:[%s7880_s9 + $0x5c] sm:$0xff]   ;;  %v8355_v46 = vld [vmem:[%s7880_s9 + $0xa4] sm:$0xff]  }
  0xd2   : > { %7258 = vmatprep.subr.bf16.mxu1 %v7614_v56  ;;  %7314 = vmatprep.subr.bf16.mxu0 %v7615_v10 }
  0xd4   : > { %7155 = vmatmul.mubr.msk.bf16.gmra.mxu1 %vm646_vm1, %v7590_v57  ;;  %7211 = vmatmul.mubr.msk.bf16.gmra.mxu0 %vm646_vm1, %v2339_v43  ;;  %v2398_v57 = vor.u32 %v2396_v52, %v2394_v34  ;;  %v2410_v43 = vrot.slane %v2408_v54, 1 }
  0xd5   : > { %7158 = vmatprep.mubr.msk.bf16.mxu1 %vm646_vm1, %v7592_v44  ;;  %7214 = vmatprep.mubr.msk.bf16.mxu0 %vm646_vm1, %v2347_v32  ;;  %v8315_v44 = vld [vmem:[%s7880_s9 + $0x84] sm:$0xff]  }
  0xd6   : > { %7259 = vmatpush3.bf16.msra.mxu1 %v7614_v56  ;;  %7315 = vmatpush3.bf16.msra.mxu0 %v7615_v10  ;;  %v2402_v56 = vrot.slane %v2400_v51, 1  ;;  %v8310_v10 = vld [vmem:[%s7880_s9 + $0x7c] sm:$0xff]   ;;  %v2424_v7 = vshll.u32 %v8315_v44, 16  ;;  %v2428_v25 = vshrl.u32 %v8315_v44, 16 }
  0xd7   : > { %7260 = vmatprep.subr.bf16.mxu1 %v7628_v13  ;;  %7316 = vmatprep.subr.bf16.mxu0 %v7629_v22  ;;  %v2416_v32 = vshll.u32 %v8310_v10, 16  ;;  %v2420_v63 = vshrl.u32 %v8310_v10, 16 }
  0xd8   : > { %v2406_v58 = vor.u32 %v2404_v38, %v2402_v56  ;;  %v2403_v60 = vsel %vm425_vm0, %v2398_v57, %v2402_v56  ;;  %v2456_v57 = vshll.u32 %v8355_v46, 16 }
  0xd9   : > { %v2418_v37 = vrot.slane %v2416_v32, 1  ;;  %v8380_v32 = vld [vmem:[%s7880_s9 + $0xac] sm:$0xff]  }
  0xda   : > { %7261 = vmatpush3.bf16.msra.mxu1 %v7628_v13  ;;  %7317 = vmatpush3.bf16.msra.mxu0 %v7629_v22  ;;  %v2412_v13 = vshrl.u32 %v8297_v48, 16  ;;  %v2411_v22 = vsel %vm425_vm0, %v2406_v58, %v2410_v43 }
  0xdb   : > { %7366 = vmatprep.subr.bf16.mxu1 %v8257_v11  ;;  %7422 = vmatprep.subr.bf16.mxu0 %v8259_v16  ;;  %v2422_v0 = vor.u32 %v2420_v63, %v2418_v37  ;;  %v2458_v63 = vrot.slane %v2456_v57, 1 }
  0xdc   : > { %7159 = vmatmul.mubr.msk.bf16.gmra.mxu1 %vm646_vm1, %v7594_v18  ;;  %7215 = vmatmul.mubr.msk.bf16.gmra.mxu0 %vm646_vm1, %v2355_v19  ;;  %v2414_v18 = vor.u32 %v2412_v13, %v2410_v43  ;;  %v2426_v19 = vrot.slane %v2424_v7, 1  ;;  %v8389_v7 = vld [vmem:[%s7880_s9 + $0xb4] sm:$0xff]  }
  0xdd   : > { %7162 = vmatprep.mubr.msk.bf16.mxu1 %vm646_vm1, %v7596_v4  ;;  %7218 = vmatprep.mubr.msk.bf16.mxu0 %vm646_vm1, %v2363_v21  ;;  %v8333_v4 = vld [vmem:[%s7880_s9 + $0x94] sm:$0xff]   ;;  %v2432_v21 = vshll.u32 %v8328_v49, 16 }
  0xde   : > { %v2419_v23 = vsel %vm425_vm0, %v2414_v18, %v2418_v37  ;;  %v2427_v27 = vsel %vm425_vm0, %v2422_v0, %v2426_v19  ;;  %v2440_v47 = vshll.u32 %v8333_v4, 16  ;;  %v2430_v36 = vor.u32 %v2428_v25, %v2426_v19  ;;  %v7622_v0 = vld [vmem:[%s7880_s9 + $0x94] sm:$0xff]  }
  0xdf   : > { %v2444_v52 = vshrl.u32 %v8333_v4, 16  ;;  %v2464_v19 = vshll.u32 %v8380_v32, 16 }
  0xe0   : > { %v2442_v42 = vrot.slane %v2440_v47, 1  ;;  %v2472_v47 = vshll.u32 %v8389_v7, 16 }
  0xe4   : > { %7163 = vmatmul.mubr.msk.bf16.gmra.mxu1 %vm646_vm1, %v7598_v5  ;;  %7219 = vmatmul.mubr.msk.bf16.gmra.mxu0 %vm646_vm1, %v2371_v33  ;;  %v2434_v33 = vrot.slane %v2432_v21, 1  ;;  %v7624_v21 = vld [vmem:[%s7880_s9 + $0x9c] sm:$0xff]  }
  0xe5   : > { %7166 = vmatprep.mubr.msk.bf16.mxu1 %vm646_vm1, %v7602_v59  ;;  %7222 = vmatprep.mubr.msk.bf16.mxu0 %vm646_vm1, %v2379_v15  ;;  %v8346_v59 = vld [vmem:[%s7880_s9 + $0x9c] sm:$0xff]  }
  0xe6   : > { %v2438_v14 = vor.u32 %v2436_v45, %v2434_v33  ;;  %v2448_v51 = vshll.u32 %v8346_v59, 16  ;;  %v2452_v56 = vshrl.u32 %v8346_v59, 16  ;;  %v2468_v45 = vshrl.u32 %v8380_v32, 16 }
  0xe8   : > { %v2443_v54 = vsel %vm425_vm0, %v2438_v14, %v2442_v42 }
  0xec   : > { %7167 = vmatmul.mubr.msk.bf16.gmra.mxu1 %vm646_vm1, %v7604_v50  ;;  %7223 = vmatmul.mubr.msk.bf16.gmra.mxu0 %vm646_vm1, %v2387_v62  ;;  %v7618_v50 = vld [vmem:[%s7880_s9 + $0x84] sm:$0xff]   ;;  %v2435_v62 = vsel %vm425_vm0, %v2430_v36, %v2434_v33  ;;  %v2466_v33 = vrot.slane %v2464_v19, 1  ;;  %v8410_v36 = vld [vmem:[%s7880_s9 + $0xbc] sm:$0xff]  }
  0xed   : > { %7170 = vmatprep.mubr.msk.bf16.mxu1 %vm646_vm1, %v7606_v3  ;;  %7226 = vmatprep.mubr.msk.bf16.mxu0 %vm646_vm1, %v2395_v24  ;;  %v7620_v3 = vld [vmem:[%s7880_s9 + $0x8c] sm:$0xff]   ;;  %v2480_v57 = vshll.u32 %v8410_v36, 16 }
  0xf4   : > { %7171 = vmatmul.mubr.msk.bf16.gmra.mxu1 %vm646_vm1, %v7608_v12  ;;  %7227 = vmatmul.mubr.msk.bf16.gmra.mxu0 %vm646_vm1, %v2403_v60  ;;  %v2450_v12 = vrot.slane %v2448_v51, 1  ;;  %v2446_v60 = vor.u32 %v2444_v52, %v2442_v42  ;;  %v2470_v51 = vor.u32 %v2468_v45, %v2466_v33  ;;  %v8434_v45 = vld [vmem:[%s7880_s9 + $0xcc] ss:$0 sps:$4 sm:$0x11]  }
  0xf5   : > { %7174 = vmatprep.mubr.msk.bf16.mxu1 %vm646_vm1, %v7610_v61  ;;  %7230 = vmatprep.mubr.msk.bf16.mxu0 %vm646_vm1, %v2411_v22  ;;  %9431 = vst [vmem:[#allocation8_spill] sm:$0xff] %v8434_v45 }
  0xf6   : > { %v2454_v22 = vor.u32 %v2452_v56, %v2450_v12  ;;  %v7626_v56 = vld [vmem:[%s7880_s9 + $0xa4] sm:$0xff]  }
  0xfc   : > { %v6984_v5 = vpop.f32.mrf.mxu0  ;;  %v7008_v30 = vpop.f32.mrf.mxu1  ;;  %7175 = vmatmul.mubr.msk.bf16.gmra.mxu1 %vm646_vm1, %v7612_v20  ;;  %7231 = vmatmul.mubr.msk.bf16.gmra.mxu0 %vm646_vm1, %v2419_v23  ;;  %v2451_v20 = vsel %vm425_vm0, %v2446_v60, %v2450_v12  ;;  %v2460_v23 = vshrl.u32 %v8355_v46, 16  ;;  %v7630_v60 = vld [vmem:[%s7880_s9 + $0xac] sm:$0xff]  }
  0xfd   : > { %7178 = vmatprep.mubr.msk.bf16.mxu1 %vm646_vm1, %v7616_v26  ;;  %7234 = vmatprep.mubr.msk.bf16.mxu0 %vm646_vm1, %v2427_v27  ;;  %v2459_v27 = vsel %vm425_vm0, %v2454_v22, %v2458_v63  ;;  %v2476_v22 = vshrl.u32 %v8389_v7, 16 }
  0xfe   : > { %v8350_v15 = vpop.f32.mrf.mxu0  ;;  %v8352_v39 = vpop.f32.mrf.mxu1  ;;  %v2462_v14 = vor.u32 %v2460_v23, %v2458_v63 }
 0x100   : > { %v8357_v41 = vpop.f32.mrf.mxu0  ;;  %v8359_v34 = vpop.f32.mrf.mxu1  ;;  %v2467_v12 = vsel %vm425_vm0, %v2462_v14, %v2466_v33 }
 0x102   : > { %v8366_v24 = vpop.f32.mrf.mxu0  ;;  %v8368_v38 = vpop.f32.mrf.mxu1 }
 0x104   : > { %v8373_v58 = vpop.f32.mrf.mxu0  ;;  %v8375_v43 = vpop.f32.mrf.mxu1  ;;  %7179 = vmatmul.mubr.msk.bf16.gmra.mxu1 %vm646_vm1, %v7618_v50  ;;  %7235 = vmatmul.mubr.msk.bf16.gmra.mxu0 %vm646_vm1, %v2435_v62  ;;  %v2474_v62 = vrot.slane %v2472_v47, 1 }
 0x105   : > { %7182 = vmatprep.mubr.msk.bf16.mxu1 %vm646_vm1, %v7620_v3  ;;  %7238 = vmatprep.mubr.msk.bf16.mxu0 %vm646_vm1, %v2443_v54  ;;  %v8415_v3 = vld [vmem:[%s7880_s9 + $0xc4] sm:$0xff]  }
 0x106   : > { %v8384_v61 = vpop.f32.mrf.mxu0  ;;  %v8386_v13 = vpop.f32.mrf.mxu1  ;;  %v2475_v19 = vsel %vm425_vm0, %v2470_v51, %v2474_v62 }
 0x108   : > { %v8391_v37 = vpop.f32.mrf.mxu0  ;;  %v8393_v18 = vpop.f32.mrf.mxu1 }
 0x10a   : > { %v771_v26 = vpop.f32.mrf.mxu0  ;;  %v859_v25 = vpop.f32.mrf.mxu1 }
 0x10b   : > { %v2482_v25 = vrot.slane %v2480_v57, 1  ;;  %v7634_v57 = vld [vmem:[%s7880_s9 + $0xbc] sm:$0xff]  }
 0x10c   : > { %v8403_v5 = vpop.f32.mrf.mxu0  ;;  %v8405_v30 = vpop.f32.mrf.mxu1  ;;  %7183 = vmatmul.mubr.msk.bf16.gmra.mxu1 %vm646_vm1, %v7622_v0  ;;  %7239 = vmatmul.mubr.msk.bf16.gmra.mxu0 %vm646_vm1, %v2451_v20  ;;  %v2484_v20 = vshrl.u32 %v8410_v36, 16 }
 0x10d   : > { %7186 = vmatprep.mubr.msk.bf16.mxu1 %vm646_vm1, %v7624_v21  ;;  %7242 = vmatprep.mubr.msk.bf16.mxu0 %vm646_vm1, %v2459_v27  ;;  %v2488_v21 = vshll.u32 %v8415_v3, 16  ;;  %v2478_v27 = vor.u32 %v2476_v22, %v2474_v62  ;;  %v2492_v62 = vshrl.u32 %v8415_v3, 16 }
 0x10e   : > { %v783_v42 = vpop.f32.mrf.mxu0  ;;  %v871_v50 = vpop.f32.mrf.mxu1  ;;  %v2486_v14 = vor.u32 %v2484_v20, %v2482_v25 }
 0x10f   : > { %v2490_v42 = vrot.slane %v2488_v21, 1  ;;  %v2837_v50 = vld [vmem:[%s7880_s9 + $0xc] sm:$0xe] }
 0x110   : > { %v6993_v52 = vpop.f32.mrf.mxu0  ;;  %v7017_v54 = vpop.f32.mrf.mxu1  ;;  %v6363_v20 = vcombine.low %v2837_v50, %v8160_v2  ;;  %v2851_v50 = vrot.slane %v8169_v8, 1  ;;  %v2853_v8 = vrot.slane %v8184_v17, 1 }
 0x111   : > { %v7632_v54 = vld [vmem:[%s7880_s9 + $0xb4] sm:$0xff]  }
 0x112   : > { %v8422_v0 = vpop.f32.mrf.mxu0  ;;  %v8424_v63 = vpop.f32.mrf.mxu1  ;;  %v2850_v2 = vrot.slane %v6363_v20, 1 }
 0x114   : > { %v6996_v23 = vpop.f32.mrf.mxu0  ;;  %v7020_v26 = vpop.f32.mrf.mxu1  ;;  %7187 = vmatmul.mubr.msk.bf16.gmra.mxu1 %vm646_vm1, %v7626_v56  ;;  %7243 = vmatmul.mubr.msk.bf16.gmra.mxu0 %vm646_vm1, %v2467_v12  ;;  %v2483_v56 = vsel %vm425_vm0, %v2478_v27, %v2482_v25  ;;  %v2496_v12 = vshll.u32 %v8434_v45, 16 }
 0x115   : > { %7190 = vmatprep.mubr.msk.bf16.mxu1 %vm646_vm1, %v7630_v60  ;;  %7246 = vmatprep.mubr.msk.bf16.mxu0 %vm646_vm1, %v2475_v19  ;;  %v2491_v19 = vsel %vm425_vm0, %v2486_v14, %v2490_v42  ;;  %v2494_v26 = vor.u32 %v2492_v62, %v2490_v42  ;;  %v2852_v62 = vsel %vm1222_vm2, %v2850_v2, %v2851_v50 }
 0x116   : > { %v8436_v47 = vpop.f32.mrf.mxu0  ;;  %v8438_v33 = vpop.f32.mrf.mxu1  ;;  %v2498_v25 = vrot.slane %v2496_v12, 1 }
 0x118   : > { %v8441_v51 = vpop.f32.mrf.mxu0  ;;  %v8443_v52 = vpop.f32.mrf.mxu1 }
 0x119   : > { %9432 = vst [vmem:[#allocation9_spill] sm:$0xff] %v8443_v52 }
 0x11a   : > { %v8450_v60 = vpop.f32.mrf.mxu0  ;;  %v8452_v22 = vpop.f32.mrf.mxu1 }
 0x11b   : > { %9433 = vst [vmem:[#allocation10_spill] sm:$0xff] %v8452_v22  ;;  %v7639_v22 = vld [vmem:[%s7880_s9 + $0x18] sm:$0xff]  }
 0x11c   : > { %v8456_v21 = vpop.f32.mrf.mxu0  ;;  %v8458_v23 = vpop.f32.mrf.mxu1  ;;  %7191 = vmatmul.mubr.msk.bf16.gmra.mxu1 %vm646_vm1, %v7632_v54  ;;  %7247 = vmatmul.mubr.msk.bf16.gmra.mxu0 %vm646_vm1, %v2483_v56  ;;  %v7636_v54 = vld [vmem:[%s7880_s9 + $0xc4] sm:$0xff]   ;;  %v2499_v56 = vsel %vm425_vm0, %v2494_v26, %v2498_v25  ;;  %v2855_v25 = vrot.slane %v8194_v28, 1  ;;  %v2857_v28 = vrot.slane %v8209_v6, 1 }
 0x11d   : > { %9434 = vst [vmem:[#allocation11_spill] sm:$0xff] %v8458_v23  ;;  %7194 = vmatprep.mubr.msk.bf16.mxu1 %vm646_vm1, %v7634_v57  ;;  %7250 = vmatprep.mubr.msk.bf16.mxu0 %vm646_vm1, %v2491_v19 }
 0x11e   : > { %v8464_v27 = vpop.f32.mrf.mxu0  ;;  %v8466_v14 = vpop.f32.mrf.mxu1 }
 0x11f   : > { %9435 = vst [vmem:[#allocation12_spill] sm:$0xff] %v8466_v14  ;;  %v7649_v14 = vld [vmem:[#allocation2 + $0xf0] sm:$0xff]  }
 0x120   : > { %v8469_v45 = vpop.f32.mrf.mxu0  ;;  %v8471_v23 = vpop.f32.mrf.mxu1 }
 0x121   : > { %9436 = vst [vmem:[#allocation13_spill] sm:$0xff] %v8471_v23  ;;  %v2854_v23 = vsel %vm1222_vm2, %v2851_v50, %v2853_v8 }
 0x122   : > { %v815_v42 = vpop.f32.mrf.mxu0  ;;  %v903_v57 = vpop.f32.mrf.mxu1 }
 0x123   : > { %v7640_v57 = vld [vmem:[%s7880_s9 + $0x20] sm:$0xff]  }
 0x124   : > { %v8477_v12 = vpop.f32.mrf.mxu0  ;;  %v8479_v19 = vpop.f32.mrf.mxu1  ;;  %7195 = vmatmul.mubr.msk.bf16.gmra.mxu1 %vm646_vm1, %v7636_v54  ;;  %7251 = vmatmul.mubr.msk.bf16.gmra.mxu0 %vm646_vm1, %v2499_v56  ;;  %v7643_v56 = vld [vmem:[%s7880_s9 + $0x28] sm:$0xff]  }
 0x125   : > { %9437 = vst [vmem:[#allocation14_spill] sm:$0xff] %v8479_v19  ;;  %7262 = vmatprep.mubr.msk.bf16.mxu1 %vm646_vm1, %v2852_v62  ;;  %7318 = vmatprep.mubr.msk.bf16.mxu0 %vm646_vm1, %v7639_v22  ;;  %v2856_v62 = vsel %vm1222_vm2, %v2853_v8, %v2855_v25  ;;  %v7650_v22 = vld [vmem:[#allocation2 + $0x110] sm:$0xff]   ;;  %v7657_v8 = vld [vmem:[#allocation2 + $0xe8] sm:$0xff]  }
 0x126   : > { %v827_v20 = vpop.f32.mrf.mxu0  ;;  %v915_v26 = vpop.f32.mrf.mxu1 }
 0x128   : > { %v7005_v2 = vpop.f32.mrf.mxu0  ;;  %v7029_v42 = vpop.f32.mrf.mxu1 }
 0x12a   : > { %v8489_v19 = vpop.f32.mrf.mxu0  ;;  %v8491_v54 = vpop.f32.mrf.mxu1 }
 0x12b   : > { %9438 = vst [vmem:[#allocation15_spill] sm:$0xff] %v8491_v54  ;;  %v7665_v54 = vld [vmem:[#allocation2 + $0xe0] sm:$0xff]  }
 0x12c   : > { %v7040_v52 = vpop.f32.mrf.mxu1  ;;  %v7096_v17 = vpop.f32.mrf.mxu0  ;;  %7263 = vmatmul.mubr.msk.bf16.vlgmr.msra.gmra.mxu1 %vm646_vm1, %v2854_v23  ;;  %7319 = vmatmul.mubr.msk.bf16.vlgmr.msra.gmra.mxu0 %vm646_vm1, %v7640_v57  ;;  %v7658_v23 = vld [vmem:[#allocation2 + $0x108] sm:$0xff]   ;;  %v2858_v57 = vsel %vm1222_vm2, %v2855_v25, %v2857_v28  ;;  %v2861_v25 = vrot.slane %v8230_v53, 1 }
 0x12d   : > { %7367 = vmatpush3.bf16.msra.mxu1 %v8257_v11  ;;  %7423 = vmatpush3.bf16.msra.mxu0 %v8259_v16  ;;  %v2859_v52 = vrot.slane %v8217_v40, 1  ;;  %v7644_v16 = vld [vmem:[%s7880_s9 + $0x30] sm:$0xff]  }
 0x12e   : > { %v1034_v50 = vpop.f32.mrf.mxu1  ;;  %v1402_v20 = vpop.f32.mrf.mxu0  ;;  %7266 = vmatprep.mubr.msk.bf16.mxu1 %vm646_vm1, %v2856_v62  ;;  %7322 = vmatprep.mubr.msk.bf16.mxu0 %vm646_vm1, %v7643_v56  ;;  %v7645_v62 = vld [vmem:[%s7880_s9 + $0x38] sm:$0xff]  }
 0x12f   : > { %v1035_v26 = vadd.f32 %v1034_v50, %v8350_v15  ;;  %7368 = vmatprep.subr.bf16.mxu1 %v7649_v14  ;;  %7424 = vmatprep.subr.bf16.mxu0 %v7650_v22  ;;  %v2860_v17 = vsel %vm1222_vm2, %v2857_v28, %v2859_v52  ;;  %v2863_v28 = vrot.slane %v8237_v55, 1 }
 0x130   : > { %v7041_v11 = vpop.f32.mrf.mxu1  ;;  %v7097_v2 = vpop.f32.mrf.mxu0 }
 0x131   : > { %v8505_v42 = vadd.f32 %v1402_v20, %v1035_v26  ;;  %v1045_v6 = vadd.f32 %v7041_v11, %v8357_v41  ;;  %7369 = vmatpush3.bf16.msra.mxu1 %v7649_v14  ;;  %7425 = vmatpush3.bf16.msra.mxu0 %v7650_v22  ;;  %v7666_v20 = vld [vmem:[#allocation2 + $0x100] sm:$0xff]  }
 0x132   : > { %v1037_v56 = vpop.f32.mrf.mxu1  ;;  %v1405_v40 = vpop.f32.mrf.mxu0  ;;  %7370 = vmatprep.subr.bf16.mxu1 %v7657_v8  ;;  %7426 = vmatprep.subr.bf16.mxu0 %v7658_v23 }
 0x133   : > { %9439 = vst [vmem:[#allocation16_spill] sm:$0xff] %v8505_v42  ;;  %v8511_v15 = vadd.f32 %v7097_v2, %v1045_v6  ;;  %v1038_v50 = vadd.f32 %v1037_v56, %v8366_v24  ;;  %v7646_v6 = vld [vmem:[%s7880_s9 + $0x40] sm:$0xff]   ;;  %v7647_v56 = vld [vmem:[%s7880_s9 + $0x48] sm:$0xff]  }
 0x134   : > { %v7044_v26 = vpop.f32.mrf.mxu1  ;;  %v7100_v42 = vpop.f32.mrf.mxu0  ;;  %7267 = vmatmul.mubr.msk.bf16.gmra.mxu1 %vm646_vm1, %v2858_v57  ;;  %7323 = vmatmul.mubr.msk.bf16.gmra.mxu0 %vm646_vm1, %v7644_v16 }
 0x135   : > { %v8516_v41 = vadd.f32 %v1405_v40, %v1038_v50  ;;  %v1057_v14 = vadd.f32 %v7044_v26, %v8373_v58  ;;  %7270 = vmatprep.mubr.msk.bf16.mxu1 %vm646_vm1, %v2860_v17  ;;  %7326 = vmatprep.mubr.msk.bf16.mxu0 %vm646_vm1, %v7645_v62  ;;  %v2862_v62 = vsel %vm1222_vm2, %v2859_v52, %v2861_v25  ;;  %v2865_v52 = vrot.slane %v8250_v1, 1 }
 0x136   : > { %v1049_v24 = vpop.f32.mrf.mxu1  ;;  %v1417_v22 = vpop.f32.mrf.mxu0  ;;  %7371 = vmatpush3.bf16.msra.mxu1 %v7657_v8  ;;  %7427 = vmatpush3.bf16.msra.mxu0 %v7658_v23  ;;  %v2864_v8 = vsel %vm1222_vm2, %v2861_v25, %v2863_v28  ;;  %v2867_v50 = vrot.slane %v8255_v9, 1  ;;  %v7648_v25 = vld [vmem:[%s7880_s9 + $0x50] sm:$0xff]  }
 0x137   : > { %v8523_v11 = vadd.f32 %v7100_v42, %v1057_v14  ;;  %v1050_v2 = vadd.f32 %v1049_v24, %v8384_v61  ;;  %7372 = vmatprep.subr.bf16.mxu1 %v7665_v54  ;;  %7428 = vmatprep.subr.bf16.mxu0 %v7666_v20  ;;  %v2866_v24 = vsel %vm1222_vm2, %v2863_v28, %v2865_v52  ;;  %v2869_v28 = vrot.slane %v8274_v31, 1 }
 0x138   : > { %v7045_v58 = vpop.f32.mrf.mxu1  ;;  %v7101_v16 = vpop.f32.mrf.mxu0 }
 0x139   : > { %v8527_v57 = vadd.f32 %v1417_v22, %v1050_v2  ;;  %v1060_v53 = vadd.f32 %v7045_v58, %v8391_v37  ;;  %v7651_v22 = vld [vmem:[%s7880_s9 + $0x58] sm:$0xff]   ;;  %v2868_v58 = vsel %vm1222_vm2, %v2865_v52, %v2867_v50  ;;  %v7653_v52 = vld [vmem:[%s7880_s9 + $0x68] sm:$0xff]  }
 0x13a   : > { %v1052_v40 = vpop.f32.mrf.mxu1  ;;  %v1420_v55 = vpop.f32.mrf.mxu0  ;;  %7373 = vmatpush3.bf16.msra.mxu1 %v7665_v54  ;;  %7429 = vmatpush3.bf16.msra.mxu0 %v7666_v20 }
 0x13b   : > { %v8533_v61 = vadd.f32 %v7101_v16, %v1060_v53 }
 0x13c   : > { %v7048_v23 = vpop.f32.mrf.mxu1  ;;  %v7104_v42 = vpop.f32.mrf.mxu0  ;;  %7271 = vmatmul.mubr.msk.bf16.gmra.mxu1 %vm646_vm1, %v2862_v62  ;;  %7327 = vmatmul.mubr.msk.bf16.gmra.mxu0 %vm646_vm1, %v7646_v6 }
 0x13d   : > { %v1072_v37 = vadd.f32 %v7048_v23, %v8403_v5  ;;  %7274 = vmatprep.mubr.msk.bf16.mxu1 %vm646_vm1, %v2864_v8  ;;  %7330 = vmatprep.mubr.msk.bf16.mxu0 %vm646_vm1, %v7647_v56  ;;  %v2871_v56 = vrot.slane %v8279_v29, 1  ;;  %v7652_v8 = vld [vmem:[%s7880_s9 + $0x60] sm:$0xff]  }
 0x13e   : > { %v1064_v54 = vpop.f32.mrf.mxu1  ;;  %v1432_v17 = vpop.f32.mrf.mxu0 }
 0x13f   : > { %v8542_v20 = vadd.f32 %v7104_v42, %v1072_v37  ;;  %v2870_v37 = vsel %vm1222_vm2, %v2867_v50, %v2869_v28  ;;  %v2872_v31 = vsel %vm1222_vm2, %v2869_v28, %v2871_v56  ;;  %v2873_v50 = vrot.slane %v8292_v35, 1 }
 0x140   : > { %v7049_v26 = vpop.f32.mrf.mxu1  ;;  %v7105_v14 = vpop.f32.mrf.mxu0 }
 0x141   : > { %v2874_v28 = vsel %vm1222_vm2, %v2871_v56, %v2873_v50 }
 0x142   : > { %v1066_v2 = vpop.f32.mrf.mxu1  ;;  %v1434_v5 = vpop.f32.mrf.mxu0 }
 0x143   : > { %v1067_v16 = vadd.f32 %v1066_v2, %v8422_v0 }
 0x144   : > { %v7052_v1 = vpop.f32.mrf.mxu1  ;;  %v7108_v6 = vpop.f32.mrf.mxu0  ;;  %7275 = vmatmul.mubr.msk.bf16.gmra.mxu1 %vm646_vm1, %v2866_v24  ;;  %7331 = vmatmul.mubr.msk.bf16.gmra.mxu0 %vm646_vm1, %v7648_v25 }
 0x145   : > { %v8551_v9 = vadd.f32 %v1434_v5, %v1067_v16  ;;  %7278 = vmatprep.mubr.msk.bf16.mxu1 %vm646_vm1, %v2868_v58  ;;  %7334 = vmatprep.mubr.msk.bf16.mxu0 %vm646_vm1, %v7651_v22  ;;  %v2875_v22 = vrot.slane %v8297_v48, 1  ;;  %v7654_v1 = vld [vmem:[%s7880_s9 + $0x70] sm:$0xff]  }
 0x146   : > { %v1078_v53 = vpop.f32.mrf.mxu1  ;;  %v1446_v62 = vpop.f32.mrf.mxu0 }
 0x147   : > { %v1079_v0 = vadd.f32 %v1078_v53, %v8436_v47  ;;  %v7655_v53 = vld [vmem:[%s7880_s9 + $0x78] sm:$0xff]  }
 0x148   : > { %v7053_v40 = vpop.f32.mrf.mxu1  ;;  %v7109_v55 = vpop.f32.mrf.mxu0 }
 0x149   : > { %v8559_v23 = vadd.f32 %v1446_v62, %v1079_v0  ;;  %v1089_v42 = vadd.f32 %v7053_v40, %v8441_v51  ;;  %v2876_v0 = vsel %vm1222_vm2, %v2873_v50, %v2875_v22 }
 0x14a   : > { %v1081_v54 = vpop.f32.mrf.mxu1  ;;  %v1449_v17 = vpop.f32.mrf.mxu0 }
 0x14b   : > { %v8565_v26 = vadd.f32 %v7109_v55, %v1089_v42  ;;  %v1082_v29 = vadd.f32 %v1081_v54, %v8450_v60  ;;  %v2879_v42 = vrot.slane %v8315_v44, 1 }
 0x14c   : > { %v7056_v14 = vpop.f32.mrf.mxu1  ;;  %v7112_v47 = vpop.f32.mrf.mxu0  ;;  %7279 = vmatmul.mubr.msk.bf16.gmra.mxu1 %vm646_vm1, %v2870_v37  ;;  %7335 = vmatmul.mubr.msk.bf16.gmra.mxu0 %vm646_vm1, %v7652_v8 }
 0x14d   : > { %v8570_v25 = vadd.f32 %v1449_v17, %v1082_v29  ;;  %v1101_v51 = vadd.f32 %v7056_v14, %v8456_v21  ;;  %7282 = vmatprep.mubr.msk.bf16.mxu1 %vm646_vm1, %v2872_v31  ;;  %7338 = vmatprep.mubr.msk.bf16.mxu0 %vm646_vm1, %v7653_v52  ;;  %v7656_v17 = vld [vmem:[%s7880_s9 + $0x80] sm:$0xff]   ;;  %v7659_v29 = vld [vmem:[%s7880_s9 + $0x88] sm:$0xff]  }
 0x14e   : > { %v1093_v24 = vpop.f32.mrf.mxu1  ;;  %v1461_v60 = vpop.f32.mrf.mxu0 }
 0x14f   : > { %v8577_v2 = vadd.f32 %v7112_v47, %v1101_v51  ;;  %v1094_v5 = vadd.f32 %v1093_v24, %v8464_v27  ;;  %v2881_v24 = vrot.slane %v8328_v49, 1 }
 0x150   : > { %v7057_v58 = vpop.f32.mrf.mxu1  ;;  %v7113_v16 = vpop.f32.mrf.mxu0 }
 0x151   : > { %v8581_v6 = vadd.f32 %v1461_v60, %v1094_v5  ;;  %v1104_v21 = vadd.f32 %v7057_v58, %v8469_v45  ;;  %v2877_v45 = vrot.slane %v8310_v10, 1  ;;  %v2883_v5 = vrot.slane %v8333_v4, 1 }
 0x152   : > { %v1096_v62 = vpop.f32.mrf.mxu1  ;;  %v1464_v35 = vpop.f32.mrf.mxu0 }
 0x153   : > { %v8587_v48 = vadd.f32 %v7113_v16, %v1104_v21  ;;  %v2878_v31 = vsel %vm1222_vm2, %v2875_v22, %v2877_v45  ;;  %v2880_v47 = vsel %vm1222_vm2, %v2877_v45, %v2879_v42  ;;  %v7661_v62 = vld [vmem:[%s7880_s9 + $0x98] sm:$0xff]   ;;  %v2884_v49 = vsel %vm1222_vm2, %v2881_v24, %v2883_v5 }
 0x154   : > { %v7060_v40 = vpop.f32.mrf.mxu1  ;;  %v7116_v27 = vpop.f32.mrf.mxu0  ;;  %7283 = vmatmul.mubr.msk.bf16.gmra.mxu1 %vm646_vm1, %v2874_v28  ;;  %7339 = vmatmul.mubr.msk.bf16.gmra.mxu0 %vm646_vm1, %v7654_v1  ;;  %v7660_v1 = vld [vmem:[%s7880_s9 + $0x90] sm:$0xff]   ;;  %v2885_v45 = vrot.slane %v8346_v59, 1 }
 0x155   : > { %v1116_v55 = vadd.f32 %v7060_v40, %v8477_v12  ;;  %7286 = vmatprep.mubr.msk.bf16.mxu1 %vm646_vm1, %v2876_v0  ;;  %7342 = vmatprep.mubr.msk.bf16.mxu0 %vm646_vm1, %v7655_v53  ;;  %v2882_v53 = vsel %vm1222_vm2, %v2879_v42, %v2881_v24 }
 0x156   : > { %v1108_v56 = vpop.f32.mrf.mxu1  ;;  %v1476_v8 = vpop.f32.mrf.mxu0 }
 0x157   : > { %v8596_v37 = vadd.f32 %v7116_v27, %v1116_v55  ;;  %v2887_v8 = vrot.slane %v8355_v46, 1 }
 0x158   : > { %v7061_v52 = vpop.f32.mrf.mxu1  ;;  %v7117_v54 = vpop.f32.mrf.mxu0 }
 0x159   : > { %v2888_v46 = vsel %vm1222_vm2, %v2885_v45, %v2887_v8 }
 0x15a   : > { %v1110_v14 = vpop.f32.mrf.mxu1  ;;  %v1478_v12 = vpop.f32.mrf.mxu0 }
 0x15b   : > { %v1111_v51 = vadd.f32 %v1110_v14, %v8489_v19  ;;  %v2886_v14 = vsel %vm1222_vm2, %v2883_v5, %v2885_v45 }
 0x15c   : > { %v7064_v10 = vpop.f32.mrf.mxu1  ;;  %v7120_v50 = vpop.f32.mrf.mxu0  ;;  %7287 = vmatmul.mubr.msk.bf16.gmra.mxu1 %vm646_vm1, %v2878_v31  ;;  %7343 = vmatmul.mubr.msk.bf16.gmra.mxu0 %vm646_vm1, %v7656_v17  ;;  %v7662_v31 = vld [vmem:[%s7880_s9 + $0xa0] sm:$0xff]  }
 0x15d   : > { %v8605_v44 = vadd.f32 %v1478_v12, %v1111_v51  ;;  %7290 = vmatprep.mubr.msk.bf16.mxu1 %vm646_vm1, %v2880_v47  ;;  %7346 = vmatprep.mubr.msk.bf16.mxu0 %vm646_vm1, %v7659_v29  ;;  %v7663_v12 = vld [vmem:[%s7880_s9 + $0xa8] sm:$0xff]   ;;  %v2889_v50 = vrot.slane %v8380_v32, 1 }
 0x15e   : > { %v1122_v60 = vpop.f32.mrf.mxu1  ;;  %v1490_v22 = vpop.f32.mrf.mxu0 }
 0x15f   : > { %v1123_v19 = vadd.f32 %v1122_v60, %v8352_v39 }
 0x160   : > { %v7065_v58 = vpop.f32.mrf.mxu1  ;;  %v7121_v16 = vpop.f32.mrf.mxu0 }
 0x161   : > { %v8613_v21 = vadd.f32 %v1490_v22, %v1123_v19  ;;  %v1133_v28 = vadd.f32 %v7065_v58, %v8359_v34  ;;  %v2891_v22 = vrot.slane %v8389_v7, 1  ;;  %v3750_v19 = vld [vmem:[%s7880_s9 + $0x18] sm:$0xf]  ;;  %v3751_v58 = vld [vmem:[%s7880_s9 + $0x1c] sm:$0xf] }
 0x162   : > { %v1125_v35 = vpop.f32.mrf.mxu1  ;;  %v1493_v0 = vpop.f32.mrf.mxu0  ;;  %v6444_v32 = vcombine.low %v3750_v19, %v3751_v58 }
 0x163   : > { %v8619_v40 = vadd.f32 %v7121_v16, %v1133_v28  ;;  %v1126_v4 = vadd.f32 %v1125_v35, %v8368_v38  ;;  %v7664_v28 = vld [vmem:[%s7880_s9 + $0xb0] sm:$0xff]  }
 0x164   : > { %v7068_v27 = vpop.f32.mrf.mxu1  ;;  %v7124_v39 = vpop.f32.mrf.mxu0  ;;  %7291 = vmatmul.mubr.msk.bf16.gmra.mxu1 %vm646_vm1, %v2882_v53  ;;  %7347 = vmatmul.mubr.msk.bf16.gmra.mxu0 %vm646_vm1, %v7660_v1  ;;  %v2890_v53 = vsel %vm1222_vm2, %v2887_v8, %v2889_v50 }
 0x165   : > { %v8624_v55 = vadd.f32 %v1493_v0, %v1126_v4  ;;  %v1145_v34 = vadd.f32 %v7068_v27, %v8375_v43  ;;  %7294 = vmatprep.mubr.msk.bf16.mxu1 %vm646_vm1, %v2884_v49  ;;  %7350 = vmatprep.mubr.msk.bf16.mxu0 %vm646_vm1, %v7661_v62  ;;  %v2892_v0 = vsel %vm1222_vm2, %v2889_v50, %v2891_v22 }
 0x166   : > { %v1137_v56 = vpop.f32.mrf.mxu1  ;;  %v1505_v38 = vpop.f32.mrf.mxu0 }
 0x167   : > { %v8631_v42 = vadd.f32 %v7124_v39, %v1145_v34  ;;  %v1138_v52 = vadd.f32 %v1137_v56, %v8386_v13  ;;  %v2893_v39 = vrot.slane %v8410_v36, 1  ;;  %v2895_v34 = vrot.slane %v8415_v3, 1  ;;  %v8668_v56 = vld [vmem:[%s7880_s9 + $0x20] sm:$0xff]  }
 0x168   : > { %v7069_v54 = vpop.f32.mrf.mxu1  ;;  %v7125_v17 = vpop.f32.mrf.mxu0 }
 0x169   : > { %v8635_v29 = vadd.f32 %v1505_v38, %v1138_v52  ;;  %v1148_v43 = vadd.f32 %v7069_v54, %v8393_v18  ;;  %v3934_v38 = vshll.u32 %v6444_v32, 16  ;;  %v4464_v52 = vld [vmem:[%s7880_s9 + $0x18] sm:$0xe]  ;;  %v2894_v36 = vsel %vm1222_vm2, %v2891_v22, %v2893_v39  ;;  %v7674_v22 = vld [vmem:[%s7880_s9 + $0x28] sm:$0xff]  }
 0x16a   : > { %v1140_v47 = vpop.f32.mrf.mxu1  ;;  %v1508_v59 = vpop.f32.mrf.mxu0  ;;  %v2896_v3 = vsel %vm1222_vm2, %v2893_v39, %v2895_v34 }
 0x16b   : > { %v8641_v51 = vadd.f32 %v7125_v17, %v1148_v43  ;;  %v7669_v47 = vld [vmem:[%s7880_s9 + $0xc8] sm:$0xff]  }
 0x16c   : > { %v7072_v10 = vpop.f32.mrf.mxu1  ;;  %v7128_v13 = vpop.f32.mrf.mxu0  ;;  %7295 = vmatmul.mubr.msk.bf16.gmra.mxu1 %vm646_vm1, %v2886_v14  ;;  %7351 = vmatmul.mubr.msk.bf16.gmra.mxu0 %vm646_vm1, %v7662_v31  ;;  %v7668_v31 = vld [vmem:[%s7880_s9 + $0xc0] sm:$0xff]   ;;  %v9440_v14 = vld [vmem:[#allocation9_spill] sm:$0xff] }
 0x16d   : > { %v1160_v18 = vadd.f32 %v7072_v10, %v8405_v30  ;;  %7298 = vmatprep.mubr.msk.bf16.mxu1 %vm646_vm1, %v2888_v46  ;;  %7354 = vmatprep.mubr.msk.bf16.mxu0 %vm646_vm1, %v7663_v12  ;;  %v7667_v30 = vld [vmem:[%s7880_s9 + $0xb8] sm:$0xff]   ;;  %v3932_v10 = vshrl.u32 %v6444_v32, 16 }
 0x16e   : > { %v1152_v24 = vpop.f32.mrf.mxu1  ;;  %v1520_v60 = vpop.f32.mrf.mxu0 }
 0x16f   : > { %v8650_v5 = vadd.f32 %v7128_v13, %v1160_v18  ;;  %v3936_v13 = vrot.slane %v3934_v38, 1  ;;  %v6497_v18 = vcombine.low %v4464_v52, %v3751_v58  ;;  %v9441_v24 = vld [vmem:[#allocation10_spill] sm:$0xff]  ;;  %v9443_v58 = vld [vmem:[#allocation8_spill] sm:$0xff] }
 0x170   : > { %v7073_v16 = vpop.f32.mrf.mxu1  ;;  %v7129_v1 = vpop.f32.mrf.mxu0  ;;  %v7670_v52 = vld [vmem:[%s7880_s9 + $0xd0] sm:$0xff]  }
 0x172   : > { %v1154_v62 = vpop.f32.mrf.mxu1  ;;  %v1522_v35 = vpop.f32.mrf.mxu0 }
 0x173   : > { %v1155_v49 = vadd.f32 %v1154_v62, %v8424_v63 }
 0x174   : > { %v7076_v7 = vpop.f32.mrf.mxu1  ;;  %v7132_v4 = vpop.f32.mrf.mxu0  ;;  %7299 = vmatmul.mubr.msk.bf16.gmra.mxu1 %vm646_vm1, %v2890_v53  ;;  %7355 = vmatmul.mubr.msk.bf16.gmra.mxu0 %vm646_vm1, %v7664_v28  ;;  %v9442_v28 = vld [vmem:[#allocation11_spill] sm:$0xff] }
 0x175   : > { %v8661_v27 = vadd.f32 %v1522_v35, %v1155_v49  ;;  %7302 = vmatprep.mubr.msk.bf16.mxu1 %vm646_vm1, %v2892_v0  ;;  %7358 = vmatprep.mubr.msk.bf16.mxu0 %vm646_vm1, %v7667_v30  ;;  %v2897_v30 = vrot.slane %v9443_v58, 1  ;;  %v3937_v0 = vor.u32 %v3936_v13, %v3932_v10  ;;  %v4477_v49 = vrot.slane %v6497_v18, 1  ;;  %v8694_v4 = vld [vmem:[%s7880_s9 + $0x30] sm:$0xff]  }
 0x176   : > { %v1166_v45 = vpop.f32.mrf.mxu1  ;;  %v1534_v63 = vpop.f32.mrf.mxu0  ;;  %v4478_v7 = vrot.slane %v8668_v56, 1  ;;  %v3951_v10 = vshrl.u32 %v7674_v22, 16  ;;  %v3955_v13 = vshll.u32 %v8694_v4, 16 }
 0x177   : > { %v1167_v8 = vadd.f32 %v1166_v45, %v8438_v33  ;;  %v3939_v33 = vshll.u32 %v8668_v56, 16  ;;  %v9444_v45 = vld [vmem:[#allocation12_spill] sm:$0xff] }
 0x178   : > { %v7077_v54 = vpop.f32.mrf.mxu1  ;;  %v7133_v17 = vpop.f32.mrf.mxu0 }
 0x179   : > { %v8673_v43 = vadd.f32 %v1534_v63, %v1167_v8  ;;  %v1177_v12 = vadd.f32 %v7077_v54, %v9440_v14  ;;  %v3941_v32 = vrot.slane %v3939_v33, 1  ;;  %v3947_v54 = vshll.u32 %v7674_v22, 16 }
 0x17a   : > { %v1169_v59 = vpop.f32.mrf.mxu1  ;;  %v1537_v46 = vpop.f32.mrf.mxu0 }
 0x17b   : > { %v8680_v50 = vadd.f32 %v7133_v17, %v1177_v12  ;;  %v1170_v60 = vadd.f32 %v1169_v59, %v9441_v24  ;;  %v2898_v12 = vsel %vm1222_vm2, %v2895_v34, %v2897_v30  ;;  %v3942_v59 = vsel %vm425_vm0, %v3937_v0, %v3941_v32  ;;  %v8718_v0 = vld [vmem:[%s7880_s9 + $0x40] sm:$0xff]  }
 0x17c   : > { %v7080_v19 = vpop.f32.mrf.mxu1  ;;  %v7136_v16 = vpop.f32.mrf.mxu0  ;;  %7303 = vmatmul.mubr.msk.bf16.gmra.mxu1 %vm646_vm1, %v2894_v36  ;;  %7359 = vmatmul.mubr.msk.bf16.gmra.mxu0 %vm646_vm1, %v7668_v31  ;;  %v9445_v31 = vld [vmem:[#allocation13_spill] sm:$0xff]  ;;  %v3943_v36 = vshrl.u32 %v8668_v56, 16  ;;  %v3949_v34 = vrot.slane %v3947_v54, 1  ;;  %v7676_v56 = vld [vmem:[%s7880_s9 + $0x38] sm:$0xff]  }
 0x17d   : > { %v8686_v1 = vadd.f32 %v1537_v46, %v1170_v60  ;;  %v1189_v53 = vadd.f32 %v7080_v19, %v9442_v28  ;;  %7306 = vmatprep.mubr.msk.bf16.mxu1 %vm646_vm1, %v2896_v3  ;;  %7362 = vmatprep.mubr.msk.bf16.mxu0 %vm646_vm1, %v7669_v47  ;;  %v4479_v46 = vsel %vm1222_vm2, %v4477_v49, %v4478_v7  ;;  %v9446_v60 = vld [vmem:[#allocation14_spill] sm:$0xff]  ;;  %v4480_v28 = vrot.slane %v7674_v22, 1 }
 0x17e   : > { %v1181_v62 = vpop.f32.mrf.mxu1  ;;  %v1549_v35 = vpop.f32.mrf.mxu0  ;;  %v3953_v30 = vor.u32 %v3951_v10, %v3949_v34  ;;  %v3959_v22 = vshrl.u32 %v8694_v4, 16 }
 0x17f   : > { %v8696_v39 = vadd.f32 %v7136_v16, %v1189_v53  ;;  %v1182_v63 = vadd.f32 %v1181_v62, %v9444_v45  ;;  %v3945_v16 = vor.u32 %v3943_v36, %v3941_v32  ;;  %v3957_v62 = vrot.slane %v3955_v13, 1 }
 0x180   : > { %v7081_v38 = vpop.f32.mrf.mxu1  ;;  %v7137_v8 = vpop.f32.mrf.mxu0  ;;  %v3971_v36 = vshll.u32 %v8718_v0, 16 }
 0x181   : > { %v8700_v17 = vadd.f32 %v1549_v35, %v1182_v63  ;;  %v1192_v14 = vadd.f32 %v7081_v38, %v9445_v31  ;;  %v4482_v35 = vrot.slane %v8694_v4, 1  ;;  %v3963_v38 = vshll.u32 %v7676_v56, 16  ;;  %v7678_v4 = vld [vmem:[%s7880_s9 + $0x48] sm:$0xff]  }
 0x182   : > { %v1184_v3 = vpop.f32.mrf.mxu1  ;;  %v1552_v47 = vpop.f32.mrf.mxu0  ;;  %v3950_v32 = vsel %vm425_vm0, %v3945_v16, %v3949_v34  ;;  %v3958_v31 = vsel %vm425_vm0, %v3953_v30, %v3957_v62  ;;  %v3961_v13 = vor.u32 %v3959_v22, %v3957_v62  ;;  %v4486_v16 = vrot.slane %v8718_v0, 1 }
 0x183   : > { %v8708_v33 = vadd.f32 %v7137_v8, %v1192_v14  ;;  %v4481_v8 = vsel %vm1222_vm2, %v4478_v7, %v4480_v28  ;;  %v4483_v14 = vsel %vm1222_vm2, %v4480_v28, %v4482_v35  ;;  %v9447_v3 = vld [vmem:[#allocation15_spill] sm:$0xff]  ;;  %v3965_v7 = vrot.slane %v3963_v38, 1  ;;  %v8738_v28 = vld [vmem:[%s7880_s9 + $0x50] sm:$0xff]  }
 0x184   : > { %v7084_v18 = vpop.f32.mrf.mxu1  ;;  %v7140_v24 = vpop.f32.mrf.mxu0  ;;  %7307 = vmatmul.mubr.msk.bf16.gmra.mxu1 %vm646_vm1, %v2898_v12  ;;  %7363 = vmatmul.mubr.msk.bf16.gmra.mxu0 %vm646_vm1, %v7670_v52  ;;  %v3967_v12 = vshrl.u32 %v7676_v56, 16  ;;  %v3979_v62 = vshll.u32 %v7678_v4, 16 }
 0x185   : > { %v1204_v19 = vadd.f32 %v7084_v18, %v9446_v60  ;;  %7374 = vmatprep.mubr.msk.bf16.mxu1 %vm646_vm1, %v3942_v59  ;;  %7430 = vmatprep.mubr.msk.bf16.mxu0 %vm646_vm1, %v4479_v46  ;;  %v4484_v18 = vrot.slane %v7676_v56, 1  ;;  %v3966_v56 = vsel %vm425_vm0, %v3961_v13, %v3965_v7  ;;  %v4488_v13 = vrot.slane %v7678_v4, 1 }
 0x186   : > { %v1196_v53 = vpop.f32.mrf.mxu1  ;;  %v1564_v58 = vpop.f32.mrf.mxu0  ;;  %v3969_v60 = vor.u32 %v3967_v12, %v3965_v7  ;;  %v3987_v12 = vshll.u32 %v8738_v28, 16 }
 0x187   : > { %v8720_v49 = vadd.f32 %v7140_v24, %v1204_v19  ;;  %v3973_v19 = vrot.slane %v3971_v36, 1  ;;  %v9448_v53 = vld [vmem:[#allocation16_spill] sm:$0xff] }
 0x188   : > { %v7085_v45 = vpop.f32.mrf.mxu1  ;;  %v7141_v63 = vpop.f32.mrf.mxu0 }
 0x189   : > { %v3975_v63 = vshrl.u32 %v8718_v0, 16 }
 0x18a   : > { %v1198_v52 = vpop.f32.mrf.mxu1  ;;  %v1566_v54 = vpop.f32.mrf.mxu0 }
 0x18b   : > { %v1199_v47 = vadd.f32 %v1198_v52, %v9447_v3 }
 0x18c   : > { %v7152_v59 = vpop.f32.mrf.mxu1  ;;  %v7208_v46 = vpop.f32.mrf.mxu0  ;;  %7375 = vmatmul.mubr.msk.bf16.vlgmr.msra.gmra.mxu1 %vm646_vm1, %v3950_v32  ;;  %7431 = vmatmul.mubr.msk.bf16.vlgmr.msra.gmra.mxu0 %vm646_vm1, %v4481_v8  ;;  %v4485_v8 = vsel %vm1222_vm2, %v4482_v35, %v4484_v18  ;;  %v3977_v35 = vor.u32 %v3975_v63, %v3973_v19 }
 0x18d   : > { %v8732_v10 = vadd.f32 %v1566_v54, %v1199_v47  ;;  %7378 = vmatprep.mubr.msk.bf16.mxu1 %vm646_vm1, %v3958_v31  ;;  %7434 = vmatprep.mubr.msk.bf16.mxu0 %vm646_vm1, %v4483_v14  ;;  %v3974_v54 = vsel %vm425_vm0, %v3969_v60, %v3973_v19  ;;  %v4487_v31 = vsel %vm1222_vm2, %v4484_v18, %v4486_v16  ;;  %v3983_v14 = vshrl.u32 %v7678_v4, 16  ;;  %v7680_v59 = vld [vmem:[%s7880_s9 + $0x58] sm:$0xff]  }
 0x18e   : > { %v1916_v24 = vpop.f32.mrf.mxu1  ;;  %v2630_v34 = vpop.f32.mrf.mxu0  ;;  %v3981_v47 = vrot.slane %v3979_v62, 1  ;;  %v4490_v60 = vrot.slane %v8738_v28, 1  ;;  %v3995_v63 = vshll.u32 %v7680_v59, 16 }
 0x18f   : > { %v2091_v58 = vadd.f32 %v1916_v24, %v9448_v53  ;;  %v8763_v53 = vld [vmem:[%s7880_s9 + $0x60] sm:$0xff]  }
 0x190   : > { %v7153_v30 = vpop.f32.mrf.mxu1  ;;  %v7209_v45 = vpop.f32.mrf.mxu0  ;;  %v3985_v24 = vor.u32 %v3983_v14, %v3981_v47 }
 0x191   : > { %v8742_v38 = vadd.f32 %v2630_v34, %v2091_v58  ;;  %v2093_v32 = vadd.f32 %v7153_v30, %v8511_v15  ;;  %v3989_v34 = vrot.slane %v3987_v12, 1 }
 0x192   : > { %v1919_v22 = vpop.f32.mrf.mxu1  ;;  %v2633_v52 = vpop.f32.mrf.mxu0 }
 0x193   : > { %v8750_v0 = vadd.f32 %v7209_v45, %v2093_v32  ;;  %v2092_v36 = vadd.f32 %v1919_v22, %v8516_v41  ;;  %v4489_v32 = vsel %vm1222_vm2, %v4486_v16, %v4488_v13  ;;  %v7682_v16 = vld [vmem:[%s7880_s9 + $0x68] sm:$0xff]  }
 0x194   : > { %v7156_v3 = vpop.f32.mrf.mxu1  ;;  %v7212_v15 = vpop.f32.mrf.mxu0  ;;  %7379 = vmatmul.mubr.msk.bf16.gmra.mxu1 %vm646_vm1, %v3966_v56  ;;  %7435 = vmatmul.mubr.msk.bf16.gmra.mxu0 %vm646_vm1, %v4485_v8  ;;  %v3991_v56 = vshrl.u32 %v8738_v28, 16 }
 0x195   : > { %v8756_v46 = vadd.f32 %v2633_v52, %v2092_v36  ;;  %v2095_v7 = vadd.f32 %v7156_v3, %v8523_v11  ;;  %7382 = vmatprep.mubr.msk.bf16.mxu1 %vm646_vm1, %v3974_v54  ;;  %7438 = vmatprep.mubr.msk.bf16.mxu0 %vm646_vm1, %v4487_v31  ;;  %v3982_v11 = vsel %vm425_vm0, %v3977_v35, %v3981_v47  ;;  %v3999_v54 = vshrl.u32 %v7680_v59, 16 }
 0x196   : > { %v1931_v41 = vpop.f32.mrf.mxu1  ;;  %v2645_v18 = vpop.f32.mrf.mxu0  ;;  %v3990_v52 = vsel %vm425_vm0, %v3985_v24, %v3989_v34  ;;  %v4003_v31 = vshll.u32 %v8763_v53, 16  ;;  %v3993_v3 = vor.u32 %v3991_v56, %v3989_v34  ;;  %v4015_v56 = vshrl.u32 %v7682_v16, 16 }
 0x197   : > { %v8765_v19 = vadd.f32 %v7212_v15, %v2095_v7  ;;  %v2094_v58 = vadd.f32 %v1931_v41, %v8527_v57  ;;  %v4491_v57 = vsel %vm1222_vm2, %v4488_v13, %v4490_v60  ;;  %v4492_v15 = vrot.slane %v7680_v59, 1 }
 0x198   : > { %v7157_v30 = vpop.f32.mrf.mxu1  ;;  %v7213_v45 = vpop.f32.mrf.mxu0  ;;  %v4005_v13 = vrot.slane %v4003_v31, 1  ;;  %v4494_v41 = vrot.slane %v8763_v53, 1  ;;  %v4007_v59 = vshrl.u32 %v8763_v53, 16  ;;  %v7684_v53 = vld [vmem:[%s7880_s9 + $0x78] sm:$0xff]  }
 0x199   : > { %v8769_v62 = vadd.f32 %v2645_v18, %v2094_v58  ;;  %v2096_v4 = vadd.f32 %v7157_v30, %v8533_v61  ;;  %v3997_v61 = vrot.slane %v3995_v63, 1  ;;  %v8787_v18 = vld [vmem:[%s7880_s9 + $0x70] sm:$0xff]   ;;  %v4493_v34 = vsel %vm1222_vm2, %v4490_v60, %v4492_v15 }
 0x19a   : > { %v1934_v8 = vpop.f32.mrf.mxu1  ;;  %v2648_v22 = vpop.f32.mrf.mxu0  ;;  %v4009_v31 = vor.u32 %v4007_v59, %v4005_v13 }
 0x19b   : > { %v8777_v14 = vadd.f32 %v7213_v45, %v2096_v4  ;;  %v4001_v7 = vor.u32 %v3999_v54, %v3997_v61  ;;  %v4011_v45 = vshll.u32 %v7682_v16, 16  ;;  %v4019_v8 = vshll.u32 %v8787_v18, 16 }
 0x19c   : > { %v7160_v12 = vpop.f32.mrf.mxu1  ;;  %v7216_v36 = vpop.f32.mrf.mxu0  ;;  %7383 = vmatmul.mubr.msk.bf16.gmra.mxu1 %vm646_vm1, %v3982_v11  ;;  %7439 = vmatmul.mubr.msk.bf16.gmra.mxu0 %vm646_vm1, %v4489_v32  ;;  %v4495_v32 = vsel %vm1222_vm2, %v4492_v15, %v4494_v41  ;;  %v8807_v15 = vld [vmem:[%s7880_s9 + $0x80] sm:$0xff]  }
 0x19d   : > { %v2098_v28 = vadd.f32 %v7160_v12, %v8542_v20  ;;  %7386 = vmatprep.mubr.msk.bf16.mxu1 %vm646_vm1, %v3990_v52  ;;  %7442 = vmatprep.mubr.msk.bf16.mxu0 %vm646_vm1, %v4491_v57  ;;  %v3998_v20 = vsel %vm425_vm0, %v3993_v3, %v3997_v61  ;;  %v4006_v4 = vsel %vm425_vm0, %v4001_v7, %v4005_v13  ;;  %v4013_v60 = vrot.slane %v4011_v45, 1 }
 0x19e   : > { %v1946_v35 = vpop.f32.mrf.mxu1  ;;  %v2660_v47 = vpop.f32.mrf.mxu0  ;;  %v4496_v12 = vrot.slane %v7682_v16, 1  ;;  %v4498_v3 = vrot.slane %v8787_v18, 1  ;;  %v4027_v13 = vshll.u32 %v7684_v53, 16 }
 0x19f   : > { %v8789_v24 = vadd.f32 %v7216_v36, %v2098_v28  ;;  %v4021_v28 = vrot.slane %v4019_v8, 1  ;;  %v4014_v16 = vsel %vm425_vm0, %v4009_v31, %v4013_v60 }
 0x1a0   : > { %v7161_v58 = vpop.f32.mrf.mxu1  ;;  %v7217_v30 = vpop.f32.mrf.mxu0  ;;  %v4029_v8 = vrot.slane %v4027_v13, 1 }
 0x1a1   : > { %v4023_v58 = vshrl.u32 %v8787_v18, 16 }
 0x1a2   : > { %v1948_v11 = vpop.f32.mrf.mxu1  ;;  %v2662_v63 = vpop.f32.mrf.mxu0 }
 0x1a3   : > { %v2097_v22 = vadd.f32 %v1948_v11, %v8551_v9  ;;  %v4017_v9 = vor.u32 %v4015_v56, %v4013_v60  ;;  %v4500_v60 = vrot.slane %v7684_v53, 1 }
 0x1a4   : > { %v7164_v52 = vpop.f32.mrf.mxu1  ;;  %v7220_v57 = vpop.f32.mrf.mxu0  ;;  %7387 = vmatmul.mubr.msk.bf16.gmra.mxu1 %vm646_vm1, %v3998_v20  ;;  %7443 = vmatmul.mubr.msk.bf16.gmra.mxu0 %vm646_vm1, %v4493_v34  ;;  %v4497_v20 = vsel %vm1222_vm2, %v4494_v41, %v4496_v12  ;;  %v4025_v41 = vor.u32 %v4023_v58, %v4021_v28 }
 0x1a5   : > { %v8801_v54 = vadd.f32 %v2662_v63, %v2097_v22  ;;  %7390 = vmatprep.mubr.msk.bf16.mxu1 %vm646_vm1, %v4006_v4  ;;  %7446 = vmatprep.mubr.msk.bf16.mxu0 %vm646_vm1, %v4495_v32  ;;  %v4022_v11 = vsel %vm425_vm0, %v4017_v9, %v4021_v28  ;;  %v4031_v63 = vshrl.u32 %v7684_v53, 16  ;;  %v4035_v4 = vshll.u32 %v8807_v15, 16  ;;  %v7686_v22 = vld [vmem:[%s7880_s9 + $0x88] sm:$0xff]   ;;  %v8832_v9 = vld [vmem:[%s7880_s9 + $0x90] sm:$0xff]  }
 0x1a6   : > { %v1960_v36 = vpop.f32.mrf.mxu1  ;;  %v2674_v61 = vpop.f32.mrf.mxu0  ;;  %v4043_v58 = vshll.u32 %v7686_v22, 16 }
 0x1a7   : > { %v2099_v35 = vadd.f32 %v1960_v36, %v8559_v23  ;;  %v4499_v23 = vsel %vm1222_vm2, %v4496_v12, %v4498_v3  ;;  %v4033_v12 = vor.u32 %v4031_v63, %v4029_v8  ;;  %v4037_v36 = vrot.slane %v4035_v4, 1 }
 0x1a8   : > { %v7165_v47 = vpop.f32.mrf.mxu1  ;;  %v7221_v7 = vpop.f32.mrf.mxu0 }
 0x1a9   : > { %v8811_v30 = vadd.f32 %v2674_v61, %v2099_v35  ;;  %v2101_v45 = vadd.f32 %v7165_v47, %v8565_v26  ;;  %v4502_v61 = vrot.slane %v8807_v15, 1 }
 0x1aa   : > { %v1963_v34 = vpop.f32.mrf.mxu1  ;;  %v2677_v59 = vpop.f32.mrf.mxu0 }
 0x1ab   : > { %v8819_v18 = vadd.f32 %v7221_v7, %v2101_v45  ;;  %v2100_v32 = vadd.f32 %v1963_v34, %v8570_v25  ;;  %v4501_v45 = vsel %vm1222_vm2, %v4498_v3, %v4500_v60  ;;  %v7688_v3 = vld [vmem:[%s7880_s9 + $0x98] sm:$0xff]  }
 0x1ac   : > { %v7168_v56 = vpop.f32.mrf.mxu1  ;;  %v7224_v26 = vpop.f32.mrf.mxu0  ;;  %7391 = vmatmul.mubr.msk.bf16.gmra.mxu1 %vm646_vm1, %v4014_v16  ;;  %7447 = vmatmul.mubr.msk.bf16.gmra.mxu0 %vm646_vm1, %v4497_v20  ;;  %v4039_v16 = vshrl.u32 %v8807_v15, 16 }
 0x1ad   : > { %v8825_v52 = vadd.f32 %v2677_v59, %v2100_v32  ;;  %v2103_v57 = vadd.f32 %v7168_v56, %v8577_v2  ;;  %7394 = vmatprep.mubr.msk.bf16.mxu1 %vm646_vm1, %v4022_v11  ;;  %7450 = vmatprep.mubr.msk.bf16.mxu0 %vm646_vm1, %v4499_v23  ;;  %v4030_v2 = vsel %vm425_vm0, %v4025_v41, %v4029_v8  ;;  %v4047_v11 = vshrl.u32 %v7686_v22, 16 }
 0x1ae   : > { %v1975_v25 = vpop.f32.mrf.mxu1  ;;  %v2689_v31 = vpop.f32.mrf.mxu0  ;;  %v4038_v59 = vsel %vm425_vm0, %v4033_v12, %v4037_v36  ;;  %v4051_v23 = vshll.u32 %v8832_v9, 16  ;;  %v4041_v56 = vor.u32 %v4039_v16, %v4037_v36  ;;  %v4063_v16 = vshrl.u32 %v7688_v3, 16 }
 0x1af   : > { %v8834_v28 = vadd.f32 %v7224_v26, %v2103_v57  ;;  %v2102_v35 = vadd.f32 %v1975_v25, %v8581_v6  ;;  %v4503_v6 = vsel %vm1222_vm2, %v4500_v60, %v4502_v61  ;;  %v4504_v26 = vrot.slane %v7686_v22, 1 }
 0x1b0   : > { %v7169_v47 = vpop.f32.mrf.mxu1  ;;  %v7225_v7 = vpop.f32.mrf.mxu0  ;;  %v4053_v60 = vrot.slane %v4051_v23, 1  ;;  %v4506_v25 = vrot.slane %v8832_v9, 1  ;;  %v4055_v22 = vshrl.u32 %v8832_v9, 16  ;;  %v7690_v9 = vld [vmem:[%s7880_s9 + $0xa8] sm:$0xff]  }
 0x1b1   : > { %v8838_v13 = vadd.f32 %v2689_v31, %v2102_v35  ;;  %v2104_v53 = vadd.f32 %v7169_v47, %v8587_v48  ;;  %v4045_v48 = vrot.slane %v4043_v58, 1  ;;  %v8856_v31 = vld [vmem:[%s7880_s9 + $0xa0] sm:$0xff]   ;;  %v4505_v36 = vsel %vm1222_vm2, %v4502_v61, %v4504_v26 }
 0x1b2   : > { %v1978_v20 = vpop.f32.mrf.mxu1  ;;  %v2692_v34 = vpop.f32.mrf.mxu0  ;;  %v4057_v23 = vor.u32 %v4055_v22, %v4053_v60 }
 0x1b3   : > { %v8846_v63 = vadd.f32 %v7225_v7, %v2104_v53  ;;  %v4049_v57 = vor.u32 %v4047_v11, %v4045_v48  ;;  %v4059_v7 = vshll.u32 %v7688_v3, 16  ;;  %v4067_v20 = vshll.u32 %v8856_v31, 16 }
 0x1b4   : > { %v7172_v4 = vpop.f32.mrf.mxu1  ;;  %v7228_v32 = vpop.f32.mrf.mxu0  ;;  %7395 = vmatmul.mubr.msk.bf16.gmra.mxu1 %vm646_vm1, %v4030_v2  ;;  %7451 = vmatmul.mubr.msk.bf16.gmra.mxu0 %vm646_vm1, %v4501_v45  ;;  %v4507_v45 = vsel %vm1222_vm2, %v4504_v26, %v4506_v25  ;;  %v8876_v26 = vld [vmem:[%s7880_s9 + $0xb0] sm:$0xff]  }
 0x1b5   : > { %v2106_v15 = vadd.f32 %v7172_v4, %v8596_v37  ;;  %7398 = vmatprep.mubr.msk.bf16.mxu1 %vm646_vm1, %v4038_v59  ;;  %7454 = vmatprep.mubr.msk.bf16.mxu0 %vm646_vm1, %v4503_v6  ;;  %v4046_v37 = vsel %vm425_vm0, %v4041_v56, %v4045_v48  ;;  %v4054_v53 = vsel %vm425_vm0, %v4049_v57, %v4053_v60  ;;  %v4061_v61 = vrot.slane %v4059_v7, 1 }
 0x1b6   : > { %v1990_v41 = vpop.f32.mrf.mxu1  ;;  %v2704_v8 = vpop.f32.mrf.mxu0  ;;  %v4508_v4 = vrot.slane %v7688_v3, 1  ;;  %v4510_v56 = vrot.slane %v8856_v31, 1  ;;  %v4075_v60 = vshll.u32 %v7690_v9, 16 }
 0x1b7   : > { %v8858_v12 = vadd.f32 %v7228_v32, %v2106_v15  ;;  %v4069_v15 = vrot.slane %v4067_v20, 1  ;;  %v4062_v3 = vsel %vm425_vm0, %v4057_v23, %v4061_v61 }
 0x1b8   : > { %v7173_v35 = vpop.f32.mrf.mxu1  ;;  %v7229_v47 = vpop.f32.mrf.mxu0  ;;  %v4077_v20 = vrot.slane %v4075_v60, 1 }
 0x1b9   : > { %v4071_v35 = vshrl.u32 %v8856_v31, 16 }
 0x1ba   : > { %v1992_v2 = vpop.f32.mrf.mxu1  ;;  %v2706_v58 = vpop.f32.mrf.mxu0 }
 0x1bb   : > { %v2105_v34 = vadd.f32 %v1992_v2, %v8605_v44  ;;  %v4065_v44 = vor.u32 %v4063_v16, %v4061_v61  ;;  %v4512_v61 = vrot.slane %v7690_v9, 1 }
 0x1bc   : > { %v7176_v59 = vpop.f32.mrf.mxu1  ;;  %v7232_v6 = vpop.f32.mrf.mxu0  ;;  %7399 = vmatmul.mubr.msk.bf16.gmra.mxu1 %vm646_vm1, %v4046_v37  ;;  %7455 = vmatmul.mubr.msk.bf16.gmra.mxu0 %vm646_vm1, %v4505_v36  ;;  %v4509_v37 = vsel %vm1222_vm2, %v4506_v25, %v4508_v4  ;;  %v4073_v25 = vor.u32 %v4071_v35, %v4069_v15 }
 0x1bd   : > { %v8870_v11 = vadd.f32 %v2706_v58, %v2105_v34  ;;  %7402 = vmatprep.mubr.msk.bf16.mxu1 %vm646_vm1, %v4054_v53  ;;  %7458 = vmatprep.mubr.msk.bf16.mxu0 %vm646_vm1, %v4507_v45  ;;  %v4070_v2 = vsel %vm425_vm0, %v4065_v44, %v4069_v15  ;;  %v4079_v58 = vshrl.u32 %v7690_v9, 16  ;;  %v4083_v53 = vshll.u32 %v8876_v26, 16  ;;  %v7692_v34 = vld [vmem:[%s7880_s9 + $0xb8] sm:$0xff]   ;;  %v8901_v44 = vld [vmem:[%s7880_s9 + $0xc0] sm:$0xff]  }
 0x1be   : > { %v2004_v32 = vpop.f32.mrf.mxu1  ;;  %v2718_v48 = vpop.f32.mrf.mxu0  ;;  %v4091_v35 = vshll.u32 %v7692_v34, 16 }
 0x1bf   : > { %v2107_v41 = vadd.f32 %v2004_v32, %v8613_v21  ;;  %v4511_v21 = vsel %vm1222_vm2, %v4508_v4, %v4510_v56  ;;  %v4081_v4 = vor.u32 %v4079_v58, %v4077_v20  ;;  %v4085_v32 = vrot.slane %v4083_v53, 1 }
 0x1c0   : > { %v7177_v8 = vpop.f32.mrf.mxu1  ;;  %v7233_v57 = vpop.f32.mrf.mxu0 }
 0x1c1   : > { %v8880_v47 = vadd.f32 %v2718_v48, %v2107_v41  ;;  %v2109_v7 = vadd.f32 %v7177_v8, %v8619_v40  ;;  %v4514_v48 = vrot.slane %v8876_v26, 1 }
 0x1c2   : > { %v2007_v36 = vpop.f32.mrf.mxu1  ;;  %v2721_v22 = vpop.f32.mrf.mxu0 }
 0x1c3   : > { %v8888_v31 = vadd.f32 %v7233_v57, %v2109_v7  ;;  %v2108_v45 = vadd.f32 %v2007_v36, %v8624_v55  ;;  %v4513_v7 = vsel %vm1222_vm2, %v4510_v56, %v4512_v61  ;;  %v7694_v56 = vld [vmem:[%s7880_s9 + $0xc8] sm:$0xff]  }
 0x1c4   : > { %v7180_v16 = vpop.f32.mrf.mxu1  ;;  %v7236_v40 = vpop.f32.mrf.mxu0  ;;  %7403 = vmatmul.mubr.msk.bf16.gmra.mxu1 %vm646_vm1, %v4062_v3  ;;  %7459 = vmatmul.mubr.msk.bf16.gmra.mxu0 %vm646_vm1, %v4509_v37  ;;  %v4087_v3 = vshrl.u32 %v8876_v26, 16 }
 0x1c5   : > { %v8894_v59 = vadd.f32 %v2721_v22, %v2108_v45  ;;  %v2111_v6 = vadd.f32 %v7180_v16, %v8631_v42  ;;  %7406 = vmatprep.mubr.msk.bf16.mxu1 %vm646_vm1, %v4070_v2  ;;  %7462 = vmatprep.mubr.msk.bf16.mxu0 %vm646_vm1, %v4511_v21  ;;  %v4078_v42 = vsel %vm425_vm0, %v4073_v25, %v4077_v20  ;;  %v4095_v2 = vshrl.u32 %v7692_v34, 16 }
 0x1c6   : > { %v2019_v55 = vpop.f32.mrf.mxu1  ;;  %v2733_v23 = vpop.f32.mrf.mxu0  ;;  %v4086_v22 = vsel %vm425_vm0, %v4081_v4, %v4085_v32  ;;  %v4099_v21 = vshll.u32 %v8901_v44, 16  ;;  %v4089_v16 = vor.u32 %v4087_v3, %v4085_v32  ;;  %v4107_v32 = vshll.u32 %v7694_v56, 16 }
 0x1c7   : > { %v8903_v15 = vadd.f32 %v7236_v40, %v2111_v6  ;;  %v2110_v41 = vadd.f32 %v2019_v55, %v8635_v29  ;;  %v4515_v29 = vsel %vm1222_vm2, %v4512_v61, %v4514_v48  ;;  %v4516_v40 = vrot.slane %v7692_v34, 1 }
 0x1c8   : > { %v7181_v8 = vpop.f32.mrf.mxu1  ;;  %v7237_v57 = vpop.f32.mrf.mxu0  ;;  %v4101_v61 = vrot.slane %v4099_v21, 1  ;;  %v4518_v55 = vrot.slane %v8901_v44, 1  ;;  %v4111_v3 = vshrl.u32 %v7694_v56, 16  ;;  %v4520_v21 = vrot.slane %v7694_v56, 1 }
 0x1c9   : > { %v8907_v60 = vadd.f32 %v2733_v23, %v2110_v41  ;;  %v2112_v9 = vadd.f32 %v7181_v8, %v8641_v51  ;;  %v4093_v51 = vrot.slane %v4091_v35, 1  ;;  %v8925_v23 = vld [vmem:[%s7880_s9 + $0xd0] sm:$0xff]  }
 0x1ca   : > { %v2022_v37 = vpop.f32.mrf.mxu1  ;;  %v2736_v36 = vpop.f32.mrf.mxu0  ;;  %v4521_v56 = vsel %vm1222_vm2, %v4518_v55, %v4520_v21 }
 0x1cb   : > { %v8915_v58 = vadd.f32 %v7237_v57, %v2112_v9  ;;  %v4097_v6 = vor.u32 %v4095_v2, %v4093_v51  ;;  %v4094_v57 = vsel %vm425_vm0, %v4089_v16, %v4093_v51  ;;  %v4115_v37 = vshll.u32 %v8925_v23, 16 }
 0x1cc   : > { %v7184_v53 = vpop.f32.mrf.mxu1  ;;  %v7240_v45 = vpop.f32.mrf.mxu0  ;;  %7407 = vmatmul.mubr.msk.bf16.gmra.mxu1 %vm646_vm1, %v4078_v42  ;;  %7463 = vmatmul.mubr.msk.bf16.gmra.mxu0 %vm646_vm1, %v4513_v7  ;;  %v4517_v42 = vsel %vm1222_vm2, %v4514_v48, %v4516_v40  ;;  %v4519_v7 = vsel %vm1222_vm2, %v4516_v40, %v4518_v55  ;;  %v4109_v48 = vrot.slane %v4107_v32, 1  ;;  %v4522_v16 = vrot.slane %v8925_v23, 1 }
 0x1cd   : > { %v2114_v26 = vadd.f32 %v7184_v53, %v8650_v5  ;;  %7410 = vmatprep.mubr.msk.bf16.mxu1 %vm646_vm1, %v4086_v22  ;;  %7466 = vmatprep.mubr.msk.bf16.mxu0 %vm646_vm1, %v4515_v29  ;;  %v4103_v5 = vshrl.u32 %v8901_v44, 16  ;;  %v4102_v9 = vsel %vm425_vm0, %v4097_v6, %v4101_v61  ;;  %v7696_v53 = vld [vmem:[%s7880_s9 + $0xd8] ss:$0 sps:$4 sm:$0x11]  }
 0x1ce   : > { %v2034_v25 = vpop.f32.mrf.mxu1  ;;  %v2748_v20 = vpop.f32.mrf.mxu0 }
 0x1cf   : > { %v8927_v4 = vadd.f32 %v7240_v45, %v2114_v26  ;;  %v4105_v44 = vor.u32 %v4103_v5, %v4101_v61  ;;  %v4113_v26 = vor.u32 %v4111_v3, %v4109_v48  ;;  %v4119_v61 = vshrl.u32 %v8925_v23, 16 }
 0x1d0   : > { %v7185_v41 = vpop.f32.mrf.mxu1  ;;  %v7241_v8 = vpop.f32.mrf.mxu0  ;;  %v4123_v5 = vshll.u32 %v7696_v53, 16 }
 0x1d1   : > { %v4110_v6 = vsel %vm425_vm0, %v4105_v44, %v4109_v48 }
 0x1d2   : > { %v2036_v34 = vpop.f32.mrf.mxu1  ;;  %v2750_v35 = vpop.f32.mrf.mxu0  ;;  %v4125_v3 = vrot.slane %v4123_v5, 1 }
 0x1d3   : > { %v2113_v36 = vadd.f32 %v2036_v34, %v8661_v27  ;;  %v4117_v27 = vrot.slane %v4115_v37, 1  ;;  %v4523_v34 = vsel %vm1222_vm2, %v4520_v21, %v4522_v16  ;;  %v4524_v37 = vrot.slane %v7696_v53, 1 }
 0x1d4   : > { %v7188_v22 = vpop.f32.mrf.mxu1  ;;  %v7244_v29 = vpop.f32.mrf.mxu0  ;;  %7411 = vmatmul.mubr.msk.bf16.gmra.mxu1 %vm646_vm1, %v4094_v57  ;;  %7467 = vmatmul.mubr.msk.bf16.gmra.mxu0 %vm646_vm1, %v4517_v42 }
 0x1d5   : > { %v8938_v2 = vadd.f32 %v2750_v35, %v2113_v36  ;;  %7414 = vmatprep.mubr.msk.bf16.mxu1 %vm646_vm1, %v4102_v9  ;;  %7470 = vmatprep.mubr.msk.bf16.mxu0 %vm646_vm1, %v4519_v7  ;;  %v4118_v42 = vsel %vm425_vm0, %v4113_v26, %v4117_v27 }
 0x1d6   : > { %v2048_v45 = vpop.f32.mrf.mxu1  ;;  %v2762_v51 = vpop.f32.mrf.mxu0 }
 0x1d7   : > { %v2115_v40 = vadd.f32 %v2048_v45, %v8673_v43 }
 0x1d8   : > { %v7189_v25 = vpop.f32.mrf.mxu1  ;;  %v7245_v20 = vpop.f32.mrf.mxu0 }
 0x1d9   : > { %v8947_v41 = vadd.f32 %v2762_v51, %v2115_v40  ;;  %v2117_v8 = vadd.f32 %v7189_v25, %v8680_v50  ;;  %v4121_v50 = vor.u32 %v4119_v61, %v4117_v27  ;;  %v4525_v51 = vsel %vm1222_vm2, %v4522_v16, %v4524_v37 }
 0x1da   : > { %v2051_v32 = vpop.f32.mrf.mxu1  ;;  %v2765_v57 = vpop.f32.mrf.mxu0 }
 0x1db   : > { %v8953_v43 = vadd.f32 %v7245_v20, %v2117_v8  ;;  %v2116_v35 = vadd.f32 %v2051_v32, %v8686_v1 }
 0x1dc   : > { %v7192_v9 = vpop.f32.mrf.mxu1  ;;  %v7248_v7 = vpop.f32.mrf.mxu0  ;;  %7415 = vmatmul.mubr.msk.bf16.gmra.mxu1 %vm646_vm1, %v4110_v6  ;;  %7471 = vmatmul.mubr.msk.bf16.gmra.mxu0 %vm646_vm1, %v4521_v56 }
 0x1dd   : > { %v8958_v23 = vadd.f32 %v2765_v57, %v2116_v35  ;;  %v2119_v55 = vadd.f32 %v7192_v9, %v8696_v39  ;;  %7418 = vmatprep.mubr.msk.bf16.mxu1 %vm646_vm1, %v4118_v42  ;;  %7474 = vmatprep.mubr.msk.bf16.mxu0 %vm646_vm1, %v4523_v34  ;;  %v4126_v39 = vsel %vm425_vm0, %v4121_v50, %v4125_v3 }
 0x1de   : > { %v2063_v36 = vpop.f32.mrf.mxu1  ;;  %v2777_v22 = vpop.f32.mrf.mxu0 }
 0x1df   : > { %v8963_v1 = vadd.f32 %v7248_v7, %v2119_v55  ;;  %v2118_v29 = vadd.f32 %v2063_v36, %v8700_v17 }
 0x1e0   : > { %v7193_v44 = vpop.f32.mrf.mxu1  ;;  %v7249_v48 = vpop.f32.mrf.mxu0 }
 0x1e1   : > { %v8966_v21 = vadd.f32 %v2777_v22, %v2118_v29  ;;  %v2120_v45 = vadd.f32 %v7193_v44, %v8708_v33 }
 0x1e2   : > { %v2066_v26 = vpop.f32.mrf.mxu1  ;;  %v2780_v27 = vpop.f32.mrf.mxu0 }
 0x1e3   : > { %v8971_v40 = vadd.f32 %v7249_v48, %v2120_v45 }
 0x1e4   : > { %v7196_v53 = vpop.f32.mrf.mxu1  ;;  %v7252_v25 = vpop.f32.mrf.mxu0  ;;  %7419 = vmatmul.mubr.msk.bf16.gmra.mxu1 %vm646_vm1, %v4126_v39  ;;  %7475 = vmatmul.mubr.msk.bf16.gmra.mxu0 %vm646_vm1, %v4525_v51 }
 0x1e5   : > { %v2122_v17 = vadd.f32 %v7196_v53, %v8720_v49 }
 0x1e6   : > { %v2078_v20 = vpop.f32.mrf.mxu1  ;;  %v2792_v6 = vpop.f32.mrf.mxu0 }
 0x1e7   : > { %v8976_v61 = vadd.f32 %v7252_v25, %v2122_v17 }
 0x1e8   : > { %v7197_v33 = vpop.f32.mrf.mxu1  ;;  %v7253_v8 = vpop.f32.mrf.mxu0 }
 0x1ea   : > { %v2080_v56 = vpop.f32.mrf.mxu1  ;;  %v2794_v16 = vpop.f32.mrf.mxu0 }
 0x1eb   : > { %v2121_v5 = vadd.f32 %v2080_v56, %v8732_v10 }
 0x1ec   : > { %v7264_v32 = vpop.f32.mrf.mxu1  ;;  %v7320_v57 = vpop.f32.mrf.mxu0 }
 0x1ed   : > { %v8979_v42 = vadd.f32 %v2794_v16, %v2121_v5 }
 0x1ee   : > { %v3029_v34 = vpop.f32.mrf.mxu1  ;;  %v3543_v35 = vpop.f32.mrf.mxu0 }
 0x1ef   : > { %v3204_v9 = vadd.f32 %v3029_v34, %v8742_v38 }
 0x1f0   : > { %v7265_v7 = vpop.f32.mrf.mxu1  ;;  %v7321_v49 = vpop.f32.mrf.mxu0 }
 0x1f1   : > { %v8982_v50 = vadd.f32 %v3543_v35, %v3204_v9  ;;  %v3206_v55 = vadd.f32 %v7265_v7, %v8750_v0 }
 0x1f2   : > { %v3032_v3 = vpop.f32.mrf.mxu1  ;;  %v3546_v37 = vpop.f32.mrf.mxu0 }
 0x1f3   : > { %v8985_v36 = vadd.f32 %v7321_v49, %v3206_v55  ;;  %v3205_v10 = vadd.f32 %v3032_v3, %v8756_v46 }
 0x1f4   : > { %v7268_v22 = vpop.f32.mrf.mxu1  ;;  %v7324_v29 = vpop.f32.mrf.mxu0 }
 0x1f5   : > { %v8988_v44 = vadd.f32 %v3546_v37, %v3205_v10  ;;  %v3208_v48 = vadd.f32 %v7268_v22, %v8765_v19 }
 0x1f6   : > { %v3044_v45 = vpop.f32.mrf.mxu1  ;;  %v3558_v38 = vpop.f32.mrf.mxu0 }
 0x1f7   : > { %v8991_v39 = vadd.f32 %v7324_v29, %v3208_v48  ;;  %v3207_v51 = vadd.f32 %v3044_v45, %v8769_v62 }
 0x1f8   : > { %v7269_v26 = vpop.f32.mrf.mxu1  ;;  %v7325_v0 = vpop.f32.mrf.mxu0 }
 0x1f9   : > { %v8994_v27 = vadd.f32 %v3558_v38, %v3207_v51  ;;  %v3209_v53 = vadd.f32 %v7269_v26, %v8777_v14 }
 0x1fa   : > { %v3047_v25 = vpop.f32.mrf.mxu1  ;;  %v3561_v46 = vpop.f32.mrf.mxu0 }
 0x1fb   : > { %v8997_v17 = vadd.f32 %v7325_v0, %v3209_v53 }
 0x1fc   : > { %v7272_v20 = vpop.f32.mrf.mxu1  ;;  %v7328_v6 = vpop.f32.mrf.mxu0 }
 0x1fd   : > { %v3211_v19 = vadd.f32 %v7272_v20, %v8789_v24 }
 0x1fe   : > { %v3059_v33 = vpop.f32.mrf.mxu1  ;;  %v3573_v8 = vpop.f32.mrf.mxu0 }
 0x1ff   : > { %v9000_v56 = vadd.f32 %v7328_v6, %v3211_v19 }
 0x200   : > { %v7273_v16 = vpop.f32.mrf.mxu1  ;;  %v7329_v62 = vpop.f32.mrf.mxu0 }
 0x202   : > { %v3061_v5 = vpop.f32.mrf.mxu1  ;;  %v3575_v32 = vpop.f32.mrf.mxu0 }
 0x203   : > { %v3210_v57 = vadd.f32 %v3061_v5, %v8801_v54 }
 0x204   : > { %v7276_v34 = vpop.f32.mrf.mxu1  ;;  %v7332_v14 = vpop.f32.mrf.mxu0 }
 0x205   : > { %v9003_v35 = vadd.f32 %v3575_v32, %v3210_v57 }
 0x206   : > { %v3073_v9 = vpop.f32.mrf.mxu1  ;;  %v3587_v7 = vpop.f32.mrf.mxu0 }
 0x207   : > { %v3212_v49 = vadd.f32 %v3073_v9, %v8811_v30 }
 0x208   : > { %v7277_v55 = vpop.f32.mrf.mxu1  ;;  %v7333_v24 = vpop.f32.mrf.mxu0 }
 0x209   : > { %v9006_v3 = vadd.f32 %v3587_v7, %v3212_v49  ;;  %v3214_v37 = vadd.f32 %v7277_v55, %v8819_v18 }
 0x20a   : > { %v3076_v10 = vpop.f32.mrf.mxu1  ;;  %v3590_v22 = vpop.f32.mrf.mxu0 }
 0x20b   : > { %v9009_v29 = vadd.f32 %v7333_v24, %v3214_v37  ;;  %v3213_v54 = vadd.f32 %v3076_v10, %v8825_v52 }
 0x20c   : > { %v7280_v48 = vpop.f32.mrf.mxu1  ;;  %v7336_v45 = vpop.f32.mrf.mxu0 }
 0x20d   : > { %v9012_v38 = vadd.f32 %v3590_v22, %v3213_v54  ;;  %v3216_v51 = vadd.f32 %v7280_v48, %v8834_v28 }
 0x20e   : > { %v3088_v26 = vpop.f32.mrf.mxu1  ;;  %v3602_v30 = vpop.f32.mrf.mxu0 }
 0x20f   : > { %v9015_v0 = vadd.f32 %v7336_v45, %v3216_v51  ;;  %v3215_v53 = vadd.f32 %v3088_v26, %v8838_v13 }
 0x210   : > { %v7281_v25 = vpop.f32.mrf.mxu1  ;;  %v7337_v18 = vpop.f32.mrf.mxu0 }
 0x211   : > { %v9018_v46 = vadd.f32 %v3602_v30, %v3215_v53  ;;  %v3217_v20 = vadd.f32 %v7281_v25, %v8846_v63 }
 0x212   : > { %v3091_v6 = vpop.f32.mrf.mxu1  ;;  %v3605_v52 = vpop.f32.mrf.mxu0 }
 0x213   : > { %v9021_v19 = vadd.f32 %v7337_v18, %v3217_v20 }
 0x214   : > { %v7284_v33 = vpop.f32.mrf.mxu1  ;;  %v7340_v8 = vpop.f32.mrf.mxu0 }
 0x215   : > { %v3219_v28 = vadd.f32 %v7284_v33, %v8858_v12 }
 0x216   : > { %v3103_v16 = vpop.f32.mrf.mxu1  ;;  %v3617_v62 = vpop.f32.mrf.mxu0 }
 0x217   : > { %v9024_v5 = vadd.f32 %v7340_v8, %v3219_v28 }
 0x218   : > { %v7285_v32 = vpop.f32.mrf.mxu1  ;;  %v7341_v13 = vpop.f32.mrf.mxu0 }
 0x21a   : > { %v3105_v57 = vpop.f32.mrf.mxu1  ;;  %v3619_v34 = vpop.f32.mrf.mxu0 }
 0x21b   : > { %v3218_v14 = vadd.f32 %v3105_v57, %v8870_v11 }
 0x21c   : > { %v7288_v9 = vpop.f32.mrf.mxu1  ;;  %v7344_v63 = vpop.f32.mrf.mxu0 }
 0x21d   : > { %v9027_v7 = vadd.f32 %v3619_v34, %v3218_v14 }
 0x21e   : > { %v3117_v49 = vpop.f32.mrf.mxu1  ;;  %v3631_v55 = vpop.f32.mrf.mxu0 }
 0x21f   : > { %v3220_v24 = vadd.f32 %v3117_v49, %v8880_v47 }
 0x220   : > { %v7289_v37 = vpop.f32.mrf.mxu1  ;;  %v7345_v12 = vpop.f32.mrf.mxu0 }
 0x221   : > { %v9030_v10 = vadd.f32 %v3631_v55, %v3220_v24  ;;  %v3222_v22 = vadd.f32 %v7289_v37, %v8888_v31 }
 0x222   : > { %v3120_v54 = vpop.f32.mrf.mxu1  ;;  %v3634_v48 = vpop.f32.mrf.mxu0 }
 0x223   : > { %v9033_v45 = vadd.f32 %v7345_v12, %v3222_v22  ;;  %v3221_v11 = vadd.f32 %v3120_v54, %v8894_v59 }
 0x224   : > { %v7292_v51 = vpop.f32.mrf.mxu1  ;;  %v7348_v26 = vpop.f32.mrf.mxu0 }
 0x225   : > { %v9036_v30 = vadd.f32 %v3634_v48, %v3221_v11  ;;  %v3224_v53 = vadd.f32 %v7292_v51, %v8903_v15 }
 0x226   : > { %v3132_v25 = vpop.f32.mrf.mxu1  ;;  %v3646_v47 = vpop.f32.mrf.mxu0 }
 0x227   : > { %v9039_v18 = vadd.f32 %v7348_v26, %v3224_v53  ;;  %v3223_v20 = vadd.f32 %v3132_v25, %v8907_v60 }
 0x228   : > { %v7293_v6 = vpop.f32.mrf.mxu1  ;;  %v7349_v31 = vpop.f32.mrf.mxu0 }
 0x229   : > { %v9042_v52 = vadd.f32 %v3646_v47, %v3223_v20  ;;  %v3225_v33 = vadd.f32 %v7293_v6, %v8915_v58 }
 0x22a   : > { %v3135_v8 = vpop.f32.mrf.mxu1  ;;  %v3649_v59 = vpop.f32.mrf.mxu0 }
 0x22b   : > { %v9045_v28 = vadd.f32 %v7349_v31, %v3225_v33 }
 0x22c   : > { %v7296_v16 = vpop.f32.mrf.mxu1  ;;  %v7352_v62 = vpop.f32.mrf.mxu0 }
 0x22d   : > { %v3227_v15 = vadd.f32 %v7296_v16, %v8927_v4 }
 0x22e   : > { %v3147_v32 = vpop.f32.mrf.mxu1  ;;  %v3661_v13 = vpop.f32.mrf.mxu0 }
 0x22f   : > { %v9048_v57 = vadd.f32 %v7352_v62, %v3227_v15 }
 0x230   : > { %v7297_v34 = vpop.f32.mrf.mxu1  ;;  %v7353_v60 = vpop.f32.mrf.mxu0 }
 0x232   : > { %v3149_v14 = vpop.f32.mrf.mxu1  ;;  %v3663_v9 = vpop.f32.mrf.mxu0 }
 0x233   : > { %v3226_v63 = vadd.f32 %v3149_v14, %v8938_v2 }
 0x234   : > { %v7300_v49 = vpop.f32.mrf.mxu1  ;;  %v7356_v58 = vpop.f32.mrf.mxu0 }
 0x235   : > { %v9051_v55 = vadd.f32 %v3663_v9, %v3226_v63 }
 0x236   : > { %v3161_v24 = vpop.f32.mrf.mxu1  ;;  %v3675_v37 = vpop.f32.mrf.mxu0 }
 0x237   : > { %v3228_v12 = vadd.f32 %v3161_v24, %v8947_v41 }
 0x238   : > { %v7301_v22 = vpop.f32.mrf.mxu1  ;;  %v7357_v4 = vpop.f32.mrf.mxu0 }
 0x239   : > { %v9054_v54 = vadd.f32 %v3675_v37, %v3228_v12  ;;  %v3230_v48 = vadd.f32 %v7301_v22, %v8953_v43 }
 0x23a   : > { %v3164_v11 = vpop.f32.mrf.mxu1  ;;  %v3678_v51 = vpop.f32.mrf.mxu0 }
 0x23b   : > { %v9057_v26 = vadd.f32 %v7357_v4, %v3230_v48  ;;  %v3229_v2 = vadd.f32 %v3164_v11, %v8958_v23  ;;  %v7786_v4 = vmov 1983009808   ;;  %v4970_v11 = vlaneseq }
 0x23c   : > { %v7304_v53 = vpop.f32.mrf.mxu1  ;;  %v7360_v25 = vpop.f32.mrf.mxu0  ;;  %v4968_v48 = vunpack.c.l.s4 %v7786_v4 }
 0x23d   : > { %v9060_v47 = vadd.f32 %v3678_v51, %v3229_v2  ;;  %v3232_v20 = vadd.f32 %v7304_v53, %v8963_v1  ;;  %v9078_v51 = vld [vmem:[#allocation4] ss:$0 sm:$0xff] }
 0x23e   : > { %v3176_v6 = vpop.f32.mrf.mxu1  ;;  %v3690_v41 = vpop.f32.mrf.mxu0 }
 0x23f   : > { %v9063_v31 = vadd.f32 %v7360_v25, %v3232_v20  ;;  %v3231_v33 = vadd.f32 %v3176_v6, %v8966_v21  ;;  %v4969_v6 = vunpack.c.0.s8 %v4968_v48 }
 0x240   : > { %v7305_v8 = vpop.f32.mrf.mxu1  ;;  %v7361_v43 = vpop.f32.mrf.mxu0 }
 0x241   : > { %9449 = vst [vmem:[#allocation9_spill] sm:$0xff] %v9063_v31  ;;  %v9066_v59 = vadd.f32 %v3690_v41, %v3231_v33  ;;  %v3233_v16 = vadd.f32 %v7305_v8, %v8971_v40 }
 0x242   : > { %v3179_v62 = vpop.f32.mrf.mxu1  ;;  %v3693_v23 = vpop.f32.mrf.mxu0 }
 0x243   : > { %v9069_v15 = vadd.f32 %v7361_v43, %v3233_v16  ;;  %v4971_v43 = vshrl.u32 %v4970_v11, 7 }
 0x244   : > { %v7308_v32 = vpop.f32.mrf.mxu1  ;;  %v7364_v13 = vpop.f32.mrf.mxu0 }
 0x245   : > { %9450 = vst [vmem:[#allocation10_spill] sm:$0xff] %v9069_v15  ;;  %v3235_v1 = vadd.f32 %v7308_v32, %v8976_v61 }
 0x246   : > { %v3191_v34 = vpop.f32.mrf.mxu1  ;;  %v3705_v60 = vpop.f32.mrf.mxu0 }
 0x247   : > { %v9072_v14 = vadd.f32 %v7364_v13, %v3235_v1 }
 0x248   : > { %v7309_v9 = vpop.f32.mrf.mxu1  ;;  %v7365_v21 = vpop.f32.mrf.mxu0 }
 0x249   : > { %9451 = vst [vmem:[#allocation11_spill] sm:$0xff] %v9072_v14  ;;  %v9085_v9 = vsub.s32 %v4969_v6, %v4971_v43 }
 0x24a   : > { %v3193_v63 = vpop.f32.mrf.mxu1  ;;  %v3707_v49 = vpop.f32.mrf.mxu0 }
 0x24b   : > { %v3234_v58 = vadd.f32 %v3193_v63, %v8979_v42 }
 0x24c   : > { %v7376_v24 = vpop.f32.mrf.mxu1  ;;  %v7432_v40 = vpop.f32.mrf.mxu0 }
 0x24d   : > { %v9075_v37 = vadd.f32 %v3707_v49, %v3234_v58 }
 0x24e   : > { %v4257_v12 = vpop.f32.mrf.mxu1  ;;  %v4656_v22 = vpop.f32.mrf.mxu0 }
 0x24f   : > { %9452 = vst [vmem:[#allocation8_spill] sm:$0xff] %v9075_v37  ;;  %v4432_v61 = vadd.f32 %v4257_v12, %v8982_v50 }
 0x250   : > { %v7377_v2 = vpop.f32.mrf.mxu1  ;;  %v7433_v53 = vpop.f32.mrf.mxu0 }
 0x251   : > { %v4831_v25 = vadd.f32 %v4656_v22, %v4432_v61  ;;  %v4434_v20 = vadd.f32 %v7377_v2, %v8985_v36 }
 0x252   : > { %v4260_v42 = vpop.f32.mrf.mxu1  ;;  %v4659_v41 = vpop.f32.mrf.mxu0 }
 0x253   : > { %v4870_v33 = vadd.f32 %v9078_v51, %v4831_v25  ;;  %v4833_v8 = vadd.f32 %v7433_v53, %v4434_v20  ;;  %v4433_v16 = vadd.f32 %v4260_v42, %v8988_v44 }
 0x254   : > { %v7380_v62 = vpop.f32.mrf.mxu1  ;;  %v7436_v23 = vpop.f32.mrf.mxu0 }
 0x255   : > { %v4872_v50 = vadd.f32 %v9078_v51, %v4833_v8  ;;  %v4436_v32 = vadd.f32 %v7380_v62, %v8991_v39  ;;  %v4832_v13 = vadd.f32 %v4659_v41, %v4433_v16  ;;  %v4902_v60 = vmax.f32 %v4870_v33, 0.0 }
 0x256   : > { %v4272_v1 = vpop.f32.mrf.mxu1  ;;  %v4671_v34 = vpop.f32.mrf.mxu0 }
 0x257   : > { %v4904_v36 = vmax.f32 %v4872_v50, 0.0  ;;  %v4435_v21 = vadd.f32 %v4272_v1, %v8994_v27  ;;  %v4835_v63 = vadd.f32 %v7436_v23, %v4436_v32  ;;  %v4871_v40 = vadd.f32 %v9078_v51, %v4832_v13 }
 0x258   : > { %v7381_v49 = vpop.f32.mrf.mxu1  ;;  %v7437_v58 = vpop.f32.mrf.mxu0 }
 0x259   : > { %v4934_v24 = vmax.f32 %v4902_v60, %v4904_v36  ;;  %v4834_v44 = vadd.f32 %v4671_v34, %v4435_v21  ;;  %v4437_v12 = vadd.f32 %v7381_v49, %v8997_v17  ;;  %v9093_v11 = vadd.f32 %v9078_v51, %v4835_v63 }
 0x25a   : > { %v4275_v22 = vpop.f32.mrf.mxu1  ;;  %v4674_v39 = vpop.f32.mrf.mxu0  ;;  %v4903_v17 = vmax.f32 %v4871_v40, 0.0 }
 0x25b   : > { %v4966_v4 = vcombine.high %v4934_v24, %v4934_v24  ;;  %v4973_v48 = vrot.slane %v4934_v24, %v9085_v9  ;;  %v4873_v61 = vadd.f32 %v9078_v51, %v4834_v44  ;;  %v4836_v27 = vadd.f32 %v7437_v58, %v4437_v12 }
 0x25c   : > { %v7384_v2 = vpop.f32.mrf.mxu1  ;;  %v7440_v53 = vpop.f32.mrf.mxu0 }
 0x25d   : > { %v4980_v25 = vrot.slane %v4966_v4, %v9085_v9  ;;  %v4981_v20 = vcombine.high %v4973_v48, %v4973_v48  ;;  %v6527_v6 = vrot.slane %v4973_v48, 9  ;;  %v4905_v42 = vmax.f32 %v4873_v61, 0.0 }
 0x25e   : > { %v4875_v41 = vadd.f32 %v9078_v51, %v4836_v27  ;;  %v4439_v33 = vadd.f32 %v7384_v2, %v9000_v56  ;;  %v4287_v8 = vpop.f32.mrf.mxu1  ;;  %v4686_v43 = vpop.f32.mrf.mxu0 }
 0x25f   : > { %v4982_v16 = vcombine.high %v4980_v25, %v4980_v25  ;;  %v6528_v62 = vrot.slane %v4981_v20, 9  ;;  %v6529_v23 = vrot.slane %v4980_v25, 9  ;;  %v5494_v50 = vmax.f32 %v4973_v48, %v6527_v6 }
 0x260   : > { %v4935_v13 = vmax.f32 %v4903_v17, %v4905_v42  ;;  %v4838_v1 = vadd.f32 %v7440_v53, %v4439_v33  ;;  %v7385_v34 = vpop.f32.mrf.mxu1  ;;  %v7441_v60 = vpop.f32.mrf.mxu0  ;;  %v4907_v24 = vmax.f32 %v4875_v41, 0.0 }
 0x261   : > { %v6530_v36 = vrot.slane %v4982_v16, 9  ;;  %v5495_v21 = vmax.f32 %v4981_v20, %v6528_v62  ;;  %v5496_v63 = vmax.f32 %v4980_v25, %v6529_v23  ;;  %v6658_v49 = vpack.c.bf16 %v5494_v50, %v5494_v50 }
 0x262   : > { %v4983_v58 = vcombine.high %v4935_v13, %v4935_v13  ;;  %v4990_v56 = vrot.slane %v4935_v13, %v9085_v9  ;;  %v4877_v44 = vadd.f32 %v9078_v51, %v4838_v1  ;;  %v4289_v40 = vpop.f32.mrf.mxu1  ;;  %v9101_v12 = vpop.f32.mrf.mxu0 }
 0x263   : > { %v5497_v22 = vmax.f32 %v4982_v16, %v6530_v36  ;;  %v6659_v39 = vpack.c.bf16 %v5495_v21, %v5495_v21  ;;  %v6660_v4 = vpack.c.bf16 %v5496_v63, %v5496_v63  ;;  %v5814_v48 = vunpack.c.l.b16 %v6658_v49 }
 0x264   : > { %v4997_v61 = vrot.slane %v4983_v58, %v9085_v9  ;;  %v4998_v27 = vcombine.high %v4990_v56, %v4990_v56  ;;  %v6531_v2 = vrot.slane %v4990_v56, 9  ;;  %v4909_v53 = vmax.f32 %v4877_v44, 0.0  ;;  %v7388_v25 = vpop.f32.mrf.mxu1  ;;  %v7444_v20 = vpop.f32.mrf.mxu0 }
 0x265   : > { %v6661_v6 = vpack.c.bf16 %v5497_v22, %v5497_v22  ;;  %v5815_v42 = vunpack.c.l.b16 %v6659_v39  ;;  %v5816_v17 = vunpack.c.l.b16 %v6660_v4  ;;  %v4438_v41 = vadd.f32 %v4289_v40, %v9003_v35 }
 0x266   : > { %v4999_v33 = vcombine.high %v4997_v61, %v4997_v61  ;;  %v6532_v8 = vrot.slane %v4998_v27, 9  ;;  %v6533_v43 = vrot.slane %v4997_v61, 9  ;;  %v5498_v16 = vmax.f32 %v4990_v56, %v6531_v2  ;;  %v4301_v62 = vpop.f32.mrf.mxu1  ;;  %v9105_v23 = vpop.f32.mrf.mxu0 }
 0x267   : > { %v5817_v50 = vunpack.c.l.b16 %v6661_v6  ;;  %v5878_v13 = vrot.slane %v5815_v42, 7  ;;  %v5881_v1 = vrot.slane %v5816_v17, 6  ;;  %v4937_v34 = vmax.f32 %v4907_v24, %v4909_v53 }
 0x268   : > { %v6534_v60 = vrot.slane %v4999_v33, 9  ;;  %v5499_v36 = vmax.f32 %v4998_v27, %v6532_v8  ;;  %v5500_v21 = vmax.f32 %v4997_v61, %v6533_v43  ;;  %v6662_v63 = vpack.c.bf16 %v5498_v16, %v5498_v16  ;;  %v7389_v49 = vpop.f32.mrf.mxu1  ;;  %v9107_v58 = vpop.f32.mrf.mxu0 }
 0x269   : > { %v5880_v35 = vsel %vm5879_vm3, %v5878_v13, %v5814_v48  ;;  %v5884_v44 = vrot.slane %v5817_v50, 5  ;;  %v5017_v56 = vcombine.high %v4937_v34, %v4937_v34  ;;  %v5024_v40 = vrot.slane %v4937_v34, %v9085_v9 }
 0x26a   : > { %v5883_v22 = vsel %vm5882_vm4, %v5881_v1, %v5880_v35  ;;  %v5501_v39 = vmax.f32 %v4999_v33, %v6534_v60  ;;  %v6663_v4 = vpack.c.bf16 %v5499_v36, %v5499_v36  ;;  %v6664_v2 = vpack.c.bf16 %v5500_v21, %v5500_v21  ;;  %v4304_v25 = vpop.f32.mrf.mxu1  ;;  %v9112_v24 = vpop.f32.mrf.mxu0 }
 0x26b   : > { %v5818_v27 = vunpack.c.l.b16 %v6662_v63  ;;  %v5886_v61 = vsel %vm5885_vm5, %v5884_v44, %v5883_v22  ;;  %v5031_v53 = vrot.slane %v5017_v56, %v9085_v9  ;;  %v5032_v20 = vcombine.high %v5024_v40, %v5024_v40 }
 0x26c   : > { %v6665_v6 = vpack.c.bf16 %v5501_v39, %v5501_v39  ;;  %v5819_v48 = vunpack.c.l.b16 %v6663_v4  ;;  %v5820_v42 = vunpack.c.l.b16 %v6664_v2  ;;  %v6539_v17 = vrot.slane %v5024_v40, 9  ;;  %v7392_v8 = vpop.f32.mrf.mxu1  ;;  %v9116_v43 = vpop.f32.mrf.mxu0 }
 0x26d   : > { %v5887_v33 = vrot.slane %v5818_v27, 4  ;;  %v5033_v16 = vcombine.high %v5031_v53, %v5031_v53  ;;  %v6540_v50 = vrot.slane %v5032_v20, 9  ;;  %v6541_v13 = vrot.slane %v5031_v53, 9 }
 0x26e   : > { %v5821_v1 = vunpack.c.l.b16 %v6665_v6  ;;  %v5890_v34 = vrot.slane %v5819_v48, 3  ;;  %v5893_v60 = vrot.slane %v5820_v42, 2  ;;  %v5506_v36 = vmax.f32 %v5024_v40, %v6539_v17  ;;  %v4316_v21 = vpop.f32.mrf.mxu1  ;;  %v4715_v63 = vpop.f32.mrf.mxu0 }
 0x26f   : > { %v5889_v35 = vsel %vm5888_vm6, %v5887_v33, %v5886_v61  ;;  %v6542_v44 = vrot.slane %v5033_v16, 9  ;;  %v5507_v56 = vmax.f32 %v5032_v20, %v6540_v50  ;;  %v5508_v22 = vmax.f32 %v5031_v53, %v6541_v13 }
 0x270   : > { %v5892_v39 = vsel %vm5891_vm7, %v5890_v34, %v5889_v35  ;;  %v5896_v4 = vrot.slane %v5821_v1, 1  ;;  %v6670_v2 = vpack.c.bf16 %v5506_v36, %v5506_v36  ;;  %v4837_v27 = vadd.f32 %v9101_v12, %v4438_v41  ;;  %v7393_v32 = vpop.f32.mrf.mxu1  ;;  %v7449_v37 = vpop.f32.mrf.mxu0 }
 0x271   : > { %v5895_v6 = vsel %vm5894_vm8, %v5893_v60, %v5892_v39  ;;  %v5509_v48 = vmax.f32 %v5033_v16, %v6542_v44  ;;  %v6671_v40 = vpack.c.bf16 %v5507_v56, %v5507_v56  ;;  %v6672_v42 = vpack.c.bf16 %v5508_v22, %v5508_v22 }
 0x272   : > { %v5898_v61 = vsel %vm5897_vm9, %v5896_v4, %v5895_v6  ;;  %v9129_v53 = vunpack.c.l.b16 %v6670_v2  ;;  %v4876_v20 = vadd.f32 %v9078_v51, %v4837_v27  ;;  %v4440_v12 = vadd.f32 %v4301_v62, %v9006_v3  ;;  %v4319_v41 = vpop.f32.mrf.mxu1  ;;  %v4718_v17 = vpop.f32.mrf.mxu0 }
 0x273   : > { %v5997_v33 = vpack.c.b16 %v5898_v61, %v5898_v61  ;;  %v6673_v16 = vpack.c.bf16 %v5509_v48, %v5509_v48  ;;  %v9133_v50 = vunpack.c.l.b16 %v6671_v40  ;;  %v9135_v13 = vunpack.c.l.b16 %v6672_v42 }
 0x274   : > { %v4908_v34 = vmax.f32 %v4876_v20, 0.0  ;;  %v4839_v60 = vadd.f32 %v9105_v23, %v4440_v12  ;;  %v4442_v36 = vadd.f32 %v7389_v49, %v9009_v29  ;;  %v7396_v35 = vpop.f32.mrf.mxu1  ;;  %v9140_v44 = vpop.f32.mrf.mxu0  ;;  %v4441_v22 = vadd.f32 %v4304_v25, %v9012_v38 }
 0x275   : > { %6013 = vst [vmem:[%s9126_s15] sm:$0xf] %v5997_v33  ;;  %v9143_v3 = vunpack.c.l.b16 %v6673_v16  ;;  %v9453_v39 = vmax.f32 %v9093_v11, 0.0  ;;  %v4444_v29 = vadd.f32 %v7392_v8, %v9015_v0  ;;  %v4443_v40 = vadd.f32 %v4316_v21, %v9018_v46 }
 0x276   : > { %v4878_v2 = vadd.f32 %v9078_v51, %v4839_v60  ;;  %v4841_v23 = vadd.f32 %v9107_v58, %v4442_v36  ;;  %v4331_v49 = vpop.f32.mrf.mxu1  ;;  %v4730_v27 = vpop.f32.mrf.mxu0  ;;  %v4840_v48 = vadd.f32 %v9112_v24, %v4441_v22  ;;  %v4445_v42 = vadd.f32 %v7393_v32, %v9021_v19 }
 0x277   : > { %v4936_v4 = vmax.f32 %v9453_v39, %v4908_v34  ;;  %v4843_v8 = vadd.f32 %v9116_v43, %v4444_v29  ;;  %v4842_v12 = vadd.f32 %v4715_v63, %v4443_v40 }
 0x278   : > { %v4910_v25 = vmax.f32 %v4878_v2, 0.0  ;;  %v4880_v61 = vadd.f32 %v9078_v51, %v4841_v23  ;;  %v7397_v20 = vpop.f32.mrf.mxu1  ;;  %v7453_v58 = vpop.f32.mrf.mxu0  ;;  %v4879_v0 = vadd.f32 %v9078_v51, %v4840_v48  ;;  %v4844_v41 = vadd.f32 %v7449_v37, %v4445_v42 }
 0x279   : > { %v5000_v38 = vcombine.high %v4936_v4, %v4936_v4  ;;  %v5007_v11 = vrot.slane %v4936_v4, %v9085_v9  ;;  %v9167_v16 = vadd.f32 %v9078_v51, %v4843_v8  ;;  %v4881_v34 = vadd.f32 %v9078_v51, %v4842_v12 }
 0x27a   : > { %v4912_v21 = vmax.f32 %v4880_v61, 0.0  ;;  %v9162_v19 = vpop.f32.mrf.mxu1  ;;  %v9164_v32 = vpop.f32.mrf.mxu0  ;;  %v4911_v33 = vmax.f32 %v4879_v0, 0.0  ;;  %v9171_v60 = vadd.f32 %v9078_v51, %v4844_v41  ;;  %v9181_v58 = vadd.f32 %v7396_v35, %v9024_v5 }
 0x27b   : > { %v5014_v24 = vrot.slane %v5000_v38, %v9085_v9  ;;  %v5015_v17 = vcombine.high %v5007_v11, %v5007_v11  ;;  %v6535_v46 = vrot.slane %v5007_v11, 9  ;;  %v4913_v23 = vmax.f32 %v4881_v34, 0.0 }
 0x27c   : > { %v7400_v22 = vpop.f32.mrf.mxu1  ;;  %v7456_v39 = vpop.f32.mrf.mxu0  ;;  %v4938_v4 = vmax.f32 %v4910_v25, %v4912_v21 }
 0x27d   : > { %v5016_v43 = vcombine.high %v5014_v24, %v5014_v24  ;;  %v6536_v37 = vrot.slane %v5015_v17, 9  ;;  %v6537_v63 = vrot.slane %v5014_v24, 9  ;;  %v5502_v36 = vmax.f32 %v5007_v11, %v6535_v46 }
 0x27e   : > { %v9175_v42 = vpop.f32.mrf.mxu1  ;;  %v9177_v38 = vpop.f32.mrf.mxu0  ;;  %v5034_v61 = vcombine.high %v4938_v4, %v4938_v4  ;;  %v5041_v20 = vrot.slane %v4938_v4, %v9085_v9  ;;  %v4939_v11 = vmax.f32 %v4911_v33, %v4913_v23 }
 0x27f   : > { %v6538_v49 = vrot.slane %v5016_v43, 9  ;;  %v5503_v27 = vmax.f32 %v5015_v17, %v6536_v37  ;;  %v5504_v48 = vmax.f32 %v5014_v24, %v6537_v63  ;;  %v6666_v40 = vpack.c.bf16 %v5502_v36, %v5502_v36 }
 0x280   : > { %v9183_v41 = vpop.f32.mrf.mxu1  ;;  %v9185_v17 = vpop.f32.mrf.mxu0  ;;  %v5048_v24 = vrot.slane %v5034_v61, %v9085_v9  ;;  %v5049_v46 = vcombine.high %v5041_v20, %v5041_v20  ;;  %v6543_v21 = vrot.slane %v5041_v20, 9  ;;  %v5051_v34 = vcombine.high %v4939_v11, %v4939_v11 }
 0x281   : > { %v5505_v25 = vmax.f32 %v5016_v43, %v6538_v49  ;;  %v6667_v0 = vpack.c.bf16 %v5503_v27, %v5503_v27  ;;  %v6668_v8 = vpack.c.bf16 %v5504_v48, %v5504_v48  ;;  %v5822_v12 = vunpack.c.l.b16 %v6666_v40 }
 0x282   : > { %v5058_v33 = vrot.slane %v4939_v11, %v9085_v9  ;;  %v9189_v5 = vpop.f32.mrf.mxu1  ;;  %v9191_v35 = vpop.f32.mrf.mxu0  ;;  %v5050_v43 = vcombine.high %v5048_v24, %v5048_v24  ;;  %v6544_v22 = vrot.slane %v5049_v46, 9  ;;  %v6545_v39 = vrot.slane %v5048_v24, 9 }
 0x283   : > { %v6669_v37 = vpack.c.bf16 %v5505_v25, %v5505_v25  ;;  %v5823_v63 = vunpack.c.l.b16 %v6667_v0  ;;  %v5824_v36 = vunpack.c.l.b16 %v6668_v8  ;;  %v5510_v4 = vmax.f32 %v5041_v20, %v6543_v21 }
 0x284   : > { %v5065_v48 = vrot.slane %v5051_v34, %v9085_v9  ;;  %v9194_v40 = vpop.f32.mrf.mxu1  ;;  %v9196_v61 = vpop.f32.mrf.mxu0  ;;  %v6546_v25 = vrot.slane %v5050_v43, 9  ;;  %v5511_v0 = vmax.f32 %v5049_v46, %v6544_v22  ;;  %v5512_v11 = vmax.f32 %v5048_v24, %v6545_v39 }
 0x285   : > { %v5825_v23 = vunpack.c.l.b16 %v6669_v37  ;;  %v5899_v49 = vrot.slane %v5823_v63, 7  ;;  %v5901_v27 = vrot.slane %v5824_v36, 6  ;;  %v6674_v8 = vpack.c.bf16 %v5510_v4, %v5510_v4 }
 0x286   : > { %v5066_v6 = vcombine.high %v5058_v33, %v5058_v33  ;;  %v5067_v56 = vcombine.high %v5065_v48, %v5065_v48  ;;  %v9199_v62 = vpop.f32.mrf.mxu1  ;;  %v9201_v20 = vpop.f32.mrf.mxu0  ;;  %v5513_v34 = vmax.f32 %v5050_v43, %v6546_v25  ;;  %v6675_v37 = vpack.c.bf16 %v5511_v0, %v5511_v0 }
 0x287   : > { %v5900_v2 = vsel %vm5879_vm3, %v5899_v49, %v5822_v12  ;;  %v5903_v29 = vrot.slane %v5825_v23, 5  ;;  %v6676_v63 = vpack.c.bf16 %v5512_v11, %v5512_v11  ;;  %v5830_v1 = vunpack.c.l.b16 %v6674_v8 }
 0x288   : > { %v5902_v21 = vsel %vm5882_vm4, %v5901_v27, %v5900_v2  ;;  %v6547_v46 = vrot.slane %v5058_v33, 9  ;;  %v6548_v24 = vrot.slane %v5066_v6, 9  ;;  %v9205_v22 = vpop.f32.mrf.mxu1  ;;  %v9207_v12 = vpop.f32.mrf.mxu0  ;;  %v9454_v39 = vrot.slane %v9129_v53, 4 }
 0x289   : > { %v5904_v36 = vsel %vm5885_vm5, %v5903_v29, %v5902_v21  ;;  %v6677_v23 = vpack.c.bf16 %v5513_v34, %v5513_v34  ;;  %v5831_v49 = vunpack.c.l.b16 %v6675_v37  ;;  %v5832_v14 = vunpack.c.l.b16 %v6676_v63 }
 0x28a   : > { %v5906_v4 = vsel %vm5888_vm6, %v9454_v39, %v5904_v36  ;;  %v9455_v2 = vrot.slane %v9133_v50, 3  ;;  %v6549_v27 = vrot.slane %v5065_v48, 9  ;;  %v6550_v29 = vrot.slane %v5067_v56, 9  ;;  %v4363_v0 = vpop.f32.mrf.mxu1  ;;  %v4762_v11 = vpop.f32.mrf.mxu0 }
 0x28b   : > { %v5514_v25 = vmax.f32 %v5058_v33, %v6547_v46  ;;  %v9456_v8 = vrot.slane %v9135_v13, 2  ;;  %v5833_v15 = vunpack.c.l.b16 %v6677_v23  ;;  %v5913_v53 = vrot.slane %v5831_v49, 7 }
 0x28c   : > { %v5908_v43 = vsel %vm5891_vm7, %v9455_v2, %v5906_v4  ;;  %v5915_v31 = vrot.slane %v5832_v14, 6  ;;  %v9457_v34 = vrot.slane %v9143_v3, 1  ;;  %v5515_v50 = vmax.f32 %v5066_v6, %v6548_v24  ;;  %v9221_v39 = vpop.f32.mrf.mxu1  ;;  %v9223_v33 = vpop.f32.mrf.mxu0 }
 0x28d   : > { %v5910_v21 = vsel %vm5894_vm8, %v9456_v8, %v5908_v43  ;;  %v5516_v63 = vmax.f32 %v5065_v48, %v6549_v27  ;;  %v5517_v36 = vmax.f32 %v5067_v56, %v6550_v29  ;;  %v5914_v13 = vsel %vm5879_vm3, %v5913_v53, %v5830_v1 }
 0x28e   : > { %v5912_v37 = vsel %vm5897_vm9, %v9457_v34, %v5910_v21  ;;  %v5917_v4 = vrot.slane %v5833_v15, 5  ;;  %v6678_v2 = vpack.c.bf16 %v5514_v25, %v5514_v25  ;;  %v5916_v23 = vsel %vm5882_vm4, %v5915_v31, %v5914_v13  ;;  %v4375_v43 = vpop.f32.mrf.mxu1  ;;  %v4774_v0 = vpop.f32.mrf.mxu0 }
 0x28f   : > { %v5998_v46 = vpack.c.b16 %v5912_v37, %v5912_v37  ;;  %v6679_v14 = vpack.c.bf16 %v5515_v50, %v5515_v50  ;;  %v6680_v49 = vpack.c.bf16 %v5516_v63, %v5516_v63  ;;  %v6681_v3 = vpack.c.bf16 %v5517_v36, %v5517_v36 }
 0x290   : > { %v5834_v6 = vunpack.c.l.b16 %v6678_v2  ;;  %v5918_v56 = vsel %vm5885_vm5, %v5917_v4, %v5916_v23  ;;  %v4846_v48 = vadd.f32 %v9140_v44, %v9181_v58  ;;  %v4446_v24 = vadd.f32 %v9162_v19, %v9027_v7  ;;  %v7409_v29 = vpop.f32.mrf.mxu1  ;;  %v7465_v25 = vpop.f32.mrf.mxu0 }
 0x291   : > { %6014 = vst [vmem:[%s9126_s15 + $0x4] sm:$0xf] %v5998_v46  ;;  %v5835_v1 = vunpack.c.l.b16 %v6679_v14  ;;  %v5836_v15 = vunpack.c.l.b16 %v6680_v49  ;;  %v5837_v27 = vunpack.c.l.b16 %v6681_v3  ;;  %v4448_v31 = vadd.f32 %v9175_v42, %v9030_v10 }
 0x292   : > { %v5919_v11 = vrot.slane %v5834_v6, 4  ;;  %v4885_v8 = vadd.f32 %v9078_v51, %v4846_v48  ;;  %v4845_v21 = vadd.f32 %v9164_v32, %v4446_v24  ;;  %v4450_v53 = vadd.f32 %v9183_v41, %v9033_v45  ;;  %v9240_v19 = vpop.f32.mrf.mxu1  ;;  %v9242_v37 = vpop.f32.mrf.mxu0 }
 0x293   : > { %v5921_v44 = vrot.slane %v5835_v1, 3  ;;  %v5923_v58 = vrot.slane %v5836_v15, 2  ;;  %v5925_v34 = vrot.slane %v5837_v27, 1  ;;  %v4847_v7 = vadd.f32 %v9177_v38, %v4448_v31 }
 0x294   : > { %v5920_v10 = vsel %vm5888_vm6, %v5919_v11, %v5918_v56  ;;  %v4917_v42 = vmax.f32 %v4885_v8, 0.0  ;;  %v4884_v50 = vadd.f32 %v9078_v51, %v4845_v21  ;;  %v4849_v63 = vadd.f32 %v9185_v17, %v4450_v53  ;;  %v7412_v36 = vpop.f32.mrf.mxu1  ;;  %v7468_v46 = vpop.f32.mrf.mxu0 }
 0x295   : > { %v5922_v32 = vsel %vm5891_vm7, %v5921_v44, %v5920_v10  ;;  %v4886_v45 = vadd.f32 %v9078_v51, %v4847_v7  ;;  %v4449_v41 = vadd.f32 %v9189_v5, %v9036_v30  ;;  %v4452_v38 = vadd.f32 %v9194_v40, %v9039_v18 }
 0x296   : > { %v5924_v13 = vsel %vm5894_vm8, %v5923_v58, %v5922_v32  ;;  %v9458_v4 = vmax.f32 %v9171_v60, 0.0  ;;  %v4916_v23 = vmax.f32 %v4884_v50, 0.0  ;;  %v4888_v17 = vadd.f32 %v9078_v51, %v4849_v63  ;;  %v9260_v5 = vpop.f32.mrf.mxu1  ;;  %v9262_v18 = vpop.f32.mrf.mxu0 }
 0x297   : > { %v5926_v14 = vsel %vm5897_vm9, %v5925_v34, %v5924_v13  ;;  %v4848_v49 = vadd.f32 %v9191_v35, %v4449_v41  ;;  %v4851_v30 = vadd.f32 %v9196_v61, %v4452_v38  ;;  %v9459_v60 = vmax.f32 %v9167_v16, 0.0 }
 0x298   : > { %v4941_v2 = vmax.f32 %v9458_v4, %v4917_v42  ;;  %v5999_v40 = vpack.c.b16 %v5926_v14, %v5926_v14  ;;  %v4918_v6 = vmax.f32 %v4886_v45, 0.0  ;;  %v4920_v56 = vmax.f32 %v4888_v17, 0.0  ;;  %v9273_v61 = vpop.f32.mrf.mxu1  ;;  %v9275_v24 = vpop.f32.mrf.mxu0 }
 0x299   : > { %v4940_v0 = vmax.f32 %v9459_v60, %v4916_v23  ;;  %v9268_v48 = vadd.f32 %v9078_v51, %v4848_v49  ;;  %v9271_v35 = vadd.f32 %v9078_v51, %v4851_v30  ;;  %v4451_v11 = vadd.f32 %v9199_v62, %v9042_v52 }
 0x29a   : > { %v5085_v3 = vcombine.high %v4941_v2, %v4941_v2  ;;  %v5092_v43 = vrot.slane %v4941_v2, %v9085_v9  ;;  %6015 = vst [vmem:[%s9126_s15 + $0x8] sm:$0xf] %v5999_v40  ;;  %v4942_v29 = vmax.f32 %v4918_v6, %v4920_v56  ;;  %v9283_v8 = vpop.f32.mrf.mxu1  ;;  %v9285_v21 = vpop.f32.mrf.mxu0 }
 0x29b   : > { %v5068_v31 = vcombine.high %v4940_v0, %v4940_v0  ;;  %v5075_v16 = vrot.slane %v4940_v0, %v9085_v9  ;;  %v4919_v25 = vmax.f32 %v9268_v48, 0.0 }
 0x29c   : > { %v5099_v1 = vrot.slane %v5085_v3, %v9085_v9  ;;  %v5100_v15 = vcombine.high %v5092_v43, %v5092_v43  ;;  %v6555_v27 = vrot.slane %v5092_v43, 9  ;;  %v5102_v50 = vcombine.high %v4942_v29, %v4942_v29  ;;  %v9288_v63 = vpop.f32.mrf.mxu1  ;;  %v9290_v32 = vpop.f32.mrf.mxu0 }
 0x29d   : > { %v5082_v7 = vrot.slane %v5068_v31, %v9085_v9  ;;  %v5083_v10 = vcombine.high %v5075_v16, %v5075_v16  ;;  %v6551_v42 = vrot.slane %v5075_v16, 9 }
 0x29e   : > { %v5101_v53 = vcombine.high %v5099_v1, %v5099_v1  ;;  %v6556_v44 = vrot.slane %v5100_v15, 9  ;;  %v6557_v58 = vrot.slane %v5099_v1, 9  ;;  %v5522_v34 = vmax.f32 %v5092_v43, %v6555_v27  ;;  %v9292_v4 = vpop.f32.mrf.mxu1  ;;  %v9294_v2 = vpop.f32.mrf.mxu0 }
 0x29f   : > { %v5084_v38 = vcombine.high %v5082_v7, %v5082_v7  ;;  %v6552_v36 = vrot.slane %v5083_v10, 9  ;;  %v6553_v46 = vrot.slane %v5082_v7, 9  ;;  %v5518_v13 = vmax.f32 %v5075_v16, %v6551_v42 }
 0x2a0   : > { %v6558_v45 = vrot.slane %v5101_v53, 9  ;;  %v5523_v41 = vmax.f32 %v5100_v15, %v6556_v44  ;;  %v5524_v52 = vmax.f32 %v5099_v1, %v6557_v58  ;;  %v6686_v62 = vpack.c.bf16 %v5522_v34, %v5522_v34  ;;  %v9296_v60 = vpop.f32.mrf.mxu1  ;;  %v9298_v0 = vpop.f32.mrf.mxu0 }
 0x2a1   : > { %v6554_v30 = vrot.slane %v5084_v38, 9  ;;  %v5519_v40 = vmax.f32 %v5083_v10, %v6552_v36  ;;  %v5520_v3 = vmax.f32 %v5082_v7, %v6553_v46  ;;  %v6682_v43 = vpack.c.bf16 %v5518_v13, %v5518_v13 }
 0x2a2   : > { %v5525_v23 = vmax.f32 %v5101_v53, %v6558_v45  ;;  %v6687_v17 = vpack.c.bf16 %v5523_v41, %v5523_v41  ;;  %v6688_v14 = vpack.c.bf16 %v5524_v52, %v5524_v52  ;;  %v5842_v49 = vunpack.c.l.b16 %v6686_v62  ;;  %v4407_v44 = vpop.f32.mrf.mxu1  ;;  %v4806_v58 = vpop.f32.mrf.mxu0 }
 0x2a3   : > { %v4922_v15 = vmax.f32 %v9271_v35, 0.0  ;;  %v5521_v31 = vmax.f32 %v5084_v38, %v6554_v30  ;;  %v6683_v16 = vpack.c.bf16 %v5519_v40, %v5519_v40  ;;  %v6684_v53 = vpack.c.bf16 %v5520_v3, %v5520_v3 }
 0x2a4   : > { %v6689_v6 = vpack.c.bf16 %v5525_v23, %v5525_v23  ;;  %v5843_v56 = vunpack.c.l.b16 %v6687_v17  ;;  %v5844_v1 = vunpack.c.l.b16 %v6688_v14  ;;  %v5933_v27 = vrot.slane %v5842_v49, 4  ;;  %v9303_v36 = vpop.f32.mrf.mxu1  ;;  %v9305_v46 = vpop.f32.mrf.mxu0 }
 0x2a5   : > { %v5838_v10 = vunpack.c.l.b16 %v6682_v43  ;;  %v5109_v7 = vrot.slane %v4942_v29, %v9085_v9  ;;  %v6685_v45 = vpack.c.bf16 %v5521_v31, %v5521_v31  ;;  %v5839_v41 = vunpack.c.l.b16 %v6683_v16 }
 0x2a6   : > { %v5845_v34 = vunpack.c.l.b16 %v6689_v6  ;;  %v5935_v42 = vrot.slane %v5843_v56, 3  ;;  %v5840_v52 = vunpack.c.l.b16 %v6684_v53  ;;  %v5116_v62 = vrot.slane %v5102_v50, %v9085_v9  ;;  %v4419_v3 = vpop.f32.mrf.mxu1  ;;  %v4818_v29 = vpop.f32.mrf.mxu0 }
 0x2a7   : > { %v5937_v13 = vrot.slane %v5844_v1, 2  ;;  %v5117_v38 = vcombine.high %v5109_v7, %v5109_v7  ;;  %v6559_v23 = vrot.slane %v5109_v7, 9  ;;  %v4850_v17 = vadd.f32 %v9201_v20, %v4451_v11 }
 0x2a8   : > { %v5841_v14 = vunpack.c.l.b16 %v6685_v45  ;;  %v5927_v49 = vrot.slane %v5839_v41, 7  ;;  %v5929_v30 = vrot.slane %v5840_v52, 6  ;;  %v5118_v40 = vcombine.high %v5116_v62, %v5116_v62  ;;  %v7421_v44 = vpop.f32.mrf.mxu1  ;;  %v7477_v20 = vpop.f32.mrf.mxu0 }
 0x2a9   : > { %v6560_v43 = vrot.slane %v5117_v38, 9  ;;  %v6561_v6 = vrot.slane %v5116_v62, 9  ;;  %v5526_v56 = vmax.f32 %v5109_v7, %v6559_v23  ;;  %v4889_v50 = vadd.f32 %v9078_v51, %v4850_v17 }
 0x2aa   : > { %v5928_v31 = vsel %vm5879_vm3, %v5927_v49, %v5838_v10  ;;  %v5931_v16 = vrot.slane %v5841_v14, 5  ;;  %v6562_v53 = vrot.slane %v5118_v40, 9  ;;  %v4453_v1 = vadd.f32 %v9205_v22, %v9045_v28 }
 0x2ab   : > { %v5939_v11 = vrot.slane %v5845_v34, 1  ;;  %v5930_v58 = vsel %vm5882_vm4, %v5929_v30, %v5928_v31  ;;  %v5527_v45 = vmax.f32 %v5117_v38, %v6560_v43  ;;  %v5528_v41 = vmax.f32 %v5116_v62, %v6561_v6 }
 0x2ac   : > { %v5932_v52 = vsel %vm5885_vm5, %v5931_v16, %v5930_v58  ;;  %v5529_v3 = vmax.f32 %v5118_v40, %v6562_v53  ;;  %v4921_v7 = vmax.f32 %v4889_v50, 0.0  ;;  %v4852_v23 = vadd.f32 %v9207_v12, %v4453_v1 }
 0x2ad   : > { %v5934_v10 = vsel %vm5888_vm6, %v5933_v27, %v5932_v52  ;;  %v6690_v17 = vpack.c.bf16 %v5526_v56, %v5526_v56  ;;  %v6691_v14 = vpack.c.bf16 %v5527_v45, %v5527_v45  ;;  %v6692_v49 = vpack.c.bf16 %v5528_v41, %v5528_v41 }
 0x2ae   : > { %v5936_v28 = vsel %vm5891_vm7, %v5935_v42, %v5934_v10  ;;  %v6693_v22 = vpack.c.bf16 %v5529_v3, %v5529_v3  ;;  %v4943_v34 = vmax.f32 %v4919_v25, %v4921_v7  ;;  %v4891_v38 = vadd.f32 %v9078_v51, %v4852_v23 }
 0x2af   : > { %v5938_v62 = vsel %vm5894_vm8, %v5937_v13, %v5936_v28  ;;  %v5847_v30 = vunpack.c.l.b16 %v6691_v14  ;;  %v5848_v40 = vunpack.c.l.b16 %v6692_v49  ;;  %v4455_v12 = vadd.f32 %v9221_v39, %v9048_v57 }
 0x2b0   : > { %v5940_v27 = vsel %vm5897_vm9, %v5939_v11, %v5938_v62  ;;  %v5849_v29 = vunpack.c.l.b16 %v6693_v22  ;;  %v5119_v43 = vcombine.high %v4943_v34, %v4943_v34  ;;  %v5126_v42 = vrot.slane %v4943_v34, %v9085_v9 }
 0x2b1   : > { %v6000_v6 = vpack.c.b16 %v5940_v27, %v5940_v27  ;;  %v5846_v56 = vunpack.c.l.b16 %v6690_v17  ;;  %v5941_v48 = vrot.slane %v5847_v30, 7  ;;  %v5943_v25 = vrot.slane %v5848_v40, 6 }
 0x2b2   : > { %v5133_v50 = vrot.slane %v5119_v43, %v9085_v9  ;;  %v5134_v31 = vcombine.high %v5126_v42, %v5126_v42  ;;  %v6563_v13 = vrot.slane %v5126_v42, 9  ;;  %v4923_v16 = vmax.f32 %v4891_v38, 0.0 }
 0x2b3   : > { %6016 = vst [vmem:[%s9126_s15 + $0xc] sm:$0xf] %v6000_v6  ;;  %v5942_v53 = vsel %vm5879_vm3, %v5941_v48, %v5846_v56  ;;  %v4854_v57 = vadd.f32 %v9223_v33, %v4455_v12  ;;  %v4454_v39 = vadd.f32 %v9240_v19, %v9051_v55  ;;  %v4456_v1 = vadd.f32 %v9260_v5, %v9054_v54 }
 0x2b4   : > { %v5945_v44 = vrot.slane %v5849_v29, 5  ;;  %v5135_v20 = vcombine.high %v5133_v50, %v5133_v50  ;;  %v6564_v11 = vrot.slane %v5134_v31, 9  ;;  %v6565_v58 = vrot.slane %v5133_v50, 9 }
 0x2b5   : > { %v5944_v45 = vsel %vm5882_vm4, %v5943_v25, %v5942_v53  ;;  %v5530_v41 = vmax.f32 %v5126_v42, %v6563_v13  ;;  %v4893_v52 = vadd.f32 %v9078_v51, %v4854_v57  ;;  %v4853_v3 = vadd.f32 %v9242_v37, %v4454_v39 }
 0x2b6   : > { %v6566_v7 = vrot.slane %v5135_v20, 9  ;;  %v5531_v23 = vmax.f32 %v5134_v31, %v6564_v11  ;;  %v5532_v33 = vmax.f32 %v5133_v50, %v6565_v58  ;;  %v4855_v10 = vadd.f32 %v9262_v18, %v4456_v1 }
 0x2b7   : > { %v6694_v55 = vpack.c.bf16 %v5530_v41, %v5530_v41  ;;  %v4925_v19 = vmax.f32 %v4893_v52, 0.0  ;;  %v4892_v54 = vadd.f32 %v9078_v51, %v4853_v3  ;;  %v4458_v5 = vadd.f32 %v9273_v61, %v9057_v26 }
 0x2b8   : > { %v5533_v17 = vmax.f32 %v5135_v20, %v6566_v7  ;;  %v6695_v14 = vpack.c.bf16 %v5531_v23, %v5531_v23  ;;  %v6696_v49 = vpack.c.bf16 %v5532_v33, %v5532_v33  ;;  %v5946_v28 = vsel %vm5885_vm5, %v5945_v44, %v5944_v45 }
 0x2b9   : > { %v5850_v22 = vunpack.c.l.b16 %v6694_v55  ;;  %v4945_v34 = vmax.f32 %v4923_v16, %v4925_v19  ;;  %v4924_v37 = vmax.f32 %v4892_v54, 0.0  ;;  %v4857_v38 = vadd.f32 %v9275_v24, %v4458_v5 }
 0x2ba   : > { %v6697_v62 = vpack.c.bf16 %v5533_v17, %v5533_v17  ;;  %v5851_v30 = vunpack.c.l.b16 %v6695_v14  ;;  %v5852_v18 = vunpack.c.l.b16 %v6696_v49  ;;  %v9343_v40 = vadd.f32 %v9078_v51, %v4855_v10 }
 0x2bb   : > { %v5947_v12 = vrot.slane %v5850_v22, 4  ;;  %v5153_v27 = vcombine.high %v4945_v34, %v4945_v34  ;;  %v5160_v26 = vrot.slane %v4945_v34, %v9085_v9  ;;  %v4944_v61 = vmax.f32 %v4922_v15, %v4924_v37 }
 0x2bc   : > { %v5853_v29 = vunpack.c.l.b16 %v6697_v62  ;;  %v5949_v43 = vrot.slane %v5851_v30, 3  ;;  %v5951_v42 = vrot.slane %v5852_v18, 2  ;;  %v4896_v6 = vadd.f32 %v9078_v51, %v4857_v38 }
 0x2bd   : > { %v5948_v24 = vsel %vm5888_vm6, %v5947_v12, %v5946_v28  ;;  %v5167_v56 = vrot.slane %v5153_v27, %v9085_v9  ;;  %v5168_v48 = vcombine.high %v5160_v26, %v5160_v26  ;;  %v6571_v25 = vrot.slane %v5160_v26, 9 }
 0x2be   : > { %v5950_v50 = vsel %vm5891_vm7, %v5949_v43, %v5948_v24  ;;  %v5953_v31 = vrot.slane %v5853_v29, 1  ;;  %v5136_v13 = vcombine.high %v4944_v61, %v4944_v61  ;;  %v5143_v16 = vrot.slane %v4944_v61, %v9085_v9 }
 0x2bf   : > { %v5952_v35 = vsel %vm5894_vm8, %v5951_v42, %v5950_v50  ;;  %v5169_v15 = vcombine.high %v5167_v56, %v5167_v56  ;;  %v6572_v53 = vrot.slane %v5168_v48, 9  ;;  %v6573_v57 = vrot.slane %v5167_v56, 9 }
 0x2c0   : > { %v5954_v51 = vsel %vm5897_vm9, %v5953_v31, %v5952_v35  ;;  %v5538_v39 = vmax.f32 %v5160_v26, %v6571_v25  ;;  %v5150_v1 = vrot.slane %v5136_v13, %v9085_v9  ;;  %v5151_v44 = vcombine.high %v5143_v16, %v5143_v16  ;;  %v9460_v35 = vld [vmem:[#allocation9_spill] sm:$0xff] }
 0x2c1   : > { %v6001_v20 = vpack.c.b16 %v5954_v51, %v5954_v51  ;;  %v6574_v11 = vrot.slane %v5169_v15, 9  ;;  %v5539_v58 = vmax.f32 %v5168_v48, %v6572_v53  ;;  %v5540_v45 = vmax.f32 %v5167_v56, %v6573_v57 }
 0x2c2   : > { %v6702_v41 = vpack.c.bf16 %v5538_v39, %v5538_v39  ;;  %v5152_v52 = vcombine.high %v5150_v1, %v5150_v1  ;;  %v6567_v3 = vrot.slane %v5143_v16, 9  ;;  %v6568_v7 = vrot.slane %v5151_v44, 9 }
 0x2c3   : > { %6017 = vst [vmem:[%s9126_s15 + $0x10] sm:$0xf] %v6001_v20  ;;  %v5541_v23 = vmax.f32 %v5169_v15, %v6574_v11  ;;  %v6703_v33 = vpack.c.bf16 %v5539_v58, %v5539_v58  ;;  %v6704_v10 = vpack.c.bf16 %v5540_v45, %v5540_v45  ;;  %v6569_v55 = vrot.slane %v5150_v1, 9 }
 0x2c4   : > { %v5858_v19 = vunpack.c.l.b16 %v6702_v41  ;;  %v6570_v54 = vrot.slane %v5152_v52, 9  ;;  %v5534_v5 = vmax.f32 %v5143_v16, %v6567_v3  ;;  %v5535_v17 = vmax.f32 %v5151_v44, %v6568_v7 }
 0x2c5   : > { %v6705_v14 = vpack.c.bf16 %v5541_v23, %v5541_v23  ;;  %v5859_v49 = vunpack.c.l.b16 %v6703_v33  ;;  %v5860_v28 = vunpack.c.l.b16 %v6704_v10  ;;  %v5536_v22 = vmax.f32 %v5150_v1, %v6569_v55 }
 0x2c6   : > { %v5537_v34 = vmax.f32 %v5152_v52, %v6570_v54  ;;  %v6698_v37 = vpack.c.bf16 %v5534_v5, %v5534_v5  ;;  %v6699_v38 = vpack.c.bf16 %v5535_v17, %v5535_v17  ;;  %v5961_v30 = vrot.slane %v5858_v19, 4 }
 0x2c7   : > { %v5861_v62 = vunpack.c.l.b16 %v6705_v14  ;;  %v6700_v18 = vpack.c.bf16 %v5536_v22, %v5536_v22  ;;  %v4926_v12 = vmax.f32 %v9343_v40, 0.0  ;;  %v5963_v27 = vrot.slane %v5859_v49, 3 }
 0x2c8   : > { %v6701_v26 = vpack.c.bf16 %v5537_v34, %v5537_v34  ;;  %v5855_v61 = vunpack.c.l.b16 %v6699_v38  ;;  %v4928_v29 = vmax.f32 %v4896_v6, 0.0  ;;  %v5965_v43 = vrot.slane %v5860_v28, 2 }
 0x2c9   : > { %v5854_v42 = vunpack.c.l.b16 %v6698_v37  ;;  %v5856_v24 = vunpack.c.l.b16 %v6700_v18  ;;  %v4457_v56 = vadd.f32 %v9283_v8, %v9060_v47  ;;  %v4459_v31 = vadd.f32 %v9292_v4, %v9066_v59  ;;  %v9368_v8 = vld [vmem:[#allocation4] ss:$0 sm:$0xff]  ;;  %v9461_v4 = vld [vmem:[#allocation10_spill] sm:$0xff] }
 0x2ca   : > { %v5857_v48 = vunpack.c.l.b16 %v6701_v26  ;;  %v5955_v25 = vrot.slane %v5855_v61, 7  ;;  %v4946_v50 = vmax.f32 %v4926_v12, %v4928_v29  ;;  %v5967_v13 = vrot.slane %v5861_v62, 1  ;;  %v9462_v37 = vld [vmem:[#allocation11_spill] sm:$0xff]  ;;  %v4421_v62 = vpop.f32.mrf.mxu1 }
 0x2cb   : > { %v5957_v16 = vrot.slane %v5856_v24, 6  ;;  %v4856_v40 = vadd.f32 %v9285_v21, %v4457_v56  ;;  %v4460_v15 = vadd.f32 %v9288_v63, %v9460_v35  ;;  %v4858_v59 = vadd.f32 %v9294_v2, %v4459_v31  ;;  %v9463_v56 = vld [vmem:[#allocation8_spill] sm:$0xff] }
 0x2cc   : > { %v5956_v6 = vsel %vm5879_vm3, %v5955_v25, %v5854_v42  ;;  %v5959_v53 = vrot.slane %v5857_v48, 5  ;;  %v5170_v57 = vcombine.high %v4946_v50, %v4946_v50  ;;  %v5177_v51 = vrot.slane %v4946_v50, %v9085_v9 }
 0x2cd   : > { %v5958_v47 = vsel %vm5882_vm4, %v5957_v16, %v5956_v6  ;;  %v4895_v39 = vadd.f32 %v9368_v8, %v4856_v40  ;;  %v4461_v21 = vadd.f32 %v9296_v60, %v9461_v4  ;;  %v4859_v45 = vadd.f32 %v9290_v32, %v4460_v15  ;;  %v4820_v15 = vpop.f32.mrf.mxu0 }
 0x2ce   : > { %v5960_v1 = vsel %vm5885_vm5, %v5959_v53, %v5958_v47  ;;  %v5184_v63 = vrot.slane %v5170_v57, %v9085_v9  ;;  %v5185_v44 = vcombine.high %v5177_v51, %v5177_v51  ;;  %v6575_v20 = vrot.slane %v5177_v51, 9 }
 0x2cf   : > { %v5962_v11 = vsel %vm5888_vm6, %v5961_v30, %v5960_v1  ;;  %v4927_v58 = vmax.f32 %v4895_v39, 0.0  ;;  %v4897_v41 = vadd.f32 %v9368_v8, %v4858_v59  ;;  %v4860_v10 = vadd.f32 %v9298_v0, %v4461_v21 }
 0x2d0   : > { %v5964_v52 = vsel %vm5891_vm7, %v5963_v27, %v5962_v11  ;;  %v5186_v3 = vcombine.high %v5184_v63, %v5184_v63  ;;  %v6576_v2 = vrot.slane %v5185_v44, 9  ;;  %v6577_v7 = vrot.slane %v5184_v63, 9 }
 0x2d1   : > { %v5966_v60 = vsel %vm5894_vm8, %v5965_v43, %v5964_v52  ;;  %v5542_v23 = vmax.f32 %v5177_v51, %v6575_v20  ;;  %v4929_v33 = vmax.f32 %v4897_v41, 0.0  ;;  %v4898_v14 = vadd.f32 %v9368_v8, %v4859_v45 }
 0x2d2   : > { %v5968_v55 = vsel %vm5897_vm9, %v5967_v13, %v5966_v60  ;;  %v6578_v19 = vrot.slane %v5186_v3, 9  ;;  %v5543_v54 = vmax.f32 %v5185_v44, %v6576_v2  ;;  %v5544_v5 = vmax.f32 %v5184_v63, %v6577_v7 }
 0x2d3   : > { %v6002_v32 = vpack.c.b16 %v5968_v55, %v5968_v55  ;;  %v6706_v17 = vpack.c.bf16 %v5542_v23, %v5542_v23  ;;  %v4947_v49 = vmax.f32 %v4927_v58, %v4929_v33  ;;  %v4463_v38 = vadd.f32 %v9303_v36, %v9462_v37 }
 0x2d4   : > { %v5545_v28 = vmax.f32 %v5186_v3, %v6578_v19  ;;  %v6707_v22 = vpack.c.bf16 %v5543_v54, %v5543_v54  ;;  %v6708_v34 = vpack.c.bf16 %v5544_v5, %v5544_v5  ;;  %v4899_v12 = vadd.f32 %v9368_v8, %v4860_v10 }
 0x2d5   : > { %6018 = vst [vmem:[%s9126_s15 + $0x14] sm:$0xf] %v6002_v32  ;;  %v5862_v30 = vunpack.c.l.b16 %v6706_v17  ;;  %v5187_v0 = vcombine.high %v4947_v49, %v4947_v49  ;;  %v5194_v18 = vrot.slane %v4947_v49, %v9085_v9  ;;  %v4862_v29 = vadd.f32 %v9305_v46, %v4463_v38 }
 0x2d6   : > { %v6709_v27 = vpack.c.bf16 %v5545_v28, %v5545_v28  ;;  %v5863_v26 = vunpack.c.l.b16 %v6707_v22  ;;  %v5864_v61 = vunpack.c.l.b16 %v6708_v34  ;;  %v4462_v48 = vadd.f32 %v4421_v62, %v9463_v56 }
 0x2d7   : > { %v5201_v43 = vrot.slane %v5187_v0, %v9085_v9  ;;  %v5202_v42 = vcombine.high %v5194_v18, %v5194_v18  ;;  %v6579_v24 = vrot.slane %v5194_v18, 9  ;;  %v4901_v31 = vadd.f32 %v9368_v8, %v4862_v29 }
 0x2d8   : > { %v5865_v36 = vunpack.c.l.b16 %v6709_v27  ;;  %v5969_v25 = vrot.slane %v5863_v26, 7  ;;  %v5971_v50 = vrot.slane %v5864_v61, 6  ;;  %v4931_v53 = vmax.f32 %v4899_v12, 0.0 }
 0x2d9   : > { %v5203_v13 = vcombine.high %v5201_v43, %v5201_v43  ;;  %v6580_v16 = vrot.slane %v5202_v42, 9  ;;  %v6581_v40 = vrot.slane %v5201_v43, 9  ;;  %v5546_v35 = vmax.f32 %v5194_v18, %v6579_v24 }
 0x2da   : > { %v5970_v6 = vsel %vm5879_vm3, %v5969_v25, %v5862_v30  ;;  %v4933_v46 = vmax.f32 %v4901_v31, 0.0  ;;  %v4861_v57 = vadd.f32 %v4820_v15, %v4462_v48  ;;  %v5973_v51 = vrot.slane %v5865_v36, 5 }
 0x2db   : > { %v6582_v47 = vrot.slane %v5203_v13, 9  ;;  %v5547_v39 = vmax.f32 %v5202_v42, %v6580_v16  ;;  %v5548_v59 = vmax.f32 %v5201_v43, %v6581_v40  ;;  %v5972_v4 = vsel %vm5882_vm4, %v5971_v50, %v5970_v6 }
 0x2dc   : > { %v6710_v21 = vpack.c.bf16 %v5546_v35, %v5546_v35  ;;  %v4949_v1 = vmax.f32 %v4931_v53, %v4933_v46  ;;  %v4900_v63 = vadd.f32 %v9368_v8, %v4861_v57  ;;  %v4930_v44 = vmax.f32 %v4898_v14, 0.0 }
 0x2dd   : > { %v5549_v20 = vmax.f32 %v5203_v13, %v6582_v47  ;;  %v6711_v11 = vpack.c.bf16 %v5547_v39, %v5547_v39  ;;  %v6712_v58 = vpack.c.bf16 %v5548_v59, %v5548_v59  ;;  %v5974_v23 = vsel %vm5885_vm5, %v5973_v51, %v5972_v4 }
 0x2de   : > { %v5866_v45 = vunpack.c.l.b16 %v6710_v21  ;;  %v5221_v41 = vcombine.high %v4949_v1, %v4949_v1  ;;  %v5228_v52 = vrot.slane %v4949_v1, %v9085_v9  ;;  %v4932_v3 = vmax.f32 %v4900_v63, 0.0 }
 0x2df   : > { %v6713_v2 = vpack.c.bf16 %v5549_v20, %v5549_v20  ;;  %v5867_v7 = vunpack.c.l.b16 %v6711_v11  ;;  %v5868_v60 = vunpack.c.l.b16 %v6712_v58 }
 0x2e0   : > { %v5975_v33 = vrot.slane %v5866_v45, 4  ;;  %v5235_v10 = vrot.slane %v5221_v41, %v9085_v9  ;;  %v5236_v55 = vcombine.high %v5228_v52, %v5228_v52  ;;  %v4948_v5 = vmax.f32 %v4930_v44, %v4932_v3 }
 0x2e1   : > { %v5869_v19 = vunpack.c.l.b16 %v6713_v2  ;;  %v5977_v8 = vrot.slane %v5867_v7, 3  ;;  %v5979_v54 = vrot.slane %v5868_v60, 2  ;;  %v6587_v34 = vrot.slane %v5228_v52, 9 }
 0x2e2   : > { %v5976_v32 = vsel %vm5888_vm6, %v5975_v33, %v5974_v23  ;;  %v5237_v49 = vcombine.high %v5235_v10, %v5235_v10  ;;  %v5204_v28 = vcombine.high %v4948_v5, %v4948_v5  ;;  %v6588_v38 = vrot.slane %v5236_v55, 9 }
 0x2e3   : > { %v5978_v17 = vsel %vm5891_vm7, %v5977_v8, %v5976_v32  ;;  %v5981_v14 = vrot.slane %v5869_v19, 1  ;;  %v5211_v62 = vrot.slane %v4948_v5, %v9085_v9  ;;  %v6589_v18 = vrot.slane %v5235_v10, 9 }
 0x2e4   : > { %v5980_v22 = vsel %vm5894_vm8, %v5979_v54, %v5978_v17  ;;  %v5218_v30 = vrot.slane %v5204_v28, %v9085_v9  ;;  %v6590_v12 = vrot.slane %v5237_v49, 9  ;;  %v5554_v29 = vmax.f32 %v5228_v52, %v6587_v34 }
 0x2e5   : > { %v5982_v37 = vsel %vm5897_vm9, %v5981_v14, %v5980_v22  ;;  %v5219_v27 = vcombine.high %v5211_v62, %v5211_v62  ;;  %v6583_v61 = vrot.slane %v5211_v62, 9  ;;  %v5555_v42 = vmax.f32 %v5236_v55, %v6588_v38 }
 0x2e6   : > { %v6003_v0 = vpack.c.b16 %v5982_v37, %v5982_v37  ;;  %v5220_v26 = vcombine.high %v5218_v30, %v5218_v30  ;;  %v6585_v43 = vrot.slane %v5218_v30, 9  ;;  %v5556_v36 = vmax.f32 %v5235_v10, %v6589_v18 }
 0x2e7   : > { %v6584_v24 = vrot.slane %v5219_v27, 9  ;;  %v5550_v48 = vmax.f32 %v5211_v62, %v6583_v61  ;;  %v5557_v50 = vmax.f32 %v5237_v49, %v6590_v12  ;;  %v6718_v16 = vpack.c.bf16 %v5554_v29, %v5554_v29 }
 0x2e8   : > { %6019 = vst [vmem:[%s9126_s15 + $0x18] sm:$0xf] %v6003_v0  ;;  %v6586_v56 = vrot.slane %v5220_v26, 9  ;;  %v5552_v25 = vmax.f32 %v5218_v30, %v6585_v43  ;;  %v6719_v40 = vpack.c.bf16 %v5555_v42, %v5555_v42  ;;  %v6720_v53 = vpack.c.bf16 %v5556_v36, %v5556_v36 }
 0x2e9   : > { %v5551_v31 = vmax.f32 %v5219_v27, %v6584_v24  ;;  %v6714_v35 = vpack.c.bf16 %v5550_v48, %v5550_v48  ;;  %v6721_v57 = vpack.c.bf16 %v5557_v50, %v5557_v50  ;;  %v5874_v39 = vunpack.c.l.b16 %v6718_v16 }
 0x2ea   : > { %v5553_v13 = vmax.f32 %v5220_v26, %v6586_v56  ;;  %v6716_v9 = vpack.c.bf16 %v5552_v25, %v5552_v25  ;;  %v5875_v4 = vunpack.c.l.b16 %v6719_v40  ;;  %v5876_v44 = vunpack.c.l.b16 %v6720_v53 }
 0x2eb   : > { %v6715_v15 = vpack.c.bf16 %v5551_v31, %v5551_v31  ;;  %v5870_v21 = vunpack.c.l.b16 %v6714_v35  ;;  %v5877_v20 = vunpack.c.l.b16 %v6721_v57  ;;  %v5989_v58 = vrot.slane %v5874_v39, 4 }
 0x2ec   : > { %v6717_v6 = vpack.c.bf16 %v5553_v13, %v5553_v13  ;;  %v5872_v46 = vunpack.c.l.b16 %v6716_v9  ;;  %v5991_v41 = vrot.slane %v5875_v4, 3  ;;  %v5993_v3 = vrot.slane %v5876_v44, 2 }
 0x2ed   : > { %v5871_v51 = vunpack.c.l.b16 %v6715_v15  ;;  %v5995_v7 = vrot.slane %v5877_v20, 1 }
 0x2ee   : > { %v5873_v47 = vunpack.c.l.b16 %v6717_v6  ;;  %v5985_v59 = vrot.slane %v5872_v46, 6 }
 0x2ef   : > { %v5983_v1 = vrot.slane %v5871_v51, 7 }
 0x2f0   : > { %v5987_v63 = vrot.slane %v5873_v47, 5 }
 0x2f1   : > { %v5984_v11 = vsel %vm5879_vm3, %v5983_v1, %v5870_v21 }
 0x2f2   : > { %v5986_v45 = vsel %vm5882_vm4, %v5985_v59, %v5984_v11 }
 0x2f3   : > { %v5988_v52 = vsel %vm5885_vm5, %v5987_v63, %v5986_v45 }
 0x2f4   : > { %v5990_v2 = vsel %vm5888_vm6, %v5989_v58, %v5988_v52 }
 0x2f5   : > { %v5992_v60 = vsel %vm5891_vm7, %v5991_v41, %v5990_v2 }
 0x2f6   : > { %v5994_v23 = vsel %vm5894_vm8, %v5993_v3, %v5992_v60 }
 0x2f7   : > { %v5996_v33 = vsel %vm5897_vm9, %v5995_v7, %v5994_v23 }
 0x2f8   : > { %v6004_v10 = vpack.c.b16 %v5996_v33, %v5996_v33 }
 0x2fa   : > { %6020 = vst [vmem:[%s9126_s15 + $0x1c] sm:$0xf] %v6004_v10 }
 0x2fb PF: > { %s15_s14 = sadd.s32 1, %s7780_s14   ;;  %s9464_s12 = smov %s7776_s13 }
 0x2fc   : > { %p12_p3 = scmp.ge.s32.totalorder %s15_s14, 4   ;;  %s9465_s13 = smov %s9467_s16 }
 0x2fe   :  { %14 = sbr.rel (!%p12_p3) target bundleno = 3 (0x3), region = 79 }
 0x303   :  { %6050 = vsyncpa [#allocation3], 1 }
 0x304   :  { %6052 = vsyncpa [#allocation3 + $0x1], 1 }
 0x305   :  { %6053 = vsyncpa [#allocation5], 1 }

// kernel: skin_disease_forward.6
= control target key start
LH: loop header
LB: loop body
LE: loop exit
PB: predicated region body
PF: predicated region fallthrough
CT: control target
= control target key end

     0   :  { %8 = vsyncpa [#allocation3], 0  ;;  %s12629_s0 = inlined_call_operand.vmem [shape: bf16[2,8192], index: 0, kind: input, shape index: {}]   ;;  %s12630_s1 = inlined_call_operand.hbm [shape: bf16[8192,512], index: 1, kind: input, shape index: {}]   ;;  %s12631_s2 = inlined_call_operand.hbm [shape: f32[1,512], index: 2, kind: input, shape index: {}]   ;;  %s12632_s3 = inlined_call_operand.vmem [shape: f32[2,512], index: 3, kind: output, shape index: {}]  }
   0x1   :  { %10 = vsyncpa [#allocation3 + $0x1], 0 }
   0x2   :  { %11 = vsyncpa [#allocation5], 0 }
   0x3   :  { %13 = vsyncpa [#allocation5 + $0x1], 0  ;;  %s11206_s12 = smov 0   ;;  %s11208_s13 = smov 0  }
   0x4   :  { %s11210_s14 = smov 0   ;;  %s11212_s15 = smov 0  }
   0x5   :  { %s11214_s16 = smov 0   ;;  %s11216_s17 = smov 0  }
   0x6 LB: > { %s8412_s18 = sadd.s32 4294967295, %s11176_s17   ;;  %s34_s19 = sadd.s32 1, %s11172_s16  ;;  %s11176_s17 = sphi %s11216_s17, %s19_s17   ;;  %s11172_s16 = sphi %s11214_s16, %s12641_s16   ;;  %s11168_s15 = sphi %s11212_s15, %s12640_s15   ;;  %s11164_s14 = sphi %s11210_s14, %s12639_s14   ;;  %s11160_s13 = sphi %s11208_s13, %s12638_s13   ;;  %s11156_s12 = sphi %s11206_s12, %s12637_s12  }
   0x7   : > { %p36_p0 = scmp.ge.s32.totalorder %s34_s19, 2  ;;  %s75_s20 = sadd.s32 1, %s11164_s14 }
   0x8   : > { %p82_p1 = scmp.ne.s32.totalorder %s11164_s14, %s11160_s13  ;;  %p83_p2 = scmp.eq.s32.totalorder %s11176_s17, 0 }
   0x9   : > { %s12643_s19 = smov (%p36_p0, %s34_s19), 0  ;;  %p88_p4 = scmp.ne.s32.totalorder %s11160_s13, %s11156_s12 }
   0xa   : > { %p11242_p3 = por %p83_p2, %p82_p1  ;;  %s71_s22 = ssub.s32 %s11172_s16, %s12643_s19 }
   0xb   : > { %p89_p5 = scmp.eq.s32.totalorder %s8412_s18, 0  ;;  %p73_p6 = scmp.eq.s32.totalorder %s71_s22, 0 }
   0xc   : > { %p9467_p8 = scmp.lt.s32.totalorder %s11176_s17, 2  ;;  %s11258_s25 = sand.u32 1, %s11164_s14  }
   0xd   : > { %p11249_p7 = por %p89_p5, %p88_p4  ;;  %s9454_s26 = sshll.u32 %s11172_s16, 7 }
   0xe   : > { %s11255_s24 = scalar_select %p73_p6, %s11164_s14, %s75_s20  }
   0xf   : > { %s8417_s27 = sshll.u32 %s11258_s25, 13  ;;  %s191_s30 = scalar_lea.hbm %s12630_s1, %s9454_s26 }
  0x10   : > { %s182_s4 = scalar_lea.vmem [#allocation2], %s8417_s27  ;;  %p11267_p9 = pnand %p9467_p8, %p11242_p3 }
  0x11   : > { %s192_s5 = sshll.u32 %s182_s4, 4  ;;  %p8423_p10 = scmp.ge.s32.totalorder %s11176_s17, 1  ;;  %s193_s5 = int_to_ptr.vmem [resolvable:$true] %s192_s5 }
  0x12   : > { %s179_s7 = scalar_lea.sflag [#allocation3], %s11258_s25  ;;  %p11068_p11 = pneg %p11267_p9 }
  0x13   : > { %s11079_s8 = scalar_lea.vmem %s193_s5, 131072  ;;  %s11178_s9 = smov [#allocation2]  }
  0x14   : > { %p11080_p12 = scmp.ne.s32.totalorder %s193_s5, %s11079_s8  ;;  %s11084_s10 = sshll.u32 %s11178_s9, 4  ;;  %s11085_s10 = int_to_ptr.vmem [resolvable:$false] %s11084_s10 }
  0x15   : > { %s11086_s11 = scalar_lea.vmem %s11085_s10, 262144  ;;  %p11087_p1 = scmp.lt.s32.totalorder %s193_s5, %s11085_s10 }
  0x16   : > { %p11082_p13 = pnand %p11080_p12, %p11068_p11  ;;  %p11088_p2 = scmp.lt.s32.totalorder %s11086_s11, %s11079_s8 }
  0x18   : > { %p11083_p0 = pneg %p11082_p13  ;;  %p11089_p3 = por %p11088_p2, %p11087_p1 }
  0x1a   : > { %p11090_p4 = pnand %p11089_p3, %p11083_p0 }
  0x1c   : > { %11093 = shalt.err (!%p11090_p4)
}
  0x1d   : > { %s11179_s12 = smov 256   ;;  %s11180_s18 = smov 128  }
  0x1e   : > { %s11181_s20 = smov 8   ;;  %p219_p5 = scmp.lt.s32.totalorder %s11176_s17, 3 }
  0x1f   : > { %9463 = dma.hbm_to_vmem [thread:$0]  (!%p11267_p9), %s191_s30, 131072, %s193_s5, %s179_s7, %s11179_s12, %s11180_s18, %s11181_s20  }
  0x20   : > { %s8420_s21 = sshll.u32 %s11258_s25, 1  ;;  %s9455_s22 = sshll.u32 %s11172_s16, 5 }
  0x21   : > { %p11285_p6 = pnand %p8423_p10, %p219_p5  ;;  %s212_s29 = scalar_lea.hbm %s12631_s2, %s9455_s22 }
  0x22   : > { %s206_s4 = scalar_lea.vmem [#allocation4], %s8420_s21  ;;  %s203_s9 = scalar_lea.sflag [#allocation5], %s11258_s25 }
  0x23   : > { %s214_s8 = sshll.u32 %s206_s4, 4  ;;  %s11182_s30 = smov [#allocation4]   ;;  %s215_s8 = int_to_ptr.vmem [resolvable:$true] %s214_s8 }
  0x24   : > { %s11107_s10 = scalar_lea.vmem %s215_s8, 32  ;;  %s11112_s5 = sshll.u32 %s11182_s30, 4  ;;  %s11113_s5 = int_to_ptr.vmem [resolvable:$false] %s11112_s5 }
  0x25   : > { %p11108_p8 = scmp.ne.s32.totalorder %s215_s8, %s11107_s10  ;;  %s11114_s7 = scalar_lea.vmem %s11113_s5, 64 }
  0x26   : > { %p11115_p10 = scmp.lt.s32.totalorder %s215_s8, %s11113_s5  ;;  %p11116_p0 = scmp.lt.s32.totalorder %s11114_s7, %s11107_s10 }
  0x27   : > { %p11110_p12 = pnand %p11108_p8, %p11068_p11 }
  0x28   : > { %p11117_p1 = por %p11116_p0, %p11115_p10 }
  0x29   : > { %p11111_p13 = pneg %p11110_p12 }
  0x2b   : > { %p11118_p2 = pnand %p11117_p1, %p11111_p13 }
  0x2d   : > { %11121 = shalt.err (!%p11118_p2)
}
  0x2e   : > { %9466 = dma.hbm_to_vmem [thread:$0]  (!%p11267_p9), %s212_s29, 32, %s215_s8, %s203_s9  }
  0x2f   : > { %223 = sbr.rel (%p11285_p6) target bundleno = 1299 (0x513), region = 32  ;;  %s225_s25 = sand.u32 (!%p11285_p6), 1, %s11160_s13  }
  0x30   : > { %s8424_s11 = sshll.u32 (!%p11285_p6), %s225_s25, 13  ;;  %s226_s12 = scalar_lea.sflag (!%p11285_p6), [#allocation3], %s225_s25 }
  0x31   : > { %s11301_s18 = scalar_lea.vmem (!%p11285_p6), [#allocation2], %s8424_s11 }
  0x34   : > { %11147 = dma.done.wait (%p11249_p7), %s226_s12, 131072  }
  0x35   : > { %11149 = vsyncadd (%p11249_p7), %s226_s12, 4294836224  ;;  %s8425_s20 = sshll.u32 %s225_s25, 1  ;;  %s235_s21 = scalar_lea.sflag [#allocation5], %s225_s25 }
  0x36   : > { %s11307_s6 = scalar_lea.vmem [#allocation4], %s8425_s20 }
  0x37   : > { %11151 = dma.done.wait (%p11249_p7), %s235_s21, 32  }
  0x38   : > { %11153 = vsyncadd (%p11249_p7), %s235_s21, 4294967264  ;;  %v9522_v0 = vld [vmem:[%s11301_s18 + $0x74] ss:$8 sps:$4 sm:$0xff]   ;;  %v9526_v2 = vld [vmem:[%s11301_s18 + $0x70] ss:$8 sps:$4 sm:$0xff]   ;;  %v1350_v38 = vlaneseq }
  0x39   : > { %v9524_v1 = vld [vmem:[%s11301_s18 + $0x174] ss:$8 sps:$4 sm:$0xff]   ;;  %6922 = vmatprep.subr.bf16.mxu0 %v9522_v0  ;;  %v9527_v3 = vld [vmem:[%s11301_s18 + $0x170] ss:$8 sps:$4 sm:$0xff]   ;;  %v9528_v4 = vld [vmem:[%s11301_s18 + $0x64] ss:$8 sps:$4 sm:$0xff]  }
  0x3a   : > { %6963 = vmatprep.subr.bf16.mxu1 %v9524_v1  ;;  %6923 = vmatpush1.bf16.msra.mxu0 %v9526_v2  ;;  %v9530_v5 = vld [vmem:[%s11301_s18 + $0x164] ss:$8 sps:$4 sm:$0xff]   ;;  %v9532_v6 = vld [vmem:[%s11301_s18 + $0x60] ss:$8 sps:$4 sm:$0xff]   ;;  %v9534_v8 = vld [vmem:[%s11301_s18 + $0x54] ss:$8 sps:$4 sm:$0xff]  }
  0x3b   : > { %6964 = vmatpush1.bf16.msra.mxu1 %v9527_v3  ;;  %6924 = vmatprep.subr.bf16.mxu0 %v9528_v4  ;;  %v9533_v7 = vld [vmem:[%s11301_s18 + $0x160] ss:$8 sps:$4 sm:$0xff]   ;;  %v9536_v9 = vld [vmem:[%s11301_s18 + $0x154] ss:$8 sps:$4 sm:$0xff]   ;;  %v9538_v10 = vld [vmem:[%s11301_s18 + $0x50] ss:$8 sps:$4 sm:$0xff]  }
  0x3c   : > { %6965 = vmatprep.subr.bf16.mxu1 %v9530_v5  ;;  %v9539_v11 = vld [vmem:[%s11301_s18 + $0x150] ss:$8 sps:$4 sm:$0xff]   ;;  %v9540_v12 = vld [vmem:[%s11301_s18 + $0x44] ss:$8 sps:$4 sm:$0xff]   ;;  %v9544_v14 = vld [vmem:[%s11301_s18 + $0x40] ss:$8 sps:$4 sm:$0xff]  }
  0x3d   : > { %v9542_v13 = vld [vmem:[%s11301_s18 + $0x144] ss:$8 sps:$4 sm:$0xff]   ;;  %v9545_v15 = vld [vmem:[%s11301_s18 + $0x140] ss:$8 sps:$4 sm:$0xff]   ;;  %v9546_v16 = vld [vmem:[%s11301_s18 + $0x34] ss:$8 sps:$4 sm:$0xff]  }
  0x3e   : > { %6925 = vmatpush1.bf16.msra.mxu0 %v9532_v6  ;;  %v9548_v17 = vld [vmem:[%s11301_s18 + $0x134] ss:$8 sps:$4 sm:$0xff]   ;;  %v9550_v18 = vld [vmem:[%s11301_s18 + $0x30] ss:$8 sps:$4 sm:$0xff]   ;;  %v9552_v20 = vld [vmem:[%s11301_s18 + $0x24] ss:$8 sps:$4 sm:$0xff]  }
  0x3f   : > { %6966 = vmatpush1.bf16.msra.mxu1 %v9533_v7  ;;  %6926 = vmatprep.subr.bf16.mxu0 %v9534_v8  ;;  %v9551_v19 = vld [vmem:[%s11301_s18 + $0x130] ss:$8 sps:$4 sm:$0xff]   ;;  %v9554_v21 = vld [vmem:[%s11301_s18 + $0x124] ss:$8 sps:$4 sm:$0xff]   ;;  %v9556_v22 = vld [vmem:[%s11301_s18 + $0x20] ss:$8 sps:$4 sm:$0xff]  }
  0x40   : > { %6967 = vmatprep.subr.bf16.mxu1 %v9536_v9  ;;  %v9557_v23 = vld [vmem:[%s11301_s18 + $0x120] ss:$8 sps:$4 sm:$0xff]   ;;  %v9558_v24 = vld [vmem:[%s11301_s18 + $0x14] ss:$8 sps:$4 sm:$0xff]   ;;  %v9562_v26 = vld [vmem:[%s11301_s18 + $0x10] ss:$8 sps:$4 sm:$0xff]  }
  0x41   : > { %v9560_v25 = vld [vmem:[%s11301_s18 + $0x114] ss:$8 sps:$4 sm:$0xff]   ;;  %v9563_v27 = vld [vmem:[%s11301_s18 + $0x110] ss:$8 sps:$4 sm:$0xff]   ;;  %v9564_v28 = vld [vmem:[%s11301_s18 + $0x4] ss:$8 sps:$4 sm:$0xff]  }
  0x42   : > { %6927 = vmatpush1.bf16.msra.mxu0 %v9538_v10  ;;  %v9566_v29 = vld [vmem:[%s11301_s18 + $0x104] ss:$8 sps:$4 sm:$0xff]   ;;  %v9568_v30 = vld [vmem:[%s11301_s18] ss:$8 sps:$4 sm:$0xff]   ;;  %v9570_v32 = vld [vmem:[%s11301_s18 + $0xf4] ss:$8 sps:$4 sm:$0xff]  }
  0x43   : > { %6968 = vmatpush1.bf16.msra.mxu1 %v9539_v11  ;;  %6928 = vmatprep.subr.bf16.mxu0 %v9540_v12  ;;  %v9569_v31 = vld [vmem:[%s11301_s18 + $0x100] ss:$8 sps:$4 sm:$0xff]   ;;  %v9572_v33 = vld [vmem:[%s11301_s18 + $0x1f4] ss:$8 sps:$4 sm:$0xff]   ;;  %v9574_v34 = vld [vmem:[%s11301_s18 + $0xf0] ss:$8 sps:$4 sm:$0xff]  }
  0x44   : > { %6969 = vmatprep.subr.bf16.mxu1 %v9542_v13  ;;  %v9575_v35 = vld [vmem:[%s11301_s18 + $0x1f0] ss:$8 sps:$4 sm:$0xff]   ;;  %v11183_v36 = vmov 1966171168   ;;  %v9576_v39 = vld [vmem:[%s11301_s18 + $0xe4] ss:$8 sps:$4 sm:$0xff]  }
  0x45   : > { %v1348_v37 = vunpack.c.l.s4 %v11183_v36  ;;  %v9578_v40 = vld [vmem:[%s11301_s18 + $0x1e4] ss:$8 sps:$4 sm:$0xff]   ;;  %v9580_v41 = vld [vmem:[%s11301_s18 + $0xe0] ss:$8 sps:$4 sm:$0xff]   ;;  %v11352_v43 = vshrl.u32 %v1350_v38, 7 }
  0x46   : > { %6929 = vmatpush1.bf16.msra.mxu0 %v9544_v14  ;;  %v9581_v44 = vld [vmem:[%s11301_s18 + $0x1e0] ss:$8 sps:$4 sm:$0xff]   ;;  %v9582_v45 = vld [vmem:[%s11301_s18 + $0xd4] ss:$8 sps:$4 sm:$0xff]   ;;  %v9586_v47 = vld [vmem:[%s11301_s18 + $0xd0] ss:$8 sps:$4 sm:$0xff]  }
  0x47   : > { %6970 = vmatpush1.bf16.msra.mxu1 %v9545_v15  ;;  %6930 = vmatprep.subr.bf16.mxu0 %v9546_v16  ;;  %v1349_v42 = vunpack.c.0.s8 %v1348_v37  ;;  %v9584_v46 = vld [vmem:[%s11301_s18 + $0x1d4] ss:$8 sps:$4 sm:$0xff]   ;;  %v9587_v48 = vld [vmem:[%s11301_s18 + $0x1d0] ss:$8 sps:$4 sm:$0xff]   ;;  %v9588_v50 = vld [vmem:[%s11301_s18 + $0xc4] ss:$8 sps:$4 sm:$0xff]  }
  0x48   : > { %6971 = vmatprep.subr.bf16.mxu1 %v9548_v17  ;;  %v9590_v51 = vld [vmem:[%s11301_s18 + $0x1c4] ss:$8 sps:$4 sm:$0xff]   ;;  %v9592_v53 = vld [vmem:[%s11301_s18 + $0xc0] ss:$8 sps:$4 sm:$0xff]   ;;  %v9594_v56 = vld [vmem:[%s11301_s18 + $0xb4] ss:$8 sps:$4 sm:$0xff]  }
  0x49   : > { %v11360_v49 = vsub.s32 %v1349_v42, %v11352_v43  ;;  %v306_v52 = vld [vmem:[%s12629_s0] sm:$0xff]  ;;  %v9596_v57 = vld [vmem:[%s11301_s18 + $0x1b4] ss:$8 sps:$4 sm:$0xff]   ;;  %v9598_v59 = vld [vmem:[%s11301_s18 + $0xb0] ss:$8 sps:$4 sm:$0xff]  }
  0x4a   : > { %6931 = vmatpush1.bf16.msra.mxu0 %v9550_v18  ;;  %v9593_v55 = vld [vmem:[%s11301_s18 + $0x1c0] ss:$8 sps:$4 sm:$0xff]   ;;  %v9599_v61 = vld [vmem:[%s11301_s18 + $0x1b0] ss:$8 sps:$4 sm:$0xff]   ;;  %v9600_v62 = vld [vmem:[%s11301_s18 + $0xa4] ss:$8 sps:$4 sm:$0xff]   ;;  %v1346_v1 = vcombine.high %v306_v52, %v306_v52 }
  0x4b   : > { %6972 = vmatpush1.bf16.msra.mxu1 %v9551_v19  ;;  %6932 = vmatprep.subr.bf16.mxu0 %v9552_v20  ;;  %v1353_v54 = vrot.slane %v306_v52, %v11360_v49  ;;  %v9602_v63 = vld [vmem:[%s11301_s18 + $0x1a4] ss:$8 sps:$4 sm:$0xff]   ;;  %v9604_v2 = vld [vmem:[%s11301_s18 + $0xa0] ss:$8 sps:$4 sm:$0xff]   ;;  %v9606_v4 = vld [vmem:[%s11301_s18 + $0x94] ss:$8 sps:$4 sm:$0xff]  }
  0x4c   : > { %6973 = vmatprep.subr.bf16.mxu1 %v9554_v21  ;;  %v9605_v3 = vld [vmem:[%s11301_s18 + $0x1a0] ss:$8 sps:$4 sm:$0xff]   ;;  %v9608_v5 = vld [vmem:[%s11301_s18 + $0x194] ss:$8 sps:$4 sm:$0xff]   ;;  %v11382_v6 = vrot.slane %v1346_v1, %v11360_v49  ;;  %v9610_v7 = vld [vmem:[%s11301_s18 + $0x90] ss:$8 sps:$4 sm:$0xff]  }
  0x4d   : > { %v1361_v58 = vcombine.high %v1353_v54, %v1353_v54  ;;  %v9611_v8 = vld [vmem:[%s11301_s18 + $0x190] ss:$8 sps:$4 sm:$0xff]   ;;  %v9612_v9 = vld [vmem:[%s11301_s18 + $0x84] ss:$8 sps:$4 sm:$0xff]   ;;  %v9616_v12 = vld [vmem:[%s11301_s18 + $0x80] ss:$8 sps:$4 sm:$0xff]   ;;  %v1369_v13 = vrot.slane %v1353_v54, %v11360_v49 }
  0x4e   : > { %6933 = vmatpush1.bf16.msra.mxu0 %v9556_v22  ;;  %v9614_v10 = vld [vmem:[%s11301_s18 + $0x184] ss:$8 sps:$4 sm:$0xff]   ;;  %v1362_v11 = vcombine.high %v11382_v6, %v11382_v6  ;;  %v9617_v14 = vld [vmem:[%s11301_s18 + $0x180] ss:$8 sps:$4 sm:$0xff]   ;;  %v9621_v15 = vld [vmem:[%s11301_s18 + $0x274] ss:$8 sps:$4 sm:$0xff]  }
  0x4f   : > { %6974 = vmatpush1.bf16.msra.mxu1 %v9557_v23  ;;  %6934 = vmatprep.subr.bf16.mxu0 %v9558_v24  ;;  %v1383_v60 = vrot.slane %v1361_v58, %v11360_v49  ;;  %v9624_v16 = vld [vmem:[%s11301_s18 + $0x374] ss:$8 sps:$4 sm:$0xff]   ;;  %v1391_v18 = vcombine.high %v1369_v13, %v1369_v13  ;;  %v9619_v19 = vld [vmem:[%s11301_s18 + $0x270] ss:$8 sps:$4 sm:$0xff]   ;;  %v9627_v21 = vld [vmem:[%s11301_s18 + $0x264] ss:$8 sps:$4 sm:$0xff]  }
  0x50   : > { %6975 = vmatprep.subr.bf16.mxu1 %v9560_v25  ;;  %v1390_v17 = vrot.slane %v1362_v11, %v11360_v49  ;;  %v9622_v20 = vld [vmem:[%s11301_s18 + $0x370] ss:$8 sps:$4 sm:$0xff]   ;;  %v9630_v22 = vld [vmem:[%s11301_s18 + $0x364] ss:$8 sps:$4 sm:$0xff]   ;;  %v9625_v24 = vld [vmem:[%s11301_s18 + $0x260] ss:$8 sps:$4 sm:$0xff]  }
  0x51   : > { %v1393_v0 = vcombine.high %v1383_v60, %v1383_v60  ;;  %6954 = vmatprep.mubr.bf16.mxu0 %v1383_v60  ;;  %v9628_v25 = vld [vmem:[%s11301_s18 + $0x360] ss:$8 sps:$4 sm:$0xff]   ;;  %v9643_v36 = vld [vmem:[%s11301_s18 + $0x230] ss:$8 sps:$4 sm:$0xff]   ;;  %v9651_v38 = vld [vmem:[%s11301_s18 + $0x224] ss:$8 sps:$4 sm:$0xff]  }
  0x52   : > { %6935 = vmatpush1.bf16.msra.mxu0 %v9562_v26  ;;  %v1394_v23 = vcombine.high %v1390_v17, %v1390_v17  ;;  %v9633_v26 = vld [vmem:[%s11301_s18 + $0x254] ss:$8 sps:$4 sm:$0xff]   ;;  %v9646_v37 = vld [vmem:[%s11301_s18 + $0x330] ss:$8 sps:$4 sm:$0xff]   ;;  %v9673_v58 = vld [vmem:[%s11301_s18 + $0x2e0] ss:$8 sps:$4 sm:$0xff]  }
  0x53   : > { %6976 = vmatpush1.bf16.msra.mxu1 %v9563_v27  ;;  %6936 = vmatprep.subr.bf16.mxu0 %v9564_v28  ;;  %v9636_v27 = vld [vmem:[%s11301_s18 + $0x354] ss:$8 sps:$4 sm:$0xff]   ;;  %v9631_v28 = vld [vmem:[%s11301_s18 + $0x250] ss:$8 sps:$4 sm:$0xff]   ;;  %v9690_v1 = vld [vmem:[%s11301_s18 + $0x3c4] ss:$8 sps:$4 sm:$0xff]  }
  0x54   : > { %6977 = vmatprep.subr.bf16.mxu1 %v9566_v29  ;;  %6995 = vmatprep.mubr.bf16.mxu1 %v1393_v0  ;;  %v9634_v29 = vld [vmem:[%s11301_s18 + $0x350] ss:$8 sps:$4 sm:$0xff]   ;;  %v9657_v42 = vld [vmem:[%s11301_s18 + $0x214] ss:$8 sps:$4 sm:$0xff]   ;;  %v9687_v0 = vld [vmem:[%s11301_s18 + $0x2c4] ss:$8 sps:$4 sm:$0xff]  }
  0x55   : > { %v9669_v52 = vld [vmem:[%s11301_s18 + $0x2f4] ss:$8 sps:$4 sm:$0xff]   ;;  %v9667_v54 = vld [vmem:[%s11301_s18 + $0x2f0] ss:$8 sps:$4 sm:$0xff]   ;;  %v9697_v11 = vld [vmem:[%s11301_s18 + $0x2a0] ss:$8 sps:$4 sm:$0xff]  }
  0x56   : > { %6937 = vmatpush1.bf16.msra.mxu0 %v9568_v30  ;;  %v9639_v30 = vld [vmem:[%s11301_s18 + $0x244] ss:$8 sps:$4 sm:$0xff]   ;;  %v9681_v60 = vld [vmem:[%s11301_s18 + $0x2d4] ss:$8 sps:$4 sm:$0xff]  }
  0x57   : > { %6978 = vmatpush1.bf16.msra.mxu1 %v9569_v31  ;;  %6938 = vmatprep.subr.bf16.mxu0 %v9570_v32  ;;  %v9642_v31 = vld [vmem:[%s11301_s18 + $0x344] ss:$8 sps:$4 sm:$0xff]   ;;  %v9637_v32 = vld [vmem:[%s11301_s18 + $0x240] ss:$8 sps:$4 sm:$0xff]  }
  0x58   : > { %6979 = vmatprep.subr.bf16.mxu1 %v9572_v33  ;;  %v9640_v33 = vld [vmem:[%s11301_s18 + $0x340] ss:$8 sps:$4 sm:$0xff]  }
  0x5a   : > { %6939 = vmatpush2.bf16.msra.mxu0 %v9574_v34  ;;  %v9645_v34 = vld [vmem:[%s11301_s18 + $0x234] ss:$8 sps:$4 sm:$0xff]  }
  0x5b   : > { %6980 = vmatpush2.bf16.msra.mxu1 %v9575_v35  ;;  %6940 = vmatprep.subr.bf16.mxu0 %v9576_v39  ;;  %v9648_v35 = vld [vmem:[%s11301_s18 + $0x334] ss:$8 sps:$4 sm:$0xff]   ;;  %v9654_v39 = vld [vmem:[%s11301_s18 + $0x324] ss:$8 sps:$4 sm:$0xff]  }
  0x5c   : > { %6981 = vmatprep.subr.bf16.mxu1 %v9578_v40  ;;  %v9649_v40 = vld [vmem:[%s11301_s18 + $0x220] ss:$8 sps:$4 sm:$0xff]  }
  0x5e   : > { %6941 = vmatpush2.bf16.msra.mxu0 %v9580_v41  ;;  %v9652_v41 = vld [vmem:[%s11301_s18 + $0x320] ss:$8 sps:$4 sm:$0xff]  }
  0x5f   : > { %6982 = vmatpush2.bf16.msra.mxu1 %v9581_v44  ;;  %6942 = vmatprep.subr.bf16.mxu0 %v9582_v45  ;;  %v9660_v44 = vld [vmem:[%s11301_s18 + $0x314] ss:$8 sps:$4 sm:$0xff]   ;;  %v9655_v45 = vld [vmem:[%s11301_s18 + $0x210] ss:$8 sps:$4 sm:$0xff]  }
  0x60   : > { %6983 = vmatprep.subr.bf16.mxu1 %v9584_v46  ;;  %v9658_v46 = vld [vmem:[%s11301_s18 + $0x310] ss:$8 sps:$4 sm:$0xff]  }
  0x62   : > { %6943 = vmatpush2.bf16.msra.mxu0 %v9586_v47  ;;  %v9663_v47 = vld [vmem:[%s11301_s18 + $0x204] ss:$8 sps:$4 sm:$0xff]  }
  0x63   : > { %6984 = vmatpush2.bf16.msra.mxu1 %v9587_v48  ;;  %6944 = vmatprep.subr.bf16.mxu0 %v9588_v50  ;;  %v9666_v48 = vld [vmem:[%s11301_s18 + $0x304] ss:$8 sps:$4 sm:$0xff]   ;;  %v9661_v50 = vld [vmem:[%s11301_s18 + $0x200] ss:$8 sps:$4 sm:$0xff]  }
  0x64   : > { %6985 = vmatprep.subr.bf16.mxu1 %v9590_v51  ;;  %v9664_v51 = vld [vmem:[%s11301_s18 + $0x300] ss:$8 sps:$4 sm:$0xff]  }
  0x66   : > { %6945 = vmatpush2.bf16.msra.mxu0 %v9592_v53  ;;  %v9672_v53 = vld [vmem:[%s11301_s18 + $0x3f4] ss:$8 sps:$4 sm:$0xff]  }
  0x67   : > { %6986 = vmatpush2.bf16.msra.mxu1 %v9593_v55  ;;  %6946 = vmatprep.subr.bf16.mxu0 %v9594_v56  ;;  %v9670_v55 = vld [vmem:[%s11301_s18 + $0x3f0] ss:$8 sps:$4 sm:$0xff]   ;;  %v9675_v56 = vld [vmem:[%s11301_s18 + $0x2e4] ss:$8 sps:$4 sm:$0xff]  }
  0x68   : > { %6987 = vmatprep.subr.bf16.mxu1 %v9596_v57  ;;  %v9678_v57 = vld [vmem:[%s11301_s18 + $0x3e4] ss:$8 sps:$4 sm:$0xff]  }
  0x6a   : > { %6947 = vmatpush2.bf16.msra.mxu0 %v9598_v59  ;;  %v9676_v59 = vld [vmem:[%s11301_s18 + $0x3e0] ss:$8 sps:$4 sm:$0xff]  }
  0x6b   : > { %6988 = vmatpush2.bf16.msra.mxu1 %v9599_v61  ;;  %6948 = vmatprep.subr.bf16.mxu0 %v9600_v62  ;;  %v9684_v61 = vld [vmem:[%s11301_s18 + $0x3d4] ss:$8 sps:$4 sm:$0xff]   ;;  %v9679_v62 = vld [vmem:[%s11301_s18 + $0x2d0] ss:$8 sps:$4 sm:$0xff]  }
  0x6c   : > { %6989 = vmatprep.subr.bf16.mxu1 %v9602_v63  ;;  %v9682_v63 = vld [vmem:[%s11301_s18 + $0x3d0] ss:$8 sps:$4 sm:$0xff]  }
  0x6e   : > { %6949 = vmatpush2.bf16.msra.mxu0 %v9604_v2  ;;  %v9685_v2 = vld [vmem:[%s11301_s18 + $0x2c0] ss:$8 sps:$4 sm:$0xff]  }
  0x6f   : > { %6990 = vmatpush2.bf16.msra.mxu1 %v9605_v3  ;;  %6950 = vmatprep.subr.bf16.mxu0 %v9606_v4  ;;  %v9688_v3 = vld [vmem:[%s11301_s18 + $0x3c0] ss:$8 sps:$4 sm:$0xff]   ;;  %v9693_v4 = vld [vmem:[%s11301_s18 + $0x2b4] ss:$8 sps:$4 sm:$0xff]  }
  0x70   : > { %6991 = vmatprep.subr.bf16.mxu1 %v9608_v5  ;;  %v9696_v5 = vld [vmem:[%s11301_s18 + $0x3b4] ss:$8 sps:$4 sm:$0xff]  }
  0x72   : > { %6951 = vmatpush2.bf16.msra.mxu0 %v9610_v7  ;;  %v9691_v7 = vld [vmem:[%s11301_s18 + $0x2b0] ss:$8 sps:$4 sm:$0xff]  }
  0x73   : > { %6992 = vmatpush2.bf16.msra.mxu1 %v9611_v8  ;;  %6952 = vmatprep.subr.bf16.mxu0 %v9612_v9  ;;  %v9694_v8 = vld [vmem:[%s11301_s18 + $0x3b0] ss:$8 sps:$4 sm:$0xff]   ;;  %v9699_v9 = vld [vmem:[%s11301_s18 + $0x2a4] ss:$8 sps:$4 sm:$0xff]  }
  0x74   : > { %6993 = vmatprep.subr.bf16.mxu1 %v9614_v10  ;;  %v9702_v10 = vld [vmem:[%s11301_s18 + $0x3a4] ss:$8 sps:$4 sm:$0xff]  }
  0x76   : > { %6953 = vmatpush2.bf16.msra.mxu0 %v9616_v12  ;;  %v9700_v12 = vld [vmem:[%s11301_s18 + $0x3a0] ss:$8 sps:$4 sm:$0xff]  }
  0x77   : > { %6994 = vmatpush2.bf16.msra.mxu1 %v9617_v14  ;;  %7004 = vmatprep.subr.bf16.mxu0 %v9621_v15  ;;  %v9708_v14 = vld [vmem:[%s11301_s18 + $0x394] ss:$8 sps:$4 sm:$0xff]   ;;  %v9703_v15 = vld [vmem:[%s11301_s18 + $0x290] ss:$8 sps:$4 sm:$0xff]  }
  0x78   : > { %7045 = vmatprep.subr.bf16.mxu1 %v9624_v16  ;;  %v9706_v16 = vld [vmem:[%s11301_s18 + $0x390] ss:$8 sps:$4 sm:$0xff]  }
  0x79   : > { %6955 = vmatmul.mubr.bf16.vlgmr.msra.gmra.mxu0 %v1369_v13  ;;  %v9705_v13 = vld [vmem:[%s11301_s18 + $0x294] ss:$8 sps:$4 sm:$0xff]  }
  0x7a   : > { %6996 = vmatmul.mubr.bf16.vlgmr.msra.gmra.mxu1 %v1391_v18  ;;  %7005 = vmatpush1.bf16.msra.mxu0 %v9619_v19  ;;  %v9714_v18 = vld [vmem:[%s11301_s18 + $0x384] ss:$8 sps:$4 sm:$0xff]   ;;  %v9709_v19 = vld [vmem:[%s11301_s18 + $0x280] ss:$8 sps:$4 sm:$0xff]  }
  0x7b   : > { %7046 = vmatpush1.bf16.msra.mxu1 %v9622_v20  ;;  %7006 = vmatprep.subr.bf16.mxu0 %v9627_v21  ;;  %v1376_v20 = vrot.slane %v11382_v6, %v11360_v49  ;;  %v9712_v21 = vld [vmem:[%s11301_s18 + $0x380] ss:$8 sps:$4 sm:$0xff]  }
  0x7c   : > { %7047 = vmatprep.subr.bf16.mxu1 %v9630_v22  ;;  %7036 = vmatprep.mubr.bf16.mxu0 %v1390_v17  ;;  %v9711_v17 = vld [vmem:[%s11301_s18 + $0x284] ss:$8 sps:$4 sm:$0xff]   ;;  %v9717_v22 = vld [vmem:[%s11301_s18 + $0x474] ss:$8 sps:$4 sm:$0xff]  }
  0x7d   : > { %7077 = vmatprep.mubr.bf16.mxu1 %v1394_v23  ;;  %v9720_v23 = vld [vmem:[%s11301_s18 + $0x574] ss:$8 sps:$4 sm:$0xff]   ;;  %v11467_v6 = vld [vmem:[%s12629_s0 + $0x8] sm:$0xff] }
  0x7e   : > { %7007 = vmatpush1.bf16.msra.mxu0 %v9625_v24  ;;  %v1392_v24 = vcombine.high %v1376_v20, %v1376_v20 }
  0x7f   : > { %7048 = vmatpush1.bf16.msra.mxu1 %v9628_v25  ;;  %7008 = vmatprep.subr.bf16.mxu0 %v9633_v26  ;;  %v9715_v25 = vld [vmem:[%s11301_s18 + $0x470] ss:$8 sps:$4 sm:$0xff]  }
  0x80   : > { %7049 = vmatprep.subr.bf16.mxu1 %v9636_v27  ;;  %v9718_v26 = vld [vmem:[%s11301_s18 + $0x570] ss:$8 sps:$4 sm:$0xff]   ;;  %v9723_v27 = vld [vmem:[%s11301_s18 + $0x464] ss:$8 sps:$4 sm:$0xff]  }
  0x82   : > { %7009 = vmatpush1.bf16.msra.mxu0 %v9631_v28  ;;  %v9726_v28 = vld [vmem:[%s11301_s18 + $0x564] ss:$8 sps:$4 sm:$0xff]  }
  0x83   : > { %7050 = vmatpush1.bf16.msra.mxu1 %v9634_v29  ;;  %7010 = vmatprep.subr.bf16.mxu0 %v9639_v30  ;;  %v11473_v29 = vrot.slane %v11467_v6, %v11360_v49 }
  0x84   : > { %7051 = vmatprep.subr.bf16.mxu1 %v9642_v31  ;;  %v9721_v31 = vld [vmem:[%s11301_s18 + $0x460] ss:$8 sps:$4 sm:$0xff]  }
  0x85   : > { %v1410_v30 = vcombine.high %v11473_v29, %v11473_v29 }
  0x86   : > { %7011 = vmatpush1.bf16.msra.mxu0 %v9637_v32  ;;  %v9724_v32 = vld [vmem:[%s11301_s18 + $0x560] ss:$8 sps:$4 sm:$0xff]  }
  0x87   : > { %7052 = vmatpush1.bf16.msra.mxu1 %v9640_v33  ;;  %7012 = vmatprep.subr.bf16.mxu0 %v9645_v34  ;;  %v9729_v33 = vld [vmem:[%s11301_s18 + $0x454] ss:$8 sps:$4 sm:$0xff]  }
  0x88   : > { %7053 = vmatprep.subr.bf16.mxu1 %v9648_v35  ;;  %v9732_v34 = vld [vmem:[%s11301_s18 + $0x554] ss:$8 sps:$4 sm:$0xff]   ;;  %v1432_v35 = vrot.slane %v1410_v30, %v11360_v49 }
  0x8a   : > { %7013 = vmatpush1.bf16.msra.mxu0 %v9643_v36  ;;  %v1442_v36 = vcombine.high %v1432_v35, %v1432_v35 }
  0x8b   : > { %7054 = vmatpush1.bf16.msra.mxu1 %v9646_v37  ;;  %7014 = vmatprep.subr.bf16.mxu0 %v9651_v38  ;;  %v9727_v37 = vld [vmem:[%s11301_s18 + $0x450] ss:$8 sps:$4 sm:$0xff]  }
  0x8c   : > { %7055 = vmatprep.subr.bf16.mxu1 %v9654_v39  ;;  %v9730_v38 = vld [vmem:[%s11301_s18 + $0x550] ss:$8 sps:$4 sm:$0xff]   ;;  %v9735_v39 = vld [vmem:[%s11301_s18 + $0x444] ss:$8 sps:$4 sm:$0xff]  }
  0x8e   : > { %7015 = vmatpush1.bf16.msra.mxu0 %v9649_v40  ;;  %v9738_v40 = vld [vmem:[%s11301_s18 + $0x544] ss:$8 sps:$4 sm:$0xff]  }
  0x8f   : > { %7056 = vmatpush1.bf16.msra.mxu1 %v9652_v41  ;;  %7016 = vmatprep.subr.bf16.mxu0 %v9657_v42  ;;  %v9733_v41 = vld [vmem:[%s11301_s18 + $0x440] ss:$8 sps:$4 sm:$0xff]  }
  0x90   : > { %7057 = vmatprep.subr.bf16.mxu1 %v9660_v44  ;;  %v9736_v42 = vld [vmem:[%s11301_s18 + $0x540] ss:$8 sps:$4 sm:$0xff]   ;;  %v9741_v44 = vld [vmem:[%s11301_s18 + $0x434] ss:$8 sps:$4 sm:$0xff]  }
  0x92   : > { %7017 = vmatpush1.bf16.msra.mxu0 %v9655_v45  ;;  %v9744_v45 = vld [vmem:[%s11301_s18 + $0x534] ss:$8 sps:$4 sm:$0xff]  }
  0x93   : > { %7058 = vmatpush1.bf16.msra.mxu1 %v9658_v46  ;;  %7018 = vmatprep.subr.bf16.mxu0 %v9663_v47  ;;  %v9739_v46 = vld [vmem:[%s11301_s18 + $0x430] ss:$8 sps:$4 sm:$0xff]  }
  0x94   : > { %7059 = vmatprep.subr.bf16.mxu1 %v9666_v48  ;;  %v9742_v47 = vld [vmem:[%s11301_s18 + $0x530] ss:$8 sps:$4 sm:$0xff]   ;;  %v9747_v48 = vld [vmem:[%s11301_s18 + $0x424] ss:$8 sps:$4 sm:$0xff]  }
  0x96   : > { %7019 = vmatpush1.bf16.msra.mxu0 %v9661_v50  ;;  %v9750_v50 = vld [vmem:[%s11301_s18 + $0x524] ss:$8 sps:$4 sm:$0xff]  }
  0x97   : > { %7060 = vmatpush1.bf16.msra.mxu1 %v9664_v51  ;;  %7020 = vmatprep.subr.bf16.mxu0 %v9669_v52  ;;  %v9745_v51 = vld [vmem:[%s11301_s18 + $0x420] ss:$8 sps:$4 sm:$0xff]  }
  0x98   : > { %7061 = vmatprep.subr.bf16.mxu1 %v9672_v53  ;;  %v9748_v52 = vld [vmem:[%s11301_s18 + $0x520] ss:$8 sps:$4 sm:$0xff]   ;;  %v9753_v53 = vld [vmem:[%s11301_s18 + $0x414] ss:$8 sps:$4 sm:$0xff]  }
  0x9a   : > { %7021 = vmatpush2.bf16.msra.mxu0 %v9667_v54  ;;  %v9756_v54 = vld [vmem:[%s11301_s18 + $0x514] ss:$8 sps:$4 sm:$0xff]  }
  0x9b   : > { %7062 = vmatpush2.bf16.msra.mxu1 %v9670_v55  ;;  %7022 = vmatprep.subr.bf16.mxu0 %v9675_v56  ;;  %v9751_v55 = vld [vmem:[%s11301_s18 + $0x410] ss:$8 sps:$4 sm:$0xff]  }
  0x9c   : > { %7063 = vmatprep.subr.bf16.mxu1 %v9678_v57  ;;  %v9754_v56 = vld [vmem:[%s11301_s18 + $0x510] ss:$8 sps:$4 sm:$0xff]   ;;  %v9759_v57 = vld [vmem:[%s11301_s18 + $0x404] ss:$8 sps:$4 sm:$0xff]  }
  0x9e   : > { %7023 = vmatpush2.bf16.msra.mxu0 %v9673_v58  ;;  %v9762_v58 = vld [vmem:[%s11301_s18 + $0x504] ss:$8 sps:$4 sm:$0xff]  }
  0x9f   : > { %7064 = vmatpush2.bf16.msra.mxu1 %v9676_v59  ;;  %7024 = vmatprep.subr.bf16.mxu0 %v9681_v60  ;;  %v9757_v59 = vld [vmem:[%s11301_s18 + $0x400] ss:$8 sps:$4 sm:$0xff]  }
  0xa0   : > { %7065 = vmatprep.subr.bf16.mxu1 %v9684_v61  ;;  %v9760_v60 = vld [vmem:[%s11301_s18 + $0x500] ss:$8 sps:$4 sm:$0xff]   ;;  %v9765_v61 = vld [vmem:[%s11301_s18 + $0x4f4] ss:$8 sps:$4 sm:$0xff]  }
  0xa2   : > { %7025 = vmatpush2.bf16.msra.mxu0 %v9679_v62  ;;  %v9768_v62 = vld [vmem:[%s11301_s18 + $0x5f4] ss:$8 sps:$4 sm:$0xff]  }
  0xa3   : > { %7066 = vmatpush2.bf16.msra.mxu1 %v9682_v63  ;;  %7026 = vmatprep.subr.bf16.mxu0 %v9687_v0  ;;  %v9763_v63 = vld [vmem:[%s11301_s18 + $0x4f0] ss:$8 sps:$4 sm:$0xff]  }
  0xa4   : > { %7067 = vmatprep.subr.bf16.mxu1 %v9690_v1  ;;  %v9766_v0 = vld [vmem:[%s11301_s18 + $0x5f0] ss:$8 sps:$4 sm:$0xff]   ;;  %v9771_v1 = vld [vmem:[%s11301_s18 + $0x4e4] ss:$8 sps:$4 sm:$0xff]  }
  0xa6   : > { %7027 = vmatpush2.bf16.msra.mxu0 %v9685_v2  ;;  %v9774_v2 = vld [vmem:[%s11301_s18 + $0x5e4] ss:$8 sps:$4 sm:$0xff]  }
  0xa7   : > { %7068 = vmatpush2.bf16.msra.mxu1 %v9688_v3  ;;  %7028 = vmatprep.subr.bf16.mxu0 %v9693_v4  ;;  %v9769_v3 = vld [vmem:[%s11301_s18 + $0x4e0] ss:$8 sps:$4 sm:$0xff]  }
  0xa8   : > { %7069 = vmatprep.subr.bf16.mxu1 %v9696_v5  ;;  %v9772_v4 = vld [vmem:[%s11301_s18 + $0x5e0] ss:$8 sps:$4 sm:$0xff]   ;;  %v9777_v5 = vld [vmem:[%s11301_s18 + $0x4d4] ss:$8 sps:$4 sm:$0xff]  }
  0xaa   : > { %7029 = vmatpush2.bf16.msra.mxu0 %v9691_v7  ;;  %v9780_v7 = vld [vmem:[%s11301_s18 + $0x5d4] ss:$8 sps:$4 sm:$0xff]  }
  0xab   : > { %7070 = vmatpush2.bf16.msra.mxu1 %v9694_v8  ;;  %7030 = vmatprep.subr.bf16.mxu0 %v9699_v9  ;;  %v9775_v8 = vld [vmem:[%s11301_s18 + $0x4d0] ss:$8 sps:$4 sm:$0xff]  }
  0xac   : > { %7071 = vmatprep.subr.bf16.mxu1 %v9702_v10  ;;  %v9778_v9 = vld [vmem:[%s11301_s18 + $0x5d0] ss:$8 sps:$4 sm:$0xff]   ;;  %v9783_v10 = vld [vmem:[%s11301_s18 + $0x4c4] ss:$8 sps:$4 sm:$0xff]  }
  0xae   : > { %7031 = vmatpush2.bf16.msra.mxu0 %v9697_v11  ;;  %v9786_v11 = vld [vmem:[%s11301_s18 + $0x5c4] ss:$8 sps:$4 sm:$0xff]  }
  0xaf   : > { %7072 = vmatpush2.bf16.msra.mxu1 %v9700_v12  ;;  %7032 = vmatprep.subr.bf16.mxu0 %v9705_v13  ;;  %v9781_v12 = vld [vmem:[%s11301_s18 + $0x4c0] ss:$8 sps:$4 sm:$0xff]  }
  0xb0   : > { %7073 = vmatprep.subr.bf16.mxu1 %v9708_v14  ;;  %v9784_v13 = vld [vmem:[%s11301_s18 + $0x5c0] ss:$8 sps:$4 sm:$0xff]   ;;  %v9789_v14 = vld [vmem:[%s11301_s18 + $0x4b4] ss:$8 sps:$4 sm:$0xff]  }
  0xb2   : > { %7033 = vmatpush2.bf16.msra.mxu0 %v9703_v15  ;;  %v9792_v15 = vld [vmem:[%s11301_s18 + $0x5b4] ss:$8 sps:$4 sm:$0xff]  }
  0xb3   : > { %7074 = vmatpush2.bf16.msra.mxu1 %v9706_v16  ;;  %7034 = vmatprep.subr.bf16.mxu0 %v9711_v17  ;;  %v9787_v16 = vld [vmem:[%s11301_s18 + $0x4b0] ss:$8 sps:$4 sm:$0xff]  }
  0xb4   : > { %7075 = vmatprep.subr.bf16.mxu1 %v9714_v18  ;;  %v9790_v17 = vld [vmem:[%s11301_s18 + $0x5b0] ss:$8 sps:$4 sm:$0xff]   ;;  %v9795_v18 = vld [vmem:[%s11301_s18 + $0x4a4] ss:$8 sps:$4 sm:$0xff]  }
  0xb6   : > { %7035 = vmatpush2.bf16.msra.mxu0 %v9709_v19  ;;  %v9798_v19 = vld [vmem:[%s11301_s18 + $0x5a4] ss:$8 sps:$4 sm:$0xff]  }
  0xb7   : > { %7076 = vmatpush2.bf16.msra.mxu1 %v9712_v21  ;;  %7086 = vmatprep.subr.bf16.mxu0 %v9717_v22  ;;  %v9793_v21 = vld [vmem:[%s11301_s18 + $0x4a0] ss:$8 sps:$4 sm:$0xff]  }
  0xb8   : > { %7127 = vmatprep.subr.bf16.mxu1 %v9720_v23  ;;  %v9796_v22 = vld [vmem:[%s11301_s18 + $0x5a0] ss:$8 sps:$4 sm:$0xff]   ;;  %v9801_v23 = vld [vmem:[%s11301_s18 + $0x494] ss:$8 sps:$4 sm:$0xff]  }
  0xb9   : > { %7037 = vmatmul.mubr.bf16.vlgmr.msra.gmra.mxu0 %v1376_v20  ;;  %v1395_v20 = vcombine.high %v11467_v6, %v11467_v6  ;;  %v9802_v6 = vld [vmem:[%s11301_s18 + $0x590] ss:$8 sps:$4 sm:$0xff]  }
  0xba   : > { %7078 = vmatmul.mubr.bf16.vlgmr.msra.gmra.mxu1 %v1392_v24  ;;  %7087 = vmatpush1.bf16.msra.mxu0 %v9715_v25  ;;  %v9804_v24 = vld [vmem:[%s11301_s18 + $0x594] ss:$8 sps:$4 sm:$0xff]  }
  0xbb   : > { %7128 = vmatpush1.bf16.msra.mxu1 %v9718_v26  ;;  %7088 = vmatprep.subr.bf16.mxu0 %v9723_v27  ;;  %v11533_v25 = vrot.slane %v1395_v20, %v11360_v49  ;;  %v9799_v26 = vld [vmem:[%s11301_s18 + $0x490] ss:$8 sps:$4 sm:$0xff]   ;;  %v9807_v27 = vld [vmem:[%s11301_s18 + $0x484] ss:$8 sps:$4 sm:$0xff]  }
  0xbc   : > { %7129 = vmatprep.subr.bf16.mxu1 %v9726_v28  ;;  %7118 = vmatprep.mubr.bf16.mxu0 %v1432_v35  ;;  %v9810_v28 = vld [vmem:[%s11301_s18 + $0x584] ss:$8 sps:$4 sm:$0xff]   ;;  %v9816_v35 = vld [vmem:[%s11301_s18 + $0x774] ss:$8 sps:$4 sm:$0xff]  }
  0xbd   : > { %7159 = vmatprep.mubr.bf16.mxu1 %v1442_v36  ;;  %v1411_v30 = vcombine.high %v11533_v25, %v11533_v25  ;;  %v9882_v20 = vld [vmem:[%s11301_s18 + $0x7c4] ss:$8 sps:$4 sm:$0xff]  }
  0xbe   : > { %7089 = vmatpush1.bf16.msra.mxu0 %v9721_v31  ;;  %v1418_v31 = vrot.slane %v11473_v29, %v11360_v49  ;;  %v9814_v29 = vld [vmem:[%s11301_s18 + $0x770] ss:$8 sps:$4 sm:$0xff]  }
  0xbf   : > { %7130 = vmatpush1.bf16.msra.mxu1 %v9724_v32  ;;  %7090 = vmatprep.subr.bf16.mxu0 %v9729_v33  ;;  %v9805_v32 = vld [vmem:[%s11301_s18 + $0x480] ss:$8 sps:$4 sm:$0xff]   ;;  %v1439_v36 = vrot.slane %v1411_v30, %v11360_v49 }
  0xc0   : > { %7131 = vmatprep.subr.bf16.mxu1 %v9732_v34  ;;  %v9808_v33 = vld [vmem:[%s11301_s18 + $0x580] ss:$8 sps:$4 sm:$0xff]   ;;  %v9813_v34 = vld [vmem:[%s11301_s18 + $0x674] ss:$8 sps:$4 sm:$0xff]  }
  0xc1   : > { %v9889_v30 = vld [vmem:[%s11301_s18 + $0x6a0] ss:$8 sps:$4 sm:$0xff]  }
  0xc2   : > { %7091 = vmatpush1.bf16.msra.mxu0 %v9727_v37  ;;  %v1440_v37 = vcombine.high %v1418_v31, %v1418_v31 }
  0xc3   : > { %7132 = vmatpush1.bf16.msra.mxu1 %v9730_v38  ;;  %7092 = vmatprep.subr.bf16.mxu0 %v9735_v39  ;;  %v9811_v38 = vld [vmem:[%s11301_s18 + $0x670] ss:$8 sps:$4 sm:$0xff]   ;;  %v9819_v39 = vld [vmem:[%s11301_s18 + $0x664] ss:$8 sps:$4 sm:$0xff]  }
  0xc4   : > { %7133 = vmatprep.subr.bf16.mxu1 %v9738_v40  ;;  %v9822_v40 = vld [vmem:[%s11301_s18 + $0x764] ss:$8 sps:$4 sm:$0xff]  }
  0xc6   : > { %7093 = vmatpush1.bf16.msra.mxu0 %v9733_v41  ;;  %v1443_v41 = vcombine.high %v1439_v36, %v1439_v36 }
  0xc7   : > { %7134 = vmatpush1.bf16.msra.mxu1 %v9736_v42  ;;  %7094 = vmatprep.subr.bf16.mxu0 %v9741_v44  ;;  %v9817_v42 = vld [vmem:[%s11301_s18 + $0x660] ss:$8 sps:$4 sm:$0xff]  }
  0xc8   : > { %7135 = vmatprep.subr.bf16.mxu1 %v9744_v45  ;;  %v9820_v44 = vld [vmem:[%s11301_s18 + $0x760] ss:$8 sps:$4 sm:$0xff]   ;;  %v9825_v45 = vld [vmem:[%s11301_s18 + $0x654] ss:$8 sps:$4 sm:$0xff]  }
  0xca   : > { %7095 = vmatpush1.bf16.msra.mxu0 %v9739_v46  ;;  %v9828_v46 = vld [vmem:[%s11301_s18 + $0x754] ss:$8 sps:$4 sm:$0xff]  }
  0xcb   : > { %7136 = vmatpush1.bf16.msra.mxu1 %v9742_v47  ;;  %7096 = vmatprep.subr.bf16.mxu0 %v9747_v48  ;;  %v9823_v47 = vld [vmem:[%s11301_s18 + $0x650] ss:$8 sps:$4 sm:$0xff]  }
  0xcc   : > { %7137 = vmatprep.subr.bf16.mxu1 %v9750_v50  ;;  %v9826_v48 = vld [vmem:[%s11301_s18 + $0x750] ss:$8 sps:$4 sm:$0xff]   ;;  %v9831_v50 = vld [vmem:[%s11301_s18 + $0x644] ss:$8 sps:$4 sm:$0xff]  }
  0xce   : > { %7097 = vmatpush1.bf16.msra.mxu0 %v9745_v51  ;;  %v9834_v51 = vld [vmem:[%s11301_s18 + $0x744] ss:$8 sps:$4 sm:$0xff]  }
  0xcf   : > { %7138 = vmatpush1.bf16.msra.mxu1 %v9748_v52  ;;  %7098 = vmatprep.subr.bf16.mxu0 %v9753_v53  ;;  %v9829_v52 = vld [vmem:[%s11301_s18 + $0x640] ss:$8 sps:$4 sm:$0xff]  }
  0xd0   : > { %7139 = vmatprep.subr.bf16.mxu1 %v9756_v54  ;;  %v9832_v53 = vld [vmem:[%s11301_s18 + $0x740] ss:$8 sps:$4 sm:$0xff]   ;;  %v9837_v54 = vld [vmem:[%s11301_s18 + $0x634] ss:$8 sps:$4 sm:$0xff]  }
  0xd2   : > { %7099 = vmatpush1.bf16.msra.mxu0 %v9751_v55  ;;  %v9840_v55 = vld [vmem:[%s11301_s18 + $0x734] ss:$8 sps:$4 sm:$0xff]  }
  0xd3   : > { %7140 = vmatpush1.bf16.msra.mxu1 %v9754_v56  ;;  %7100 = vmatprep.subr.bf16.mxu0 %v9759_v57  ;;  %v9835_v56 = vld [vmem:[%s11301_s18 + $0x630] ss:$8 sps:$4 sm:$0xff]  }
  0xd4   : > { %7141 = vmatprep.subr.bf16.mxu1 %v9762_v58  ;;  %v9838_v57 = vld [vmem:[%s11301_s18 + $0x730] ss:$8 sps:$4 sm:$0xff]   ;;  %v9843_v58 = vld [vmem:[%s11301_s18 + $0x624] ss:$8 sps:$4 sm:$0xff]  }
  0xd6   : > { %7101 = vmatpush1.bf16.msra.mxu0 %v9757_v59  ;;  %v9846_v59 = vld [vmem:[%s11301_s18 + $0x724] ss:$8 sps:$4 sm:$0xff]  }
  0xd7   : > { %7142 = vmatpush1.bf16.msra.mxu1 %v9760_v60  ;;  %7102 = vmatprep.subr.bf16.mxu0 %v9765_v61  ;;  %v9841_v60 = vld [vmem:[%s11301_s18 + $0x620] ss:$8 sps:$4 sm:$0xff]  }
  0xd8   : > { %7143 = vmatprep.subr.bf16.mxu1 %v9768_v62  ;;  %v9844_v61 = vld [vmem:[%s11301_s18 + $0x720] ss:$8 sps:$4 sm:$0xff]   ;;  %v9849_v62 = vld [vmem:[%s11301_s18 + $0x614] ss:$8 sps:$4 sm:$0xff]  }
  0xda   : > { %7103 = vmatpush2.bf16.msra.mxu0 %v9763_v63  ;;  %v9852_v63 = vld [vmem:[%s11301_s18 + $0x714] ss:$8 sps:$4 sm:$0xff]  }
  0xdb   : > { %7144 = vmatpush2.bf16.msra.mxu1 %v9766_v0  ;;  %7104 = vmatprep.subr.bf16.mxu0 %v9771_v1  ;;  %v9847_v0 = vld [vmem:[%s11301_s18 + $0x610] ss:$8 sps:$4 sm:$0xff]  }
  0xdc   : > { %7145 = vmatprep.subr.bf16.mxu1 %v9774_v2  ;;  %v9850_v1 = vld [vmem:[%s11301_s18 + $0x710] ss:$8 sps:$4 sm:$0xff]   ;;  %v9855_v2 = vld [vmem:[%s11301_s18 + $0x604] ss:$8 sps:$4 sm:$0xff]  }
  0xde   : > { %7105 = vmatpush2.bf16.msra.mxu0 %v9769_v3  ;;  %v9858_v3 = vld [vmem:[%s11301_s18 + $0x704] ss:$8 sps:$4 sm:$0xff]  }
  0xdf   : > { %7146 = vmatpush2.bf16.msra.mxu1 %v9772_v4  ;;  %7106 = vmatprep.subr.bf16.mxu0 %v9777_v5  ;;  %v9853_v4 = vld [vmem:[%s11301_s18 + $0x600] ss:$8 sps:$4 sm:$0xff]  }
  0xe0   : > { %7147 = vmatprep.subr.bf16.mxu1 %v9780_v7  ;;  %v9856_v5 = vld [vmem:[%s11301_s18 + $0x700] ss:$8 sps:$4 sm:$0xff]   ;;  %v9861_v7 = vld [vmem:[%s11301_s18 + $0x6f4] ss:$8 sps:$4 sm:$0xff]  }
  0xe2   : > { %7107 = vmatpush2.bf16.msra.mxu0 %v9775_v8  ;;  %v9864_v8 = vld [vmem:[%s11301_s18 + $0x7f4] ss:$8 sps:$4 sm:$0xff]  }
  0xe3   : > { %7148 = vmatpush2.bf16.msra.mxu1 %v9778_v9  ;;  %7108 = vmatprep.subr.bf16.mxu0 %v9783_v10  ;;  %v9859_v9 = vld [vmem:[%s11301_s18 + $0x6f0] ss:$8 sps:$4 sm:$0xff]  }
  0xe4   : > { %7149 = vmatprep.subr.bf16.mxu1 %v9786_v11  ;;  %v9862_v10 = vld [vmem:[%s11301_s18 + $0x7f0] ss:$8 sps:$4 sm:$0xff]   ;;  %v9867_v11 = vld [vmem:[%s11301_s18 + $0x6e4] ss:$8 sps:$4 sm:$0xff]  }
  0xe6   : > { %7109 = vmatpush2.bf16.msra.mxu0 %v9781_v12  ;;  %v9870_v12 = vld [vmem:[%s11301_s18 + $0x7e4] ss:$8 sps:$4 sm:$0xff]  }
  0xe7   : > { %7150 = vmatpush2.bf16.msra.mxu1 %v9784_v13  ;;  %7110 = vmatprep.subr.bf16.mxu0 %v9789_v14  ;;  %v9865_v13 = vld [vmem:[%s11301_s18 + $0x6e0] ss:$8 sps:$4 sm:$0xff]  }
  0xe8   : > { %7151 = vmatprep.subr.bf16.mxu1 %v9792_v15  ;;  %v9868_v14 = vld [vmem:[%s11301_s18 + $0x7e0] ss:$8 sps:$4 sm:$0xff]   ;;  %v9873_v15 = vld [vmem:[%s11301_s18 + $0x6d4] ss:$8 sps:$4 sm:$0xff]  }
  0xea   : > { %7111 = vmatpush2.bf16.msra.mxu0 %v9787_v16  ;;  %v9876_v16 = vld [vmem:[%s11301_s18 + $0x7d4] ss:$8 sps:$4 sm:$0xff]  }
  0xeb   : > { %7152 = vmatpush2.bf16.msra.mxu1 %v9790_v17  ;;  %7112 = vmatprep.subr.bf16.mxu0 %v9795_v18  ;;  %v9871_v17 = vld [vmem:[%s11301_s18 + $0x6d0] ss:$8 sps:$4 sm:$0xff]  }
  0xec   : > { %7153 = vmatprep.subr.bf16.mxu1 %v9798_v19  ;;  %v9874_v18 = vld [vmem:[%s11301_s18 + $0x7d0] ss:$8 sps:$4 sm:$0xff]   ;;  %v9879_v19 = vld [vmem:[%s11301_s18 + $0x6c4] ss:$8 sps:$4 sm:$0xff]  }
  0xee   : > { %7113 = vmatpush2.bf16.msra.mxu0 %v9793_v21  ;;  %v9877_v21 = vld [vmem:[%s11301_s18 + $0x6c0] ss:$8 sps:$4 sm:$0xff]  }
  0xef   : > { %7154 = vmatpush2.bf16.msra.mxu1 %v9796_v22  ;;  %7114 = vmatprep.subr.bf16.mxu0 %v9801_v23  ;;  %v9880_v22 = vld [vmem:[%s11301_s18 + $0x7c0] ss:$8 sps:$4 sm:$0xff]   ;;  %v9885_v23 = vld [vmem:[%s11301_s18 + $0x6b4] ss:$8 sps:$4 sm:$0xff]  }
  0xf0   : > { %7155 = vmatprep.subr.bf16.mxu1 %v9804_v24  ;;  %v9888_v24 = vld [vmem:[%s11301_s18 + $0x7b4] ss:$8 sps:$4 sm:$0xff]  }
  0xf2   : > { %7115 = vmatpush2.bf16.msra.mxu0 %v9799_v26  ;;  %v9883_v26 = vld [vmem:[%s11301_s18 + $0x6b0] ss:$8 sps:$4 sm:$0xff]  }
  0xf3   : > { %7156 = vmatpush2.bf16.msra.mxu1 %v9802_v6  ;;  %7116 = vmatprep.subr.bf16.mxu0 %v9807_v27  ;;  %v9886_v6 = vld [vmem:[%s11301_s18 + $0x7b0] ss:$8 sps:$4 sm:$0xff]   ;;  %v9891_v27 = vld [vmem:[%s11301_s18 + $0x6a4] ss:$8 sps:$4 sm:$0xff]  }
  0xf4   : > { %7157 = vmatprep.subr.bf16.mxu1 %v9810_v28  ;;  %v9894_v28 = vld [vmem:[%s11301_s18 + $0x7a4] ss:$8 sps:$4 sm:$0xff]  }
  0xf6   : > { %7117 = vmatpush2.bf16.msra.mxu0 %v9805_v32  ;;  %v9892_v32 = vld [vmem:[%s11301_s18 + $0x7a0] ss:$8 sps:$4 sm:$0xff]  }
  0xf7   : > { %7158 = vmatpush2.bf16.msra.mxu1 %v9808_v33  ;;  %7168 = vmatprep.subr.bf16.mxu0 %v9813_v34  ;;  %v9897_v33 = vld [vmem:[%s11301_s18 + $0x694] ss:$8 sps:$4 sm:$0xff]  }
  0xf8   : > { %7209 = vmatprep.subr.bf16.mxu1 %v9816_v35  ;;  %v9900_v34 = vld [vmem:[%s11301_s18 + $0x794] ss:$8 sps:$4 sm:$0xff]  }
  0xf9   : > { %7119 = vmatmul.mubr.bf16.vlgmr.msra.gmra.mxu0 %v1418_v31  ;;  %v11604_v31 = vld [vmem:[%s12629_s0 + $0x10] sm:$0xff] }
  0xfa   : > { %7160 = vmatmul.mubr.bf16.vlgmr.msra.gmra.mxu1 %v1440_v37  ;;  %7169 = vmatpush1.bf16.msra.mxu0 %v9811_v38  ;;  %v11611_v35 = vrot.slane %v11604_v31, %v11360_v49  ;;  %v9898_v37 = vld [vmem:[%s11301_s18 + $0x790] ss:$8 sps:$4 sm:$0xff]   ;;  %v9903_v38 = vld [vmem:[%s11301_s18 + $0x684] ss:$8 sps:$4 sm:$0xff]  }
  0xfb   : > { %7210 = vmatpush1.bf16.msra.mxu1 %v9814_v29  ;;  %7170 = vmatprep.subr.bf16.mxu0 %v9819_v39  ;;  %v9906_v29 = vld [vmem:[%s11301_s18 + $0x784] ss:$8 sps:$4 sm:$0xff]  }
  0xfc   : > { %7211 = vmatprep.subr.bf16.mxu1 %v9822_v40  ;;  %7200 = vmatprep.mubr.bf16.mxu0 %v1439_v36  ;;  %v9895_v36 = vld [vmem:[%s11301_s18 + $0x690] ss:$8 sps:$4 sm:$0xff]   ;;  %v1459_v39 = vcombine.high %v11611_v35, %v11611_v35  ;;  %v9901_v40 = vld [vmem:[%s11301_s18 + $0x680] ss:$8 sps:$4 sm:$0xff]  }
  0xfd   : > { %7241 = vmatprep.mubr.bf16.mxu1 %v1443_v41  ;;  %v1425_v41 = vrot.slane %v11533_v25, %v11360_v49  ;;  %v9919_v25 = vld [vmem:[%s11301_s18 + $0x964] ss:$8 sps:$4 sm:$0xff]  }
  0xfe   : > { %7171 = vmatpush1.bf16.msra.mxu0 %v9817_v42  ;;  %v9904_v42 = vld [vmem:[%s11301_s18 + $0x780] ss:$8 sps:$4 sm:$0xff]  }
  0xff   : > { %7212 = vmatpush1.bf16.msra.mxu1 %v9820_v44  ;;  %7172 = vmatprep.subr.bf16.mxu0 %v9825_v45  ;;  %v9910_v44 = vld [vmem:[%s11301_s18 + $0x874] ss:$8 sps:$4 sm:$0xff]  }
 0x100   : > { %7213 = vmatprep.subr.bf16.mxu1 %v9828_v46  ;;  %v9913_v45 = vld [vmem:[%s11301_s18 + $0x974] ss:$8 sps:$4 sm:$0xff]   ;;  %v1481_v46 = vrot.slane %v1459_v39, %v11360_v49  ;;  %v9971_v39 = vld [vmem:[%s11301_s18 + $0x9d0] ss:$8 sps:$4 sm:$0xff]  }
 0x102   : > { %7173 = vmatpush1.bf16.msra.mxu0 %v9823_v47  ;;  %v1441_v47 = vcombine.high %v1425_v41, %v1425_v41 }
 0x103   : > { %7214 = vmatpush1.bf16.msra.mxu1 %v9826_v48  ;;  %7174 = vmatprep.subr.bf16.mxu0 %v9831_v50  ;;  %v9908_v48 = vld [vmem:[%s11301_s18 + $0x870] ss:$8 sps:$4 sm:$0xff]  }
 0x104   : > { %7215 = vmatprep.subr.bf16.mxu1 %v9834_v51  ;;  %v9911_v50 = vld [vmem:[%s11301_s18 + $0x970] ss:$8 sps:$4 sm:$0xff]   ;;  %v9916_v51 = vld [vmem:[%s11301_s18 + $0x864] ss:$8 sps:$4 sm:$0xff]  }
 0x106   : > { %7175 = vmatpush1.bf16.msra.mxu0 %v9829_v52  ;;  %v1491_v52 = vcombine.high %v1481_v46, %v1481_v46 }
 0x107   : > { %7216 = vmatpush1.bf16.msra.mxu1 %v9832_v53  ;;  %7176 = vmatprep.subr.bf16.mxu0 %v9837_v54 }
 0x108   : > { %7217 = vmatprep.subr.bf16.mxu1 %v9840_v55  ;;  %v9914_v55 = vld [vmem:[%s11301_s18 + $0x860] ss:$8 sps:$4 sm:$0xff]  }
 0x10a   : > { %7177 = vmatpush1.bf16.msra.mxu0 %v9835_v56  ;;  %v9917_v56 = vld [vmem:[%s11301_s18 + $0x960] ss:$8 sps:$4 sm:$0xff]  }
 0x10b   : > { %7218 = vmatpush1.bf16.msra.mxu1 %v9838_v57  ;;  %7178 = vmatprep.subr.bf16.mxu0 %v9843_v58 }
 0x10c   : > { %7219 = vmatprep.subr.bf16.mxu1 %v9846_v59 }
 0x10e   : > { %7179 = vmatpush1.bf16.msra.mxu0 %v9841_v60  ;;  %v9922_v60 = vld [vmem:[%s11301_s18 + $0x854] ss:$8 sps:$4 sm:$0xff]  }
 0x10f   : > { %7220 = vmatpush1.bf16.msra.mxu1 %v9844_v61  ;;  %7180 = vmatprep.subr.bf16.mxu0 %v9849_v62  ;;  %v9925_v61 = vld [vmem:[%s11301_s18 + $0x954] ss:$8 sps:$4 sm:$0xff]  }
 0x110   : > { %7221 = vmatprep.subr.bf16.mxu1 %v9852_v63  ;;  %v9920_v63 = vld [vmem:[%s11301_s18 + $0x850] ss:$8 sps:$4 sm:$0xff]  }
 0x112   : > { %7181 = vmatpush1.bf16.msra.mxu0 %v9847_v0  ;;  %v9923_v0 = vld [vmem:[%s11301_s18 + $0x950] ss:$8 sps:$4 sm:$0xff]  }
 0x113   : > { %7222 = vmatpush1.bf16.msra.mxu1 %v9850_v1  ;;  %7182 = vmatprep.subr.bf16.mxu0 %v9855_v2 }
 0x114   : > { %7223 = vmatprep.subr.bf16.mxu1 %v9858_v3 }
 0x116   : > { %7183 = vmatpush1.bf16.msra.mxu0 %v9853_v4 }
 0x117   : > { %7224 = vmatpush1.bf16.msra.mxu1 %v9856_v5  ;;  %7184 = vmatprep.subr.bf16.mxu0 %v9861_v7  ;;  %v9928_v5 = vld [vmem:[%s11301_s18 + $0x844] ss:$8 sps:$4 sm:$0xff]  }
 0x118   : > { %7225 = vmatprep.subr.bf16.mxu1 %v9864_v8  ;;  %v9931_v7 = vld [vmem:[%s11301_s18 + $0x944] ss:$8 sps:$4 sm:$0xff]   ;;  %v9926_v8 = vld [vmem:[%s11301_s18 + $0x840] ss:$8 sps:$4 sm:$0xff]  }
 0x11a   : > { %7185 = vmatpush2.bf16.msra.mxu0 %v9859_v9  ;;  %v9929_v9 = vld [vmem:[%s11301_s18 + $0x940] ss:$8 sps:$4 sm:$0xff]  }
 0x11b   : > { %7226 = vmatpush2.bf16.msra.mxu1 %v9862_v10  ;;  %7186 = vmatprep.subr.bf16.mxu0 %v9867_v11  ;;  %v9934_v10 = vld [vmem:[%s11301_s18 + $0x834] ss:$8 sps:$4 sm:$0xff]  }
 0x11c   : > { %7227 = vmatprep.subr.bf16.mxu1 %v9870_v12  ;;  %v9937_v11 = vld [vmem:[%s11301_s18 + $0x934] ss:$8 sps:$4 sm:$0xff]   ;;  %v9932_v12 = vld [vmem:[%s11301_s18 + $0x830] ss:$8 sps:$4 sm:$0xff]  }
 0x11e   : > { %7187 = vmatpush2.bf16.msra.mxu0 %v9865_v13  ;;  %v9935_v13 = vld [vmem:[%s11301_s18 + $0x930] ss:$8 sps:$4 sm:$0xff]  }
 0x11f   : > { %7228 = vmatpush2.bf16.msra.mxu1 %v9868_v14  ;;  %7188 = vmatprep.subr.bf16.mxu0 %v9873_v15  ;;  %v9940_v14 = vld [vmem:[%s11301_s18 + $0x824] ss:$8 sps:$4 sm:$0xff]  }
 0x120   : > { %7229 = vmatprep.subr.bf16.mxu1 %v9876_v16  ;;  %v9943_v15 = vld [vmem:[%s11301_s18 + $0x924] ss:$8 sps:$4 sm:$0xff]   ;;  %v9938_v16 = vld [vmem:[%s11301_s18 + $0x820] ss:$8 sps:$4 sm:$0xff]  }
 0x122   : > { %7189 = vmatpush2.bf16.msra.mxu0 %v9871_v17  ;;  %v9941_v17 = vld [vmem:[%s11301_s18 + $0x920] ss:$8 sps:$4 sm:$0xff]  }
 0x123   : > { %7230 = vmatpush2.bf16.msra.mxu1 %v9874_v18  ;;  %7190 = vmatprep.subr.bf16.mxu0 %v9879_v19  ;;  %v9946_v18 = vld [vmem:[%s11301_s18 + $0x814] ss:$8 sps:$4 sm:$0xff]  }
 0x124   : > { %7231 = vmatprep.subr.bf16.mxu1 %v9882_v20  ;;  %v9949_v19 = vld [vmem:[%s11301_s18 + $0x914] ss:$8 sps:$4 sm:$0xff]   ;;  %v9944_v20 = vld [vmem:[%s11301_s18 + $0x810] ss:$8 sps:$4 sm:$0xff]  }
 0x126   : > { %7191 = vmatpush2.bf16.msra.mxu0 %v9877_v21  ;;  %v9947_v21 = vld [vmem:[%s11301_s18 + $0x910] ss:$8 sps:$4 sm:$0xff]  }
 0x127   : > { %7232 = vmatpush2.bf16.msra.mxu1 %v9880_v22  ;;  %7192 = vmatprep.subr.bf16.mxu0 %v9885_v23  ;;  %v9952_v22 = vld [vmem:[%s11301_s18 + $0x804] ss:$8 sps:$4 sm:$0xff]  }
 0x128   : > { %7233 = vmatprep.subr.bf16.mxu1 %v9888_v24  ;;  %v9955_v23 = vld [vmem:[%s11301_s18 + $0x904] ss:$8 sps:$4 sm:$0xff]   ;;  %v9950_v24 = vld [vmem:[%s11301_s18 + $0x800] ss:$8 sps:$4 sm:$0xff]  }
 0x12a   : > { %7193 = vmatpush2.bf16.msra.mxu0 %v9883_v26  ;;  %v9953_v26 = vld [vmem:[%s11301_s18 + $0x900] ss:$8 sps:$4 sm:$0xff]  }
 0x12b   : > { %7234 = vmatpush2.bf16.msra.mxu1 %v9886_v6  ;;  %7194 = vmatprep.subr.bf16.mxu0 %v9891_v27  ;;  %v9958_v6 = vld [vmem:[%s11301_s18 + $0x8f4] ss:$8 sps:$4 sm:$0xff]  }
 0x12c   : > { %7235 = vmatprep.subr.bf16.mxu1 %v9894_v28  ;;  %v9961_v27 = vld [vmem:[%s11301_s18 + $0x9f4] ss:$8 sps:$4 sm:$0xff]   ;;  %v9956_v28 = vld [vmem:[%s11301_s18 + $0x8f0] ss:$8 sps:$4 sm:$0xff]  }
 0x12e   : > { %7195 = vmatpush2.bf16.msra.mxu0 %v9889_v30  ;;  %v9959_v30 = vld [vmem:[%s11301_s18 + $0x9f0] ss:$8 sps:$4 sm:$0xff]  }
 0x12f   : > { %7236 = vmatpush2.bf16.msra.mxu1 %v9892_v32  ;;  %7196 = vmatprep.subr.bf16.mxu0 %v9897_v33  ;;  %v9964_v32 = vld [vmem:[%s11301_s18 + $0x8e4] ss:$8 sps:$4 sm:$0xff]  }
 0x130   : > { %7237 = vmatprep.subr.bf16.mxu1 %v9900_v34  ;;  %v9967_v33 = vld [vmem:[%s11301_s18 + $0x9e4] ss:$8 sps:$4 sm:$0xff]   ;;  %v9962_v34 = vld [vmem:[%s11301_s18 + $0x8e0] ss:$8 sps:$4 sm:$0xff]  }
 0x132   : > { %7197 = vmatpush2.bf16.msra.mxu0 %v9895_v36  ;;  %v9965_v36 = vld [vmem:[%s11301_s18 + $0x9e0] ss:$8 sps:$4 sm:$0xff]  }
 0x133   : > { %7238 = vmatpush2.bf16.msra.mxu1 %v9898_v37  ;;  %7198 = vmatprep.subr.bf16.mxu0 %v9903_v38  ;;  %v9970_v37 = vld [vmem:[%s11301_s18 + $0x8d4] ss:$8 sps:$4 sm:$0xff]  }
 0x134   : > { %7239 = vmatprep.subr.bf16.mxu1 %v9906_v29  ;;  %v9973_v38 = vld [vmem:[%s11301_s18 + $0x9d4] ss:$8 sps:$4 sm:$0xff]   ;;  %v9968_v29 = vld [vmem:[%s11301_s18 + $0x8d0] ss:$8 sps:$4 sm:$0xff]  }
 0x136   : > { %7199 = vmatpush2.bf16.msra.mxu0 %v9901_v40  ;;  %v9976_v40 = vld [vmem:[%s11301_s18 + $0x8c4] ss:$8 sps:$4 sm:$0xff]  }
 0x137   : > { %7240 = vmatpush2.bf16.msra.mxu1 %v9904_v42  ;;  %7250 = vmatprep.subr.bf16.mxu0 %v9910_v44  ;;  %v9974_v42 = vld [vmem:[%s11301_s18 + $0x8c0] ss:$8 sps:$4 sm:$0xff]  }
 0x138   : > { %7291 = vmatprep.subr.bf16.mxu1 %v9913_v45  ;;  %v9977_v44 = vld [vmem:[%s11301_s18 + $0x9c0] ss:$8 sps:$4 sm:$0xff]   ;;  %v9982_v45 = vld [vmem:[%s11301_s18 + $0x8b4] ss:$8 sps:$4 sm:$0xff]  }
 0x139   : > { %v6956_v53 = vpop.f32.mrf.mxu0  ;;  %7201 = vmatmul.mubr.bf16.vlgmr.msra.gmra.mxu0 %v1425_v41  ;;  %v9979_v41 = vld [vmem:[%s11301_s18 + $0x9c4] ss:$8 sps:$4 sm:$0xff]  }
 0x13a   : > { %v6997_v54 = vpop.f32.mrf.mxu1  ;;  %7242 = vmatmul.mubr.bf16.vlgmr.msra.gmra.mxu1 %v1441_v47  ;;  %7251 = vmatpush1.bf16.msra.mxu0 %v9908_v48  ;;  %v9980_v47 = vld [vmem:[%s11301_s18 + $0x8b0] ss:$8 sps:$4 sm:$0xff]  }
 0x13b   : > { %v11632_v57 = vadd.f32 %v6997_v54, %v6956_v53  ;;  %7292 = vmatpush1.bf16.msra.mxu1 %v9911_v50  ;;  %v6958_v58 = vpop.f32.mrf.mxu0  ;;  %7252 = vmatprep.subr.bf16.mxu0 %v9916_v51  ;;  %v9983_v48 = vld [vmem:[%s11301_s18 + $0x9b0] ss:$8 sps:$4 sm:$0xff]   ;;  %v9988_v50 = vld [vmem:[%s11301_s18 + $0x8a4] ss:$8 sps:$4 sm:$0xff]   ;;  %v9989_v53 = vld [vmem:[%s11301_s18 + $0x9a0] ss:$8 sps:$4 sm:$0xff]  }
 0x13c   : > { %v6999_v59 = vpop.f32.mrf.mxu1  ;;  %7293 = vmatprep.subr.bf16.mxu1 %v9919_v25  ;;  %7282 = vmatprep.mubr.bf16.mxu0 %v1481_v46  ;;  %v9985_v46 = vld [vmem:[%s11301_s18 + $0x9b4] ss:$8 sps:$4 sm:$0xff]   ;;  %v9991_v51 = vld [vmem:[%s11301_s18 + $0x9a4] ss:$8 sps:$4 sm:$0xff]   ;;  %v1444_v25 = vcombine.high %v11604_v31, %v11604_v31  ;;  %v9992_v31 = vld [vmem:[%s11301_s18 + $0x890] ss:$8 sps:$4 sm:$0xff]  }
 0x13d   : > { %v11636_v62 = vadd.f32 %v6999_v59, %v6958_v58  ;;  %7323 = vmatprep.mubr.bf16.mxu1 %v1491_v52  ;;  %v6960_v1 = vpop.f32.mrf.mxu0  ;;  %v9986_v52 = vld [vmem:[%s11301_s18 + $0x8a0] ss:$8 sps:$4 sm:$0xff]   ;;  %v9994_v54 = vld [vmem:[%s11301_s18 + $0x894] ss:$8 sps:$4 sm:$0xff]   ;;  %v9995_v58 = vld [vmem:[%s11301_s18 + $0x990] ss:$8 sps:$4 sm:$0xff]  }
 0x13e   : > { %v7001_v2 = vpop.f32.mrf.mxu1  ;;  %7253 = vmatpush1.bf16.msra.mxu0 %v9914_v55  ;;  %v9997_v55 = vld [vmem:[%s11301_s18 + $0x994] ss:$8 sps:$4 sm:$0xff]   ;;  %v10000_v59 = vld [vmem:[%s11301_s18 + $0x884] ss:$8 sps:$4 sm:$0xff]   ;;  %v10001_v1 = vld [vmem:[%s11301_s18 + $0x980] ss:$8 sps:$4 sm:$0xff]  }
 0x13f   : > { %7294 = vmatpush1.bf16.msra.mxu1 %v9917_v56  ;;  %v6961_v3 = vpop.f32.mrf.mxu0  ;;  %7254 = vmatprep.subr.bf16.mxu0 %v9922_v60  ;;  %v11689_v56 = vrot.slane %v1444_v25, %v11360_v49  ;;  %v10003_v60 = vld [vmem:[%s11301_s18 + $0x984] ss:$8 sps:$4 sm:$0xff]   ;;  %v10006_v2 = vld [vmem:[%s11301_s18 + $0xa74] ss:$8 sps:$4 sm:$0xff]  }
 0x140   : > { %v7002_v4 = vpop.f32.mrf.mxu1  ;;  %7295 = vmatprep.subr.bf16.mxu1 %v9925_v61  ;;  %v10009_v3 = vld [vmem:[%s11301_s18 + $0xb74] ss:$8 sps:$4 sm:$0xff]  }
 0x141   : > { %v1460_v61 = vcombine.high %v11689_v56, %v11689_v56  ;;  %v10004_v4 = vld [vmem:[%s11301_s18 + $0xa70] ss:$8 sps:$4 sm:$0xff]   ;;  %v10057_v25 = vld [vmem:[%s11301_s18 + $0xbf4] ss:$8 sps:$4 sm:$0xff]  }
 0x142   : > { %7255 = vmatpush1.bf16.msra.mxu0 %v9920_v63  ;;  %v1467_v63 = vrot.slane %v11611_v35, %v11360_v49  ;;  %v10012_v35 = vld [vmem:[%s11301_s18 + $0xa64] ss:$8 sps:$4 sm:$0xff]  }
 0x143   : > { %7296 = vmatpush1.bf16.msra.mxu1 %v9923_v0  ;;  %7256 = vmatprep.subr.bf16.mxu0 %v9928_v5  ;;  %v9998_v0 = vld [vmem:[%s11301_s18 + $0x880] ss:$8 sps:$4 sm:$0xff]   ;;  %v10007_v5 = vld [vmem:[%s11301_s18 + $0xb70] ss:$8 sps:$4 sm:$0xff]  }
 0x144   : > { %7297 = vmatprep.subr.bf16.mxu1 %v9931_v7  ;;  %v1488_v7 = vrot.slane %v1460_v61, %v11360_v49  ;;  %v10064_v61 = vld [vmem:[%s11301_s18 + $0xad0] ss:$8 sps:$4 sm:$0xff]  }
 0x146   : > { %7257 = vmatpush1.bf16.msra.mxu0 %v9926_v8  ;;  %v1489_v8 = vcombine.high %v1467_v63, %v1467_v63 }
 0x147   : > { %7298 = vmatpush1.bf16.msra.mxu1 %v9929_v9  ;;  %7258 = vmatprep.subr.bf16.mxu0 %v9934_v10  ;;  %v10015_v9 = vld [vmem:[%s11301_s18 + $0xb64] ss:$8 sps:$4 sm:$0xff]   ;;  %v10010_v10 = vld [vmem:[%s11301_s18 + $0xa60] ss:$8 sps:$4 sm:$0xff]  }
 0x148   : > { %7299 = vmatprep.subr.bf16.mxu1 %v9937_v11  ;;  %v10013_v11 = vld [vmem:[%s11301_s18 + $0xb60] ss:$8 sps:$4 sm:$0xff]  }
 0x14a   : > { %7259 = vmatpush1.bf16.msra.mxu0 %v9932_v12  ;;  %v1492_v12 = vcombine.high %v1488_v7, %v1488_v7 }
 0x14b   : > { %7300 = vmatpush1.bf16.msra.mxu1 %v9935_v13  ;;  %7260 = vmatprep.subr.bf16.mxu0 %v9940_v14 }
 0x14c   : > { %7301 = vmatprep.subr.bf16.mxu1 %v9943_v15 }
 0x14e   : > { %7261 = vmatpush1.bf16.msra.mxu0 %v9938_v16 }
 0x14f   : > { %7302 = vmatpush1.bf16.msra.mxu1 %v9941_v17  ;;  %7262 = vmatprep.subr.bf16.mxu0 %v9946_v18  ;;  %v10018_v18 = vld [vmem:[%s11301_s18 + $0xa54] ss:$8 sps:$4 sm:$0xff]  }
 0x150   : > { %7303 = vmatprep.subr.bf16.mxu1 %v9949_v19  ;;  %v10021_v19 = vld [vmem:[%s11301_s18 + $0xb54] ss:$8 sps:$4 sm:$0xff]  }
 0x152   : > { %7263 = vmatpush1.bf16.msra.mxu0 %v9944_v20 }
 0x153   : > { %7304 = vmatpush1.bf16.msra.mxu1 %v9947_v21  ;;  %7264 = vmatprep.subr.bf16.mxu0 %v9952_v22  ;;  %v10016_v22 = vld [vmem:[%s11301_s18 + $0xa50] ss:$8 sps:$4 sm:$0xff]  }
 0x154   : > { %7305 = vmatprep.subr.bf16.mxu1 %v9955_v23  ;;  %v10019_v23 = vld [vmem:[%s11301_s18 + $0xb50] ss:$8 sps:$4 sm:$0xff]  }
 0x156   : > { %7265 = vmatpush1.bf16.msra.mxu0 %v9950_v24 }
 0x157   : > { %7306 = vmatpush1.bf16.msra.mxu1 %v9953_v26  ;;  %7266 = vmatprep.subr.bf16.mxu0 %v9958_v6 }
 0x158   : > { %7307 = vmatprep.subr.bf16.mxu1 %v9961_v27 }
 0x15a   : > { %7267 = vmatpush2.bf16.msra.mxu0 %v9956_v28  ;;  %v10027_v28 = vld [vmem:[%s11301_s18 + $0xb44] ss:$8 sps:$4 sm:$0xff]  }
 0x15b   : > { %7308 = vmatpush2.bf16.msra.mxu1 %v9959_v30  ;;  %7268 = vmatprep.subr.bf16.mxu0 %v9964_v32  ;;  %v10022_v30 = vld [vmem:[%s11301_s18 + $0xa40] ss:$8 sps:$4 sm:$0xff]  }
 0x15c   : > { %7309 = vmatprep.subr.bf16.mxu1 %v9967_v33  ;;  %v10025_v32 = vld [vmem:[%s11301_s18 + $0xb40] ss:$8 sps:$4 sm:$0xff]   ;;  %v10030_v33 = vld [vmem:[%s11301_s18 + $0xa34] ss:$8 sps:$4 sm:$0xff]  }
 0x15e   : > { %7269 = vmatpush2.bf16.msra.mxu0 %v9962_v34  ;;  %v10033_v34 = vld [vmem:[%s11301_s18 + $0xb34] ss:$8 sps:$4 sm:$0xff]  }
 0x15f   : > { %7310 = vmatpush2.bf16.msra.mxu1 %v9965_v36  ;;  %7270 = vmatprep.subr.bf16.mxu0 %v9970_v37  ;;  %v10028_v36 = vld [vmem:[%s11301_s18 + $0xa30] ss:$8 sps:$4 sm:$0xff]  }
 0x160   : > { %7311 = vmatprep.subr.bf16.mxu1 %v9973_v38  ;;  %v10031_v37 = vld [vmem:[%s11301_s18 + $0xb30] ss:$8 sps:$4 sm:$0xff]   ;;  %v10036_v38 = vld [vmem:[%s11301_s18 + $0xa24] ss:$8 sps:$4 sm:$0xff]  }
 0x162   : > { %7271 = vmatpush2.bf16.msra.mxu0 %v9968_v29  ;;  %v10039_v29 = vld [vmem:[%s11301_s18 + $0xb24] ss:$8 sps:$4 sm:$0xff]  }
 0x163   : > { %7312 = vmatpush2.bf16.msra.mxu1 %v9971_v39  ;;  %7272 = vmatprep.subr.bf16.mxu0 %v9976_v40  ;;  %v10034_v39 = vld [vmem:[%s11301_s18 + $0xa20] ss:$8 sps:$4 sm:$0xff]  }
 0x164   : > { %7313 = vmatprep.subr.bf16.mxu1 %v9979_v41  ;;  %v10037_v40 = vld [vmem:[%s11301_s18 + $0xb20] ss:$8 sps:$4 sm:$0xff]   ;;  %v10042_v41 = vld [vmem:[%s11301_s18 + $0xa14] ss:$8 sps:$4 sm:$0xff]  }
 0x166   : > { %7273 = vmatpush2.bf16.msra.mxu0 %v9974_v42  ;;  %v10045_v42 = vld [vmem:[%s11301_s18 + $0xb14] ss:$8 sps:$4 sm:$0xff]  }
 0x167   : > { %7314 = vmatpush2.bf16.msra.mxu1 %v9977_v44  ;;  %7274 = vmatprep.subr.bf16.mxu0 %v9982_v45  ;;  %v10040_v44 = vld [vmem:[%s11301_s18 + $0xa10] ss:$8 sps:$4 sm:$0xff]  }
 0x168   : > { %7315 = vmatprep.subr.bf16.mxu1 %v9985_v46  ;;  %v10043_v45 = vld [vmem:[%s11301_s18 + $0xb10] ss:$8 sps:$4 sm:$0xff]   ;;  %v10048_v46 = vld [vmem:[%s11301_s18 + $0xa04] ss:$8 sps:$4 sm:$0xff]  }
 0x16a   : > { %7275 = vmatpush2.bf16.msra.mxu0 %v9980_v47  ;;  %v10051_v47 = vld [vmem:[%s11301_s18 + $0xb04] ss:$8 sps:$4 sm:$0xff]  }
 0x16b   : > { %7316 = vmatpush2.bf16.msra.mxu1 %v9983_v48  ;;  %7276 = vmatprep.subr.bf16.mxu0 %v9988_v50  ;;  %v10046_v48 = vld [vmem:[%s11301_s18 + $0xa00] ss:$8 sps:$4 sm:$0xff]  }
 0x16c   : > { %7317 = vmatprep.subr.bf16.mxu1 %v9991_v51  ;;  %v10049_v50 = vld [vmem:[%s11301_s18 + $0xb00] ss:$8 sps:$4 sm:$0xff]   ;;  %v10054_v51 = vld [vmem:[%s11301_s18 + $0xaf4] ss:$8 sps:$4 sm:$0xff]  }
 0x16e   : > { %7277 = vmatpush2.bf16.msra.mxu0 %v9986_v52  ;;  %v10052_v52 = vld [vmem:[%s11301_s18 + $0xaf0] ss:$8 sps:$4 sm:$0xff]  }
 0x16f   : > { %7318 = vmatpush2.bf16.msra.mxu1 %v9989_v53  ;;  %7278 = vmatprep.subr.bf16.mxu0 %v9994_v54  ;;  %v10055_v53 = vld [vmem:[%s11301_s18 + $0xbf0] ss:$8 sps:$4 sm:$0xff]   ;;  %v10060_v54 = vld [vmem:[%s11301_s18 + $0xae4] ss:$8 sps:$4 sm:$0xff]  }
 0x170   : > { %7319 = vmatprep.subr.bf16.mxu1 %v9997_v55  ;;  %v10063_v55 = vld [vmem:[%s11301_s18 + $0xbe4] ss:$8 sps:$4 sm:$0xff]  }
 0x172   : > { %7279 = vmatpush2.bf16.msra.mxu0 %v9992_v31  ;;  %v10058_v31 = vld [vmem:[%s11301_s18 + $0xae0] ss:$8 sps:$4 sm:$0xff]  }
 0x173   : > { %7320 = vmatpush2.bf16.msra.mxu1 %v9995_v58  ;;  %7280 = vmatprep.subr.bf16.mxu0 %v10000_v59  ;;  %v10061_v58 = vld [vmem:[%s11301_s18 + $0xbe0] ss:$8 sps:$4 sm:$0xff]   ;;  %v10066_v59 = vld [vmem:[%s11301_s18 + $0xad4] ss:$8 sps:$4 sm:$0xff]  }
 0x174   : > { %7321 = vmatprep.subr.bf16.mxu1 %v10003_v60  ;;  %v10069_v60 = vld [vmem:[%s11301_s18 + $0xbd4] ss:$8 sps:$4 sm:$0xff]  }
 0x176   : > { %7281 = vmatpush2.bf16.msra.mxu0 %v9998_v0  ;;  %v10072_v0 = vld [vmem:[%s11301_s18 + $0xac4] ss:$8 sps:$4 sm:$0xff]  }
 0x177   : > { %7322 = vmatpush2.bf16.msra.mxu1 %v10001_v1  ;;  %7332 = vmatprep.subr.bf16.mxu0 %v10006_v2  ;;  %v10075_v1 = vld [vmem:[%s11301_s18 + $0xbc4] ss:$8 sps:$4 sm:$0xff]   ;;  %v10070_v2 = vld [vmem:[%s11301_s18 + $0xac0] ss:$8 sps:$4 sm:$0xff]  }
 0x178   : > { %7373 = vmatprep.subr.bf16.mxu1 %v10009_v3  ;;  %v10073_v3 = vld [vmem:[%s11301_s18 + $0xbc0] ss:$8 sps:$4 sm:$0xff]  }
 0x179   : > { %v7038_v13 = vpop.f32.mrf.mxu0  ;;  %7283 = vmatmul.mubr.bf16.vlgmr.msra.gmra.mxu0 %v1467_v63  ;;  %v10067_v63 = vld [vmem:[%s11301_s18 + $0xbd0] ss:$8 sps:$4 sm:$0xff]  }
 0x17a   : > { %v7079_v14 = vpop.f32.mrf.mxu1  ;;  %7324 = vmatmul.mubr.bf16.vlgmr.msra.gmra.mxu1 %v1489_v8  ;;  %v7039_v15 = vadd.f32 %v7038_v13, %v11632_v57  ;;  %7333 = vmatpush1.bf16.msra.mxu0 %v10004_v4  ;;  %v10078_v4 = vld [vmem:[%s11301_s18 + $0xab4] ss:$8 sps:$4 sm:$0xff]   ;;  %v10079_v8 = vld [vmem:[%s11301_s18 + $0xbb0] ss:$8 sps:$4 sm:$0xff]  }
 0x17b   : > { %7374 = vmatpush1.bf16.msra.mxu1 %v10007_v5  ;;  %v7040_v16 = vpop.f32.mrf.mxu0  ;;  %7334 = vmatprep.subr.bf16.mxu0 %v10012_v35  ;;  %v10081_v5 = vld [vmem:[%s11301_s18 + $0xbb4] ss:$8 sps:$4 sm:$0xff]   ;;  %v10084_v35 = vld [vmem:[%s11301_s18 + $0xaa4] ss:$8 sps:$4 sm:$0xff]  }
 0x17c   : > { %v7081_v17 = vpop.f32.mrf.mxu1  ;;  %7375 = vmatprep.subr.bf16.mxu1 %v10015_v9  ;;  %v11713_v20 = vadd.f32 %v7079_v14, %v7039_v15  ;;  %v7041_v21 = vadd.f32 %v7040_v16, %v11636_v62  ;;  %7364 = vmatprep.mubr.bf16.mxu0 %v1488_v7  ;;  %v10024_v62 = vld [vmem:[%s11301_s18 + $0xa44] ss:$8 sps:$4 sm:$0xff]   ;;  %v10076_v7 = vld [vmem:[%s11301_s18 + $0xab0] ss:$8 sps:$4 sm:$0xff]   ;;  %v10090_v13 = vld [vmem:[%s11301_s18 + $0xa94] ss:$8 sps:$4 sm:$0xff]  }
 0x17d   : > { %7405 = vmatprep.mubr.bf16.mxu1 %v1492_v12  ;;  %v7042_v57 = vpop.f32.mrf.mxu0  ;;  %v10087_v9 = vld [vmem:[%s11301_s18 + $0xba4] ss:$8 sps:$4 sm:$0xff]   ;;  %v10085_v12 = vld [vmem:[%s11301_s18 + $0xba0] ss:$8 sps:$4 sm:$0xff]   ;;  %v10093_v14 = vld [vmem:[%s11301_s18 + $0xb94] ss:$8 sps:$4 sm:$0xff]  }
 0x17e   : > { %v7083_v24 = vpop.f32.mrf.mxu1  ;;  %v11718_v26 = vadd.f32 %v7081_v17, %v7041_v21  ;;  %7335 = vmatpush1.bf16.msra.mxu0 %v10010_v10  ;;  %v11765_v10 = vld [vmem:[%s12629_s0 + $0x18] sm:$0xff]  ;;  %v10097_v57 = vld [vmem:[%s11301_s18 + $0xb80] ss:$8 sps:$4 sm:$0xff]  }
 0x17f   : > { %7376 = vmatpush1.bf16.msra.mxu1 %v10013_v11  ;;  %v7043_v6 = vpop.f32.mrf.mxu0  ;;  %7336 = vmatprep.subr.bf16.mxu0 %v10018_v18  ;;  %v10082_v11 = vld [vmem:[%s11301_s18 + $0xaa0] ss:$8 sps:$4 sm:$0xff]   ;;  %v11773_v15 = vrot.slane %v11765_v10, %v11360_v49  ;;  %v10088_v16 = vld [vmem:[%s11301_s18 + $0xa90] ss:$8 sps:$4 sm:$0xff]   ;;  %v10096_v18 = vld [vmem:[%s11301_s18 + $0xa84] ss:$8 sps:$4 sm:$0xff]  }
 0x180   : > { %v7084_v27 = vpop.f32.mrf.mxu1  ;;  %7377 = vmatprep.subr.bf16.mxu1 %v10021_v19  ;;  %v10091_v17 = vld [vmem:[%s11301_s18 + $0xb90] ss:$8 sps:$4 sm:$0xff]   ;;  %v10099_v19 = vld [vmem:[%s11301_s18 + $0xb84] ss:$8 sps:$4 sm:$0xff]   ;;  %v10103_v24 = vld [vmem:[%s11301_s18 + $0xc74] ss:$8 sps:$4 sm:$0xff]  }
 0x181   : > { %v1508_v21 = vcombine.high %v11773_v15, %v11773_v15  ;;  %v10106_v6 = vld [vmem:[%s11301_s18 + $0xd74] ss:$8 sps:$4 sm:$0xff]   ;;  %v10101_v27 = vld [vmem:[%s11301_s18 + $0xc70] ss:$8 sps:$4 sm:$0xff]  }
 0x182   : > { %7337 = vmatpush1.bf16.msra.mxu0 %v10016_v22  ;;  %v1474_v22 = vrot.slane %v11689_v56, %v11360_v49  ;;  %v10109_v56 = vld [vmem:[%s11301_s18 + $0xc64] ss:$8 sps:$4 sm:$0xff]  }
 0x183   : > { %7378 = vmatpush1.bf16.msra.mxu1 %v10019_v23  ;;  %7338 = vmatprep.subr.bf16.mxu0 %v10024_v62  ;;  %v10094_v23 = vld [vmem:[%s11301_s18 + $0xa80] ss:$8 sps:$4 sm:$0xff]   ;;  %v10104_v62 = vld [vmem:[%s11301_s18 + $0xd70] ss:$8 sps:$4 sm:$0xff]  }
 0x184   : > { %7379 = vmatprep.subr.bf16.mxu1 %v10027_v28  ;;  %v1530_v28 = vrot.slane %v1508_v21, %v11360_v49  ;;  %v10166_v21 = vld [vmem:[%s11301_s18 + $0xdd4] ss:$8 sps:$4 sm:$0xff]  }
 0x186   : > { %7339 = vmatpush1.bf16.msra.mxu0 %v10022_v30  ;;  %v1490_v30 = vcombine.high %v1474_v22, %v1474_v22 }
 0x187   : > { %7380 = vmatpush1.bf16.msra.mxu1 %v10025_v32  ;;  %7340 = vmatprep.subr.bf16.mxu0 %v10030_v33  ;;  %v10112_v32 = vld [vmem:[%s11301_s18 + $0xd64] ss:$8 sps:$4 sm:$0xff]   ;;  %v10107_v33 = vld [vmem:[%s11301_s18 + $0xc60] ss:$8 sps:$4 sm:$0xff]  }
 0x188   : > { %7381 = vmatprep.subr.bf16.mxu1 %v10033_v34  ;;  %v10110_v34 = vld [vmem:[%s11301_s18 + $0xd60] ss:$8 sps:$4 sm:$0xff]  }
 0x18a   : > { %7341 = vmatpush1.bf16.msra.mxu0 %v10028_v36  ;;  %v1540_v36 = vcombine.high %v1530_v28, %v1530_v28 }
 0x18b   : > { %7382 = vmatpush1.bf16.msra.mxu1 %v10031_v37  ;;  %7342 = vmatprep.subr.bf16.mxu0 %v10036_v38 }
 0x18c   : > { %7383 = vmatprep.subr.bf16.mxu1 %v10039_v29 }
 0x18e   : > { %7343 = vmatpush1.bf16.msra.mxu0 %v10034_v39 }
 0x18f   : > { %7384 = vmatpush1.bf16.msra.mxu1 %v10037_v40  ;;  %7344 = vmatprep.subr.bf16.mxu0 %v10042_v41  ;;  %v10115_v41 = vld [vmem:[%s11301_s18 + $0xc54] ss:$8 sps:$4 sm:$0xff]  }
 0x190   : > { %7385 = vmatprep.subr.bf16.mxu1 %v10045_v42  ;;  %v10118_v42 = vld [vmem:[%s11301_s18 + $0xd54] ss:$8 sps:$4 sm:$0xff]  }
 0x192   : > { %7345 = vmatpush1.bf16.msra.mxu0 %v10040_v44 }
 0x193   : > { %7386 = vmatpush1.bf16.msra.mxu1 %v10043_v45  ;;  %7346 = vmatprep.subr.bf16.mxu0 %v10048_v46  ;;  %v10113_v46 = vld [vmem:[%s11301_s18 + $0xc50] ss:$8 sps:$4 sm:$0xff]  }
 0x194   : > { %7387 = vmatprep.subr.bf16.mxu1 %v10051_v47  ;;  %v10116_v47 = vld [vmem:[%s11301_s18 + $0xd50] ss:$8 sps:$4 sm:$0xff]  }
 0x196   : > { %7347 = vmatpush1.bf16.msra.mxu0 %v10046_v48 }
 0x197   : > { %7388 = vmatpush1.bf16.msra.mxu1 %v10049_v50  ;;  %7348 = vmatprep.subr.bf16.mxu0 %v10054_v51 }
 0x198   : > { %7389 = vmatprep.subr.bf16.mxu1 %v10057_v25 }
 0x19a   : > { %7349 = vmatpush2.bf16.msra.mxu0 %v10052_v52  ;;  %v10124_v52 = vld [vmem:[%s11301_s18 + $0xd44] ss:$8 sps:$4 sm:$0xff]  }
 0x19b   : > { %7390 = vmatpush2.bf16.msra.mxu1 %v10055_v53  ;;  %7350 = vmatprep.subr.bf16.mxu0 %v10060_v54  ;;  %v10119_v53 = vld [vmem:[%s11301_s18 + $0xc40] ss:$8 sps:$4 sm:$0xff]  }
 0x19c   : > { %7391 = vmatprep.subr.bf16.mxu1 %v10063_v55  ;;  %v10122_v54 = vld [vmem:[%s11301_s18 + $0xd40] ss:$8 sps:$4 sm:$0xff]   ;;  %v10127_v55 = vld [vmem:[%s11301_s18 + $0xc34] ss:$8 sps:$4 sm:$0xff]  }
 0x19e   : > { %7351 = vmatpush2.bf16.msra.mxu0 %v10058_v31  ;;  %v10130_v31 = vld [vmem:[%s11301_s18 + $0xd34] ss:$8 sps:$4 sm:$0xff]  }
 0x19f   : > { %7392 = vmatpush2.bf16.msra.mxu1 %v10061_v58  ;;  %7352 = vmatprep.subr.bf16.mxu0 %v10066_v59  ;;  %v10125_v58 = vld [vmem:[%s11301_s18 + $0xc30] ss:$8 sps:$4 sm:$0xff]  }
 0x1a0   : > { %7393 = vmatprep.subr.bf16.mxu1 %v10069_v60  ;;  %v10128_v59 = vld [vmem:[%s11301_s18 + $0xd30] ss:$8 sps:$4 sm:$0xff]   ;;  %v10133_v60 = vld [vmem:[%s11301_s18 + $0xc24] ss:$8 sps:$4 sm:$0xff]  }
 0x1a2   : > { %7353 = vmatpush2.bf16.msra.mxu0 %v10064_v61  ;;  %v10136_v61 = vld [vmem:[%s11301_s18 + $0xd24] ss:$8 sps:$4 sm:$0xff]  }
 0x1a3   : > { %7394 = vmatpush2.bf16.msra.mxu1 %v10067_v63  ;;  %7354 = vmatprep.subr.bf16.mxu0 %v10072_v0  ;;  %v10131_v63 = vld [vmem:[%s11301_s18 + $0xc20] ss:$8 sps:$4 sm:$0xff]  }
 0x1a4   : > { %7395 = vmatprep.subr.bf16.mxu1 %v10075_v1  ;;  %v10134_v0 = vld [vmem:[%s11301_s18 + $0xd20] ss:$8 sps:$4 sm:$0xff]   ;;  %v10139_v1 = vld [vmem:[%s11301_s18 + $0xc14] ss:$8 sps:$4 sm:$0xff]  }
 0x1a6   : > { %7355 = vmatpush2.bf16.msra.mxu0 %v10070_v2  ;;  %v10142_v2 = vld [vmem:[%s11301_s18 + $0xd14] ss:$8 sps:$4 sm:$0xff]  }
 0x1a7   : > { %7396 = vmatpush2.bf16.msra.mxu1 %v10073_v3  ;;  %7356 = vmatprep.subr.bf16.mxu0 %v10078_v4  ;;  %v10137_v3 = vld [vmem:[%s11301_s18 + $0xc10] ss:$8 sps:$4 sm:$0xff]  }
 0x1a8   : > { %7397 = vmatprep.subr.bf16.mxu1 %v10081_v5  ;;  %v10140_v4 = vld [vmem:[%s11301_s18 + $0xd10] ss:$8 sps:$4 sm:$0xff]   ;;  %v10145_v5 = vld [vmem:[%s11301_s18 + $0xc04] ss:$8 sps:$4 sm:$0xff]  }
 0x1aa   : > { %7357 = vmatpush2.bf16.msra.mxu0 %v10076_v7  ;;  %v10148_v7 = vld [vmem:[%s11301_s18 + $0xd04] ss:$8 sps:$4 sm:$0xff]  }
 0x1ab   : > { %7398 = vmatpush2.bf16.msra.mxu1 %v10079_v8  ;;  %7358 = vmatprep.subr.bf16.mxu0 %v10084_v35  ;;  %v10143_v8 = vld [vmem:[%s11301_s18 + $0xc00] ss:$8 sps:$4 sm:$0xff]  }
 0x1ac   : > { %7399 = vmatprep.subr.bf16.mxu1 %v10087_v9  ;;  %v10146_v35 = vld [vmem:[%s11301_s18 + $0xd00] ss:$8 sps:$4 sm:$0xff]   ;;  %v10151_v9 = vld [vmem:[%s11301_s18 + $0xcf4] ss:$8 sps:$4 sm:$0xff]  }
 0x1ae   : > { %7359 = vmatpush2.bf16.msra.mxu0 %v10082_v11  ;;  %v10154_v11 = vld [vmem:[%s11301_s18 + $0xdf4] ss:$8 sps:$4 sm:$0xff]  }
 0x1af   : > { %7400 = vmatpush2.bf16.msra.mxu1 %v10085_v12  ;;  %7360 = vmatprep.subr.bf16.mxu0 %v10090_v13  ;;  %v10149_v12 = vld [vmem:[%s11301_s18 + $0xcf0] ss:$8 sps:$4 sm:$0xff]  }
 0x1b0   : > { %7401 = vmatprep.subr.bf16.mxu1 %v10093_v14  ;;  %v10152_v13 = vld [vmem:[%s11301_s18 + $0xdf0] ss:$8 sps:$4 sm:$0xff]   ;;  %v10157_v14 = vld [vmem:[%s11301_s18 + $0xce4] ss:$8 sps:$4 sm:$0xff]  }
 0x1b2   : > { %7361 = vmatpush2.bf16.msra.mxu0 %v10088_v16  ;;  %v10160_v16 = vld [vmem:[%s11301_s18 + $0xde4] ss:$8 sps:$4 sm:$0xff]  }
 0x1b3   : > { %7402 = vmatpush2.bf16.msra.mxu1 %v10091_v17  ;;  %7362 = vmatprep.subr.bf16.mxu0 %v10096_v18  ;;  %v10155_v17 = vld [vmem:[%s11301_s18 + $0xce0] ss:$8 sps:$4 sm:$0xff]  }
 0x1b4   : > { %7403 = vmatprep.subr.bf16.mxu1 %v10099_v19  ;;  %v10158_v18 = vld [vmem:[%s11301_s18 + $0xde0] ss:$8 sps:$4 sm:$0xff]   ;;  %v10163_v19 = vld [vmem:[%s11301_s18 + $0xcd4] ss:$8 sps:$4 sm:$0xff]  }
 0x1b6   : > { %7363 = vmatpush2.bf16.msra.mxu0 %v10094_v23  ;;  %v10164_v23 = vld [vmem:[%s11301_s18 + $0xdd0] ss:$8 sps:$4 sm:$0xff]  }
 0x1b7   : > { %7404 = vmatpush2.bf16.msra.mxu1 %v10097_v57  ;;  %7414 = vmatprep.subr.bf16.mxu0 %v10103_v24  ;;  %v10169_v57 = vld [vmem:[%s11301_s18 + $0xcc4] ss:$8 sps:$4 sm:$0xff]  }
 0x1b8   : > { %7455 = vmatprep.subr.bf16.mxu1 %v10106_v6  ;;  %v10172_v24 = vld [vmem:[%s11301_s18 + $0xdc4] ss:$8 sps:$4 sm:$0xff]   ;;  %v10167_v6 = vld [vmem:[%s11301_s18 + $0xcc0] ss:$8 sps:$4 sm:$0xff]  }
 0x1b9   : > { %v7120_v37 = vpop.f32.mrf.mxu0  ;;  %7365 = vmatmul.mubr.bf16.vlgmr.msra.gmra.mxu0 %v1474_v22  ;;  %v10161_v22 = vld [vmem:[%s11301_s18 + $0xcd0] ss:$8 sps:$4 sm:$0xff]  }
 0x1ba   : > { %v7161_v38 = vpop.f32.mrf.mxu1  ;;  %7406 = vmatmul.mubr.bf16.vlgmr.msra.gmra.mxu1 %v1490_v30  ;;  %v7121_v29 = vadd.f32 %v7120_v37, %v11713_v20  ;;  %7415 = vmatpush1.bf16.msra.mxu0 %v10101_v27  ;;  %v10170_v27 = vld [vmem:[%s11301_s18 + $0xdc0] ss:$8 sps:$4 sm:$0xff]   ;;  %v10173_v30 = vld [vmem:[%s11301_s18 + $0xcb0] ss:$8 sps:$4 sm:$0xff]  }
 0x1bb   : > { %7456 = vmatpush1.bf16.msra.mxu1 %v10104_v62  ;;  %v7122_v39 = vpop.f32.mrf.mxu0  ;;  %7416 = vmatprep.subr.bf16.mxu0 %v10109_v56  ;;  %v10175_v62 = vld [vmem:[%s11301_s18 + $0xcb4] ss:$8 sps:$4 sm:$0xff]   ;;  %v10176_v56 = vld [vmem:[%s11301_s18 + $0xdb0] ss:$8 sps:$4 sm:$0xff]   ;;  %v10182_v37 = vld [vmem:[%s11301_s18 + $0xda0] ss:$8 sps:$4 sm:$0xff]  }
 0x1bc   : > { %v7163_v40 = vpop.f32.mrf.mxu1  ;;  %7457 = vmatprep.subr.bf16.mxu1 %v10112_v32  ;;  %v11797_v44 = vadd.f32 %v7161_v38, %v7121_v29  ;;  %v7123_v45 = vadd.f32 %v7122_v39, %v11718_v26  ;;  %7446 = vmatprep.mubr.bf16.mxu0 %v1530_v28  ;;  %v10121_v26 = vld [vmem:[%s11301_s18 + $0xc44] ss:$8 sps:$4 sm:$0xff]   ;;  %v10178_v28 = vld [vmem:[%s11301_s18 + $0xdb4] ss:$8 sps:$4 sm:$0xff]  }
 0x1bd   : > { %7487 = vmatprep.mubr.bf16.mxu1 %v1540_v36  ;;  %v7124_v20 = vpop.f32.mrf.mxu0  ;;  %v10181_v32 = vld [vmem:[%s11301_s18 + $0xca4] ss:$8 sps:$4 sm:$0xff]   ;;  %v10179_v36 = vld [vmem:[%s11301_s18 + $0xca0] ss:$8 sps:$4 sm:$0xff]   ;;  %v10187_v38 = vld [vmem:[%s11301_s18 + $0xc94] ss:$8 sps:$4 sm:$0xff]  }
 0x1be   : > { %v7165_v48 = vpop.f32.mrf.mxu1  ;;  %v11802_v50 = vadd.f32 %v7163_v40, %v7123_v45  ;;  %7417 = vmatpush1.bf16.msra.mxu0 %v10107_v33  ;;  %v10184_v33 = vld [vmem:[%s11301_s18 + $0xda4] ss:$8 sps:$4 sm:$0xff]   ;;  %v10190_v29 = vld [vmem:[%s11301_s18 + $0xd94] ss:$8 sps:$4 sm:$0xff]   ;;  %v10188_v40 = vld [vmem:[%s11301_s18 + $0xd90] ss:$8 sps:$4 sm:$0xff]  }
 0x1bf   : > { %7458 = vmatpush1.bf16.msra.mxu1 %v10110_v34  ;;  %v7125_v51 = vpop.f32.mrf.mxu0  ;;  %7418 = vmatprep.subr.bf16.mxu0 %v10115_v41  ;;  %v1493_v34 = vcombine.high %v11765_v10, %v11765_v10  ;;  %v10185_v10 = vld [vmem:[%s11301_s18 + $0xc90] ss:$8 sps:$4 sm:$0xff]   ;;  %v10193_v41 = vld [vmem:[%s11301_s18 + $0xc84] ss:$8 sps:$4 sm:$0xff]   ;;  %v10194_v20 = vld [vmem:[%s11301_s18 + $0xd80] ss:$8 sps:$4 sm:$0xff]  }
 0x1c0   : > { %v7166_v25 = vpop.f32.mrf.mxu1  ;;  %7459 = vmatprep.subr.bf16.mxu1 %v10118_v42  ;;  %v10196_v42 = vld [vmem:[%s11301_s18 + $0xd84] ss:$8 sps:$4 sm:$0xff]   ;;  %v10199_v48 = vld [vmem:[%s11301_s18 + $0xe74] ss:$8 sps:$4 sm:$0xff]  }
 0x1c1   : > { %v11853_v39 = vrot.slane %v1493_v34, %v11360_v49  ;;  %v10202_v51 = vld [vmem:[%s11301_s18 + $0xf74] ss:$8 sps:$4 sm:$0xff]   ;;  %v10197_v25 = vld [vmem:[%s11301_s18 + $0xe70] ss:$8 sps:$4 sm:$0xff]  }
 0x1c2   : > { %7419 = vmatpush1.bf16.msra.mxu0 %v10113_v46  ;;  %v1516_v46 = vrot.slane %v11773_v15, %v11360_v49  ;;  %v10205_v15 = vld [vmem:[%s11301_s18 + $0xe64] ss:$8 sps:$4 sm:$0xff]   ;;  %v10250_v34 = vld [vmem:[%s11301_s18 + $0xff4] ss:$8 sps:$4 sm:$0xff]  }
 0x1c3   : > { %7460 = vmatpush1.bf16.msra.mxu1 %v10116_v47  ;;  %7420 = vmatprep.subr.bf16.mxu0 %v10121_v26  ;;  %v1509_v45 = vcombine.high %v11853_v39, %v11853_v39  ;;  %v10191_v47 = vld [vmem:[%s11301_s18 + $0xc80] ss:$8 sps:$4 sm:$0xff]   ;;  %v10200_v26 = vld [vmem:[%s11301_s18 + $0xf70] ss:$8 sps:$4 sm:$0xff]  }
 0x1c4   : > { %7461 = vmatprep.subr.bf16.mxu1 %v10124_v52 }
 0x1c5   : > { %v1537_v52 = vrot.slane %v1509_v45, %v11360_v49  ;;  %v10257_v45 = vld [vmem:[%s11301_s18 + $0xed0] ss:$8 sps:$4 sm:$0xff]  }
 0x1c6   : > { %7421 = vmatpush1.bf16.msra.mxu0 %v10119_v53  ;;  %v1538_v53 = vcombine.high %v1516_v46, %v1516_v46 }
 0x1c7   : > { %7462 = vmatpush1.bf16.msra.mxu1 %v10122_v54  ;;  %7422 = vmatprep.subr.bf16.mxu0 %v10127_v55  ;;  %v10208_v54 = vld [vmem:[%s11301_s18 + $0xf64] ss:$8 sps:$4 sm:$0xff]   ;;  %v10203_v55 = vld [vmem:[%s11301_s18 + $0xe60] ss:$8 sps:$4 sm:$0xff]  }
 0x1c8   : > { %7463 = vmatprep.subr.bf16.mxu1 %v10130_v31  ;;  %v10206_v31 = vld [vmem:[%s11301_s18 + $0xf60] ss:$8 sps:$4 sm:$0xff]  }
 0x1ca   : > { %7423 = vmatpush1.bf16.msra.mxu0 %v10125_v58  ;;  %v1541_v58 = vcombine.high %v1537_v52, %v1537_v52 }
 0x1cb   : > { %7464 = vmatpush1.bf16.msra.mxu1 %v10128_v59  ;;  %7424 = vmatprep.subr.bf16.mxu0 %v10133_v60 }
 0x1cc   : > { %7465 = vmatprep.subr.bf16.mxu1 %v10136_v61 }
 0x1ce   : > { %7425 = vmatpush1.bf16.msra.mxu0 %v10131_v63 }
 0x1cf   : > { %7466 = vmatpush1.bf16.msra.mxu1 %v10134_v0  ;;  %7426 = vmatprep.subr.bf16.mxu0 %v10139_v1  ;;  %v10211_v1 = vld [vmem:[%s11301_s18 + $0xe54] ss:$8 sps:$4 sm:$0xff]  }
 0x1d0   : > { %7467 = vmatprep.subr.bf16.mxu1 %v10142_v2  ;;  %v10214_v2 = vld [vmem:[%s11301_s18 + $0xf54] ss:$8 sps:$4 sm:$0xff]  }
 0x1d2   : > { %7427 = vmatpush1.bf16.msra.mxu0 %v10137_v3 }
 0x1d3   : > { %7468 = vmatpush1.bf16.msra.mxu1 %v10140_v4  ;;  %7428 = vmatprep.subr.bf16.mxu0 %v10145_v5  ;;  %v10209_v5 = vld [vmem:[%s11301_s18 + $0xe50] ss:$8 sps:$4 sm:$0xff]  }
 0x1d4   : > { %7469 = vmatprep.subr.bf16.mxu1 %v10148_v7  ;;  %v10212_v7 = vld [vmem:[%s11301_s18 + $0xf50] ss:$8 sps:$4 sm:$0xff]  }
 0x1d6   : > { %7429 = vmatpush1.bf16.msra.mxu0 %v10143_v8 }
 0x1d7   : > { %7470 = vmatpush1.bf16.msra.mxu1 %v10146_v35  ;;  %7430 = vmatprep.subr.bf16.mxu0 %v10151_v9 }
 0x1d8   : > { %7471 = vmatprep.subr.bf16.mxu1 %v10154_v11 }
 0x1da   : > { %7431 = vmatpush2.bf16.msra.mxu0 %v10149_v12  ;;  %v10220_v12 = vld [vmem:[%s11301_s18 + $0xf44] ss:$8 sps:$4 sm:$0xff]  }
 0x1db   : > { %7472 = vmatpush2.bf16.msra.mxu1 %v10152_v13  ;;  %7432 = vmatprep.subr.bf16.mxu0 %v10157_v14  ;;  %v10215_v13 = vld [vmem:[%s11301_s18 + $0xe40] ss:$8 sps:$4 sm:$0xff]  }
 0x1dc   : > { %7473 = vmatprep.subr.bf16.mxu1 %v10160_v16  ;;  %v10218_v14 = vld [vmem:[%s11301_s18 + $0xf40] ss:$8 sps:$4 sm:$0xff]   ;;  %v10223_v16 = vld [vmem:[%s11301_s18 + $0xe34] ss:$8 sps:$4 sm:$0xff]  }
 0x1de   : > { %7433 = vmatpush2.bf16.msra.mxu0 %v10155_v17  ;;  %v10226_v17 = vld [vmem:[%s11301_s18 + $0xf34] ss:$8 sps:$4 sm:$0xff]  }
 0x1df   : > { %7474 = vmatpush2.bf16.msra.mxu1 %v10158_v18  ;;  %7434 = vmatprep.subr.bf16.mxu0 %v10163_v19  ;;  %v10221_v18 = vld [vmem:[%s11301_s18 + $0xe30] ss:$8 sps:$4 sm:$0xff]  }
 0x1e0   : > { %7475 = vmatprep.subr.bf16.mxu1 %v10166_v21  ;;  %v10224_v19 = vld [vmem:[%s11301_s18 + $0xf30] ss:$8 sps:$4 sm:$0xff]   ;;  %v10229_v21 = vld [vmem:[%s11301_s18 + $0xe24] ss:$8 sps:$4 sm:$0xff]  }
 0x1e2   : > { %7435 = vmatpush2.bf16.msra.mxu0 %v10161_v22  ;;  %v10232_v22 = vld [vmem:[%s11301_s18 + $0xf24] ss:$8 sps:$4 sm:$0xff]  }
 0x1e3   : > { %7476 = vmatpush2.bf16.msra.mxu1 %v10164_v23  ;;  %7436 = vmatprep.subr.bf16.mxu0 %v10169_v57  ;;  %v10227_v23 = vld [vmem:[%s11301_s18 + $0xe20] ss:$8 sps:$4 sm:$0xff]  }
 0x1e4   : > { %7477 = vmatprep.subr.bf16.mxu1 %v10172_v24  ;;  %v10230_v57 = vld [vmem:[%s11301_s18 + $0xf20] ss:$8 sps:$4 sm:$0xff]   ;;  %v10235_v24 = vld [vmem:[%s11301_s18 + $0xe14] ss:$8 sps:$4 sm:$0xff]  }
 0x1e6   : > { %7437 = vmatpush2.bf16.msra.mxu0 %v10167_v6  ;;  %v10238_v6 = vld [vmem:[%s11301_s18 + $0xf14] ss:$8 sps:$4 sm:$0xff]  }
 0x1e7   : > { %7478 = vmatpush2.bf16.msra.mxu1 %v10170_v27  ;;  %7438 = vmatprep.subr.bf16.mxu0 %v10175_v62  ;;  %v10233_v27 = vld [vmem:[%s11301_s18 + $0xe10] ss:$8 sps:$4 sm:$0xff]  }
 0x1e8   : > { %7479 = vmatprep.subr.bf16.mxu1 %v10178_v28  ;;  %v10236_v62 = vld [vmem:[%s11301_s18 + $0xf10] ss:$8 sps:$4 sm:$0xff]   ;;  %v10241_v28 = vld [vmem:[%s11301_s18 + $0xe04] ss:$8 sps:$4 sm:$0xff]  }
 0x1ea   : > { %7439 = vmatpush2.bf16.msra.mxu0 %v10173_v30  ;;  %v10244_v30 = vld [vmem:[%s11301_s18 + $0xf04] ss:$8 sps:$4 sm:$0xff]  }
 0x1eb   : > { %7480 = vmatpush2.bf16.msra.mxu1 %v10176_v56  ;;  %7440 = vmatprep.subr.bf16.mxu0 %v10181_v32  ;;  %v10239_v56 = vld [vmem:[%s11301_s18 + $0xe00] ss:$8 sps:$4 sm:$0xff]  }
 0x1ec   : > { %7481 = vmatprep.subr.bf16.mxu1 %v10184_v33  ;;  %v10242_v32 = vld [vmem:[%s11301_s18 + $0xf00] ss:$8 sps:$4 sm:$0xff]   ;;  %v10247_v33 = vld [vmem:[%s11301_s18 + $0xef4] ss:$8 sps:$4 sm:$0xff]  }
 0x1ee   : > { %7441 = vmatpush2.bf16.msra.mxu0 %v10179_v36  ;;  %v10245_v36 = vld [vmem:[%s11301_s18 + $0xef0] ss:$8 sps:$4 sm:$0xff]  }
 0x1ef   : > { %7482 = vmatpush2.bf16.msra.mxu1 %v10182_v37  ;;  %7442 = vmatprep.subr.bf16.mxu0 %v10187_v38  ;;  %v10248_v37 = vld [vmem:[%s11301_s18 + $0xff0] ss:$8 sps:$4 sm:$0xff]   ;;  %v10253_v38 = vld [vmem:[%s11301_s18 + $0xee4] ss:$8 sps:$4 sm:$0xff]  }
 0x1f0   : > { %7483 = vmatprep.subr.bf16.mxu1 %v10190_v29  ;;  %v10256_v29 = vld [vmem:[%s11301_s18 + $0xfe4] ss:$8 sps:$4 sm:$0xff]  }
 0x1f2   : > { %7443 = vmatpush2.bf16.msra.mxu0 %v10185_v10  ;;  %v10251_v10 = vld [vmem:[%s11301_s18 + $0xee0] ss:$8 sps:$4 sm:$0xff]  }
 0x1f3   : > { %7484 = vmatpush2.bf16.msra.mxu1 %v10188_v40  ;;  %7444 = vmatprep.subr.bf16.mxu0 %v10193_v41  ;;  %v10254_v40 = vld [vmem:[%s11301_s18 + $0xfe0] ss:$8 sps:$4 sm:$0xff]   ;;  %v10259_v41 = vld [vmem:[%s11301_s18 + $0xed4] ss:$8 sps:$4 sm:$0xff]  }
 0x1f4   : > { %7485 = vmatprep.subr.bf16.mxu1 %v10196_v42  ;;  %v10262_v42 = vld [vmem:[%s11301_s18 + $0xfd4] ss:$8 sps:$4 sm:$0xff]  }
 0x1f6   : > { %7445 = vmatpush2.bf16.msra.mxu0 %v10191_v47  ;;  %v10265_v47 = vld [vmem:[%s11301_s18 + $0xec4] ss:$8 sps:$4 sm:$0xff]  }
 0x1f7   : > { %7486 = vmatpush2.bf16.msra.mxu1 %v10194_v20  ;;  %7496 = vmatprep.subr.bf16.mxu0 %v10199_v48  ;;  %v10268_v20 = vld [vmem:[%s11301_s18 + $0xfc4] ss:$8 sps:$4 sm:$0xff]   ;;  %v10263_v48 = vld [vmem:[%s11301_s18 + $0xec0] ss:$8 sps:$4 sm:$0xff]  }
 0x1f8   : > { %7537 = vmatprep.subr.bf16.mxu1 %v10202_v51  ;;  %v10266_v51 = vld [vmem:[%s11301_s18 + $0xfc0] ss:$8 sps:$4 sm:$0xff]  }
 0x1f9   : > { %v7202_v59 = vpop.f32.mrf.mxu0  ;;  %7447 = vmatmul.mubr.bf16.vlgmr.msra.gmra.mxu0 %v1516_v46  ;;  %v10260_v46 = vld [vmem:[%s11301_s18 + $0xfd0] ss:$8 sps:$4 sm:$0xff]  }
 0x1fa   : > { %v7243_v60 = vpop.f32.mrf.mxu1  ;;  %7488 = vmatmul.mubr.bf16.vlgmr.msra.gmra.mxu1 %v1538_v53  ;;  %v7203_v61 = vadd.f32 %v7202_v59, %v11797_v44  ;;  %7497 = vmatpush1.bf16.msra.mxu0 %v10197_v25  ;;  %v10271_v25 = vld [vmem:[%s11301_s18 + $0xeb4] ss:$8 sps:$4 sm:$0xff]   ;;  %v10272_v53 = vld [vmem:[%s11301_s18 + $0xfb0] ss:$8 sps:$4 sm:$0xff]  }
 0x1fb   : > { %7538 = vmatpush1.bf16.msra.mxu1 %v10200_v26  ;;  %v7204_v63 = vpop.f32.mrf.mxu0  ;;  %7498 = vmatprep.subr.bf16.mxu0 %v10205_v15  ;;  %v10274_v26 = vld [vmem:[%s11301_s18 + $0xfb4] ss:$8 sps:$4 sm:$0xff]   ;;  %v10277_v15 = vld [vmem:[%s11301_s18 + $0xea4] ss:$8 sps:$4 sm:$0xff]  }
 0x1fc   : > { %v7245_v0 = vpop.f32.mrf.mxu1  ;;  %7539 = vmatprep.subr.bf16.mxu1 %v10208_v54  ;;  %v11877_v3 = vadd.f32 %v7243_v60, %v7203_v61  ;;  %v7205_v4 = vadd.f32 %v7204_v63, %v11802_v50  ;;  %7528 = vmatprep.mubr.bf16.mxu0 %v1537_v52  ;;  %v10217_v50 = vld [vmem:[%s11301_s18 + $0xe44] ss:$8 sps:$4 sm:$0xff]   ;;  %v10269_v52 = vld [vmem:[%s11301_s18 + $0xeb0] ss:$8 sps:$4 sm:$0xff]   ;;  %v10283_v59 = vld [vmem:[%s11301_s18 + $0xe94] ss:$8 sps:$4 sm:$0xff]  }
 0x1fd   : > { %7569 = vmatprep.mubr.bf16.mxu1 %v1541_v58  ;;  %v7206_v44 = vpop.f32.mrf.mxu0  ;;  %v10280_v54 = vld [vmem:[%s11301_s18 + $0xfa4] ss:$8 sps:$4 sm:$0xff]   ;;  %v10278_v58 = vld [vmem:[%s11301_s18 + $0xfa0] ss:$8 sps:$4 sm:$0xff]   ;;  %v10286_v60 = vld [vmem:[%s11301_s18 + $0xf94] ss:$8 sps:$4 sm:$0xff]  }
 0x1fe   : > { %v7247_v8 = vpop.f32.mrf.mxu1  ;;  %v11882_v35 = vadd.f32 %v7245_v0, %v7205_v4  ;;  %7499 = vmatpush1.bf16.msra.mxu0 %v10203_v55  ;;  %v11929_v55 = vld [vmem:[%s12629_s0 + $0x20] sm:$0xff]  ;;  %v10281_v63 = vld [vmem:[%s11301_s18 + $0xe90] ss:$8 sps:$4 sm:$0xff]  }
 0x1ff   : > { %7540 = vmatpush1.bf16.msra.mxu1 %v10206_v31  ;;  %v7207_v9 = vpop.f32.mrf.mxu0  ;;  %7500 = vmatprep.subr.bf16.mxu0 %v10211_v1  ;;  %v10275_v31 = vld [vmem:[%s11301_s18 + $0xea0] ss:$8 sps:$4 sm:$0xff]   ;;  %v11937_v61 = vrot.slane %v11929_v55, %v11360_v49  ;;  %v10284_v0 = vld [vmem:[%s11301_s18 + $0xf90] ss:$8 sps:$4 sm:$0xff]   ;;  %v10289_v1 = vld [vmem:[%s11301_s18 + $0xe84] ss:$8 sps:$4 sm:$0xff]  }
 0x200   : > { %v7248_v11 = vpop.f32.mrf.mxu1  ;;  %7541 = vmatprep.subr.bf16.mxu1 %v10214_v2  ;;  %v10292_v2 = vld [vmem:[%s11301_s18 + $0xf84] ss:$8 sps:$4 sm:$0xff]   ;;  %v10290_v44 = vld [vmem:[%s11301_s18 + $0xf80] ss:$8 sps:$4 sm:$0xff]   ;;  %v10296_v8 = vld [vmem:[%s11301_s18 + $0x1074] ss:$8 sps:$4 sm:$0xff]  }
 0x201   : > { %v1557_v4 = vcombine.high %v11937_v61, %v11937_v61  ;;  %v10299_v9 = vld [vmem:[%s11301_s18 + $0x1174] ss:$8 sps:$4 sm:$0xff]   ;;  %v10294_v11 = vld [vmem:[%s11301_s18 + $0x1070] ss:$8 sps:$4 sm:$0xff]  }
 0x202   : > { %7501 = vmatpush1.bf16.msra.mxu0 %v10209_v5  ;;  %v1523_v5 = vrot.slane %v11853_v39, %v11360_v49  ;;  %v10302_v39 = vld [vmem:[%s11301_s18 + $0x1064] ss:$8 sps:$4 sm:$0xff]  }
 0x203   : > { %7542 = vmatpush1.bf16.msra.mxu1 %v10212_v7  ;;  %7502 = vmatprep.subr.bf16.mxu0 %v10217_v50  ;;  %v10287_v7 = vld [vmem:[%s11301_s18 + $0xe80] ss:$8 sps:$4 sm:$0xff]   ;;  %v10297_v50 = vld [vmem:[%s11301_s18 + $0x1170] ss:$8 sps:$4 sm:$0xff]  }
 0x204   : > { %7543 = vmatprep.subr.bf16.mxu1 %v10220_v12  ;;  %v1579_v12 = vrot.slane %v1557_v4, %v11360_v49  ;;  %v10359_v4 = vld [vmem:[%s11301_s18 + $0x11d4] ss:$8 sps:$4 sm:$0xff]  }
 0x206   : > { %7503 = vmatpush1.bf16.msra.mxu0 %v10215_v13  ;;  %v1539_v13 = vcombine.high %v1523_v5, %v1523_v5 }
 0x207   : > { %7544 = vmatpush1.bf16.msra.mxu1 %v10218_v14  ;;  %7504 = vmatprep.subr.bf16.mxu0 %v10223_v16  ;;  %v10305_v14 = vld [vmem:[%s11301_s18 + $0x1164] ss:$8 sps:$4 sm:$0xff]   ;;  %v10300_v16 = vld [vmem:[%s11301_s18 + $0x1060] ss:$8 sps:$4 sm:$0xff]  }
 0x208   : > { %7545 = vmatprep.subr.bf16.mxu1 %v10226_v17  ;;  %v10303_v17 = vld [vmem:[%s11301_s18 + $0x1160] ss:$8 sps:$4 sm:$0xff]  }
 0x20a   : > { %7505 = vmatpush1.bf16.msra.mxu0 %v10221_v18  ;;  %v1589_v18 = vcombine.high %v1579_v12, %v1579_v12 }
 0x20b   : > { %7546 = vmatpush1.bf16.msra.mxu1 %v10224_v19  ;;  %7506 = vmatprep.subr.bf16.mxu0 %v10229_v21 }
 0x20c   : > { %7547 = vmatprep.subr.bf16.mxu1 %v10232_v22 }
 0x20e   : > { %7507 = vmatpush1.bf16.msra.mxu0 %v10227_v23 }
 0x20f   : > { %7548 = vmatpush1.bf16.msra.mxu1 %v10230_v57  ;;  %7508 = vmatprep.subr.bf16.mxu0 %v10235_v24  ;;  %v10308_v24 = vld [vmem:[%s11301_s18 + $0x1054] ss:$8 sps:$4 sm:$0xff]  }
 0x210   : > { %7549 = vmatprep.subr.bf16.mxu1 %v10238_v6  ;;  %v10311_v6 = vld [vmem:[%s11301_s18 + $0x1154] ss:$8 sps:$4 sm:$0xff]  }
 0x212   : > { %7509 = vmatpush1.bf16.msra.mxu0 %v10233_v27 }
 0x213   : > { %7550 = vmatpush1.bf16.msra.mxu1 %v10236_v62  ;;  %7510 = vmatprep.subr.bf16.mxu0 %v10241_v28  ;;  %v10306_v28 = vld [vmem:[%s11301_s18 + $0x1050] ss:$8 sps:$4 sm:$0xff]  }
 0x214   : > { %7551 = vmatprep.subr.bf16.mxu1 %v10244_v30  ;;  %v10309_v30 = vld [vmem:[%s11301_s18 + $0x1150] ss:$8 sps:$4 sm:$0xff]  }
 0x216   : > { %7511 = vmatpush1.bf16.msra.mxu0 %v10239_v56 }
 0x217   : > { %7552 = vmatpush1.bf16.msra.mxu1 %v10242_v32  ;;  %7512 = vmatprep.subr.bf16.mxu0 %v10247_v33 }
 0x218   : > { %7553 = vmatprep.subr.bf16.mxu1 %v10250_v34 }
 0x21a   : > { %7513 = vmatpush2.bf16.msra.mxu0 %v10245_v36  ;;  %v10317_v36 = vld [vmem:[%s11301_s18 + $0x1144] ss:$8 sps:$4 sm:$0xff]  }
 0x21b   : > { %7554 = vmatpush2.bf16.msra.mxu1 %v10248_v37  ;;  %7514 = vmatprep.subr.bf16.mxu0 %v10253_v38  ;;  %v10312_v37 = vld [vmem:[%s11301_s18 + $0x1040] ss:$8 sps:$4 sm:$0xff]  }
 0x21c   : > { %7555 = vmatprep.subr.bf16.mxu1 %v10256_v29  ;;  %v10315_v38 = vld [vmem:[%s11301_s18 + $0x1140] ss:$8 sps:$4 sm:$0xff]   ;;  %v10320_v29 = vld [vmem:[%s11301_s18 + $0x1034] ss:$8 sps:$4 sm:$0xff]  }
 0x21e   : > { %7515 = vmatpush2.bf16.msra.mxu0 %v10251_v10  ;;  %v10323_v10 = vld [vmem:[%s11301_s18 + $0x1134] ss:$8 sps:$4 sm:$0xff]  }
 0x21f   : > { %7556 = vmatpush2.bf16.msra.mxu1 %v10254_v40  ;;  %7516 = vmatprep.subr.bf16.mxu0 %v10259_v41  ;;  %v10318_v40 = vld [vmem:[%s11301_s18 + $0x1030] ss:$8 sps:$4 sm:$0xff]  }
 0x220   : > { %7557 = vmatprep.subr.bf16.mxu1 %v10262_v42  ;;  %v10321_v41 = vld [vmem:[%s11301_s18 + $0x1130] ss:$8 sps:$4 sm:$0xff]   ;;  %v10326_v42 = vld [vmem:[%s11301_s18 + $0x1024] ss:$8 sps:$4 sm:$0xff]  }
 0x222   : > { %7517 = vmatpush2.bf16.msra.mxu0 %v10257_v45  ;;  %v10329_v45 = vld [vmem:[%s11301_s18 + $0x1124] ss:$8 sps:$4 sm:$0xff]  }
 0x223   : > { %7558 = vmatpush2.bf16.msra.mxu1 %v10260_v46  ;;  %7518 = vmatprep.subr.bf16.mxu0 %v10265_v47  ;;  %v10324_v46 = vld [vmem:[%s11301_s18 + $0x1020] ss:$8 sps:$4 sm:$0xff]  }
 0x224   : > { %7559 = vmatprep.subr.bf16.mxu1 %v10268_v20  ;;  %v10327_v47 = vld [vmem:[%s11301_s18 + $0x1120] ss:$8 sps:$4 sm:$0xff]   ;;  %v10332_v20 = vld [vmem:[%s11301_s18 + $0x1014] ss:$8 sps:$4 sm:$0xff]  }
 0x226   : > { %7519 = vmatpush2.bf16.msra.mxu0 %v10263_v48  ;;  %v10335_v48 = vld [vmem:[%s11301_s18 + $0x1114] ss:$8 sps:$4 sm:$0xff]  }
 0x227   : > { %7560 = vmatpush2.bf16.msra.mxu1 %v10266_v51  ;;  %7520 = vmatprep.subr.bf16.mxu0 %v10271_v25  ;;  %v10330_v51 = vld [vmem:[%s11301_s18 + $0x1010] ss:$8 sps:$4 sm:$0xff]  }
 0x228   : > { %7561 = vmatprep.subr.bf16.mxu1 %v10274_v26  ;;  %v10333_v25 = vld [vmem:[%s11301_s18 + $0x1110] ss:$8 sps:$4 sm:$0xff]   ;;  %v10338_v26 = vld [vmem:[%s11301_s18 + $0x1004] ss:$8 sps:$4 sm:$0xff]  }
 0x22a   : > { %7521 = vmatpush2.bf16.msra.mxu0 %v10269_v52  ;;  %v10341_v52 = vld [vmem:[%s11301_s18 + $0x1104] ss:$8 sps:$4 sm:$0xff]  }
 0x22b   : > { %7562 = vmatpush2.bf16.msra.mxu1 %v10272_v53  ;;  %7522 = vmatprep.subr.bf16.mxu0 %v10277_v15  ;;  %v10336_v53 = vld [vmem:[%s11301_s18 + $0x1000] ss:$8 sps:$4 sm:$0xff]  }
 0x22c   : > { %7563 = vmatprep.subr.bf16.mxu1 %v10280_v54  ;;  %v10339_v15 = vld [vmem:[%s11301_s18 + $0x1100] ss:$8 sps:$4 sm:$0xff]   ;;  %v10344_v54 = vld [vmem:[%s11301_s18 + $0x10f4] ss:$8 sps:$4 sm:$0xff]  }
 0x22e   : > { %7523 = vmatpush2.bf16.msra.mxu0 %v10275_v31  ;;  %v10347_v31 = vld [vmem:[%s11301_s18 + $0x11f4] ss:$8 sps:$4 sm:$0xff]  }
 0x22f   : > { %7564 = vmatpush2.bf16.msra.mxu1 %v10278_v58  ;;  %7524 = vmatprep.subr.bf16.mxu0 %v10283_v59  ;;  %v10342_v58 = vld [vmem:[%s11301_s18 + $0x10f0] ss:$8 sps:$4 sm:$0xff]  }
 0x230   : > { %7565 = vmatprep.subr.bf16.mxu1 %v10286_v60  ;;  %v10345_v59 = vld [vmem:[%s11301_s18 + $0x11f0] ss:$8 sps:$4 sm:$0xff]   ;;  %v10350_v60 = vld [vmem:[%s11301_s18 + $0x10e4] ss:$8 sps:$4 sm:$0xff]  }
 0x232   : > { %7525 = vmatpush2.bf16.msra.mxu0 %v10281_v63  ;;  %v10353_v63 = vld [vmem:[%s11301_s18 + $0x11e4] ss:$8 sps:$4 sm:$0xff]  }
 0x233   : > { %7566 = vmatpush2.bf16.msra.mxu1 %v10284_v0  ;;  %7526 = vmatprep.subr.bf16.mxu0 %v10289_v1  ;;  %v10348_v0 = vld [vmem:[%s11301_s18 + $0x10e0] ss:$8 sps:$4 sm:$0xff]  }
 0x234   : > { %7567 = vmatprep.subr.bf16.mxu1 %v10292_v2  ;;  %v10351_v1 = vld [vmem:[%s11301_s18 + $0x11e0] ss:$8 sps:$4 sm:$0xff]   ;;  %v10356_v2 = vld [vmem:[%s11301_s18 + $0x10d4] ss:$8 sps:$4 sm:$0xff]  }
 0x236   : > { %7527 = vmatpush2.bf16.msra.mxu0 %v10287_v7  ;;  %v10357_v7 = vld [vmem:[%s11301_s18 + $0x11d0] ss:$8 sps:$4 sm:$0xff]  }
 0x237   : > { %7568 = vmatpush2.bf16.msra.mxu1 %v10290_v44  ;;  %7578 = vmatprep.subr.bf16.mxu0 %v10296_v8  ;;  %v10362_v44 = vld [vmem:[%s11301_s18 + $0x10c4] ss:$8 sps:$4 sm:$0xff]  }
 0x238   : > { %7619 = vmatprep.subr.bf16.mxu1 %v10299_v9  ;;  %v10365_v8 = vld [vmem:[%s11301_s18 + $0x11c4] ss:$8 sps:$4 sm:$0xff]   ;;  %v10360_v9 = vld [vmem:[%s11301_s18 + $0x10c0] ss:$8 sps:$4 sm:$0xff]  }
 0x239   : > { %v7284_v19 = vpop.f32.mrf.mxu0  ;;  %7529 = vmatmul.mubr.bf16.vlgmr.msra.gmra.mxu0 %v1523_v5  ;;  %v10354_v5 = vld [vmem:[%s11301_s18 + $0x10d0] ss:$8 sps:$4 sm:$0xff]  }
 0x23a   : > { %v7325_v21 = vpop.f32.mrf.mxu1  ;;  %7570 = vmatmul.mubr.bf16.vlgmr.msra.gmra.mxu1 %v1539_v13  ;;  %v7285_v22 = vadd.f32 %v7284_v19, %v11877_v3  ;;  %7579 = vmatpush1.bf16.msra.mxu0 %v10294_v11  ;;  %v10363_v11 = vld [vmem:[%s11301_s18 + $0x11c0] ss:$8 sps:$4 sm:$0xff]   ;;  %v10366_v13 = vld [vmem:[%s11301_s18 + $0x10b0] ss:$8 sps:$4 sm:$0xff]  }
 0x23b   : > { %7620 = vmatpush1.bf16.msra.mxu1 %v10297_v50  ;;  %v7286_v23 = vpop.f32.mrf.mxu0  ;;  %7580 = vmatprep.subr.bf16.mxu0 %v10302_v39  ;;  %v10368_v50 = vld [vmem:[%s11301_s18 + $0x10b4] ss:$8 sps:$4 sm:$0xff]   ;;  %v10369_v39 = vld [vmem:[%s11301_s18 + $0x11b0] ss:$8 sps:$4 sm:$0xff]   ;;  %v10375_v19 = vld [vmem:[%s11301_s18 + $0x11a0] ss:$8 sps:$4 sm:$0xff]  }
 0x23c   : > { %v7327_v57 = vpop.f32.mrf.mxu1  ;;  %7621 = vmatprep.subr.bf16.mxu1 %v10305_v14  ;;  %v11961_v27 = vadd.f32 %v7325_v21, %v7285_v22  ;;  %v7287_v62 = vadd.f32 %v7286_v23, %v11882_v35  ;;  %7610 = vmatprep.mubr.bf16.mxu0 %v1579_v12  ;;  %v10314_v35 = vld [vmem:[%s11301_s18 + $0x1044] ss:$8 sps:$4 sm:$0xff]   ;;  %v10371_v12 = vld [vmem:[%s11301_s18 + $0x11b4] ss:$8 sps:$4 sm:$0xff]  }
 0x23d   : > { %7651 = vmatprep.mubr.bf16.mxu1 %v1589_v18  ;;  %v7288_v3 = vpop.f32.mrf.mxu0  ;;  %v10374_v14 = vld [vmem:[%s11301_s18 + $0x10a4] ss:$8 sps:$4 sm:$0xff]   ;;  %v10372_v18 = vld [vmem:[%s11301_s18 + $0x10a0] ss:$8 sps:$4 sm:$0xff]   ;;  %v10380_v21 = vld [vmem:[%s11301_s18 + $0x1094] ss:$8 sps:$4 sm:$0xff]  }
 0x23e   : > { %v7329_v56 = vpop.f32.mrf.mxu1  ;;  %v11966_v32 = vadd.f32 %v7327_v57, %v7287_v62  ;;  %7581 = vmatpush1.bf16.msra.mxu0 %v10300_v16  ;;  %v10377_v16 = vld [vmem:[%s11301_s18 + $0x11a4] ss:$8 sps:$4 sm:$0xff]   ;;  %v10383_v22 = vld [vmem:[%s11301_s18 + $0x1194] ss:$8 sps:$4 sm:$0xff]   ;;  %v10381_v57 = vld [vmem:[%s11301_s18 + $0x1190] ss:$8 sps:$4 sm:$0xff]  }
 0x23f   : > { %7622 = vmatpush1.bf16.msra.mxu1 %v10303_v17  ;;  %v7289_v33 = vpop.f32.mrf.mxu0  ;;  %7582 = vmatprep.subr.bf16.mxu0 %v10308_v24  ;;  %v1542_v17 = vcombine.high %v11929_v55, %v11929_v55  ;;  %v10378_v55 = vld [vmem:[%s11301_s18 + $0x1090] ss:$8 sps:$4 sm:$0xff]   ;;  %v10386_v24 = vld [vmem:[%s11301_s18 + $0x1084] ss:$8 sps:$4 sm:$0xff]   ;;  %v10387_v3 = vld [vmem:[%s11301_s18 + $0x1180] ss:$8 sps:$4 sm:$0xff]  }
 0x240   : > { %v7330_v34 = vpop.f32.mrf.mxu1  ;;  %7623 = vmatprep.subr.bf16.mxu1 %v10311_v6  ;;  %v10389_v6 = vld [vmem:[%s11301_s18 + $0x1184] ss:$8 sps:$4 sm:$0xff]   ;;  %v10392_v56 = vld [vmem:[%s11301_s18 + $0x1274] ss:$8 sps:$4 sm:$0xff]  }
 0x241   : > { %v12017_v23 = vrot.slane %v1542_v17, %v11360_v49  ;;  %v10395_v33 = vld [vmem:[%s11301_s18 + $0x1374] ss:$8 sps:$4 sm:$0xff]   ;;  %v10390_v34 = vld [vmem:[%s11301_s18 + $0x1270] ss:$8 sps:$4 sm:$0xff]  }
 0x242   : > { %7583 = vmatpush1.bf16.msra.mxu0 %v10306_v28  ;;  %v1565_v28 = vrot.slane %v11937_v61, %v11360_v49  ;;  %v10398_v61 = vld [vmem:[%s11301_s18 + $0x1264] ss:$8 sps:$4 sm:$0xff]   ;;  %v10443_v17 = vld [vmem:[%s11301_s18 + $0x13f4] ss:$8 sps:$4 sm:$0xff]  }
 0x243   : > { %7624 = vmatpush1.bf16.msra.mxu1 %v10309_v30  ;;  %7584 = vmatprep.subr.bf16.mxu0 %v10314_v35  ;;  %v1558_v62 = vcombine.high %v12017_v23, %v12017_v23  ;;  %v10384_v30 = vld [vmem:[%s11301_s18 + $0x1080] ss:$8 sps:$4 sm:$0xff]   ;;  %v10393_v35 = vld [vmem:[%s11301_s18 + $0x1370] ss:$8 sps:$4 sm:$0xff]  }
 0x244   : > { %7625 = vmatprep.subr.bf16.mxu1 %v10317_v36 }
 0x245   : > { %v1586_v36 = vrot.slane %v1558_v62, %v11360_v49  ;;  %v10450_v62 = vld [vmem:[%s11301_s18 + $0x12d0] ss:$8 sps:$4 sm:$0xff]  }
 0x246   : > { %7585 = vmatpush1.bf16.msra.mxu0 %v10312_v37  ;;  %v1587_v37 = vcombine.high %v1565_v28, %v1565_v28 }
 0x247   : > { %7626 = vmatpush1.bf16.msra.mxu1 %v10315_v38  ;;  %7586 = vmatprep.subr.bf16.mxu0 %v10320_v29  ;;  %v10401_v38 = vld [vmem:[%s11301_s18 + $0x1364] ss:$8 sps:$4 sm:$0xff]   ;;  %v1590_v29 = vcombine.high %v1586_v36, %v1586_v36 }
 0x248   : > { %7627 = vmatprep.subr.bf16.mxu1 %v10323_v10 }
 0x24a   : > { %7587 = vmatpush1.bf16.msra.mxu0 %v10318_v40 }
 0x24b   : > { %7628 = vmatpush1.bf16.msra.mxu1 %v10321_v41  ;;  %7588 = vmatprep.subr.bf16.mxu0 %v10326_v42  ;;  %v10396_v42 = vld [vmem:[%s11301_s18 + $0x1260] ss:$8 sps:$4 sm:$0xff]  }
 0x24c   : > { %7629 = vmatprep.subr.bf16.mxu1 %v10329_v45  ;;  %v10399_v45 = vld [vmem:[%s11301_s18 + $0x1360] ss:$8 sps:$4 sm:$0xff]  }
 0x24e   : > { %7589 = vmatpush1.bf16.msra.mxu0 %v10324_v46 }
 0x24f   : > { %7630 = vmatpush1.bf16.msra.mxu1 %v10327_v47  ;;  %7590 = vmatprep.subr.bf16.mxu0 %v10332_v20  ;;  %v10404_v20 = vld [vmem:[%s11301_s18 + $0x1254] ss:$8 sps:$4 sm:$0xff]  }
 0x250   : > { %7631 = vmatprep.subr.bf16.mxu1 %v10335_v48  ;;  %v10407_v48 = vld [vmem:[%s11301_s18 + $0x1354] ss:$8 sps:$4 sm:$0xff]  }
 0x252   : > { %7591 = vmatpush1.bf16.msra.mxu0 %v10330_v51 }
 0x253   : > { %7632 = vmatpush1.bf16.msra.mxu1 %v10333_v25  ;;  %7592 = vmatprep.subr.bf16.mxu0 %v10338_v26 }
 0x254   : > { %7633 = vmatprep.subr.bf16.mxu1 %v10341_v52 }
 0x256   : > { %7593 = vmatpush1.bf16.msra.mxu0 %v10336_v53  ;;  %v10402_v53 = vld [vmem:[%s11301_s18 + $0x1250] ss:$8 sps:$4 sm:$0xff]  }
 0x257   : > { %7634 = vmatpush1.bf16.msra.mxu1 %v10339_v15  ;;  %7594 = vmatprep.subr.bf16.mxu0 %v10344_v54  ;;  %v10405_v15 = vld [vmem:[%s11301_s18 + $0x1350] ss:$8 sps:$4 sm:$0xff]  }
 0x258   : > { %7635 = vmatprep.subr.bf16.mxu1 %v10347_v31 }
 0x25a   : > { %7595 = vmatpush2.bf16.msra.mxu0 %v10342_v58  ;;  %v10413_v58 = vld [vmem:[%s11301_s18 + $0x1344] ss:$8 sps:$4 sm:$0xff]  }
 0x25b   : > { %7636 = vmatpush2.bf16.msra.mxu1 %v10345_v59  ;;  %7596 = vmatprep.subr.bf16.mxu0 %v10350_v60  ;;  %v10408_v59 = vld [vmem:[%s11301_s18 + $0x1240] ss:$8 sps:$4 sm:$0xff]  }
 0x25c   : > { %7637 = vmatprep.subr.bf16.mxu1 %v10353_v63  ;;  %v10411_v60 = vld [vmem:[%s11301_s18 + $0x1340] ss:$8 sps:$4 sm:$0xff]   ;;  %v10416_v63 = vld [vmem:[%s11301_s18 + $0x1234] ss:$8 sps:$4 sm:$0xff]  }
 0x25e   : > { %7597 = vmatpush2.bf16.msra.mxu0 %v10348_v0  ;;  %v10419_v0 = vld [vmem:[%s11301_s18 + $0x1334] ss:$8 sps:$4 sm:$0xff]  }
 0x25f   : > { %7638 = vmatpush2.bf16.msra.mxu1 %v10351_v1  ;;  %7598 = vmatprep.subr.bf16.mxu0 %v10356_v2  ;;  %v10414_v1 = vld [vmem:[%s11301_s18 + $0x1230] ss:$8 sps:$4 sm:$0xff]  }
 0x260   : > { %7639 = vmatprep.subr.bf16.mxu1 %v10359_v4  ;;  %v10417_v2 = vld [vmem:[%s11301_s18 + $0x1330] ss:$8 sps:$4 sm:$0xff]   ;;  %v10422_v4 = vld [vmem:[%s11301_s18 + $0x1224] ss:$8 sps:$4 sm:$0xff]  }
 0x262   : > { %7599 = vmatpush2.bf16.msra.mxu0 %v10354_v5  ;;  %v10425_v5 = vld [vmem:[%s11301_s18 + $0x1324] ss:$8 sps:$4 sm:$0xff]  }
 0x263   : > { %7640 = vmatpush2.bf16.msra.mxu1 %v10357_v7  ;;  %7600 = vmatprep.subr.bf16.mxu0 %v10362_v44  ;;  %v10420_v7 = vld [vmem:[%s11301_s18 + $0x1220] ss:$8 sps:$4 sm:$0xff]  }
 0x264   : > { %7641 = vmatprep.subr.bf16.mxu1 %v10365_v8  ;;  %v10423_v44 = vld [vmem:[%s11301_s18 + $0x1320] ss:$8 sps:$4 sm:$0xff]   ;;  %v10428_v8 = vld [vmem:[%s11301_s18 + $0x1214] ss:$8 sps:$4 sm:$0xff]  }
 0x266   : > { %7601 = vmatpush2.bf16.msra.mxu0 %v10360_v9  ;;  %v10431_v9 = vld [vmem:[%s11301_s18 + $0x1314] ss:$8 sps:$4 sm:$0xff]  }
 0x267   : > { %7642 = vmatpush2.bf16.msra.mxu1 %v10363_v11  ;;  %7602 = vmatprep.subr.bf16.mxu0 %v10368_v50  ;;  %v10426_v11 = vld [vmem:[%s11301_s18 + $0x1210] ss:$8 sps:$4 sm:$0xff]  }
 0x268   : > { %7643 = vmatprep.subr.bf16.mxu1 %v10371_v12  ;;  %v10429_v50 = vld [vmem:[%s11301_s18 + $0x1310] ss:$8 sps:$4 sm:$0xff]   ;;  %v10434_v12 = vld [vmem:[%s11301_s18 + $0x1204] ss:$8 sps:$4 sm:$0xff]  }
 0x26a   : > { %7603 = vmatpush2.bf16.msra.mxu0 %v10366_v13  ;;  %v10437_v13 = vld [vmem:[%s11301_s18 + $0x1304] ss:$8 sps:$4 sm:$0xff]  }
 0x26b   : > { %7644 = vmatpush2.bf16.msra.mxu1 %v10369_v39  ;;  %7604 = vmatprep.subr.bf16.mxu0 %v10374_v14  ;;  %v10432_v39 = vld [vmem:[%s11301_s18 + $0x1200] ss:$8 sps:$4 sm:$0xff]  }
 0x26c   : > { %7645 = vmatprep.subr.bf16.mxu1 %v10377_v16  ;;  %v10435_v14 = vld [vmem:[%s11301_s18 + $0x1300] ss:$8 sps:$4 sm:$0xff]   ;;  %v10440_v16 = vld [vmem:[%s11301_s18 + $0x12f4] ss:$8 sps:$4 sm:$0xff]  }
 0x26e   : > { %7605 = vmatpush2.bf16.msra.mxu0 %v10372_v18  ;;  %v10438_v18 = vld [vmem:[%s11301_s18 + $0x12f0] ss:$8 sps:$4 sm:$0xff]  }
 0x26f   : > { %7646 = vmatpush2.bf16.msra.mxu1 %v10375_v19  ;;  %7606 = vmatprep.subr.bf16.mxu0 %v10380_v21  ;;  %v10441_v19 = vld [vmem:[%s11301_s18 + $0x13f0] ss:$8 sps:$4 sm:$0xff]   ;;  %v10446_v21 = vld [vmem:[%s11301_s18 + $0x12e4] ss:$8 sps:$4 sm:$0xff]  }
 0x270   : > { %7647 = vmatprep.subr.bf16.mxu1 %v10383_v22  ;;  %v10449_v22 = vld [vmem:[%s11301_s18 + $0x13e4] ss:$8 sps:$4 sm:$0xff]  }
 0x272   : > { %7607 = vmatpush2.bf16.msra.mxu0 %v10378_v55  ;;  %v10444_v55 = vld [vmem:[%s11301_s18 + $0x12e0] ss:$8 sps:$4 sm:$0xff]  }
 0x273   : > { %7648 = vmatpush2.bf16.msra.mxu1 %v10381_v57  ;;  %7608 = vmatprep.subr.bf16.mxu0 %v10386_v24  ;;  %v10447_v57 = vld [vmem:[%s11301_s18 + $0x13e0] ss:$8 sps:$4 sm:$0xff]   ;;  %v10452_v24 = vld [vmem:[%s11301_s18 + $0x12d4] ss:$8 sps:$4 sm:$0xff]  }
 0x274   : > { %7649 = vmatprep.subr.bf16.mxu1 %v10389_v6  ;;  %v10455_v6 = vld [vmem:[%s11301_s18 + $0x13d4] ss:$8 sps:$4 sm:$0xff]  }
 0x276   : > { %7609 = vmatpush2.bf16.msra.mxu0 %v10384_v30  ;;  %v10458_v30 = vld [vmem:[%s11301_s18 + $0x12c4] ss:$8 sps:$4 sm:$0xff]  }
 0x277   : > { %7650 = vmatpush2.bf16.msra.mxu1 %v10387_v3  ;;  %7660 = vmatprep.subr.bf16.mxu0 %v10392_v56  ;;  %v10461_v3 = vld [vmem:[%s11301_s18 + $0x13c4] ss:$8 sps:$4 sm:$0xff]   ;;  %v10456_v56 = vld [vmem:[%s11301_s18 + $0x12c0] ss:$8 sps:$4 sm:$0xff]  }
 0x278   : > { %7701 = vmatprep.subr.bf16.mxu1 %v10395_v33  ;;  %v10459_v33 = vld [vmem:[%s11301_s18 + $0x13c0] ss:$8 sps:$4 sm:$0xff]  }
 0x279   : > { %v7366_v10 = vpop.f32.mrf.mxu0  ;;  %7611 = vmatmul.mubr.bf16.vlgmr.msra.gmra.mxu0 %v1565_v28  ;;  %v10453_v28 = vld [vmem:[%s11301_s18 + $0x13d0] ss:$8 sps:$4 sm:$0xff]  }
 0x27a   : > { %v7407_v40 = vpop.f32.mrf.mxu1  ;;  %7652 = vmatmul.mubr.bf16.vlgmr.msra.gmra.mxu1 %v1587_v37  ;;  %v7367_v41 = vadd.f32 %v7366_v10, %v11961_v27  ;;  %7661 = vmatpush1.bf16.msra.mxu0 %v10390_v34  ;;  %v10464_v34 = vld [vmem:[%s11301_s18 + $0x12b4] ss:$8 sps:$4 sm:$0xff]   ;;  %v10465_v37 = vld [vmem:[%s11301_s18 + $0x13b0] ss:$8 sps:$4 sm:$0xff]   ;;  %v10468_v10 = vld [vmem:[%s11301_s18 + $0x12a0] ss:$8 sps:$4 sm:$0xff]  }
 0x27b   : > { %7702 = vmatpush1.bf16.msra.mxu1 %v10393_v35  ;;  %v7368_v46 = vpop.f32.mrf.mxu0  ;;  %7662 = vmatprep.subr.bf16.mxu0 %v10398_v61  ;;  %v10467_v35 = vld [vmem:[%s11301_s18 + $0x13b4] ss:$8 sps:$4 sm:$0xff]   ;;  %v10470_v61 = vld [vmem:[%s11301_s18 + $0x12a4] ss:$8 sps:$4 sm:$0xff]  }
 0x27c   : > { %v7409_v47 = vpop.f32.mrf.mxu1  ;;  %7703 = vmatprep.subr.bf16.mxu1 %v10401_v38  ;;  %v12041_v51 = vadd.f32 %v7407_v40, %v7367_v41  ;;  %v7369_v25 = vadd.f32 %v7368_v46, %v11966_v32  ;;  %7692 = vmatprep.mubr.bf16.mxu0 %v1586_v36  ;;  %v10410_v32 = vld [vmem:[%s11301_s18 + $0x1244] ss:$8 sps:$4 sm:$0xff]   ;;  %v10462_v36 = vld [vmem:[%s11301_s18 + $0x12b0] ss:$8 sps:$4 sm:$0xff]   ;;  %v10471_v40 = vld [vmem:[%s11301_s18 + $0x13a0] ss:$8 sps:$4 sm:$0xff]  }
 0x27d   : > { %7733 = vmatprep.mubr.bf16.mxu1 %v1590_v29  ;;  %v7370_v27 = vpop.f32.mrf.mxu0  ;;  %v10473_v38 = vld [vmem:[%s11301_s18 + $0x13a4] ss:$8 sps:$4 sm:$0xff]   ;;  %v10476_v41 = vld [vmem:[%s11301_s18 + $0x1294] ss:$8 sps:$4 sm:$0xff]   ;;  %v10474_v46 = vld [vmem:[%s11301_s18 + $0x1290] ss:$8 sps:$4 sm:$0xff]  }
 0x27e   : > { %v7411_v26 = vpop.f32.mrf.mxu1  ;;  %v12044_v52 = vadd.f32 %v7409_v47, %v7369_v25  ;;  %7663 = vmatpush1.bf16.msra.mxu0 %v10396_v42  ;;  %v12093_v29 = vld [vmem:[%s12629_s0 + $0x28] sm:$0xff]  ;;  %v10479_v42 = vld [vmem:[%s11301_s18 + $0x1394] ss:$8 sps:$4 sm:$0xff]   ;;  %v10477_v47 = vld [vmem:[%s11301_s18 + $0x1390] ss:$8 sps:$4 sm:$0xff]   ;;  %v1572_v27 = vrot.slane %v12017_v23, %v11360_v49 }
 0x27f   : > { %7704 = vmatpush1.bf16.msra.mxu1 %v10399_v45  ;;  %v7371_v54 = vpop.f32.mrf.mxu0  ;;  %7664 = vmatprep.subr.bf16.mxu0 %v10404_v20  ;;  %v12101_v45 = vrot.slane %v12093_v29, %v11360_v49  ;;  %v10482_v20 = vld [vmem:[%s11301_s18 + $0x1284] ss:$8 sps:$4 sm:$0xff]   ;;  %v10480_v26 = vld [vmem:[%s11301_s18 + $0x1280] ss:$8 sps:$4 sm:$0xff]  }
 0x280   : > { %v7412_v31 = vpop.f32.mrf.mxu1  ;;  %7705 = vmatprep.subr.bf16.mxu1 %v10407_v48  ;;  %v10485_v48 = vld [vmem:[%s11301_s18 + $0x1384] ss:$8 sps:$4 sm:$0xff]   ;;  %v10492_v54 = vld [vmem:[%s11301_s18 + $0x1574] ss:$8 sps:$4 sm:$0xff]  }
 0x281   : > { %v1606_v25 = vcombine.high %v12101_v45, %v12101_v45  ;;  %v10495_v23 = vld [vmem:[%s11301_s18 + $0x1464] ss:$8 sps:$4 sm:$0xff]  }
 0x282   : > { %7665 = vmatpush1.bf16.msra.mxu0 %v10402_v53  ;;  %v10483_v53 = vld [vmem:[%s11301_s18 + $0x1380] ss:$8 sps:$4 sm:$0xff]  }
 0x283   : > { %7706 = vmatpush1.bf16.msra.mxu1 %v10405_v15  ;;  %7666 = vmatprep.subr.bf16.mxu0 %v10410_v32  ;;  %v10489_v15 = vld [vmem:[%s11301_s18 + $0x1474] ss:$8 sps:$4 sm:$0xff]   ;;  %v1628_v31 = vrot.slane %v1606_v25, %v11360_v49  ;;  %v1588_v32 = vcombine.high %v1572_v27, %v1572_v27 }
 0x284   : > { %7707 = vmatprep.subr.bf16.mxu1 %v10413_v58  ;;  %v10487_v58 = vld [vmem:[%s11301_s18 + $0x1470] ss:$8 sps:$4 sm:$0xff]   ;;  %v10552_v25 = vld [vmem:[%s11301_s18 + $0x15d4] ss:$8 sps:$4 sm:$0xff]  }
 0x286   : > { %7667 = vmatpush1.bf16.msra.mxu0 %v10408_v59  ;;  %v10490_v59 = vld [vmem:[%s11301_s18 + $0x1570] ss:$8 sps:$4 sm:$0xff]  }
 0x287   : > { %7708 = vmatpush1.bf16.msra.mxu1 %v10411_v60  ;;  %7668 = vmatprep.subr.bf16.mxu0 %v10416_v63  ;;  %v10498_v60 = vld [vmem:[%s11301_s18 + $0x1564] ss:$8 sps:$4 sm:$0xff]   ;;  %v1638_v63 = vcombine.high %v1628_v31, %v1628_v31 }
 0x288   : > { %7709 = vmatprep.subr.bf16.mxu1 %v10419_v0 }
 0x28a   : > { %7669 = vmatpush1.bf16.msra.mxu0 %v10414_v1 }
 0x28b   : > { %7710 = vmatpush1.bf16.msra.mxu1 %v10417_v2  ;;  %7670 = vmatprep.subr.bf16.mxu0 %v10422_v4  ;;  %v10493_v4 = vld [vmem:[%s11301_s18 + $0x1460] ss:$8 sps:$4 sm:$0xff]  }
 0x28c   : > { %7711 = vmatprep.subr.bf16.mxu1 %v10425_v5  ;;  %v10496_v5 = vld [vmem:[%s11301_s18 + $0x1560] ss:$8 sps:$4 sm:$0xff]  }
 0x28e   : > { %7671 = vmatpush1.bf16.msra.mxu0 %v10420_v7 }
 0x28f   : > { %7712 = vmatpush1.bf16.msra.mxu1 %v10423_v44  ;;  %7672 = vmatprep.subr.bf16.mxu0 %v10428_v8  ;;  %v10501_v8 = vld [vmem:[%s11301_s18 + $0x1454] ss:$8 sps:$4 sm:$0xff]  }
 0x290   : > { %7713 = vmatprep.subr.bf16.mxu1 %v10431_v9  ;;  %v10504_v9 = vld [vmem:[%s11301_s18 + $0x1554] ss:$8 sps:$4 sm:$0xff]  }
 0x292   : > { %7673 = vmatpush1.bf16.msra.mxu0 %v10426_v11 }
 0x293   : > { %7714 = vmatpush1.bf16.msra.mxu1 %v10429_v50  ;;  %7674 = vmatprep.subr.bf16.mxu0 %v10434_v12 }
 0x294   : > { %7715 = vmatprep.subr.bf16.mxu1 %v10437_v13 }
 0x296   : > { %7675 = vmatpush1.bf16.msra.mxu0 %v10432_v39  ;;  %v10499_v39 = vld [vmem:[%s11301_s18 + $0x1450] ss:$8 sps:$4 sm:$0xff]  }
 0x297   : > { %7716 = vmatpush1.bf16.msra.mxu1 %v10435_v14  ;;  %7676 = vmatprep.subr.bf16.mxu0 %v10440_v16  ;;  %v10502_v14 = vld [vmem:[%s11301_s18 + $0x1550] ss:$8 sps:$4 sm:$0xff]  }
 0x298   : > { %7717 = vmatprep.subr.bf16.mxu1 %v10443_v17 }
 0x29a   : > { %7677 = vmatpush2.bf16.msra.mxu0 %v10438_v18  ;;  %v10510_v18 = vld [vmem:[%s11301_s18 + $0x1544] ss:$8 sps:$4 sm:$0xff]  }
 0x29b   : > { %7718 = vmatpush2.bf16.msra.mxu1 %v10441_v19  ;;  %7678 = vmatprep.subr.bf16.mxu0 %v10446_v21  ;;  %v10505_v19 = vld [vmem:[%s11301_s18 + $0x1440] ss:$8 sps:$4 sm:$0xff]  }
 0x29c   : > { %7719 = vmatprep.subr.bf16.mxu1 %v10449_v22  ;;  %v10508_v21 = vld [vmem:[%s11301_s18 + $0x1540] ss:$8 sps:$4 sm:$0xff]   ;;  %v10513_v22 = vld [vmem:[%s11301_s18 + $0x1434] ss:$8 sps:$4 sm:$0xff]  }
 0x29e   : > { %7679 = vmatpush2.bf16.msra.mxu0 %v10444_v55  ;;  %v10516_v55 = vld [vmem:[%s11301_s18 + $0x1534] ss:$8 sps:$4 sm:$0xff]  }
 0x29f   : > { %7720 = vmatpush2.bf16.msra.mxu1 %v10447_v57  ;;  %7680 = vmatprep.subr.bf16.mxu0 %v10452_v24  ;;  %v10511_v57 = vld [vmem:[%s11301_s18 + $0x1430] ss:$8 sps:$4 sm:$0xff]  }
 0x2a0   : > { %7721 = vmatprep.subr.bf16.mxu1 %v10455_v6  ;;  %v10514_v24 = vld [vmem:[%s11301_s18 + $0x1530] ss:$8 sps:$4 sm:$0xff]   ;;  %v10519_v6 = vld [vmem:[%s11301_s18 + $0x1424] ss:$8 sps:$4 sm:$0xff]  }
 0x2a2   : > { %7681 = vmatpush2.bf16.msra.mxu0 %v10450_v62  ;;  %v10522_v62 = vld [vmem:[%s11301_s18 + $0x1524] ss:$8 sps:$4 sm:$0xff]  }
 0x2a3   : > { %7722 = vmatpush2.bf16.msra.mxu1 %v10453_v28  ;;  %7682 = vmatprep.subr.bf16.mxu0 %v10458_v30  ;;  %v10517_v28 = vld [vmem:[%s11301_s18 + $0x1420] ss:$8 sps:$4 sm:$0xff]  }
 0x2a4   : > { %7723 = vmatprep.subr.bf16.mxu1 %v10461_v3  ;;  %v10520_v30 = vld [vmem:[%s11301_s18 + $0x1520] ss:$8 sps:$4 sm:$0xff]   ;;  %v10525_v3 = vld [vmem:[%s11301_s18 + $0x1414] ss:$8 sps:$4 sm:$0xff]  }
 0x2a6   : > { %7683 = vmatpush2.bf16.msra.mxu0 %v10456_v56  ;;  %v10528_v56 = vld [vmem:[%s11301_s18 + $0x1514] ss:$8 sps:$4 sm:$0xff]  }
 0x2a7   : > { %7724 = vmatpush2.bf16.msra.mxu1 %v10459_v33  ;;  %7684 = vmatprep.subr.bf16.mxu0 %v10464_v34  ;;  %v10523_v33 = vld [vmem:[%s11301_s18 + $0x1410] ss:$8 sps:$4 sm:$0xff]  }
 0x2a8   : > { %7725 = vmatprep.subr.bf16.mxu1 %v10467_v35  ;;  %v10526_v34 = vld [vmem:[%s11301_s18 + $0x1510] ss:$8 sps:$4 sm:$0xff]   ;;  %v10531_v35 = vld [vmem:[%s11301_s18 + $0x1404] ss:$8 sps:$4 sm:$0xff]  }
 0x2aa   : > { %7685 = vmatpush2.bf16.msra.mxu0 %v10462_v36  ;;  %v10534_v36 = vld [vmem:[%s11301_s18 + $0x1504] ss:$8 sps:$4 sm:$0xff]  }
 0x2ab   : > { %7726 = vmatpush2.bf16.msra.mxu1 %v10465_v37  ;;  %7686 = vmatprep.subr.bf16.mxu0 %v10470_v61  ;;  %v10529_v37 = vld [vmem:[%s11301_s18 + $0x1400] ss:$8 sps:$4 sm:$0xff]  }
 0x2ac   : > { %7727 = vmatprep.subr.bf16.mxu1 %v10473_v38  ;;  %v10532_v61 = vld [vmem:[%s11301_s18 + $0x1500] ss:$8 sps:$4 sm:$0xff]   ;;  %v10537_v38 = vld [vmem:[%s11301_s18 + $0x14f4] ss:$8 sps:$4 sm:$0xff]  }
 0x2ae   : > { %7687 = vmatpush2.bf16.msra.mxu0 %v10468_v10  ;;  %v10540_v10 = vld [vmem:[%s11301_s18 + $0x15f4] ss:$8 sps:$4 sm:$0xff]  }
 0x2af   : > { %7728 = vmatpush2.bf16.msra.mxu1 %v10471_v40  ;;  %7688 = vmatprep.subr.bf16.mxu0 %v10476_v41  ;;  %v10535_v40 = vld [vmem:[%s11301_s18 + $0x14f0] ss:$8 sps:$4 sm:$0xff]  }
 0x2b0   : > { %7729 = vmatprep.subr.bf16.mxu1 %v10479_v42  ;;  %v10538_v41 = vld [vmem:[%s11301_s18 + $0x15f0] ss:$8 sps:$4 sm:$0xff]   ;;  %v10543_v42 = vld [vmem:[%s11301_s18 + $0x14e4] ss:$8 sps:$4 sm:$0xff]  }
 0x2b2   : > { %7689 = vmatpush2.bf16.msra.mxu0 %v10474_v46  ;;  %v10546_v46 = vld [vmem:[%s11301_s18 + $0x15e4] ss:$8 sps:$4 sm:$0xff]  }
 0x2b3   : > { %7730 = vmatpush2.bf16.msra.mxu1 %v10477_v47  ;;  %7690 = vmatprep.subr.bf16.mxu0 %v10482_v20  ;;  %v10541_v47 = vld [vmem:[%s11301_s18 + $0x14e0] ss:$8 sps:$4 sm:$0xff]  }
 0x2b4   : > { %7731 = vmatprep.subr.bf16.mxu1 %v10485_v48  ;;  %v10544_v20 = vld [vmem:[%s11301_s18 + $0x15e0] ss:$8 sps:$4 sm:$0xff]   ;;  %v10549_v48 = vld [vmem:[%s11301_s18 + $0x14d4] ss:$8 sps:$4 sm:$0xff]  }
 0x2b6   : > { %7691 = vmatpush2.bf16.msra.mxu0 %v10480_v26  ;;  %v10550_v26 = vld [vmem:[%s11301_s18 + $0x15d0] ss:$8 sps:$4 sm:$0xff]  }
 0x2b7   : > { %7732 = vmatpush2.bf16.msra.mxu1 %v10483_v53  ;;  %7742 = vmatprep.subr.bf16.mxu0 %v10489_v15  ;;  %v10555_v53 = vld [vmem:[%s11301_s18 + $0x14c4] ss:$8 sps:$4 sm:$0xff]  }
 0x2b8   : > { %7783 = vmatprep.subr.bf16.mxu1 %v10492_v54  ;;  %v10558_v15 = vld [vmem:[%s11301_s18 + $0x15c4] ss:$8 sps:$4 sm:$0xff]   ;;  %v10553_v54 = vld [vmem:[%s11301_s18 + $0x14c0] ss:$8 sps:$4 sm:$0xff]  }
 0x2b9   : > { %v7448_v0 = vpop.f32.mrf.mxu0  ;;  %7693 = vmatmul.mubr.bf16.vlgmr.msra.gmra.mxu0 %v1572_v27  ;;  %v10547_v27 = vld [vmem:[%s11301_s18 + $0x14d0] ss:$8 sps:$4 sm:$0xff]  }
 0x2ba   : > { %v7489_v1 = vpop.f32.mrf.mxu1  ;;  %7734 = vmatmul.mubr.bf16.vlgmr.msra.gmra.mxu1 %v1588_v32  ;;  %v7449_v2 = vadd.f32 %v7448_v0, %v12041_v51  ;;  %7743 = vmatpush1.bf16.msra.mxu0 %v10487_v58  ;;  %v10561_v32 = vld [vmem:[%s11301_s18 + $0x14b4] ss:$8 sps:$4 sm:$0xff]   ;;  %v1591_v0 = vcombine.high %v12093_v29, %v12093_v29  ;;  %v10571_v29 = vld [vmem:[%s11301_s18 + $0x1490] ss:$8 sps:$4 sm:$0xff]  }
 0x2bb   : > { %7784 = vmatpush1.bf16.msra.mxu1 %v10490_v59  ;;  %v7450_v7 = vpop.f32.mrf.mxu0  ;;  %7744 = vmatprep.subr.bf16.mxu0 %v10495_v23  ;;  %v10564_v58 = vld [vmem:[%s11301_s18 + $0x15b4] ss:$8 sps:$4 sm:$0xff]   ;;  %v10559_v59 = vld [vmem:[%s11301_s18 + $0x14b0] ss:$8 sps:$4 sm:$0xff]  }
 0x2bc   : > { %v7491_v44 = vpop.f32.mrf.mxu1  ;;  %7785 = vmatprep.subr.bf16.mxu1 %v10498_v60  ;;  %v12125_v11 = vadd.f32 %v7489_v1, %v7449_v2  ;;  %v7451_v50 = vadd.f32 %v7450_v7, %v12044_v52  ;;  %7774 = vmatprep.mubr.bf16.mxu0 %v1628_v31  ;;  %v10507_v52 = vld [vmem:[%s11301_s18 + $0x1444] ss:$8 sps:$4 sm:$0xff]   ;;  %v10556_v31 = vld [vmem:[%s11301_s18 + $0x15c0] ss:$8 sps:$4 sm:$0xff]   ;;  %v10562_v23 = vld [vmem:[%s11301_s18 + $0x15b0] ss:$8 sps:$4 sm:$0xff]   ;;  %v12181_v7 = vrot.slane %v1591_v0, %v11360_v49 }
 0x2bd   : > { %7815 = vmatprep.mubr.bf16.mxu1 %v1638_v63  ;;  %v7452_v51 = vpop.f32.mrf.mxu0  ;;  %v10567_v60 = vld [vmem:[%s11301_s18 + $0x14a4] ss:$8 sps:$4 sm:$0xff]   ;;  %v10565_v1 = vld [vmem:[%s11301_s18 + $0x14a0] ss:$8 sps:$4 sm:$0xff]   ;;  %v10636_v0 = vld [vmem:[%s11301_s18 + $0x17f4] ss:$8 sps:$4 sm:$0xff]  }
 0x2be   : > { %v7493_v12 = vpop.f32.mrf.mxu1  ;;  %v12128_v13 = vadd.f32 %v7491_v44, %v7451_v50  ;;  %7745 = vmatpush1.bf16.msra.mxu0 %v10493_v4  ;;  %v10570_v63 = vld [vmem:[%s11301_s18 + $0x15a4] ss:$8 sps:$4 sm:$0xff]   ;;  %v10568_v2 = vld [vmem:[%s11301_s18 + $0x15a0] ss:$8 sps:$4 sm:$0xff]   ;;  %v10573_v4 = vld [vmem:[%s11301_s18 + $0x1494] ss:$8 sps:$4 sm:$0xff]   ;;  %v1607_v50 = vcombine.high %v12181_v7, %v12181_v7  ;;  %v1614_v51 = vrot.slane %v12101_v45, %v11360_v49 }
 0x2bf   : > { %7786 = vmatpush1.bf16.msra.mxu1 %v10496_v5  ;;  %v7453_v16 = vpop.f32.mrf.mxu0  ;;  %7746 = vmatprep.subr.bf16.mxu0 %v10501_v8  ;;  %v10576_v5 = vld [vmem:[%s11301_s18 + $0x1594] ss:$8 sps:$4 sm:$0xff]   ;;  %v10574_v44 = vld [vmem:[%s11301_s18 + $0x1590] ss:$8 sps:$4 sm:$0xff]   ;;  %v10579_v8 = vld [vmem:[%s11301_s18 + $0x1484] ss:$8 sps:$4 sm:$0xff]  }
 0x2c0   : > { %v7494_v17 = vpop.f32.mrf.mxu1  ;;  %7787 = vmatprep.subr.bf16.mxu1 %v10504_v9  ;;  %v10582_v9 = vld [vmem:[%s11301_s18 + $0x1584] ss:$8 sps:$4 sm:$0xff]   ;;  %v10577_v12 = vld [vmem:[%s11301_s18 + $0x1480] ss:$8 sps:$4 sm:$0xff]   ;;  %v10588_v16 = vld [vmem:[%s11301_s18 + $0x1774] ss:$8 sps:$4 sm:$0xff]  }
 0x2c1   : > { %v1635_v17 = vrot.slane %v1607_v50, %v11360_v49  ;;  %v10591_v45 = vld [vmem:[%s11301_s18 + $0x1664] ss:$8 sps:$4 sm:$0xff]   ;;  %v10643_v50 = vld [vmem:[%s11301_s18 + $0x16d0] ss:$8 sps:$4 sm:$0xff]  }
 0x2c2   : > { %7747 = vmatpush1.bf16.msra.mxu0 %v10499_v39  ;;  %v10580_v39 = vld [vmem:[%s11301_s18 + $0x1580] ss:$8 sps:$4 sm:$0xff]  }
 0x2c3   : > { %7788 = vmatpush1.bf16.msra.mxu1 %v10502_v14  ;;  %7748 = vmatprep.subr.bf16.mxu0 %v10507_v52  ;;  %v10585_v14 = vld [vmem:[%s11301_s18 + $0x1674] ss:$8 sps:$4 sm:$0xff]   ;;  %v1636_v52 = vcombine.high %v1614_v51, %v1614_v51 }
 0x2c4   : > { %7789 = vmatprep.subr.bf16.mxu1 %v10510_v18  ;;  %v10583_v18 = vld [vmem:[%s11301_s18 + $0x1670] ss:$8 sps:$4 sm:$0xff]  }
 0x2c6   : > { %7749 = vmatpush1.bf16.msra.mxu0 %v10505_v19  ;;  %v10586_v19 = vld [vmem:[%s11301_s18 + $0x1770] ss:$8 sps:$4 sm:$0xff]  }
 0x2c7   : > { %7790 = vmatpush1.bf16.msra.mxu1 %v10508_v21  ;;  %7750 = vmatprep.subr.bf16.mxu0 %v10513_v22  ;;  %v10594_v21 = vld [vmem:[%s11301_s18 + $0x1764] ss:$8 sps:$4 sm:$0xff]   ;;  %v1639_v22 = vcombine.high %v1635_v17, %v1635_v17 }
 0x2c8   : > { %7791 = vmatprep.subr.bf16.mxu1 %v10516_v55 }
 0x2ca   : > { %7751 = vmatpush1.bf16.msra.mxu0 %v10511_v57 }
 0x2cb   : > { %7792 = vmatpush1.bf16.msra.mxu1 %v10514_v24  ;;  %7752 = vmatprep.subr.bf16.mxu0 %v10519_v6  ;;  %v10589_v6 = vld [vmem:[%s11301_s18 + $0x1660] ss:$8 sps:$4 sm:$0xff]  }
 0x2cc   : > { %7793 = vmatprep.subr.bf16.mxu1 %v10522_v62  ;;  %v10592_v62 = vld [vmem:[%s11301_s18 + $0x1760] ss:$8 sps:$4 sm:$0xff]  }
 0x2ce   : > { %7753 = vmatpush1.bf16.msra.mxu0 %v10517_v28 }
 0x2cf   : > { %7794 = vmatpush1.bf16.msra.mxu1 %v10520_v30  ;;  %7754 = vmatprep.subr.bf16.mxu0 %v10525_v3  ;;  %v10597_v3 = vld [vmem:[%s11301_s18 + $0x1654] ss:$8 sps:$4 sm:$0xff]  }
 0x2d0   : > { %7795 = vmatprep.subr.bf16.mxu1 %v10528_v56  ;;  %v10600_v56 = vld [vmem:[%s11301_s18 + $0x1754] ss:$8 sps:$4 sm:$0xff]  }
 0x2d2   : > { %7755 = vmatpush1.bf16.msra.mxu0 %v10523_v33 }
 0x2d3   : > { %7796 = vmatpush1.bf16.msra.mxu1 %v10526_v34  ;;  %7756 = vmatprep.subr.bf16.mxu0 %v10531_v35 }
 0x2d4   : > { %7797 = vmatprep.subr.bf16.mxu1 %v10534_v36 }
 0x2d6   : > { %7757 = vmatpush1.bf16.msra.mxu0 %v10529_v37  ;;  %v10595_v37 = vld [vmem:[%s11301_s18 + $0x1650] ss:$8 sps:$4 sm:$0xff]  }
 0x2d7   : > { %7798 = vmatpush1.bf16.msra.mxu1 %v10532_v61  ;;  %7758 = vmatprep.subr.bf16.mxu0 %v10537_v38  ;;  %v10598_v61 = vld [vmem:[%s11301_s18 + $0x1750] ss:$8 sps:$4 sm:$0xff]  }
 0x2d8   : > { %7799 = vmatprep.subr.bf16.mxu1 %v10540_v10 }
 0x2da   : > { %7759 = vmatpush2.bf16.msra.mxu0 %v10535_v40  ;;  %v10606_v40 = vld [vmem:[%s11301_s18 + $0x1744] ss:$8 sps:$4 sm:$0xff]  }
 0x2db   : > { %7800 = vmatpush2.bf16.msra.mxu1 %v10538_v41  ;;  %7760 = vmatprep.subr.bf16.mxu0 %v10543_v42  ;;  %v10601_v41 = vld [vmem:[%s11301_s18 + $0x1640] ss:$8 sps:$4 sm:$0xff]  }
 0x2dc   : > { %7801 = vmatprep.subr.bf16.mxu1 %v10546_v46  ;;  %v10604_v42 = vld [vmem:[%s11301_s18 + $0x1740] ss:$8 sps:$4 sm:$0xff]   ;;  %v10609_v46 = vld [vmem:[%s11301_s18 + $0x1634] ss:$8 sps:$4 sm:$0xff]  }
 0x2de   : > { %7761 = vmatpush2.bf16.msra.mxu0 %v10541_v47  ;;  %v10612_v47 = vld [vmem:[%s11301_s18 + $0x1734] ss:$8 sps:$4 sm:$0xff]  }
 0x2df   : > { %7802 = vmatpush2.bf16.msra.mxu1 %v10544_v20  ;;  %7762 = vmatprep.subr.bf16.mxu0 %v10549_v48  ;;  %v10607_v20 = vld [vmem:[%s11301_s18 + $0x1630] ss:$8 sps:$4 sm:$0xff]  }
 0x2e0   : > { %7803 = vmatprep.subr.bf16.mxu1 %v10552_v25  ;;  %v10610_v48 = vld [vmem:[%s11301_s18 + $0x1730] ss:$8 sps:$4 sm:$0xff]   ;;  %v10615_v25 = vld [vmem:[%s11301_s18 + $0x1624] ss:$8 sps:$4 sm:$0xff]  }
 0x2e2   : > { %7763 = vmatpush2.bf16.msra.mxu0 %v10547_v27  ;;  %v10618_v27 = vld [vmem:[%s11301_s18 + $0x1724] ss:$8 sps:$4 sm:$0xff]  }
 0x2e3   : > { %7804 = vmatpush2.bf16.msra.mxu1 %v10550_v26  ;;  %7764 = vmatprep.subr.bf16.mxu0 %v10555_v53  ;;  %v10613_v26 = vld [vmem:[%s11301_s18 + $0x1620] ss:$8 sps:$4 sm:$0xff]  }
 0x2e4   : > { %7805 = vmatprep.subr.bf16.mxu1 %v10558_v15  ;;  %v10616_v53 = vld [vmem:[%s11301_s18 + $0x1720] ss:$8 sps:$4 sm:$0xff]   ;;  %v10621_v15 = vld [vmem:[%s11301_s18 + $0x1614] ss:$8 sps:$4 sm:$0xff]  }
 0x2e6   : > { %7765 = vmatpush2.bf16.msra.mxu0 %v10553_v54  ;;  %v10624_v54 = vld [vmem:[%s11301_s18 + $0x1714] ss:$8 sps:$4 sm:$0xff]  }
 0x2e7   : > { %7806 = vmatpush2.bf16.msra.mxu1 %v10556_v31  ;;  %7766 = vmatprep.subr.bf16.mxu0 %v10561_v32  ;;  %v10619_v31 = vld [vmem:[%s11301_s18 + $0x1610] ss:$8 sps:$4 sm:$0xff]  }
 0x2e8   : > { %7807 = vmatprep.subr.bf16.mxu1 %v10564_v58  ;;  %v10622_v32 = vld [vmem:[%s11301_s18 + $0x1710] ss:$8 sps:$4 sm:$0xff]   ;;  %v10627_v58 = vld [vmem:[%s11301_s18 + $0x1604] ss:$8 sps:$4 sm:$0xff]  }
 0x2ea   : > { %7767 = vmatpush2.bf16.msra.mxu0 %v10559_v59  ;;  %v10630_v59 = vld [vmem:[%s11301_s18 + $0x1704] ss:$8 sps:$4 sm:$0xff]  }
 0x2eb   : > { %7808 = vmatpush2.bf16.msra.mxu1 %v10562_v23  ;;  %7768 = vmatprep.subr.bf16.mxu0 %v10567_v60  ;;  %v10625_v23 = vld [vmem:[%s11301_s18 + $0x1600] ss:$8 sps:$4 sm:$0xff]  }
 0x2ec   : > { %7809 = vmatprep.subr.bf16.mxu1 %v10570_v63  ;;  %v10628_v60 = vld [vmem:[%s11301_s18 + $0x1700] ss:$8 sps:$4 sm:$0xff]   ;;  %v10633_v63 = vld [vmem:[%s11301_s18 + $0x16f4] ss:$8 sps:$4 sm:$0xff]  }
 0x2ee   : > { %7769 = vmatpush2.bf16.msra.mxu0 %v10565_v1  ;;  %v10631_v1 = vld [vmem:[%s11301_s18 + $0x16f0] ss:$8 sps:$4 sm:$0xff]  }
 0x2ef   : > { %7810 = vmatpush2.bf16.msra.mxu1 %v10568_v2  ;;  %7770 = vmatprep.subr.bf16.mxu0 %v10573_v4  ;;  %v10634_v2 = vld [vmem:[%s11301_s18 + $0x17f0] ss:$8 sps:$4 sm:$0xff]   ;;  %v10639_v4 = vld [vmem:[%s11301_s18 + $0x16e4] ss:$8 sps:$4 sm:$0xff]  }
 0x2f0   : > { %7811 = vmatprep.subr.bf16.mxu1 %v10576_v5  ;;  %v10642_v5 = vld [vmem:[%s11301_s18 + $0x17e4] ss:$8 sps:$4 sm:$0xff]  }
 0x2f2   : > { %7771 = vmatpush2.bf16.msra.mxu0 %v10571_v29  ;;  %v10637_v29 = vld [vmem:[%s11301_s18 + $0x16e0] ss:$8 sps:$4 sm:$0xff]  }
 0x2f3   : > { %7812 = vmatpush2.bf16.msra.mxu1 %v10574_v44  ;;  %7772 = vmatprep.subr.bf16.mxu0 %v10579_v8  ;;  %v10640_v44 = vld [vmem:[%s11301_s18 + $0x17e0] ss:$8 sps:$4 sm:$0xff]   ;;  %v10645_v8 = vld [vmem:[%s11301_s18 + $0x16d4] ss:$8 sps:$4 sm:$0xff]  }
 0x2f4   : > { %7813 = vmatprep.subr.bf16.mxu1 %v10582_v9  ;;  %v10648_v9 = vld [vmem:[%s11301_s18 + $0x17d4] ss:$8 sps:$4 sm:$0xff]  }
 0x2f6   : > { %7773 = vmatpush2.bf16.msra.mxu0 %v10577_v12  ;;  %v10651_v12 = vld [vmem:[%s11301_s18 + $0x16c4] ss:$8 sps:$4 sm:$0xff]  }
 0x2f7   : > { %7814 = vmatpush2.bf16.msra.mxu1 %v10580_v39  ;;  %7824 = vmatprep.subr.bf16.mxu0 %v10585_v14  ;;  %v10654_v39 = vld [vmem:[%s11301_s18 + $0x17c4] ss:$8 sps:$4 sm:$0xff]   ;;  %v10649_v14 = vld [vmem:[%s11301_s18 + $0x16c0] ss:$8 sps:$4 sm:$0xff]  }
 0x2f8   : > { %7865 = vmatprep.subr.bf16.mxu1 %v10588_v16  ;;  %v10652_v16 = vld [vmem:[%s11301_s18 + $0x17c0] ss:$8 sps:$4 sm:$0xff]  }
 0x2f9   : > { %v7530_v55 = vpop.f32.mrf.mxu0  ;;  %7775 = vmatmul.mubr.bf16.vlgmr.msra.gmra.mxu0 %v1614_v51  ;;  %v10646_v51 = vld [vmem:[%s11301_s18 + $0x17d0] ss:$8 sps:$4 sm:$0xff]  }
 0x2fa   : > { %v7571_v57 = vpop.f32.mrf.mxu1  ;;  %7816 = vmatmul.mubr.bf16.vlgmr.msra.gmra.mxu1 %v1636_v52  ;;  %v7531_v24 = vadd.f32 %v7530_v55, %v12125_v11  ;;  %7825 = vmatpush1.bf16.msra.mxu0 %v10583_v18  ;;  %v10660_v52 = vld [vmem:[%s11301_s18 + $0x17b4] ss:$8 sps:$4 sm:$0xff]   ;;  %v10655_v18 = vld [vmem:[%s11301_s18 + $0x16b0] ss:$8 sps:$4 sm:$0xff]   ;;  %v10661_v55 = vld [vmem:[%s11301_s18 + $0x16a0] ss:$8 sps:$4 sm:$0xff]  }
 0x2fb   : > { %7866 = vmatpush1.bf16.msra.mxu1 %v10586_v19  ;;  %v7532_v28 = vpop.f32.mrf.mxu0  ;;  %7826 = vmatprep.subr.bf16.mxu0 %v10591_v45  ;;  %v10658_v19 = vld [vmem:[%s11301_s18 + $0x17b0] ss:$8 sps:$4 sm:$0xff]   ;;  %v10663_v45 = vld [vmem:[%s11301_s18 + $0x16a4] ss:$8 sps:$4 sm:$0xff]  }
 0x2fc   : > { %v7573_v30 = vpop.f32.mrf.mxu1  ;;  %7867 = vmatprep.subr.bf16.mxu1 %v10594_v21  ;;  %v12205_v33 = vadd.f32 %v7571_v57, %v7531_v24  ;;  %v7533_v34 = vadd.f32 %v7532_v28, %v12128_v13  ;;  %7856 = vmatprep.mubr.bf16.mxu0 %v1635_v17  ;;  %v10603_v13 = vld [vmem:[%s11301_s18 + $0x1644] ss:$8 sps:$4 sm:$0xff]   ;;  %v10657_v17 = vld [vmem:[%s11301_s18 + $0x16b4] ss:$8 sps:$4 sm:$0xff]   ;;  %v10664_v57 = vld [vmem:[%s11301_s18 + $0x17a0] ss:$8 sps:$4 sm:$0xff]  }
 0x2fd   : > { %7897 = vmatprep.mubr.bf16.mxu1 %v1639_v22  ;;  %v7534_v11 = vpop.f32.mrf.mxu0  ;;  %v10666_v21 = vld [vmem:[%s11301_s18 + $0x17a4] ss:$8 sps:$4 sm:$0xff]   ;;  %v12257_v22 = vld [vmem:[%s12629_s0 + $0x30] sm:$0xff] }
 0x2fe   : > { %v7575_v35 = vpop.f32.mrf.mxu1  ;;  %v12208_v36 = vadd.f32 %v7573_v30, %v7533_v34  ;;  %7827 = vmatpush1.bf16.msra.mxu0 %v10589_v6  ;;  %v10669_v24 = vld [vmem:[%s11301_s18 + $0x1694] ss:$8 sps:$4 sm:$0xff]   ;;  %v10667_v28 = vld [vmem:[%s11301_s18 + $0x1690] ss:$8 sps:$4 sm:$0xff]   ;;  %v1621_v11 = vrot.slane %v12181_v7, %v11360_v49  ;;  %v10688_v7 = vld [vmem:[%s11301_s18 + $0x1864] ss:$8 sps:$4 sm:$0xff]  }
 0x2ff   : > { %7868 = vmatpush1.bf16.msra.mxu1 %v10592_v62  ;;  %v7535_v38 = vpop.f32.mrf.mxu0  ;;  %7828 = vmatprep.subr.bf16.mxu0 %v10597_v3  ;;  %v10672_v6 = vld [vmem:[%s11301_s18 + $0x1794] ss:$8 sps:$4 sm:$0xff]   ;;  %v12265_v62 = vrot.slane %v12257_v22, %v11360_v49  ;;  %v10670_v30 = vld [vmem:[%s11301_s18 + $0x1790] ss:$8 sps:$4 sm:$0xff]   ;;  %v10675_v3 = vld [vmem:[%s11301_s18 + $0x1684] ss:$8 sps:$4 sm:$0xff]  }
 0x300   : > { %v7576_v10 = vpop.f32.mrf.mxu1  ;;  %7869 = vmatprep.subr.bf16.mxu1 %v10600_v56  ;;  %v10678_v56 = vld [vmem:[%s11301_s18 + $0x1784] ss:$8 sps:$4 sm:$0xff]   ;;  %v10673_v35 = vld [vmem:[%s11301_s18 + $0x1680] ss:$8 sps:$4 sm:$0xff]   ;;  %v10685_v38 = vld [vmem:[%s11301_s18 + $0x1974] ss:$8 sps:$4 sm:$0xff]  }
 0x301   : > { %v1655_v34 = vcombine.high %v12265_v62, %v12265_v62 }
 0x302   : > { %7829 = vmatpush1.bf16.msra.mxu0 %v10595_v37  ;;  %v10676_v37 = vld [vmem:[%s11301_s18 + $0x1780] ss:$8 sps:$4 sm:$0xff]  }
 0x303   : > { %7870 = vmatpush1.bf16.msra.mxu1 %v10598_v61  ;;  %7830 = vmatprep.subr.bf16.mxu0 %v10603_v13  ;;  %v10682_v61 = vld [vmem:[%s11301_s18 + $0x1874] ss:$8 sps:$4 sm:$0xff]   ;;  %v1677_v10 = vrot.slane %v1655_v34, %v11360_v49  ;;  %v1637_v13 = vcombine.high %v1621_v11, %v1621_v11 }
 0x304   : > { %7871 = vmatprep.subr.bf16.mxu1 %v10606_v40  ;;  %v10680_v40 = vld [vmem:[%s11301_s18 + $0x1870] ss:$8 sps:$4 sm:$0xff]   ;;  %v10745_v34 = vld [vmem:[%s11301_s18 + $0x19d4] ss:$8 sps:$4 sm:$0xff]  }
 0x306   : > { %7831 = vmatpush1.bf16.msra.mxu0 %v10601_v41  ;;  %v10683_v41 = vld [vmem:[%s11301_s18 + $0x1970] ss:$8 sps:$4 sm:$0xff]  }
 0x307   : > { %7872 = vmatpush1.bf16.msra.mxu1 %v10604_v42  ;;  %7832 = vmatprep.subr.bf16.mxu0 %v10609_v46  ;;  %v10691_v42 = vld [vmem:[%s11301_s18 + $0x1964] ss:$8 sps:$4 sm:$0xff]   ;;  %v1687_v46 = vcombine.high %v1677_v10, %v1677_v10 }
 0x308   : > { %7873 = vmatprep.subr.bf16.mxu1 %v10612_v47 }
 0x30a   : > { %7833 = vmatpush1.bf16.msra.mxu0 %v10607_v20 }
 0x30b   : > { %7874 = vmatpush1.bf16.msra.mxu1 %v10610_v48  ;;  %7834 = vmatprep.subr.bf16.mxu0 %v10615_v25  ;;  %v10686_v25 = vld [vmem:[%s11301_s18 + $0x1860] ss:$8 sps:$4 sm:$0xff]  }
 0x30c   : > { %7875 = vmatprep.subr.bf16.mxu1 %v10618_v27  ;;  %v10689_v27 = vld [vmem:[%s11301_s18 + $0x1960] ss:$8 sps:$4 sm:$0xff]  }
 0x30e   : > { %7835 = vmatpush1.bf16.msra.mxu0 %v10613_v26 }
 0x30f   : > { %7876 = vmatpush1.bf16.msra.mxu1 %v10616_v53  ;;  %7836 = vmatprep.subr.bf16.mxu0 %v10621_v15  ;;  %v10694_v15 = vld [vmem:[%s11301_s18 + $0x1854] ss:$8 sps:$4 sm:$0xff]  }
 0x310   : > { %7877 = vmatprep.subr.bf16.mxu1 %v10624_v54  ;;  %v10697_v54 = vld [vmem:[%s11301_s18 + $0x1954] ss:$8 sps:$4 sm:$0xff]  }
 0x312   : > { %7837 = vmatpush1.bf16.msra.mxu0 %v10619_v31 }
 0x313   : > { %7878 = vmatpush1.bf16.msra.mxu1 %v10622_v32  ;;  %7838 = vmatprep.subr.bf16.mxu0 %v10627_v58 }
 0x314   : > { %7879 = vmatprep.subr.bf16.mxu1 %v10630_v59 }
 0x316   : > { %7839 = vmatpush1.bf16.msra.mxu0 %v10625_v23  ;;  %v10692_v23 = vld [vmem:[%s11301_s18 + $0x1850] ss:$8 sps:$4 sm:$0xff]  }
 0x317   : > { %7880 = vmatpush1.bf16.msra.mxu1 %v10628_v60  ;;  %7840 = vmatprep.subr.bf16.mxu0 %v10633_v63  ;;  %v10695_v60 = vld [vmem:[%s11301_s18 + $0x1950] ss:$8 sps:$4 sm:$0xff]  }
 0x318   : > { %7881 = vmatprep.subr.bf16.mxu1 %v10636_v0 }
 0x31a   : > { %7841 = vmatpush2.bf16.msra.mxu0 %v10631_v1  ;;  %v10703_v1 = vld [vmem:[%s11301_s18 + $0x1944] ss:$8 sps:$4 sm:$0xff]  }
 0x31b   : > { %7882 = vmatpush2.bf16.msra.mxu1 %v10634_v2  ;;  %7842 = vmatprep.subr.bf16.mxu0 %v10639_v4  ;;  %v10698_v2 = vld [vmem:[%s11301_s18 + $0x1840] ss:$8 sps:$4 sm:$0xff]  }
 0x31c   : > { %7883 = vmatprep.subr.bf16.mxu1 %v10642_v5  ;;  %v10701_v4 = vld [vmem:[%s11301_s18 + $0x1940] ss:$8 sps:$4 sm:$0xff]   ;;  %v10706_v5 = vld [vmem:[%s11301_s18 + $0x1834] ss:$8 sps:$4 sm:$0xff]  }
 0x31e   : > { %7843 = vmatpush2.bf16.msra.mxu0 %v10637_v29  ;;  %v10709_v29 = vld [vmem:[%s11301_s18 + $0x1934] ss:$8 sps:$4 sm:$0xff]  }
 0x31f   : > { %7884 = vmatpush2.bf16.msra.mxu1 %v10640_v44  ;;  %7844 = vmatprep.subr.bf16.mxu0 %v10645_v8  ;;  %v10704_v44 = vld [vmem:[%s11301_s18 + $0x1830] ss:$8 sps:$4 sm:$0xff]  }
 0x320   : > { %7885 = vmatprep.subr.bf16.mxu1 %v10648_v9  ;;  %v10707_v8 = vld [vmem:[%s11301_s18 + $0x1930] ss:$8 sps:$4 sm:$0xff]   ;;  %v10712_v9 = vld [vmem:[%s11301_s18 + $0x1824] ss:$8 sps:$4 sm:$0xff]  }
 0x322   : > { %7845 = vmatpush2.bf16.msra.mxu0 %v10643_v50  ;;  %v10715_v50 = vld [vmem:[%s11301_s18 + $0x1924] ss:$8 sps:$4 sm:$0xff]  }
 0x323   : > { %7886 = vmatpush2.bf16.msra.mxu1 %v10646_v51  ;;  %7846 = vmatprep.subr.bf16.mxu0 %v10651_v12  ;;  %v10710_v51 = vld [vmem:[%s11301_s18 + $0x1820] ss:$8 sps:$4 sm:$0xff]  }
 0x324   : > { %7887 = vmatprep.subr.bf16.mxu1 %v10654_v39  ;;  %v10713_v12 = vld [vmem:[%s11301_s18 + $0x1920] ss:$8 sps:$4 sm:$0xff]   ;;  %v10718_v39 = vld [vmem:[%s11301_s18 + $0x1814] ss:$8 sps:$4 sm:$0xff]  }
 0x326   : > { %7847 = vmatpush2.bf16.msra.mxu0 %v10649_v14  ;;  %v10721_v14 = vld [vmem:[%s11301_s18 + $0x1914] ss:$8 sps:$4 sm:$0xff]  }
 0x327   : > { %7888 = vmatpush2.bf16.msra.mxu1 %v10652_v16  ;;  %7848 = vmatprep.subr.bf16.mxu0 %v10657_v17  ;;  %v10716_v16 = vld [vmem:[%s11301_s18 + $0x1810] ss:$8 sps:$4 sm:$0xff]  }
 0x328   : > { %7889 = vmatprep.subr.bf16.mxu1 %v10660_v52  ;;  %v10719_v17 = vld [vmem:[%s11301_s18 + $0x1910] ss:$8 sps:$4 sm:$0xff]   ;;  %v10724_v52 = vld [vmem:[%s11301_s18 + $0x1804] ss:$8 sps:$4 sm:$0xff]  }
 0x32a   : > { %7849 = vmatpush2.bf16.msra.mxu0 %v10655_v18  ;;  %v10727_v18 = vld [vmem:[%s11301_s18 + $0x1904] ss:$8 sps:$4 sm:$0xff]  }
 0x32b   : > { %7890 = vmatpush2.bf16.msra.mxu1 %v10658_v19  ;;  %7850 = vmatprep.subr.bf16.mxu0 %v10663_v45  ;;  %v10722_v19 = vld [vmem:[%s11301_s18 + $0x1800] ss:$8 sps:$4 sm:$0xff]  }
 0x32c   : > { %7891 = vmatprep.subr.bf16.mxu1 %v10666_v21  ;;  %v10725_v45 = vld [vmem:[%s11301_s18 + $0x1900] ss:$8 sps:$4 sm:$0xff]   ;;  %v10730_v21 = vld [vmem:[%s11301_s18 + $0x18f4] ss:$8 sps:$4 sm:$0xff]  }
 0x32e   : > { %7851 = vmatpush2.bf16.msra.mxu0 %v10661_v55  ;;  %v10733_v55 = vld [vmem:[%s11301_s18 + $0x19f4] ss:$8 sps:$4 sm:$0xff]  }
 0x32f   : > { %7892 = vmatpush2.bf16.msra.mxu1 %v10664_v57  ;;  %7852 = vmatprep.subr.bf16.mxu0 %v10669_v24  ;;  %v10728_v57 = vld [vmem:[%s11301_s18 + $0x18f0] ss:$8 sps:$4 sm:$0xff]  }
 0x330   : > { %7893 = vmatprep.subr.bf16.mxu1 %v10672_v6  ;;  %v10731_v24 = vld [vmem:[%s11301_s18 + $0x19f0] ss:$8 sps:$4 sm:$0xff]   ;;  %v10736_v6 = vld [vmem:[%s11301_s18 + $0x18e4] ss:$8 sps:$4 sm:$0xff]  }
 0x332   : > { %7853 = vmatpush2.bf16.msra.mxu0 %v10667_v28  ;;  %v10739_v28 = vld [vmem:[%s11301_s18 + $0x19e4] ss:$8 sps:$4 sm:$0xff]  }
 0x333   : > { %7894 = vmatpush2.bf16.msra.mxu1 %v10670_v30  ;;  %7854 = vmatprep.subr.bf16.mxu0 %v10675_v3  ;;  %v10734_v30 = vld [vmem:[%s11301_s18 + $0x18e0] ss:$8 sps:$4 sm:$0xff]  }
 0x334   : > { %7895 = vmatprep.subr.bf16.mxu1 %v10678_v56  ;;  %v10737_v3 = vld [vmem:[%s11301_s18 + $0x19e0] ss:$8 sps:$4 sm:$0xff]   ;;  %v10742_v56 = vld [vmem:[%s11301_s18 + $0x18d4] ss:$8 sps:$4 sm:$0xff]  }
 0x336   : > { %7855 = vmatpush2.bf16.msra.mxu0 %v10673_v35  ;;  %v10743_v35 = vld [vmem:[%s11301_s18 + $0x19d0] ss:$8 sps:$4 sm:$0xff]  }
 0x337   : > { %7896 = vmatpush2.bf16.msra.mxu1 %v10676_v37  ;;  %7906 = vmatprep.subr.bf16.mxu0 %v10682_v61  ;;  %v10748_v37 = vld [vmem:[%s11301_s18 + $0x18c4] ss:$8 sps:$4 sm:$0xff]  }
 0x338   : > { %7947 = vmatprep.subr.bf16.mxu1 %v10685_v38  ;;  %v10751_v61 = vld [vmem:[%s11301_s18 + $0x19c4] ss:$8 sps:$4 sm:$0xff]   ;;  %v10746_v38 = vld [vmem:[%s11301_s18 + $0x18c0] ss:$8 sps:$4 sm:$0xff]  }
 0x339   : > { %v7612_v47 = vpop.f32.mrf.mxu0  ;;  %7857 = vmatmul.mubr.bf16.vlgmr.msra.gmra.mxu0 %v1621_v11  ;;  %v10740_v11 = vld [vmem:[%s11301_s18 + $0x18d0] ss:$8 sps:$4 sm:$0xff]  }
 0x33a   : > { %v7653_v20 = vpop.f32.mrf.mxu1  ;;  %7898 = vmatmul.mubr.bf16.vlgmr.msra.gmra.mxu1 %v1637_v13  ;;  %v7613_v48 = vadd.f32 %v7612_v47, %v12205_v33  ;;  %7907 = vmatpush1.bf16.msra.mxu0 %v10680_v40  ;;  %v10754_v13 = vld [vmem:[%s11301_s18 + $0x18b4] ss:$8 sps:$4 sm:$0xff]   ;;  %v1640_v47 = vcombine.high %v12257_v22, %v12257_v22  ;;  %v10764_v22 = vld [vmem:[%s11301_s18 + $0x1890] ss:$8 sps:$4 sm:$0xff]  }
 0x33b   : > { %7948 = vmatpush1.bf16.msra.mxu1 %v10683_v41  ;;  %v7614_v26 = vpop.f32.mrf.mxu0  ;;  %7908 = vmatprep.subr.bf16.mxu0 %v10688_v7  ;;  %v10757_v40 = vld [vmem:[%s11301_s18 + $0x19b4] ss:$8 sps:$4 sm:$0xff]   ;;  %v10752_v41 = vld [vmem:[%s11301_s18 + $0x18b0] ss:$8 sps:$4 sm:$0xff]  }
 0x33c   : > { %v7655_v53 = vpop.f32.mrf.mxu1  ;;  %7949 = vmatprep.subr.bf16.mxu1 %v10691_v42  ;;  %v12289_v31 = vadd.f32 %v7653_v20, %v7613_v48  ;;  %v7615_v32 = vadd.f32 %v7614_v26, %v12208_v36  ;;  %7938 = vmatprep.mubr.bf16.mxu0 %v1677_v10  ;;  %v10700_v36 = vld [vmem:[%s11301_s18 + $0x1844] ss:$8 sps:$4 sm:$0xff]   ;;  %v10749_v10 = vld [vmem:[%s11301_s18 + $0x19c0] ss:$8 sps:$4 sm:$0xff]   ;;  %v10755_v7 = vld [vmem:[%s11301_s18 + $0x19b0] ss:$8 sps:$4 sm:$0xff]   ;;  %v12345_v26 = vrot.slane %v1640_v47, %v11360_v49 }
 0x33d   : > { %7979 = vmatprep.mubr.bf16.mxu1 %v1687_v46  ;;  %v7616_v33 = vpop.f32.mrf.mxu0  ;;  %v10760_v42 = vld [vmem:[%s11301_s18 + $0x18a4] ss:$8 sps:$4 sm:$0xff]   ;;  %v10758_v20 = vld [vmem:[%s11301_s18 + $0x18a0] ss:$8 sps:$4 sm:$0xff]   ;;  %v10829_v47 = vld [vmem:[%s11301_s18 + $0x1bf4] ss:$8 sps:$4 sm:$0xff]  }
 0x33e   : > { %v7657_v58 = vpop.f32.mrf.mxu1  ;;  %v12292_v59 = vadd.f32 %v7655_v53, %v7615_v32  ;;  %7909 = vmatpush1.bf16.msra.mxu0 %v10686_v25  ;;  %v10763_v46 = vld [vmem:[%s11301_s18 + $0x19a4] ss:$8 sps:$4 sm:$0xff]   ;;  %v10761_v48 = vld [vmem:[%s11301_s18 + $0x19a0] ss:$8 sps:$4 sm:$0xff]   ;;  %v10766_v25 = vld [vmem:[%s11301_s18 + $0x1894] ss:$8 sps:$4 sm:$0xff]   ;;  %v1656_v32 = vcombine.high %v12345_v26, %v12345_v26  ;;  %v1663_v33 = vrot.slane %v12265_v62, %v11360_v49 }
 0x33f   : > { %7950 = vmatpush1.bf16.msra.mxu1 %v10689_v27  ;;  %v7617_v63 = vpop.f32.mrf.mxu0  ;;  %7910 = vmatprep.subr.bf16.mxu0 %v10694_v15  ;;  %v10769_v27 = vld [vmem:[%s11301_s18 + $0x1994] ss:$8 sps:$4 sm:$0xff]   ;;  %v10767_v53 = vld [vmem:[%s11301_s18 + $0x1990] ss:$8 sps:$4 sm:$0xff]   ;;  %v10772_v15 = vld [vmem:[%s11301_s18 + $0x1884] ss:$8 sps:$4 sm:$0xff]  }
 0x340   : > { %v7658_v0 = vpop.f32.mrf.mxu1  ;;  %7951 = vmatprep.subr.bf16.mxu1 %v10697_v54  ;;  %v10775_v54 = vld [vmem:[%s11301_s18 + $0x1984] ss:$8 sps:$4 sm:$0xff]   ;;  %v10770_v58 = vld [vmem:[%s11301_s18 + $0x1880] ss:$8 sps:$4 sm:$0xff]   ;;  %v10781_v63 = vld [vmem:[%s11301_s18 + $0x1b74] ss:$8 sps:$4 sm:$0xff]  }
 0x341   : > { %v1684_v0 = vrot.slane %v1656_v32, %v11360_v49  ;;  %v10784_v62 = vld [vmem:[%s11301_s18 + $0x1a64] ss:$8 sps:$4 sm:$0xff]   ;;  %v10836_v32 = vld [vmem:[%s11301_s18 + $0x1ad0] ss:$8 sps:$4 sm:$0xff]  }
 0x342   : > { %7911 = vmatpush1.bf16.msra.mxu0 %v10692_v23  ;;  %v10773_v23 = vld [vmem:[%s11301_s18 + $0x1980] ss:$8 sps:$4 sm:$0xff]  }
 0x343   : > { %7952 = vmatpush1.bf16.msra.mxu1 %v10695_v60  ;;  %7912 = vmatprep.subr.bf16.mxu0 %v10700_v36  ;;  %v10778_v60 = vld [vmem:[%s11301_s18 + $0x1a74] ss:$8 sps:$4 sm:$0xff]   ;;  %v1685_v36 = vcombine.high %v1663_v33, %v1663_v33 }
 0x344   : > { %7953 = vmatprep.subr.bf16.mxu1 %v10703_v1  ;;  %v10776_v1 = vld [vmem:[%s11301_s18 + $0x1a70] ss:$8 sps:$4 sm:$0xff]  }
 0x346   : > { %7913 = vmatpush1.bf16.msra.mxu0 %v10698_v2  ;;  %v10779_v2 = vld [vmem:[%s11301_s18 + $0x1b70] ss:$8 sps:$4 sm:$0xff]  }
 0x347   : > { %7954 = vmatpush1.bf16.msra.mxu1 %v10701_v4  ;;  %7914 = vmatprep.subr.bf16.mxu0 %v10706_v5  ;;  %v10787_v4 = vld [vmem:[%s11301_s18 + $0x1b64] ss:$8 sps:$4 sm:$0xff]   ;;  %v1688_v5 = vcombine.high %v1684_v0, %v1684_v0 }
 0x348   : > { %7955 = vmatprep.subr.bf16.mxu1 %v10709_v29 }
 0x34a   : > { %7915 = vmatpush1.bf16.msra.mxu0 %v10704_v44 }
 0x34b   : > { %7956 = vmatpush1.bf16.msra.mxu1 %v10707_v8  ;;  %7916 = vmatprep.subr.bf16.mxu0 %v10712_v9  ;;  %v10782_v9 = vld [vmem:[%s11301_s18 + $0x1a60] ss:$8 sps:$4 sm:$0xff]  }
 0x34c   : > { %7957 = vmatprep.subr.bf16.mxu1 %v10715_v50  ;;  %v10785_v50 = vld [vmem:[%s11301_s18 + $0x1b60] ss:$8 sps:$4 sm:$0xff]  }
 0x34e   : > { %7917 = vmatpush1.bf16.msra.mxu0 %v10710_v51 }
 0x34f   : > { %7958 = vmatpush1.bf16.msra.mxu1 %v10713_v12  ;;  %7918 = vmatprep.subr.bf16.mxu0 %v10718_v39  ;;  %v10790_v39 = vld [vmem:[%s11301_s18 + $0x1a54] ss:$8 sps:$4 sm:$0xff]  }
 0x350   : > { %7959 = vmatprep.subr.bf16.mxu1 %v10721_v14  ;;  %v10793_v14 = vld [vmem:[%s11301_s18 + $0x1b54] ss:$8 sps:$4 sm:$0xff]  }
 0x352   : > { %7919 = vmatpush1.bf16.msra.mxu0 %v10716_v16 }
 0x353   : > { %7960 = vmatpush1.bf16.msra.mxu1 %v10719_v17  ;;  %7920 = vmatprep.subr.bf16.mxu0 %v10724_v52 }
 0x354   : > { %7961 = vmatprep.subr.bf16.mxu1 %v10727_v18 }
 0x356   : > { %7921 = vmatpush1.bf16.msra.mxu0 %v10722_v19  ;;  %v10788_v19 = vld [vmem:[%s11301_s18 + $0x1a50] ss:$8 sps:$4 sm:$0xff]  }
 0x357   : > { %7962 = vmatpush1.bf16.msra.mxu1 %v10725_v45  ;;  %7922 = vmatprep.subr.bf16.mxu0 %v10730_v21  ;;  %v10791_v45 = vld [vmem:[%s11301_s18 + $0x1b50] ss:$8 sps:$4 sm:$0xff]  }
 0x358   : > { %7963 = vmatprep.subr.bf16.mxu1 %v10733_v55 }
 0x35a   : > { %7923 = vmatpush2.bf16.msra.mxu0 %v10728_v57  ;;  %v10799_v57 = vld [vmem:[%s11301_s18 + $0x1b44] ss:$8 sps:$4 sm:$0xff]  }
 0x35b   : > { %7964 = vmatpush2.bf16.msra.mxu1 %v10731_v24  ;;  %7924 = vmatprep.subr.bf16.mxu0 %v10736_v6  ;;  %v10794_v24 = vld [vmem:[%s11301_s18 + $0x1a40] ss:$8 sps:$4 sm:$0xff]  }
 0x35c   : > { %7965 = vmatprep.subr.bf16.mxu1 %v10739_v28  ;;  %v10797_v6 = vld [vmem:[%s11301_s18 + $0x1b40] ss:$8 sps:$4 sm:$0xff]   ;;  %v10802_v28 = vld [vmem:[%s11301_s18 + $0x1a34] ss:$8 sps:$4 sm:$0xff]  }
 0x35e   : > { %7925 = vmatpush2.bf16.msra.mxu0 %v10734_v30  ;;  %v10805_v30 = vld [vmem:[%s11301_s18 + $0x1b34] ss:$8 sps:$4 sm:$0xff]  }
 0x35f   : > { %7966 = vmatpush2.bf16.msra.mxu1 %v10737_v3  ;;  %7926 = vmatprep.subr.bf16.mxu0 %v10742_v56  ;;  %v10800_v3 = vld [vmem:[%s11301_s18 + $0x1a30] ss:$8 sps:$4 sm:$0xff]  }
 0x360   : > { %7967 = vmatprep.subr.bf16.mxu1 %v10745_v34  ;;  %v10803_v56 = vld [vmem:[%s11301_s18 + $0x1b30] ss:$8 sps:$4 sm:$0xff]   ;;  %v10808_v34 = vld [vmem:[%s11301_s18 + $0x1a24] ss:$8 sps:$4 sm:$0xff]  }
 0x362   : > { %7927 = vmatpush2.bf16.msra.mxu0 %v10740_v11  ;;  %v10811_v11 = vld [vmem:[%s11301_s18 + $0x1b24] ss:$8 sps:$4 sm:$0xff]  }
 0x363   : > { %7968 = vmatpush2.bf16.msra.mxu1 %v10743_v35  ;;  %7928 = vmatprep.subr.bf16.mxu0 %v10748_v37  ;;  %v10806_v35 = vld [vmem:[%s11301_s18 + $0x1a20] ss:$8 sps:$4 sm:$0xff]  }
 0x364   : > { %7969 = vmatprep.subr.bf16.mxu1 %v10751_v61  ;;  %v10809_v37 = vld [vmem:[%s11301_s18 + $0x1b20] ss:$8 sps:$4 sm:$0xff]   ;;  %v10814_v61 = vld [vmem:[%s11301_s18 + $0x1a14] ss:$8 sps:$4 sm:$0xff]  }
 0x366   : > { %7929 = vmatpush2.bf16.msra.mxu0 %v10746_v38  ;;  %v10817_v38 = vld [vmem:[%s11301_s18 + $0x1b14] ss:$8 sps:$4 sm:$0xff]  }
 0x367   : > { %7970 = vmatpush2.bf16.msra.mxu1 %v10749_v10  ;;  %7930 = vmatprep.subr.bf16.mxu0 %v10754_v13  ;;  %v10812_v10 = vld [vmem:[%s11301_s18 + $0x1a10] ss:$8 sps:$4 sm:$0xff]  }
 0x368   : > { %7971 = vmatprep.subr.bf16.mxu1 %v10757_v40  ;;  %v10815_v13 = vld [vmem:[%s11301_s18 + $0x1b10] ss:$8 sps:$4 sm:$0xff]   ;;  %v10820_v40 = vld [vmem:[%s11301_s18 + $0x1a04] ss:$8 sps:$4 sm:$0xff]  }
 0x36a   : > { %7931 = vmatpush2.bf16.msra.mxu0 %v10752_v41  ;;  %v10823_v41 = vld [vmem:[%s11301_s18 + $0x1b04] ss:$8 sps:$4 sm:$0xff]  }
 0x36b   : > { %7972 = vmatpush2.bf16.msra.mxu1 %v10755_v7  ;;  %7932 = vmatprep.subr.bf16.mxu0 %v10760_v42  ;;  %v10818_v7 = vld [vmem:[%s11301_s18 + $0x1a00] ss:$8 sps:$4 sm:$0xff]  }
 0x36c   : > { %7973 = vmatprep.subr.bf16.mxu1 %v10763_v46  ;;  %v10821_v42 = vld [vmem:[%s11301_s18 + $0x1b00] ss:$8 sps:$4 sm:$0xff]   ;;  %v10826_v46 = vld [vmem:[%s11301_s18 + $0x1af4] ss:$8 sps:$4 sm:$0xff]  }
 0x36e   : > { %7933 = vmatpush2.bf16.msra.mxu0 %v10758_v20  ;;  %v10824_v20 = vld [vmem:[%s11301_s18 + $0x1af0] ss:$8 sps:$4 sm:$0xff]  }
 0x36f   : > { %7974 = vmatpush2.bf16.msra.mxu1 %v10761_v48  ;;  %7934 = vmatprep.subr.bf16.mxu0 %v10766_v25  ;;  %v10827_v48 = vld [vmem:[%s11301_s18 + $0x1bf0] ss:$8 sps:$4 sm:$0xff]   ;;  %v10832_v25 = vld [vmem:[%s11301_s18 + $0x1ae4] ss:$8 sps:$4 sm:$0xff]  }
 0x370   : > { %7975 = vmatprep.subr.bf16.mxu1 %v10769_v27  ;;  %v10835_v27 = vld [vmem:[%s11301_s18 + $0x1be4] ss:$8 sps:$4 sm:$0xff]  }
 0x372   : > { %7935 = vmatpush2.bf16.msra.mxu0 %v10764_v22  ;;  %v10830_v22 = vld [vmem:[%s11301_s18 + $0x1ae0] ss:$8 sps:$4 sm:$0xff]  }
 0x373   : > { %7976 = vmatpush2.bf16.msra.mxu1 %v10767_v53  ;;  %7936 = vmatprep.subr.bf16.mxu0 %v10772_v15  ;;  %v10833_v53 = vld [vmem:[%s11301_s18 + $0x1be0] ss:$8 sps:$4 sm:$0xff]   ;;  %v10838_v15 = vld [vmem:[%s11301_s18 + $0x1ad4] ss:$8 sps:$4 sm:$0xff]  }
 0x374   : > { %7977 = vmatprep.subr.bf16.mxu1 %v10775_v54  ;;  %v10841_v54 = vld [vmem:[%s11301_s18 + $0x1bd4] ss:$8 sps:$4 sm:$0xff]  }
 0x376   : > { %7937 = vmatpush2.bf16.msra.mxu0 %v10770_v58  ;;  %v10844_v58 = vld [vmem:[%s11301_s18 + $0x1ac4] ss:$8 sps:$4 sm:$0xff]  }
 0x377   : > { %7978 = vmatpush2.bf16.msra.mxu1 %v10773_v23  ;;  %7988 = vmatprep.subr.bf16.mxu0 %v10778_v60  ;;  %v10847_v23 = vld [vmem:[%s11301_s18 + $0x1bc4] ss:$8 sps:$4 sm:$0xff]   ;;  %v10842_v60 = vld [vmem:[%s11301_s18 + $0x1ac0] ss:$8 sps:$4 sm:$0xff]  }
 0x378   : > { %8029 = vmatprep.subr.bf16.mxu1 %v10781_v63  ;;  %v10845_v63 = vld [vmem:[%s11301_s18 + $0x1bc0] ss:$8 sps:$4 sm:$0xff]  }
 0x379   : > { %v7694_v29 = vpop.f32.mrf.mxu0  ;;  %7939 = vmatmul.mubr.bf16.vlgmr.msra.gmra.mxu0 %v1663_v33  ;;  %v10839_v33 = vld [vmem:[%s11301_s18 + $0x1bd0] ss:$8 sps:$4 sm:$0xff]  }
 0x37a   : > { %v7735_v44 = vpop.f32.mrf.mxu1  ;;  %7980 = vmatmul.mubr.bf16.vlgmr.msra.gmra.mxu1 %v1685_v36  ;;  %v7695_v8 = vadd.f32 %v7694_v29, %v12289_v31  ;;  %7989 = vmatpush1.bf16.msra.mxu0 %v10776_v1  ;;  %v10853_v36 = vld [vmem:[%s11301_s18 + $0x1bb4] ss:$8 sps:$4 sm:$0xff]   ;;  %v10848_v1 = vld [vmem:[%s11301_s18 + $0x1ab0] ss:$8 sps:$4 sm:$0xff]   ;;  %v10854_v29 = vld [vmem:[%s11301_s18 + $0x1aa0] ss:$8 sps:$4 sm:$0xff]  }
 0x37b   : > { %8030 = vmatpush1.bf16.msra.mxu1 %v10779_v2  ;;  %v7696_v51 = vpop.f32.mrf.mxu0  ;;  %7990 = vmatprep.subr.bf16.mxu0 %v10784_v62  ;;  %v10851_v2 = vld [vmem:[%s11301_s18 + $0x1bb0] ss:$8 sps:$4 sm:$0xff]   ;;  %v10856_v62 = vld [vmem:[%s11301_s18 + $0x1aa4] ss:$8 sps:$4 sm:$0xff]  }
 0x37c   : > { %v7737_v12 = vpop.f32.mrf.mxu1  ;;  %8031 = vmatprep.subr.bf16.mxu1 %v10787_v4  ;;  %v12369_v16 = vadd.f32 %v7735_v44, %v7695_v8  ;;  %v7697_v17 = vadd.f32 %v7696_v51, %v12292_v59  ;;  %8020 = vmatprep.mubr.bf16.mxu0 %v1684_v0  ;;  %v10796_v59 = vld [vmem:[%s11301_s18 + $0x1a44] ss:$8 sps:$4 sm:$0xff]   ;;  %v10850_v0 = vld [vmem:[%s11301_s18 + $0x1ab4] ss:$8 sps:$4 sm:$0xff]   ;;  %v10857_v44 = vld [vmem:[%s11301_s18 + $0x1ba0] ss:$8 sps:$4 sm:$0xff]  }
 0x37d   : > { %8061 = vmatprep.mubr.bf16.mxu1 %v1688_v5  ;;  %v7698_v31 = vpop.f32.mrf.mxu0  ;;  %v10859_v4 = vld [vmem:[%s11301_s18 + $0x1ba4] ss:$8 sps:$4 sm:$0xff]   ;;  %v12421_v5 = vld [vmem:[%s12629_s0 + $0x38] sm:$0xff] }
 0x37e   : > { %v7739_v52 = vpop.f32.mrf.mxu1  ;;  %v12372_v18 = vadd.f32 %v7737_v12, %v7697_v17  ;;  %7991 = vmatpush1.bf16.msra.mxu0 %v10782_v9  ;;  %v10862_v8 = vld [vmem:[%s11301_s18 + $0x1a94] ss:$8 sps:$4 sm:$0xff]   ;;  %v10860_v51 = vld [vmem:[%s11301_s18 + $0x1a90] ss:$8 sps:$4 sm:$0xff]   ;;  %v1670_v31 = vrot.slane %v12345_v26, %v11360_v49  ;;  %v10881_v26 = vld [vmem:[%s11301_s18 + $0x1c64] ss:$8 sps:$4 sm:$0xff]  }
 0x37f   : > { %8032 = vmatpush1.bf16.msra.mxu1 %v10785_v50  ;;  %v7699_v21 = vpop.f32.mrf.mxu0  ;;  %7992 = vmatprep.subr.bf16.mxu0 %v10790_v39  ;;  %v10865_v9 = vld [vmem:[%s11301_s18 + $0x1b94] ss:$8 sps:$4 sm:$0xff]   ;;  %v12429_v50 = vrot.slane %v12421_v5, %v11360_v49  ;;  %v10863_v12 = vld [vmem:[%s11301_s18 + $0x1b90] ss:$8 sps:$4 sm:$0xff]   ;;  %v10868_v39 = vld [vmem:[%s11301_s18 + $0x1a84] ss:$8 sps:$4 sm:$0xff]  }
 0x380   : > { %v7740_v55 = vpop.f32.mrf.mxu1  ;;  %8033 = vmatprep.subr.bf16.mxu1 %v10793_v14  ;;  %v10871_v14 = vld [vmem:[%s11301_s18 + $0x1b84] ss:$8 sps:$4 sm:$0xff]   ;;  %v10866_v52 = vld [vmem:[%s11301_s18 + $0x1a80] ss:$8 sps:$4 sm:$0xff]   ;;  %v10878_v21 = vld [vmem:[%s11301_s18 + $0x1d74] ss:$8 sps:$4 sm:$0xff]  }
 0x381   : > { %v1704_v17 = vcombine.high %v12429_v50, %v12429_v50 }
 0x382   : > { %7993 = vmatpush1.bf16.msra.mxu0 %v10788_v19  ;;  %v10869_v19 = vld [vmem:[%s11301_s18 + $0x1b80] ss:$8 sps:$4 sm:$0xff]  }
 0x383   : > { %8034 = vmatpush1.bf16.msra.mxu1 %v10791_v45  ;;  %7994 = vmatprep.subr.bf16.mxu0 %v10796_v59  ;;  %v10875_v45 = vld [vmem:[%s11301_s18 + $0x1c74] ss:$8 sps:$4 sm:$0xff]   ;;  %v1726_v55 = vrot.slane %v1704_v17, %v11360_v49  ;;  %v1686_v59 = vcombine.high %v1670_v31, %v1670_v31 }
 0x384   : > { %8035 = vmatprep.subr.bf16.mxu1 %v10799_v57  ;;  %v10873_v57 = vld [vmem:[%s11301_s18 + $0x1c70] ss:$8 sps:$4 sm:$0xff]   ;;  %v10938_v17 = vld [vmem:[%s11301_s18 + $0x1dd4] ss:$8 sps:$4 sm:$0xff]  }
 0x386   : > { %7995 = vmatpush1.bf16.msra.mxu0 %v10794_v24  ;;  %v10876_v24 = vld [vmem:[%s11301_s18 + $0x1d70] ss:$8 sps:$4 sm:$0xff]  }
 0x387   : > { %8036 = vmatpush1.bf16.msra.mxu1 %v10797_v6  ;;  %7996 = vmatprep.subr.bf16.mxu0 %v10802_v28  ;;  %v10884_v6 = vld [vmem:[%s11301_s18 + $0x1d64] ss:$8 sps:$4 sm:$0xff]   ;;  %v1736_v28 = vcombine.high %v1726_v55, %v1726_v55 }
 0x388   : > { %8037 = vmatprep.subr.bf16.mxu1 %v10805_v30 }
 0x38a   : > { %7997 = vmatpush1.bf16.msra.mxu0 %v10800_v3 }
 0x38b   : > { %8038 = vmatpush1.bf16.msra.mxu1 %v10803_v56  ;;  %7998 = vmatprep.subr.bf16.mxu0 %v10808_v34  ;;  %v10879_v34 = vld [vmem:[%s11301_s18 + $0x1c60] ss:$8 sps:$4 sm:$0xff]  }
 0x38c   : > { %8039 = vmatprep.subr.bf16.mxu1 %v10811_v11  ;;  %v10882_v11 = vld [vmem:[%s11301_s18 + $0x1d60] ss:$8 sps:$4 sm:$0xff]  }
 0x38e   : > { %7999 = vmatpush1.bf16.msra.mxu0 %v10806_v35 }
 0x38f   : > { %8040 = vmatpush1.bf16.msra.mxu1 %v10809_v37  ;;  %8000 = vmatprep.subr.bf16.mxu0 %v10814_v61  ;;  %v10887_v61 = vld [vmem:[%s11301_s18 + $0x1c54] ss:$8 sps:$4 sm:$0xff]  }
 0x390   : > { %8041 = vmatprep.subr.bf16.mxu1 %v10817_v38  ;;  %v10890_v38 = vld [vmem:[%s11301_s18 + $0x1d54] ss:$8 sps:$4 sm:$0xff]  }
 0x392   : > { %8001 = vmatpush1.bf16.msra.mxu0 %v10812_v10 }
 0x393   : > { %8042 = vmatpush1.bf16.msra.mxu1 %v10815_v13  ;;  %8002 = vmatprep.subr.bf16.mxu0 %v10820_v40 }
 0x394   : > { %8043 = vmatprep.subr.bf16.mxu1 %v10823_v41 }
 0x396   : > { %8003 = vmatpush1.bf16.msra.mxu0 %v10818_v7  ;;  %v10885_v7 = vld [vmem:[%s11301_s18 + $0x1c50] ss:$8 sps:$4 sm:$0xff]  }
 0x397   : > { %8044 = vmatpush1.bf16.msra.mxu1 %v10821_v42  ;;  %8004 = vmatprep.subr.bf16.mxu0 %v10826_v46  ;;  %v10888_v42 = vld [vmem:[%s11301_s18 + $0x1d50] ss:$8 sps:$4 sm:$0xff]  }
 0x398   : > { %8045 = vmatprep.subr.bf16.mxu1 %v10829_v47 }
 0x39a   : > { %8005 = vmatpush2.bf16.msra.mxu0 %v10824_v20  ;;  %v10896_v20 = vld [vmem:[%s11301_s18 + $0x1d44] ss:$8 sps:$4 sm:$0xff]  }
 0x39b   : > { %8046 = vmatpush2.bf16.msra.mxu1 %v10827_v48  ;;  %8006 = vmatprep.subr.bf16.mxu0 %v10832_v25  ;;  %v10891_v48 = vld [vmem:[%s11301_s18 + $0x1c40] ss:$8 sps:$4 sm:$0xff]  }
 0x39c   : > { %8047 = vmatprep.subr.bf16.mxu1 %v10835_v27  ;;  %v10894_v25 = vld [vmem:[%s11301_s18 + $0x1d40] ss:$8 sps:$4 sm:$0xff]   ;;  %v10899_v27 = vld [vmem:[%s11301_s18 + $0x1c34] ss:$8 sps:$4 sm:$0xff]  }
 0x39e   : > { %8007 = vmatpush2.bf16.msra.mxu0 %v10830_v22  ;;  %v10902_v22 = vld [vmem:[%s11301_s18 + $0x1d34] ss:$8 sps:$4 sm:$0xff]  }
 0x39f   : > { %8048 = vmatpush2.bf16.msra.mxu1 %v10833_v53  ;;  %8008 = vmatprep.subr.bf16.mxu0 %v10838_v15  ;;  %v10897_v53 = vld [vmem:[%s11301_s18 + $0x1c30] ss:$8 sps:$4 sm:$0xff]  }
 0x3a0   : > { %8049 = vmatprep.subr.bf16.mxu1 %v10841_v54  ;;  %v10900_v15 = vld [vmem:[%s11301_s18 + $0x1d30] ss:$8 sps:$4 sm:$0xff]   ;;  %v10905_v54 = vld [vmem:[%s11301_s18 + $0x1c24] ss:$8 sps:$4 sm:$0xff]  }
 0x3a2   : > { %8009 = vmatpush2.bf16.msra.mxu0 %v10836_v32  ;;  %v10908_v32 = vld [vmem:[%s11301_s18 + $0x1d24] ss:$8 sps:$4 sm:$0xff]  }
 0x3a3   : > { %8050 = vmatpush2.bf16.msra.mxu1 %v10839_v33  ;;  %8010 = vmatprep.subr.bf16.mxu0 %v10844_v58  ;;  %v10903_v33 = vld [vmem:[%s11301_s18 + $0x1c20] ss:$8 sps:$4 sm:$0xff]  }
 0x3a4   : > { %8051 = vmatprep.subr.bf16.mxu1 %v10847_v23  ;;  %v10906_v58 = vld [vmem:[%s11301_s18 + $0x1d20] ss:$8 sps:$4 sm:$0xff]   ;;  %v10911_v23 = vld [vmem:[%s11301_s18 + $0x1c14] ss:$8 sps:$4 sm:$0xff]  }
 0x3a6   : > { %8011 = vmatpush2.bf16.msra.mxu0 %v10842_v60  ;;  %v10914_v60 = vld [vmem:[%s11301_s18 + $0x1d14] ss:$8 sps:$4 sm:$0xff]  }
 0x3a7   : > { %8052 = vmatpush2.bf16.msra.mxu1 %v10845_v63  ;;  %8012 = vmatprep.subr.bf16.mxu0 %v10850_v0  ;;  %v10909_v63 = vld [vmem:[%s11301_s18 + $0x1c10] ss:$8 sps:$4 sm:$0xff]  }
 0x3a8   : > { %8053 = vmatprep.subr.bf16.mxu1 %v10853_v36  ;;  %v10912_v0 = vld [vmem:[%s11301_s18 + $0x1d10] ss:$8 sps:$4 sm:$0xff]   ;;  %v10917_v36 = vld [vmem:[%s11301_s18 + $0x1c04] ss:$8 sps:$4 sm:$0xff]  }
 0x3aa   : > { %8013 = vmatpush2.bf16.msra.mxu0 %v10848_v1  ;;  %v10920_v1 = vld [vmem:[%s11301_s18 + $0x1d04] ss:$8 sps:$4 sm:$0xff]  }
 0x3ab   : > { %8054 = vmatpush2.bf16.msra.mxu1 %v10851_v2  ;;  %8014 = vmatprep.subr.bf16.mxu0 %v10856_v62  ;;  %v10915_v2 = vld [vmem:[%s11301_s18 + $0x1c00] ss:$8 sps:$4 sm:$0xff]  }
 0x3ac   : > { %8055 = vmatprep.subr.bf16.mxu1 %v10859_v4  ;;  %v10918_v62 = vld [vmem:[%s11301_s18 + $0x1d00] ss:$8 sps:$4 sm:$0xff]   ;;  %v10923_v4 = vld [vmem:[%s11301_s18 + $0x1cf4] ss:$8 sps:$4 sm:$0xff]  }
 0x3ae   : > { %8015 = vmatpush2.bf16.msra.mxu0 %v10854_v29  ;;  %v10926_v29 = vld [vmem:[%s11301_s18 + $0x1df4] ss:$8 sps:$4 sm:$0xff]  }
 0x3af   : > { %8056 = vmatpush2.bf16.msra.mxu1 %v10857_v44  ;;  %8016 = vmatprep.subr.bf16.mxu0 %v10862_v8  ;;  %v10921_v44 = vld [vmem:[%s11301_s18 + $0x1cf0] ss:$8 sps:$4 sm:$0xff]  }
 0x3b0   : > { %8057 = vmatprep.subr.bf16.mxu1 %v10865_v9  ;;  %v10924_v8 = vld [vmem:[%s11301_s18 + $0x1df0] ss:$8 sps:$4 sm:$0xff]   ;;  %v10929_v9 = vld [vmem:[%s11301_s18 + $0x1ce4] ss:$8 sps:$4 sm:$0xff]  }
 0x3b2   : > { %8017 = vmatpush2.bf16.msra.mxu0 %v10860_v51  ;;  %v10932_v51 = vld [vmem:[%s11301_s18 + $0x1de4] ss:$8 sps:$4 sm:$0xff]  }
 0x3b3   : > { %8058 = vmatpush2.bf16.msra.mxu1 %v10863_v12  ;;  %8018 = vmatprep.subr.bf16.mxu0 %v10868_v39  ;;  %v10927_v12 = vld [vmem:[%s11301_s18 + $0x1ce0] ss:$8 sps:$4 sm:$0xff]  }
 0x3b4   : > { %8059 = vmatprep.subr.bf16.mxu1 %v10871_v14  ;;  %v10930_v39 = vld [vmem:[%s11301_s18 + $0x1de0] ss:$8 sps:$4 sm:$0xff]   ;;  %v10935_v14 = vld [vmem:[%s11301_s18 + $0x1cd4] ss:$8 sps:$4 sm:$0xff]  }
 0x3b6   : > { %8019 = vmatpush2.bf16.msra.mxu0 %v10866_v52  ;;  %v10936_v52 = vld [vmem:[%s11301_s18 + $0x1dd0] ss:$8 sps:$4 sm:$0xff]  }
 0x3b7   : > { %8060 = vmatpush2.bf16.msra.mxu1 %v10869_v19  ;;  %8070 = vmatprep.subr.bf16.mxu0 %v10875_v45  ;;  %v10941_v19 = vld [vmem:[%s11301_s18 + $0x1cc4] ss:$8 sps:$4 sm:$0xff]  }
 0x3b8   : > { %8111 = vmatprep.subr.bf16.mxu1 %v10878_v21  ;;  %v10944_v45 = vld [vmem:[%s11301_s18 + $0x1dc4] ss:$8 sps:$4 sm:$0xff]   ;;  %v10939_v21 = vld [vmem:[%s11301_s18 + $0x1cc0] ss:$8 sps:$4 sm:$0xff]  }
 0x3b9   : > { %v7776_v30 = vpop.f32.mrf.mxu0  ;;  %8021 = vmatmul.mubr.bf16.vlgmr.msra.gmra.mxu0 %v1670_v31  ;;  %v10933_v31 = vld [vmem:[%s11301_s18 + $0x1cd0] ss:$8 sps:$4 sm:$0xff]  }
 0x3ba   : > { %v7817_v3 = vpop.f32.mrf.mxu1  ;;  %8062 = vmatmul.mubr.bf16.vlgmr.msra.gmra.mxu1 %v1686_v59  ;;  %v7777_v56 = vadd.f32 %v7776_v30, %v12369_v16  ;;  %8071 = vmatpush1.bf16.msra.mxu0 %v10873_v57  ;;  %v10947_v59 = vld [vmem:[%s11301_s18 + $0x1cb4] ss:$8 sps:$4 sm:$0xff]   ;;  %v1689_v30 = vcombine.high %v12421_v5, %v12421_v5  ;;  %v10957_v5 = vld [vmem:[%s11301_s18 + $0x1c90] ss:$8 sps:$4 sm:$0xff]  }
 0x3bb   : > { %8112 = vmatpush1.bf16.msra.mxu1 %v10876_v24  ;;  %v7778_v35 = vpop.f32.mrf.mxu0  ;;  %8072 = vmatprep.subr.bf16.mxu0 %v10881_v26  ;;  %v10950_v57 = vld [vmem:[%s11301_s18 + $0x1db4] ss:$8 sps:$4 sm:$0xff]   ;;  %v10945_v24 = vld [vmem:[%s11301_s18 + $0x1cb0] ss:$8 sps:$4 sm:$0xff]  }
 0x3bc   : > { %v7819_v37 = vpop.f32.mrf.mxu1  ;;  %8113 = vmatprep.subr.bf16.mxu1 %v10884_v6  ;;  %v12453_v10 = vadd.f32 %v7817_v3, %v7777_v56  ;;  %v7779_v13 = vadd.f32 %v7778_v35, %v12372_v18  ;;  %8102 = vmatprep.mubr.bf16.mxu0 %v1726_v55  ;;  %v10893_v18 = vld [vmem:[%s11301_s18 + $0x1c44] ss:$8 sps:$4 sm:$0xff]   ;;  %v10942_v55 = vld [vmem:[%s11301_s18 + $0x1dc0] ss:$8 sps:$4 sm:$0xff]   ;;  %v10948_v26 = vld [vmem:[%s11301_s18 + $0x1db0] ss:$8 sps:$4 sm:$0xff]   ;;  %v12509_v35 = vrot.slane %v1689_v30, %v11360_v49 }
 0x3bd   : > { %8143 = vmatprep.mubr.bf16.mxu1 %v1736_v28  ;;  %v7780_v16 = vpop.f32.mrf.mxu0  ;;  %v10953_v6 = vld [vmem:[%s11301_s18 + $0x1ca4] ss:$8 sps:$4 sm:$0xff]   ;;  %v10951_v3 = vld [vmem:[%s11301_s18 + $0x1ca0] ss:$8 sps:$4 sm:$0xff]   ;;  %v11022_v30 = vld [vmem:[%s11301_s18 + $0x1ff4] ss:$8 sps:$4 sm:$0xff]  }
 0x3be   : > { %v7821_v40 = vpop.f32.mrf.mxu1  ;;  %v12456_v41 = vadd.f32 %v7819_v37, %v7779_v13  ;;  %8073 = vmatpush1.bf16.msra.mxu0 %v10879_v34  ;;  %v10956_v28 = vld [vmem:[%s11301_s18 + $0x1da4] ss:$8 sps:$4 sm:$0xff]   ;;  %v10954_v56 = vld [vmem:[%s11301_s18 + $0x1da0] ss:$8 sps:$4 sm:$0xff]   ;;  %v10959_v34 = vld [vmem:[%s11301_s18 + $0x1c94] ss:$8 sps:$4 sm:$0xff]   ;;  %v1705_v13 = vcombine.high %v12509_v35, %v12509_v35  ;;  %v1712_v16 = vrot.slane %v12429_v50, %v11360_v49 }
 0x3bf   : > { %8114 = vmatpush1.bf16.msra.mxu1 %v10882_v11  ;;  %v7781_v46 = vpop.f32.mrf.mxu0  ;;  %8074 = vmatprep.subr.bf16.mxu0 %v10887_v61  ;;  %v10962_v11 = vld [vmem:[%s11301_s18 + $0x1d94] ss:$8 sps:$4 sm:$0xff]   ;;  %v10960_v37 = vld [vmem:[%s11301_s18 + $0x1d90] ss:$8 sps:$4 sm:$0xff]   ;;  %v10965_v61 = vld [vmem:[%s11301_s18 + $0x1c84] ss:$8 sps:$4 sm:$0xff]  }
 0x3c0   : > { %v7822_v47 = vpop.f32.mrf.mxu1  ;;  %8115 = vmatprep.subr.bf16.mxu1 %v10890_v38  ;;  %v10968_v38 = vld [vmem:[%s11301_s18 + $0x1d84] ss:$8 sps:$4 sm:$0xff]   ;;  %v10963_v40 = vld [vmem:[%s11301_s18 + $0x1c80] ss:$8 sps:$4 sm:$0xff]   ;;  %v10974_v46 = vld [vmem:[%s11301_s18 + $0x1f74] ss:$8 sps:$4 sm:$0xff]  }
 0x3c1   : > { %v1733_v47 = vrot.slane %v1705_v13, %v11360_v49  ;;  %v10977_v50 = vld [vmem:[%s11301_s18 + $0x1e64] ss:$8 sps:$4 sm:$0xff]   ;;  %v11029_v13 = vld [vmem:[%s11301_s18 + $0x1ed0] ss:$8 sps:$4 sm:$0xff]  }
 0x3c2   : > { %8075 = vmatpush1.bf16.msra.mxu0 %v10885_v7  ;;  %v10966_v7 = vld [vmem:[%s11301_s18 + $0x1d80] ss:$8 sps:$4 sm:$0xff]  }
 0x3c3   : > { %8116 = vmatpush1.bf16.msra.mxu1 %v10888_v42  ;;  %8076 = vmatprep.subr.bf16.mxu0 %v10893_v18  ;;  %v10971_v42 = vld [vmem:[%s11301_s18 + $0x1e74] ss:$8 sps:$4 sm:$0xff]   ;;  %v1734_v18 = vcombine.high %v1712_v16, %v1712_v16 }
 0x3c4   : > { %8117 = vmatprep.subr.bf16.mxu1 %v10896_v20  ;;  %v10969_v20 = vld [vmem:[%s11301_s18 + $0x1e70] ss:$8 sps:$4 sm:$0xff]  }
 0x3c6   : > { %8077 = vmatpush1.bf16.msra.mxu0 %v10891_v48  ;;  %v10972_v48 = vld [vmem:[%s11301_s18 + $0x1f70] ss:$8 sps:$4 sm:$0xff]  }
 0x3c7   : > { %8118 = vmatpush1.bf16.msra.mxu1 %v10894_v25  ;;  %8078 = vmatprep.subr.bf16.mxu0 %v10899_v27  ;;  %v10980_v25 = vld [vmem:[%s11301_s18 + $0x1f64] ss:$8 sps:$4 sm:$0xff]   ;;  %v1737_v27 = vcombine.high %v1733_v47, %v1733_v47 }
 0x3c8   : > { %8119 = vmatprep.subr.bf16.mxu1 %v10902_v22 }
 0x3ca   : > { %8079 = vmatpush1.bf16.msra.mxu0 %v10897_v53 }
 0x3cb   : > { %8120 = vmatpush1.bf16.msra.mxu1 %v10900_v15  ;;  %8080 = vmatprep.subr.bf16.mxu0 %v10905_v54  ;;  %v10975_v54 = vld [vmem:[%s11301_s18 + $0x1e60] ss:$8 sps:$4 sm:$0xff]  }
 0x3cc   : > { %8121 = vmatprep.subr.bf16.mxu1 %v10908_v32  ;;  %v10978_v32 = vld [vmem:[%s11301_s18 + $0x1f60] ss:$8 sps:$4 sm:$0xff]  }
 0x3ce   : > { %8081 = vmatpush1.bf16.msra.mxu0 %v10903_v33 }
 0x3cf   : > { %8122 = vmatpush1.bf16.msra.mxu1 %v10906_v58  ;;  %8082 = vmatprep.subr.bf16.mxu0 %v10911_v23  ;;  %v10983_v23 = vld [vmem:[%s11301_s18 + $0x1e54] ss:$8 sps:$4 sm:$0xff]  }
 0x3d0   : > { %8123 = vmatprep.subr.bf16.mxu1 %v10914_v60  ;;  %v10986_v60 = vld [vmem:[%s11301_s18 + $0x1f54] ss:$8 sps:$4 sm:$0xff]  }
 0x3d2   : > { %8083 = vmatpush1.bf16.msra.mxu0 %v10909_v63 }
 0x3d3   : > { %8124 = vmatpush1.bf16.msra.mxu1 %v10912_v0  ;;  %8084 = vmatprep.subr.bf16.mxu0 %v10917_v36 }
 0x3d4   : > { %8125 = vmatprep.subr.bf16.mxu1 %v10920_v1 }
 0x3d6   : > { %8085 = vmatpush1.bf16.msra.mxu0 %v10915_v2  ;;  %v10981_v2 = vld [vmem:[%s11301_s18 + $0x1e50] ss:$8 sps:$4 sm:$0xff]  }
 0x3d7   : > { %8126 = vmatpush1.bf16.msra.mxu1 %v10918_v62  ;;  %8086 = vmatprep.subr.bf16.mxu0 %v10923_v4  ;;  %v10984_v62 = vld [vmem:[%s11301_s18 + $0x1f50] ss:$8 sps:$4 sm:$0xff]  }
 0x3d8   : > { %8127 = vmatprep.subr.bf16.mxu1 %v10926_v29 }
 0x3da   : > { %8087 = vmatpush2.bf16.msra.mxu0 %v10921_v44  ;;  %v10992_v44 = vld [vmem:[%s11301_s18 + $0x1f44] ss:$8 sps:$4 sm:$0xff]  }
 0x3db   : > { %8128 = vmatpush2.bf16.msra.mxu1 %v10924_v8  ;;  %8088 = vmatprep.subr.bf16.mxu0 %v10929_v9  ;;  %v10987_v8 = vld [vmem:[%s11301_s18 + $0x1e40] ss:$8 sps:$4 sm:$0xff]  }
 0x3dc   : > { %8129 = vmatprep.subr.bf16.mxu1 %v10932_v51  ;;  %v10990_v9 = vld [vmem:[%s11301_s18 + $0x1f40] ss:$8 sps:$4 sm:$0xff]   ;;  %v10995_v51 = vld [vmem:[%s11301_s18 + $0x1e34] ss:$8 sps:$4 sm:$0xff]  }
 0x3de   : > { %8089 = vmatpush2.bf16.msra.mxu0 %v10927_v12  ;;  %v10998_v12 = vld [vmem:[%s11301_s18 + $0x1f34] ss:$8 sps:$4 sm:$0xff]  }
 0x3df   : > { %8130 = vmatpush2.bf16.msra.mxu1 %v10930_v39  ;;  %8090 = vmatprep.subr.bf16.mxu0 %v10935_v14  ;;  %v10993_v39 = vld [vmem:[%s11301_s18 + $0x1e30] ss:$8 sps:$4 sm:$0xff]  }
 0x3e0   : > { %8131 = vmatprep.subr.bf16.mxu1 %v10938_v17  ;;  %v10996_v14 = vld [vmem:[%s11301_s18 + $0x1f30] ss:$8 sps:$4 sm:$0xff]   ;;  %v11001_v17 = vld [vmem:[%s11301_s18 + $0x1e24] ss:$8 sps:$4 sm:$0xff]  }
 0x3e2   : > { %8091 = vmatpush2.bf16.msra.mxu0 %v10933_v31  ;;  %v11004_v31 = vld [vmem:[%s11301_s18 + $0x1f24] ss:$8 sps:$4 sm:$0xff]  }
 0x3e3   : > { %8132 = vmatpush2.bf16.msra.mxu1 %v10936_v52  ;;  %8092 = vmatprep.subr.bf16.mxu0 %v10941_v19  ;;  %v10999_v52 = vld [vmem:[%s11301_s18 + $0x1e20] ss:$8 sps:$4 sm:$0xff]  }
 0x3e4   : > { %8133 = vmatprep.subr.bf16.mxu1 %v10944_v45  ;;  %v11002_v19 = vld [vmem:[%s11301_s18 + $0x1f20] ss:$8 sps:$4 sm:$0xff]   ;;  %v11007_v45 = vld [vmem:[%s11301_s18 + $0x1e14] ss:$8 sps:$4 sm:$0xff]  }
 0x3e6   : > { %8093 = vmatpush2.bf16.msra.mxu0 %v10939_v21  ;;  %v11010_v21 = vld [vmem:[%s11301_s18 + $0x1f14] ss:$8 sps:$4 sm:$0xff]  }
 0x3e7   : > { %8134 = vmatpush2.bf16.msra.mxu1 %v10942_v55  ;;  %8094 = vmatprep.subr.bf16.mxu0 %v10947_v59  ;;  %v11005_v55 = vld [vmem:[%s11301_s18 + $0x1e10] ss:$8 sps:$4 sm:$0xff]  }
 0x3e8   : > { %8135 = vmatprep.subr.bf16.mxu1 %v10950_v57  ;;  %v11008_v59 = vld [vmem:[%s11301_s18 + $0x1f10] ss:$8 sps:$4 sm:$0xff]   ;;  %v11013_v57 = vld [vmem:[%s11301_s18 + $0x1e04] ss:$8 sps:$4 sm:$0xff]  }
 0x3ea   : > { %8095 = vmatpush2.bf16.msra.mxu0 %v10945_v24  ;;  %v11016_v24 = vld [vmem:[%s11301_s18 + $0x1f04] ss:$8 sps:$4 sm:$0xff]  }
 0x3eb   : > { %8136 = vmatpush2.bf16.msra.mxu1 %v10948_v26  ;;  %8096 = vmatprep.subr.bf16.mxu0 %v10953_v6  ;;  %v11011_v26 = vld [vmem:[%s11301_s18 + $0x1e00] ss:$8 sps:$4 sm:$0xff]  }
 0x3ec   : > { %8137 = vmatprep.subr.bf16.mxu1 %v10956_v28  ;;  %v11014_v6 = vld [vmem:[%s11301_s18 + $0x1f00] ss:$8 sps:$4 sm:$0xff]   ;;  %v11019_v28 = vld [vmem:[%s11301_s18 + $0x1ef4] ss:$8 sps:$4 sm:$0xff]  }
 0x3ee   : > { %8097 = vmatpush2.bf16.msra.mxu0 %v10951_v3  ;;  %v11017_v3 = vld [vmem:[%s11301_s18 + $0x1ef0] ss:$8 sps:$4 sm:$0xff]  }
 0x3ef   : > { %8138 = vmatpush2.bf16.msra.mxu1 %v10954_v56  ;;  %8098 = vmatprep.subr.bf16.mxu0 %v10959_v34  ;;  %v11020_v56 = vld [vmem:[%s11301_s18 + $0x1ff0] ss:$8 sps:$4 sm:$0xff]   ;;  %v11025_v34 = vld [vmem:[%s11301_s18 + $0x1ee4] ss:$8 sps:$4 sm:$0xff]  }
 0x3f0   : > { %8139 = vmatprep.subr.bf16.mxu1 %v10962_v11  ;;  %v11028_v11 = vld [vmem:[%s11301_s18 + $0x1fe4] ss:$8 sps:$4 sm:$0xff]  }
 0x3f2   : > { %8099 = vmatpush2.bf16.msra.mxu0 %v10957_v5  ;;  %v11023_v5 = vld [vmem:[%s11301_s18 + $0x1ee0] ss:$8 sps:$4 sm:$0xff]  }
 0x3f3   : > { %8140 = vmatpush2.bf16.msra.mxu1 %v10960_v37  ;;  %8100 = vmatprep.subr.bf16.mxu0 %v10965_v61  ;;  %v11026_v37 = vld [vmem:[%s11301_s18 + $0x1fe0] ss:$8 sps:$4 sm:$0xff]   ;;  %v11031_v61 = vld [vmem:[%s11301_s18 + $0x1ed4] ss:$8 sps:$4 sm:$0xff]  }
 0x3f4   : > { %8141 = vmatprep.subr.bf16.mxu1 %v10968_v38  ;;  %v11034_v38 = vld [vmem:[%s11301_s18 + $0x1fd4] ss:$8 sps:$4 sm:$0xff]  }
 0x3f6   : > { %8101 = vmatpush2.bf16.msra.mxu0 %v10963_v40  ;;  %v11037_v40 = vld [vmem:[%s11301_s18 + $0x1ec4] ss:$8 sps:$4 sm:$0xff]  }
 0x3f7   : > { %8142 = vmatpush2.bf16.msra.mxu1 %v10966_v7  ;;  %8152 = vmatprep.subr.bf16.mxu0 %v10971_v42  ;;  %v11040_v7 = vld [vmem:[%s11301_s18 + $0x1fc4] ss:$8 sps:$4 sm:$0xff]   ;;  %v11035_v42 = vld [vmem:[%s11301_s18 + $0x1ec0] ss:$8 sps:$4 sm:$0xff]  }
 0x3f8   : > { %8193 = vmatprep.subr.bf16.mxu1 %v10974_v46  ;;  %v11038_v46 = vld [vmem:[%s11301_s18 + $0x1fc0] ss:$8 sps:$4 sm:$0xff]  }
 0x3f9   : > { %v7858_v22 = vpop.f32.mrf.mxu0  ;;  %8103 = vmatmul.mubr.bf16.vlgmr.msra.gmra.mxu0 %v1712_v16  ;;  %v11032_v16 = vld [vmem:[%s11301_s18 + $0x1fd0] ss:$8 sps:$4 sm:$0xff]  }
 0x3fa   : > { %v7899_v53 = vpop.f32.mrf.mxu1  ;;  %8144 = vmatmul.mubr.bf16.vlgmr.msra.gmra.mxu1 %v1734_v18  ;;  %v7859_v15 = vadd.f32 %v7858_v22, %v12453_v10  ;;  %8153 = vmatpush1.bf16.msra.mxu0 %v10969_v20  ;;  %v11046_v18 = vld [vmem:[%s11301_s18 + $0x1fb4] ss:$8 sps:$4 sm:$0xff]   ;;  %v11041_v20 = vld [vmem:[%s11301_s18 + $0x1eb0] ss:$8 sps:$4 sm:$0xff]   ;;  %v11050_v22 = vld [vmem:[%s11301_s18 + $0x1fa0] ss:$8 sps:$4 sm:$0xff]  }
 0x3fb   : > { %8194 = vmatpush1.bf16.msra.mxu1 %v10972_v48  ;;  %v7860_v33 = vpop.f32.mrf.mxu0  ;;  %8154 = vmatprep.subr.bf16.mxu0 %v10977_v50  ;;  %v11044_v48 = vld [vmem:[%s11301_s18 + $0x1fb0] ss:$8 sps:$4 sm:$0xff]   ;;  %v11049_v50 = vld [vmem:[%s11301_s18 + $0x1ea4] ss:$8 sps:$4 sm:$0xff]  }
 0x3fc   : > { %v7901_v58 = vpop.f32.mrf.mxu1  ;;  %8195 = vmatprep.subr.bf16.mxu1 %v10980_v25  ;;  %v12533_v63 = vadd.f32 %v7899_v53, %v7859_v15  ;;  %v7861_v0 = vadd.f32 %v7860_v33, %v12456_v41  ;;  %8184 = vmatprep.mubr.bf16.mxu0 %v1733_v47  ;;  %v10989_v41 = vld [vmem:[%s11301_s18 + $0x1e44] ss:$8 sps:$4 sm:$0xff]   ;;  %v11043_v47 = vld [vmem:[%s11301_s18 + $0x1eb4] ss:$8 sps:$4 sm:$0xff]  }
 0x3fd   : > { %8225 = vmatprep.mubr.bf16.mxu1 %v1737_v27  ;;  %v7862_v10 = vpop.f32.mrf.mxu0  ;;  %v11052_v25 = vld [vmem:[%s11301_s18 + $0x1fa4] ss:$8 sps:$4 sm:$0xff]   ;;  %v11047_v27 = vld [vmem:[%s11301_s18 + $0x1ea0] ss:$8 sps:$4 sm:$0xff]   ;;  %v11055_v53 = vld [vmem:[%s11301_s18 + $0x1e94] ss:$8 sps:$4 sm:$0xff]  }
 0x3fe   : > { %v7903_v36 = vpop.f32.mrf.mxu1  ;;  %v12536_v1 = vadd.f32 %v7901_v58, %v7861_v0  ;;  %8155 = vmatpush1.bf16.msra.mxu0 %v10975_v54  ;;  %v11058_v15 = vld [vmem:[%s11301_s18 + $0x1f94] ss:$8 sps:$4 sm:$0xff]   ;;  %v11053_v54 = vld [vmem:[%s11301_s18 + $0x1e90] ss:$8 sps:$4 sm:$0xff]   ;;  %v11061_v33 = vld [vmem:[%s11301_s18 + $0x1e84] ss:$8 sps:$4 sm:$0xff]  }
 0x3ff   : > { %8196 = vmatpush1.bf16.msra.mxu1 %v10978_v32  ;;  %v7863_v4 = vpop.f32.mrf.mxu0  ;;  %8156 = vmatprep.subr.bf16.mxu0 %v10983_v23  ;;  %v11056_v32 = vld [vmem:[%s11301_s18 + $0x1f90] ss:$8 sps:$4 sm:$0xff]   ;;  %v11064_v58 = vld [vmem:[%s11301_s18 + $0x1f84] ss:$8 sps:$4 sm:$0xff]   ;;  %v1719_v23 = vrot.slane %v12509_v35, %v11360_v49  ;;  %v11062_v0 = vld [vmem:[%s11301_s18 + $0x1f80] ss:$8 sps:$4 sm:$0xff]  }
 0x400   : > { %v7904_v29 = vpop.f32.mrf.mxu1  ;;  %8197 = vmatprep.subr.bf16.mxu1 %v10986_v60  ;;  %v11059_v60 = vld [vmem:[%s11301_s18 + $0x1e80] ss:$8 sps:$4 sm:$0xff]   ;;  %s8426_s18 = sshll.u32 %s11168_s15, 1 }
 0x401   : > { %v1735_v10 = vcombine.high %v1719_v23, %v1719_v23  ;;  %p293_p7 = scmp.lt.s32.totalorder %s8426_s18, 3 }
 0x402   : > { %8157 = vmatpush1.bf16.msra.mxu0 %v10981_v2 }
 0x403   : > { %8198 = vmatpush1.bf16.msra.mxu1 %v10984_v62  ;;  %8158 = vmatprep.subr.bf16.mxu0 %v10989_v41  ;;  %s12645_s18 = smov (!%p293_p7, %s8426_s18), 3 }
 0x404   : > { %8199 = vmatprep.subr.bf16.mxu1 %v10992_v44  ;;  %s8427_s20 = sshll.u32 %s12645_s18, 1 }
 0x405   : > { %s12600_s22 = scalar_lea.vmem %s12632_s3, %s8427_s20 }
 0x406   : > { %8159 = vmatpush1.bf16.msra.mxu0 %v10987_v8 }
 0x407   : > { %8200 = vmatpush1.bf16.msra.mxu1 %v10990_v9  ;;  %8160 = vmatprep.subr.bf16.mxu0 %v10995_v51 }
 0x408   : > { %8201 = vmatprep.subr.bf16.mxu1 %v10998_v12 }
 0x40a   : > { %8161 = vmatpush1.bf16.msra.mxu0 %v10993_v39 }
 0x40b   : > { %8202 = vmatpush1.bf16.msra.mxu1 %v10996_v14  ;;  %8162 = vmatprep.subr.bf16.mxu0 %v11001_v17 }
 0x40c   : > { %8203 = vmatprep.subr.bf16.mxu1 %v11004_v31 }
 0x40e   : > { %8163 = vmatpush1.bf16.msra.mxu0 %v10999_v52  ;;  %v11184_v52 = vmov 0.0  }
 0x40f   : > { %8204 = vmatpush1.bf16.msra.mxu1 %v11002_v19  ;;  %8164 = vmatprep.subr.bf16.mxu0 %v11007_v45  ;;  %304 = vst [vmem:[%s12600_s22] sm:$0xf] %v11184_v52 }
 0x410   : > { %8205 = vmatprep.subr.bf16.mxu1 %v11010_v21 }
 0x412   : > { %8165 = vmatpush1.bf16.msra.mxu0 %v11005_v55 }
 0x413   : > { %8206 = vmatpush1.bf16.msra.mxu1 %v11008_v59  ;;  %8166 = vmatprep.subr.bf16.mxu0 %v11013_v57 }
 0x414   : > { %8207 = vmatprep.subr.bf16.mxu1 %v11016_v24 }
 0x416   : > { %8167 = vmatpush1.bf16.msra.mxu0 %v11011_v26 }
 0x417   : > { %8208 = vmatpush1.bf16.msra.mxu1 %v11014_v6  ;;  %8168 = vmatprep.subr.bf16.mxu0 %v11019_v28 }
 0x418   : > { %8209 = vmatprep.subr.bf16.mxu1 %v11022_v30 }
 0x41a   : > { %8169 = vmatpush2.bf16.msra.mxu0 %v11017_v3 }
 0x41b   : > { %8210 = vmatpush2.bf16.msra.mxu1 %v11020_v56  ;;  %8170 = vmatprep.subr.bf16.mxu0 %v11025_v34 }
 0x41c   : > { %8211 = vmatprep.subr.bf16.mxu1 %v11028_v11 }
 0x41e   : > { %8171 = vmatpush2.bf16.msra.mxu0 %v11023_v5  ;;  %v11185_v5 = vmov 1983009808  }
 0x41f   : > { %8212 = vmatpush2.bf16.msra.mxu1 %v11026_v37  ;;  %8172 = vmatprep.subr.bf16.mxu0 %v11031_v61  ;;  %v8238_v37 = vunpack.c.l.s4 %v11185_v5 }
 0x420   : > { %8213 = vmatprep.subr.bf16.mxu1 %v11034_v38 }
 0x422   : > { %8173 = vmatpush2.bf16.msra.mxu0 %v11029_v13 }
 0x423   : > { %8214 = vmatpush2.bf16.msra.mxu1 %v11032_v16  ;;  %8174 = vmatprep.subr.bf16.mxu0 %v11037_v40  ;;  %v8239_v16 = vunpack.c.0.s8 %v8238_v37 }
 0x424   : > { %8215 = vmatprep.subr.bf16.mxu1 %v11040_v7 }
 0x426   : > { %8175 = vmatpush2.bf16.msra.mxu0 %v11035_v42 }
 0x427   : > { %8216 = vmatpush2.bf16.msra.mxu1 %v11038_v46  ;;  %8176 = vmatprep.subr.bf16.mxu0 %v11043_v47 }
 0x428   : > { %8217 = vmatprep.subr.bf16.mxu1 %v11046_v18  ;;  %v8242_v18 = vsub.s32 %v8239_v16, %v11352_v43 }
 0x42a   : > { %8177 = vmatpush2.bf16.msra.mxu0 %v11041_v20 }
 0x42b   : > { %8218 = vmatpush2.bf16.msra.mxu1 %v11044_v48  ;;  %8178 = vmatprep.subr.bf16.mxu0 %v11049_v50 }
 0x42c   : > { %8219 = vmatprep.subr.bf16.mxu1 %v11052_v25 }
 0x42e   : > { %8179 = vmatpush2.bf16.msra.mxu0 %v11047_v27  ;;  %v8255_v27 = vsub.s32 0, %v11352_v43 }
 0x42f   : > { %8220 = vmatpush2.bf16.msra.mxu1 %v11050_v22  ;;  %8180 = vmatprep.subr.bf16.mxu0 %v11055_v53  ;;  %v8259_v22 = vsub.s32 1, %v11352_v43  ;;  %v8251_v53 = vld [vmem:[%s11307_s6] sm:$0x3] }
 0x430   : > { %8221 = vmatprep.subr.bf16.mxu1 %v11058_v15 }
 0x432   : > { %8181 = vmatpush2.bf16.msra.mxu0 %v11053_v54 }
 0x433   : > { %8222 = vmatpush2.bf16.msra.mxu1 %v11056_v32  ;;  %8182 = vmatprep.subr.bf16.mxu0 %v11061_v33  ;;  %v305_v33 = vld [vmem:[%s12600_s22] sm:$0xf] }
 0x434   : > { %8223 = vmatprep.subr.bf16.mxu1 %v11064_v58 }
 0x436   : > { %8183 = vmatpush2.bf16.msra.mxu0 %v11059_v60  ;;  %v8260_v60 = vrot.slane %v8251_v53, %v8259_v22 }
 0x437   : > { %8224 = vmatpush2.bf16.msra.mxu1 %v11062_v0 }
 0x439   : > { %v7940_v36 = vpop.f32.mrf.mxu0  ;;  %8185 = vmatmul.mubr.bf16.vlgmr.msra.gmra.mxu0 %v1719_v23  ;;  %v8256_v23 = vrot.slane %v8251_v53, %v8255_v27 }
 0x43a   : > { %v7981_v2 = vpop.f32.mrf.mxu1  ;;  %8226 = vmatmul.mubr.bf16.vlgmr.msra.gmra.mxu1 %v1735_v10  ;;  %v7941_v62 = vadd.f32 %v7940_v36, %v12533_v63 }
 0x43b   : > { %v7942_v4 = vpop.f32.mrf.mxu0  ;;  %v8261_v10 = vcombine.low %v8256_v23, %v8260_v60 }
 0x43c   : > { %v7983_v29 = vpop.f32.mrf.mxu1  ;;  %v7982_v41 = vadd.f32 %v7981_v2, %v7941_v62  ;;  %v7943_v49 = vadd.f32 %v7942_v4, %v12536_v1 }
 0x43d   : > { %v7944_v35 = vpop.f32.mrf.mxu0  ;;  %v8268_v36 = vrot.slane %v8261_v10, %v8242_v18 }
 0x43e   : > { %v7985_v44 = vpop.f32.mrf.mxu1  ;;  %v7984_v8 = vadd.f32 %v7983_v29, %v7943_v49 }
 0x43f   : > { %v7945_v9 = vpop.f32.mrf.mxu0 }
 0x440   : > { %v7986_v51 = vpop.f32.mrf.mxu1 }
 0x479   : > { %v8022_v12 = vpop.f32.mrf.mxu0 }
 0x47a   : > { %v8063_v39 = vpop.f32.mrf.mxu1  ;;  %v8023_v14 = vadd.f32 %v8022_v12, %v7982_v41 }
 0x47b   : > { %v8024_v17 = vpop.f32.mrf.mxu0 }
 0x47c   : > { %v8065_v31 = vpop.f32.mrf.mxu1  ;;  %v8064_v63 = vadd.f32 %v8063_v39, %v8023_v14  ;;  %v8025_v1 = vadd.f32 %v8024_v17, %v7984_v8 }
 0x47d   : > { %v8026_v19 = vpop.f32.mrf.mxu0 }
 0x47e   : > { %v8067_v45 = vpop.f32.mrf.mxu1  ;;  %v8066_v21 = vadd.f32 %v8065_v31, %v8025_v1 }
 0x47f   : > { %v8027_v55 = vpop.f32.mrf.mxu0 }
 0x480   : > { %v8068_v59 = vpop.f32.mrf.mxu1 }
 0x4b9   : > { %v8104_v57 = vpop.f32.mrf.mxu0 }
 0x4ba   : > { %v8145_v24 = vpop.f32.mrf.mxu1  ;;  %v8105_v26 = vadd.f32 %v8104_v57, %v8064_v63 }
 0x4bb   : > { %v8106_v6 = vpop.f32.mrf.mxu0 }
 0x4bc   : > { %v8147_v28 = vpop.f32.mrf.mxu1  ;;  %v8146_v30 = vadd.f32 %v8145_v24, %v8105_v26  ;;  %v8107_v61 = vadd.f32 %v8106_v6, %v8066_v21 }
 0x4bd   : > { %v8108_v3 = vpop.f32.mrf.mxu0 }
 0x4be   : > { %v8149_v56 = vpop.f32.mrf.mxu1  ;;  %v8148_v40 = vadd.f32 %v8147_v28, %v8107_v61 }
 0x4bf   : > { %v8109_v34 = vpop.f32.mrf.mxu0 }
 0x4c0   : > { %v8150_v11 = vpop.f32.mrf.mxu1 }
 0x4f9   : > { %v8186_v38 = vpop.f32.mrf.mxu0 }
 0x4fa   : > { %v8227_v13 = vpop.f32.mrf.mxu1  ;;  %v8187_v7 = vadd.f32 %v8186_v38, %v8146_v30 }
 0x4fb   : > { %v8188_v42 = vpop.f32.mrf.mxu0 }
 0x4fc   : > { %v8229_v46 = vpop.f32.mrf.mxu1  ;;  %v8189_v47 = vadd.f32 %v8188_v42, %v8148_v40  ;;  %v8228_v50 = vadd.f32 %v8227_v13, %v8187_v7 }
 0x4fd   : > { %v8190_v20 = vpop.f32.mrf.mxu0 }
 0x4fe   : > { %v8231_v48 = vpop.f32.mrf.mxu1  ;;  %v8230_v25 = vadd.f32 %v8229_v46, %v8189_v47 }
 0x4ff   : > { %v8191_v15 = vpop.f32.mrf.mxu0 }
 0x500   : > { %v8232_v54 = vpop.f32.mrf.mxu1  ;;  %v8236_v32 = vcombine.low %v8228_v50, %v8230_v25 }
 0x502   : > { %v8243_v58 = vrot.slane %v8236_v32, %v8242_v18 }
 0x504   : > { %v8245_v0 = vadd.f32 %v8243_v58, %v305_v33 }
 0x506   : > { %8246 = vst [vmem:[%s12600_s22] sm:$0xf] %v8245_v0 }
 0x50d   : > { %v8250_v2 = vld [vmem:[%s12600_s22] sm:$0xf] }
 0x50e   : > { %v8270_v62 = vadd.f32 %v8268_v36, %v8250_v2 }
 0x510   : > { %v8271_v4 = vmax.f32 %v8270_v62, 0.0 }
 0x512   : > { %8272 = vst [vmem:[%s12600_s22] sm:$0xf] %v8271_v4 }
 0x513 PF: > { %s19_s17 = sadd.s32 1, %s11176_s17   ;;  %s12637_s12 = smov %s11160_s13 }
 0x514   : > { %p16_p9 = scmp.ge.s32.totalorder %s19_s17, 4   ;;  %s12638_s13 = smov %s11164_s14 }
 0x515   : > { %s12639_s14 = smov %s11255_s24  ;;  %s12640_s15 = smov %s11172_s16 }
 0x516   : > { %s12641_s16 = smov %s12643_s19  ;;  %18 = sbr.rel (!%p16_p9) target bundleno = 6 (0x6), region = 96 }
 0x51b   :  { %8303 = vsyncpa [#allocation3], 1 }
 0x51c   :  { %8305 = vsyncpa [#allocation3 + $0x1], 1 }
 0x51d   :  { %8306 = vsyncpa [#allocation5], 1 }
 0x51e   :  { %8308 = vsyncpa [#allocation5 + $0x1], 1 }

</bundles_post_ra>
